<compile_context>
chip_gen: v7x
topology: tpu7x:2x2x1
jax: 0.10.0
libtpu: 0.0.40
codegen_flags: <defaults>
</compile_context>

<pallas_src>
import functools

import jax
import jax.numpy as jnp
from jax.experimental import pallas as pl
from jax.experimental.pallas import tpu as pltpu

SELU_ALPHA = 1.6732632423543772848170429916717
SELU_SCALE = 1.0507009873554804934193349852946
BN_EPS = 1e-5


# ------------------------------- Pallas kernel ------------------------------- #

def _head_kernel(*refs, n_hidden, quantized, chain):
    """One fused head per grid step; softmax output carried into the next head.

    refs layout (inputs, outputs, scratch — in order):
      refs[0]   : x_ref  (B, output_dim) f32  (flattened original input)
      per layer : w_ref (Cin, Cout) bf16|int8, [s_ref (1, Cout) f32,] b_ref (1, Cout) f32
      refs[-2]  : out_ref   (B, n_classes) f32
      refs[-1]  : carry_ref (B, output_dim) f32  VMEM scratch (head chaining)
    """
    per_layer = 3 if quantized else 2
    x_ref = refs[0]
    layer_refs = refs[1:1 + per_layer * (n_hidden + 1)]
    out_ref = refs[-2]
    carry_ref = refs[-1]

    @pl.when(pl.program_id(0) == 0)
    def _():
        carry_ref[...] = x_ref[...]

    def dense(v, j):
        lr = layer_refs[per_layer * j: per_layer * (j + 1)]
        if quantized:
            w_ref, s_ref, b_ref = lr
            # int8 weights streamed from HBM (half the bytes of bf16); dequant is
            # folded into the f32 epilogue since the scale is per output channel.
            w = w_ref[...].astype(jnp.float32).astype(jnp.bfloat16)
            acc = jnp.dot(v.astype(jnp.bfloat16), w,
                          preferred_element_type=jnp.float32)
            return acc * s_ref[...] + b_ref[...]
        w_ref, b_ref = lr
        return jnp.dot(v.astype(jnp.bfloat16), w_ref[...],
                       preferred_element_type=jnp.float32) + b_ref[...]

    def batch_norm(a):
        # Training-mode BatchNorm1d, gamma=1 / beta=0, biased variance (PyTorch).
        n = a.shape[0]
        mean = jnp.sum(a, axis=0, keepdims=True) * (1.0 / n)
        d = a - mean
        var = jnp.sum(d * d, axis=0, keepdims=True) * (1.0 / n)
        return d * jax.lax.rsqrt(var + BN_EPS)

    a = carry_ref[...]
    if n_hidden == 0:
        # Only in this configuration is the module's first batch_norm call
        # well-formed (output_dim >= 2000).
        a = batch_norm(a)

    for j in range(n_hidden):                      # Linear + SELU chain, all in VMEM
        a = dense(a, j)
        # TODO(synk): exp(a)-1 instead of expm1 (kept for guaranteed lowering);
        # the precision loss is far below the bf16 matmul rounding already accepted.
        a = SELU_SCALE * jnp.where(a > 0, a, SELU_ALPHA * (jnp.exp(a) - 1.0))

    a = batch_norm(a)

    # Final Linear + Softmax over classes (classes on the lane axis).
    logits = dense(a, n_hidden)
    m = jnp.max(logits, axis=-1, keepdims=True)
    e = jnp.exp(logits - m)
    p = e / jnp.sum(e, axis=-1, keepdims=True)     # exact: carry feeds next head

    out_ref[...] = p
    if chain:                                      # nmb_heads > 1 => n_classes == output_dim
        @pl.when(pl.program_id(0) + 1 < pl.num_programs(0))
        def _():
            carry_ref[...] = p                     # chain into the next head


# ----------------------------- one-time weight packing ----------------------- #

def pack_params(params, quantize_int8=False):
    """One-time packing of per-head Linear params into the kernel's streaming
    layout. Hoisted OUT of the forward so repeated calls do not re-stack /
    re-cast weights in HBM (the forward is weight-DMA-bound).

    `params`: list over heads; each head is a list of (w (Cin, Cout) f32, b (Cout,) f32).
    Returns a list over layers of (w, scale_or_None, b) with
      w : (H, Cin, Cout) bf16, or int8 when quantize_int8 (per-output-channel scales)
      b : (H, 1, Cout) f32
    """
    nmb_heads = len(params)
    n_layers = len(params[0])
    packed = []
    for j in range(n_layers):
        w = jnp.stack([params[h][j][0] for h in range(nmb_heads)]).astype(jnp.float32)
        b = jnp.stack([params[h][j][1].reshape(1, -1)
                       for h in range(nmb_heads)]).astype(jnp.float32)
        if quantize_int8:
            s = jnp.maximum(jnp.max(jnp.abs(w), axis=1, keepdims=True), 1e-8) / 127.0
            q = jnp.clip(jnp.round(w / s), -127, 127).astype(jnp.int8)
            packed.append((q, s.astype(jnp.float32), b))
        else:
            packed.append((w.astype(jnp.bfloat16), None, b))
    return packed


def _vmem_limit_bytes(B, output_dim, n_classes, layer_dims, w_itemsize, quantized):
    # Double-buffered weight / bias / scale blocks + I/O blocks + carry scratch
    # + live f32 activation temporaries + margin (replaces hardcoded 32 MiB).
    w_bytes = sum(ci * co * w_itemsize for ci, co in layer_dims)
    aux_bytes = sum(co * 4 for _, co in layer_dims) * (2 if quantized else 1)
    io_bytes = B * (output_dim + n_classes) * 4
    widest = max([output_dim, n_classes] + [co for _, co in layer_dims])
    act_bytes = 4 * B * widest * 4                  # ~4 live f32 temporaries at peak width
    carry_bytes = B * output_dim * 4
    total = 2 * (w_bytes + aux_bytes + io_bytes) + act_bytes + carry_bytes + (4 << 20)
    # TODO(synk): on v7x (64 MiB physical VMEM) batch-tile the kernel instead of
    # raising the limit past ~56 MiB; ceiling below is v5e/v6e-safe.
    return int(min(max(total, 16 << 20), 100 << 20))


# -------------------------------- JAX wrapper -------------------------------- #

def deep_multi_prototypes(x, packed):
    """Forward pass. `packed` = pack_params(params[, quantize_int8]) packed once
    and reused across calls. Returns a list over heads of (B, n_classes) f32."""
    n_layers = len(packed)
    n_hidden = n_layers - 1
    nmb_heads = packed[0][0].shape[0]
    quantized = packed[0][1] is not None

    B = x.shape[0]
    x2 = jnp.reshape(x, (B, -1)).astype(jnp.float32)          # nn.Flatten
    output_dim = x2.shape[1]
    n_classes = packed[-1][0].shape[-1]
    assert packed[0][0].shape[1] == output_dim, "first Linear Cin must match flattened input"
    chain = nmb_heads > 1
    if chain:
        assert n_classes == output_dim, "head chaining requires n_classes == output_dim"

    # One pallas_call runs all heads: grid over heads, so head i+1's weights are
    # DMA-prefetched while head i computes; activations never leave VMEM.
    flat_inputs = [x2]
    in_specs = [pl.BlockSpec((B, output_dim), lambda h: (0, 0))]
    for (w, s, b) in packed:
        flat_inputs.append(w)
        in_specs.append(pl.BlockSpec((None,) + tuple(w.shape[1:]), lambda h: (h, 0, 0)))
        if quantized:
            flat_inputs.append(s)
            in_specs.append(pl.BlockSpec((None,) + tuple(s.shape[1:]), lambda h: (h, 0, 0)))
        flat_inputs.append(b)
        in_specs.append(pl.BlockSpec((None,) + tuple(b.shape[1:]), lambda h: (h, 0, 0)))

    layer_dims = [(w.shape[1], w.shape[2]) for (w, _, _) in packed]
    vmem_limit = _vmem_limit_bytes(B, output_dim, n_classes, layer_dims,
                                   1 if quantized else 2, quantized)

    out = pl.pallas_call(
        functools.partial(_head_kernel, n_hidden=n_hidden,
                          quantized=quantized, chain=chain),
        out_shape=jax.ShapeDtypeStruct((nmb_heads, B, n_classes), jnp.float32),
        grid=(nmb_heads,),
        in_specs=in_specs,
        out_specs=pl.BlockSpec((None, B, n_classes), lambda h: (h, 0, 0)),
        scratch_shapes=[pltpu.VMEM((B, output_dim), jnp.float32)],
        compiler_params=pltpu.CompilerParams(
            dimension_semantics=("arbitrary",),       # heads chain via the carry
            vmem_limit_bytes=vmem_limit),
    )(*flat_inputs)
    return [out[h] for h in range(nmb_heads)]


# ----------------------------- deterministic params -------------------------- #

def init_params(key, output_dim, n_classes, nmb_heads):
    """Mirrors the module: Linear(od, 2*od) while od < 2000, then Linear(od, n_classes);
    xavier_normal_ weights, zero biases. (BatchNorm params stay at default 1/0.)"""
    dims = []
    od = output_dim
    while od < 2000:
        dims.append((od, od * 2))
        od *= 2
    dims.append((od, n_classes))

    params = []
    for _ in range(nmb_heads):
        head = []
        for (cin, cout) in dims:
            key, kw = jax.random.split(key)
            std = (2.0 / (cin + cout)) ** 0.5             # xavier_normal, gain=1
            head.append((std * jax.random.normal(kw, (cin, cout), jnp.float32),
                         jnp.zeros((cout,), jnp.float32)))
        params.append(head)
    return params


# ------------------------------ pure-JAX reference ---------------------------- #

def _reference(x, params):
    B = x.shape[0]
    h = jnp.reshape(x, (B, -1)).astype(jnp.float32)
    hi = jax.lax.Precision.HIGHEST

    def bn(a):
        mean = jnp.mean(a, axis=0, keepdims=True)
        var = jnp.mean((a - mean) ** 2, axis=0, keepdims=True)
        return (a - mean) * jax.lax.rsqrt(var + BN_EPS)

    outs = []
    for head in params:
        a = h
        if len(head) == 1:
            a = bn(a)
        for (w, b) in head[:-1]:
            a = jnp.dot(a, w, precision=hi) + b
            a = SELU_SCALE * jnp.where(a > 0, a, SELU_ALPHA * jnp.expm1(a))
        a = bn(a)
        w, b = head[-1]
        a = jnp.dot(a, w, precision=hi) + b
        a = jax.nn.softmax(a, axis=1)
        outs.append(a)
        h = a
    return outs


if __name__ == "__main__":
    # n_classes == output_dim is required by the module's head-chaining forward.
    # B is a multiple of 8 (f32 sublane) / 16 (bf16 packing) for unmasked layouts.
    output_dim, n_classes, nmb_heads = 256, 256, 2
    batch = 16

    key = jax.random.PRNGKey(0)
    kx, kp = jax.random.split(key)
    x = jax.random.normal(kx, (batch, 4, 8, 8), jnp.float32)   # Flatten -> (batch, 256)
    params = init_params(kp, output_dim, n_classes, nmb_heads)

    # --- bf16 weight-streaming path (default) ---
    packed = pack_params(params)                     # packed ONCE, reused per call
    outs = deep_multi_prototypes(x, packed)
    outs = [jax.block_until_ready(o) for o in outs]

    refs = _reference(x, params)
    for o, r in zip(outs, refs):
        assert o.shape == (batch, n_classes)
        assert bool(jnp.allclose(jnp.sum(o, axis=1), 1.0, atol=1e-3))
        assert bool(jnp.allclose(o, r, atol=2e-2, rtol=2e-2))

    # --- int8 weight-streaming path (halves weight HBM bytes on v5e/v6e) ---
    packed_i8 = pack_params(params, quantize_int8=True)
    outs_i8 = deep_multi_prototypes(x, packed_i8)
    outs_i8 = [jax.block_until_ready(o) for o in outs_i8]
    for o8, o in zip(outs_i8, outs):
        assert o8.shape == (batch, n_classes)
        assert bool(jnp.allclose(jnp.sum(o8, axis=1), 1.0, atol=1e-3))
        assert bool(jnp.allclose(o8, o, atol=5e-2, rtol=5e-2))

    print("KERNEL_OK")
</pallas_src>

<mosaic_0001>
module attributes {stable_mosaic.version = 11 : i64} {
  func.func @_head_kernel(%arg0: i32, %arg1: memref<16x256xf32, #tpu.memory_space<vmem>>, %arg2: memref<1x256x512xbf16, #tpu.memory_space<vmem>>, %arg3: memref<1x1x512xf32, #tpu.memory_space<vmem>>, %arg4: memref<1x512x1024xbf16, #tpu.memory_space<vmem>>, %arg5: memref<1x1x1024xf32, #tpu.memory_space<vmem>>, %arg6: memref<1x1024x2048xbf16, #tpu.memory_space<vmem>>, %arg7: memref<1x1x2048xf32, #tpu.memory_space<vmem>>, %arg8: memref<1x2048x256xbf16, #tpu.memory_space<vmem>>, %arg9: memref<1x1x256xf32, #tpu.memory_space<vmem>>, %arg10: memref<1x16x256xf32, #tpu.memory_space<vmem>>, %arg11: memref<16x256xf32, #tpu.memory_space<vmem>>) attributes {dimension_semantics = [#tpu.dimension_semantics<arbitrary>], iteration_bounds = array<i64: 2>, scalar_prefetch = 0 : i64, scratch_operands = 1 : i64, tpu.core_type = #tpu.core_type<tc>, window_params = [{pipeline_mode = #tpu.pipeline_mode<synchronous>, transform_indices = @transform_0, window_bounds = array<i64: 16, 256>}, {transform_indices = @transform_1, window_bounds = array<i64: 1, 256, 512>}, {transform_indices = @transform_2, window_bounds = array<i64: 1, 1, 512>}, {transform_indices = @transform_3, window_bounds = array<i64: 1, 512, 1024>}, {transform_indices = @transform_4, window_bounds = array<i64: 1, 1, 1024>}, {transform_indices = @transform_5, window_bounds = array<i64: 1, 1024, 2048>}, {transform_indices = @transform_6, window_bounds = array<i64: 1, 1, 2048>}, {transform_indices = @transform_7, window_bounds = array<i64: 1, 2048, 256>}, {transform_indices = @transform_8, window_bounds = array<i64: 1, 1, 256>}, {transform_indices = @transform_9, window_bounds = array<i64: 1, 16, 256>}]} {
    %c0_i32 = arith.constant 0 : i32
    %0 = arith.cmpi eq, %arg0, %c0_i32 : i32
    %1 = arith.extui %0 : i1 to i32
    %c0_i32_0 = arith.constant 0 : i32
    %2 = arith.cmpi ne, %1, %c0_i32_0 : i32
    scf.if %2 {
      %c0_52 = arith.constant 0 : index
      %c0_53 = arith.constant 0 : index
      %98 = vector.load %arg1[%c0_52, %c0_53] : memref<16x256xf32, #tpu.memory_space<vmem>>, vector<16x256xf32>
      %c0_54 = arith.constant 0 : index
      %c0_55 = arith.constant 0 : index
      %99 = vector.load %arg11[%c0_54, %c0_55] : memref<16x256xf32, #tpu.memory_space<vmem>>, vector<16x256xf32>
      tpu.vector_store %arg11[%c0_54, %c0_55], %98 {strides = array<i32>} : memref<16x256xf32, #tpu.memory_space<vmem>>, vector<16x256xf32>,
    } else {
    }
    %c0 = arith.constant 0 : index
    %c0_1 = arith.constant 0 : index
    %3 = vector.load %arg11[%c0, %c0_1] : memref<16x256xf32, #tpu.memory_space<vmem>>, vector<16x256xf32>
    %4 = arith.truncf %3 : vector<16x256xf32> to vector<16x256xbf16>
    %c0_2 = arith.constant 0 : index
    %c0_3 = arith.constant 0 : index
    %c0_4 = arith.constant 0 : index
    %5 = vector.load %arg2[%c0_2, %c0_3, %c0_4] : memref<1x256x512xbf16, #tpu.memory_space<vmem>>, vector<1x256x512xbf16>
    %6 = vector.shape_cast %5 : vector<1x256x512xbf16> to vector<256x512xbf16>
    %cst = arith.constant dense<0.000000e+00> : vector<16x512xf32>
    %7 = tpu.matmul %4, %6, %cst {dimension_numbers = #tpu.dot_dimension_numbers<[1], [0], [0], [1], [0, 0, 1, 1], [], []>} : vector<16x256xbf16>, vector<256x512xbf16>, vector<16x512xf32> -> vector<16x512xf32>
    %c0_5 = arith.constant 0 : index
    %c0_6 = arith.constant 0 : index
    %c0_7 = arith.constant 0 : index
    %8 = vector.load %arg3[%c0_5, %c0_6, %c0_7] : memref<1x1x512xf32, #tpu.memory_space<vmem>>, vector<1x1x512xf32>
    %9 = vector.shape_cast %8 : vector<1x1x512xf32> to vector<1x512xf32>
    %10 = vector.broadcast %9 : vector<1x512xf32> to vector<16x512xf32>
    %11 = arith.addf %7, %10 : vector<16x512xf32>
    %cst_8 = arith.constant 0.000000e+00 : f32
    %12 = vector.broadcast %cst_8 : f32 to vector<16x512xf32>
    %13 = arith.cmpf ogt, %11, %12 : vector<16x512xf32>
    %14 = math.exp %11 : vector<16x512xf32>
    %cst_9 = arith.constant 1.000000e+00 : f32
    %15 = vector.broadcast %cst_9 : f32 to vector<16x512xf32>
    %16 = arith.subf %14, %15 : vector<16x512xf32>
    %cst_10 = arith.constant 1.67326319 : f32
    %17 = vector.broadcast %cst_10 : f32 to vector<16x512xf32>
    %18 = arith.mulf %17, %16 : vector<16x512xf32>
    %19 = arith.select %13, %11, %18 : vector<16x512xi1>, vector<16x512xf32>
    %cst_11 = arith.constant 1.05070102 : f32
    %20 = vector.broadcast %cst_11 : f32 to vector<16x512xf32>
    %21 = arith.mulf %20, %19 : vector<16x512xf32>
    %22 = arith.truncf %21 : vector<16x512xf32> to vector<16x512xbf16>
    %c0_12 = arith.constant 0 : index
    %c0_13 = arith.constant 0 : index
    %c0_14 = arith.constant 0 : index
    %23 = vector.load %arg4[%c0_12, %c0_13, %c0_14] : memref<1x512x1024xbf16, #tpu.memory_space<vmem>>, vector<1x512x1024xbf16>
    %24 = vector.shape_cast %23 : vector<1x512x1024xbf16> to vector<512x1024xbf16>
    %cst_15 = arith.constant dense<0.000000e+00> : vector<16x1024xf32>
    %25 = tpu.matmul %22, %24, %cst_15 {dimension_numbers = #tpu.dot_dimension_numbers<[1], [0], [0], [1], [0, 0, 1, 1], [], []>} : vector<16x512xbf16>, vector<512x1024xbf16>, vector<16x1024xf32> -> vector<16x1024xf32>
    %c0_16 = arith.constant 0 : index
    %c0_17 = arith.constant 0 : index
    %c0_18 = arith.constant 0 : index
    %26 = vector.load %arg5[%c0_16, %c0_17, %c0_18] : memref<1x1x1024xf32, #tpu.memory_space<vmem>>, vector<1x1x1024xf32>
    %27 = vector.shape_cast %26 : vector<1x1x1024xf32> to vector<1x1024xf32>
    %28 = vector.broadcast %27 : vector<1x1024xf32> to vector<16x1024xf32>
    %29 = arith.addf %25, %28 : vector<16x1024xf32>
    %cst_19 = arith.constant 0.000000e+00 : f32
    %30 = vector.broadcast %cst_19 : f32 to vector<16x1024xf32>
    %31 = arith.cmpf ogt, %29, %30 : vector<16x1024xf32>
    %32 = math.exp %29 : vector<16x1024xf32>
    %cst_20 = arith.constant 1.000000e+00 : f32
    %33 = vector.broadcast %cst_20 : f32 to vector<16x1024xf32>
    %34 = arith.subf %32, %33 : vector<16x1024xf32>
    %cst_21 = arith.constant 1.67326319 : f32
    %35 = vector.broadcast %cst_21 : f32 to vector<16x1024xf32>
    %36 = arith.mulf %35, %34 : vector<16x1024xf32>
    %37 = arith.select %31, %29, %36 : vector<16x1024xi1>, vector<16x1024xf32>
    %cst_22 = arith.constant 1.05070102 : f32
    %38 = vector.broadcast %cst_22 : f32 to vector<16x1024xf32>
    %39 = arith.mulf %38, %37 : vector<16x1024xf32>
    %40 = arith.truncf %39 : vector<16x1024xf32> to vector<16x1024xbf16>
    %c0_23 = arith.constant 0 : index
    %c0_24 = arith.constant 0 : index
    %c0_25 = arith.constant 0 : index
    %41 = vector.load %arg6[%c0_23, %c0_24, %c0_25] : memref<1x1024x2048xbf16, #tpu.memory_space<vmem>>, vector<1x1024x2048xbf16>
    %42 = vector.shape_cast %41 : vector<1x1024x2048xbf16> to vector<1024x2048xbf16>
    %cst_26 = arith.constant dense<0.000000e+00> : vector<16x2048xf32>
    %43 = tpu.matmul %40, %42, %cst_26 {dimension_numbers = #tpu.dot_dimension_numbers<[1], [0], [0], [1], [0, 0, 1, 1], [], []>} : vector<16x1024xbf16>, vector<1024x2048xbf16>, vector<16x2048xf32> -> vector<16x2048xf32>
    %c0_27 = arith.constant 0 : index
    %c0_28 = arith.constant 0 : index
    %c0_29 = arith.constant 0 : index
    %44 = vector.load %arg7[%c0_27, %c0_28, %c0_29] : memref<1x1x2048xf32, #tpu.memory_space<vmem>>, vector<1x1x2048xf32>
    %45 = vector.shape_cast %44 : vector<1x1x2048xf32> to vector<1x2048xf32>
    %46 = vector.broadcast %45 : vector<1x2048xf32> to vector<16x2048xf32>
    %47 = arith.addf %43, %46 : vector<16x2048xf32>
    %cst_30 = arith.constant 0.000000e+00 : f32
    %48 = vector.broadcast %cst_30 : f32 to vector<16x2048xf32>
    %49 = arith.cmpf ogt, %47, %48 : vector<16x2048xf32>
    %50 = math.exp %47 : vector<16x2048xf32>
    %cst_31 = arith.constant 1.000000e+00 : f32
    %51 = vector.broadcast %cst_31 : f32 to vector<16x2048xf32>
    %52 = arith.subf %50, %51 : vector<16x2048xf32>
    %cst_32 = arith.constant 1.67326319 : f32
    %53 = vector.broadcast %cst_32 : f32 to vector<16x2048xf32>
    %54 = arith.mulf %53, %52 : vector<16x2048xf32>
    %55 = arith.select %49, %47, %54 : vector<16x2048xi1>, vector<16x2048xf32>
    %cst_33 = arith.constant 1.05070102 : f32
    %56 = vector.broadcast %cst_33 : f32 to vector<16x2048xf32>
    %57 = arith.mulf %56, %55 : vector<16x2048xf32>
    %cst_34 = arith.constant dense<0.000000e+00> : vector<2048xf32>
    %58 = vector.multi_reduction <add>, %57, %cst_34 [0] : vector<16x2048xf32> to vector<2048xf32>
    %59 = vector.shape_cast %58 : vector<2048xf32> to vector<1x2048xf32>
    %cst_35 = arith.constant 6.250000e-02 : f32
    %60 = vector.broadcast %cst_35 : f32 to vector<1x2048xf32>
    %61 = arith.mulf %59, %60 : vector<1x2048xf32>
    %62 = vector.broadcast %61 : vector<1x2048xf32> to vector<16x2048xf32>
    %63 = arith.subf %57, %62 : vector<16x2048xf32>
    %64 = arith.mulf %63, %63 : vector<16x2048xf32>
    %cst_36 = arith.constant dense<0.000000e+00> : vector<2048xf32>
    %65 = vector.multi_reduction <add>, %64, %cst_36 [0] : vector<16x2048xf32> to vector<2048xf32>
    %66 = vector.shape_cast %65 : vector<2048xf32> to vector<1x2048xf32>
    %cst_37 = arith.constant 6.250000e-02 : f32
    %67 = vector.broadcast %cst_37 : f32 to vector<1x2048xf32>
    %68 = arith.mulf %66, %67 : vector<1x2048xf32>
    %cst_38 = arith.constant 9.99999974E-6 : f32
    %69 = vector.broadcast %cst_38 : f32 to vector<1x2048xf32>
    %70 = arith.addf %68, %69 : vector<1x2048xf32>
    %71 = math.rsqrt %70 : vector<1x2048xf32>
    %72 = vector.broadcast %71 : vector<1x2048xf32> to vector<16x2048xf32>
    %73 = arith.mulf %63, %72 : vector<16x2048xf32>
    %74 = arith.truncf %73 : vector<16x2048xf32> to vector<16x2048xbf16>
    %c0_39 = arith.constant 0 : index
    %c0_40 = arith.constant 0 : index
    %c0_41 = arith.constant 0 : index
    %75 = vector.load %arg8[%c0_39, %c0_40, %c0_41] : memref<1x2048x256xbf16, #tpu.memory_space<vmem>>, vector<1x2048x256xbf16>
    %76 = vector.shape_cast %75 : vector<1x2048x256xbf16> to vector<2048x256xbf16>
    %cst_42 = arith.constant dense<0.000000e+00> : vector<16x256xf32>
    %77 = tpu.matmul %74, %76, %cst_42 {dimension_numbers = #tpu.dot_dimension_numbers<[1], [0], [0], [1], [0, 0, 1, 1], [], []>} : vector<16x2048xbf16>, vector<2048x256xbf16>, vector<16x256xf32> -> vector<16x256xf32>
    %c0_43 = arith.constant 0 : index
    %c0_44 = arith.constant 0 : index
    %c0_45 = arith.constant 0 : index
    %78 = vector.load %arg9[%c0_43, %c0_44, %c0_45] : memref<1x1x256xf32, #tpu.memory_space<vmem>>, vector<1x1x256xf32>
    %79 = vector.shape_cast %78 : vector<1x1x256xf32> to vector<1x256xf32>
    %80 = vector.broadcast %79 : vector<1x256xf32> to vector<16x256xf32>
    %81 = arith.addf %77, %80 : vector<16x256xf32>
    %cst_46 = arith.constant dense<0xFF800000> : vector<16xf32>
    %82 = vector.multi_reduction <maximumf>, %81, %cst_46 [1] : vector<16x256xf32> to vector<16xf32>
    %83 = vector.shape_cast %82 : vector<16xf32> to vector<16x1xf32>
    %84 = vector.broadcast %83 : vector<16x1xf32> to vector<16x256xf32>
    %85 = arith.subf %81, %84 : vector<16x256xf32>
    %86 = math.exp %85 : vector<16x256xf32>
    %cst_47 = arith.constant dense<0.000000e+00> : vector<16xf32>
    %87 = vector.multi_reduction <add>, %86, %cst_47 [1] : vector<16x256xf32> to vector<16xf32>
    %88 = vector.shape_cast %87 : vector<16xf32> to vector<16x1xf32>
    %89 = vector.broadcast %88 : vector<16x1xf32> to vector<16x256xf32>
    %90 = arith.divf %86, %89 : vector<16x256xf32>
    %c0_48 = arith.constant 0 : index
    %c0_49 = arith.constant 0 : index
    %c0_50 = arith.constant 0 : index
    %91 = vector.load %arg10[%c0_48, %c0_49, %c0_50] : memref<1x16x256xf32, #tpu.memory_space<vmem>>, vector<1x16x256xf32>
    %92 = vector.shape_cast %91 : vector<1x16x256xf32> to vector<16x256xf32>
    %93 = vector.shape_cast %90 : vector<16x256xf32> to vector<1x16x256xf32>
    tpu.vector_store %arg10[%c0_48, %c0_49, %c0_50], %93 {strides = array<i32>} : memref<1x16x256xf32, #tpu.memory_space<vmem>>, vector<1x16x256xf32>,
    %c1_i32 = arith.constant 1 : i32
    %94 = arith.addi %arg0, %c1_i32 : i32
    %c2_i32 = arith.constant 2 : i32
    %95 = arith.cmpi slt, %94, %c2_i32 : i32
    %96 = arith.extui %95 : i1 to i32
    %c0_i32_51 = arith.constant 0 : i32
    %97 = arith.cmpi ne, %96, %c0_i32_51 : i32
    scf.if %97 {
      %c0_52 = arith.constant 0 : index
      %c0_53 = arith.constant 0 : index
      %98 = vector.load %arg11[%c0_52, %c0_53] : memref<16x256xf32, #tpu.memory_space<vmem>>, vector<16x256xf32>
      tpu.vector_store %arg11[%c0_52, %c0_53], %90 {strides = array<i32>} : memref<16x256xf32, #tpu.memory_space<vmem>>, vector<16x256xf32>,
    } else {
    }
    return
  }
  func.func @transform_0(%arg0: i32) -> (i32, i32) {
    %c0_i32 = arith.constant 0 : i32
    %c0_i32_0 = arith.constant 0 : i32
    %c0_i32_1 = arith.constant 0 : i32
    return %c0_i32, %c0_i32_0 : i32, i32
  }
  func.func @transform_1(%arg0: i32) -> (i32, i32, i32) {
    %c0_i32 = arith.constant 0 : i32
    %c0_i32_0 = arith.constant 0 : i32
    %c0_i32_1 = arith.constant 0 : i32
    return %arg0, %c0_i32, %c0_i32_0 : i32, i32, i32
  }
  func.func @transform_2(%arg0: i32) -> (i32, i32, i32) {
    %c0_i32 = arith.constant 0 : i32
    %c0_i32_0 = arith.constant 0 : i32
    %c0_i32_1 = arith.constant 0 : i32
    return %arg0, %c0_i32, %c0_i32_0 : i32, i32, i32
  }
  func.func @transform_3(%arg0: i32) -> (i32, i32, i32) {
    %c0_i32 = arith.constant 0 : i32
    %c0_i32_0 = arith.constant 0 : i32
    %c0_i32_1 = arith.constant 0 : i32
    return %arg0, %c0_i32, %c0_i32_0 : i32, i32, i32
  }
  func.func @transform_4(%arg0: i32) -> (i32, i32, i32) {
    %c0_i32 = arith.constant 0 : i32
    %c0_i32_0 = arith.constant 0 : i32
    %c0_i32_1 = arith.constant 0 : i32
    return %arg0, %c0_i32, %c0_i32_0 : i32, i32, i32
  }
  func.func @transform_5(%arg0: i32) -> (i32, i32, i32) {
    %c0_i32 = arith.constant 0 : i32
    %c0_i32_0 = arith.constant 0 : i32
    %c0_i32_1 = arith.constant 0 : i32
    return %arg0, %c0_i32, %c0_i32_0 : i32, i32, i32
  }
  func.func @transform_6(%arg0: i32) -> (i32, i32, i32) {
    %c0_i32 = arith.constant 0 : i32
    %c0_i32_0 = arith.constant 0 : i32
    %c0_i32_1 = arith.constant 0 : i32
    return %arg0, %c0_i32, %c0_i32_0 : i32, i32, i32
  }
  func.func @transform_7(%arg0: i32) -> (i32, i32, i32) {
    %c0_i32 = arith.constant 0 : i32
    %c0_i32_0 = arith.constant 0 : i32
    %c0_i32_1 = arith.constant 0 : i32
    return %arg0, %c0_i32, %c0_i32_0 : i32, i32, i32
  }
  func.func @transform_8(%arg0: i32) -> (i32, i32, i32) {
    %c0_i32 = arith.constant 0 : i32
    %c0_i32_0 = arith.constant 0 : i32
    %c0_i32_1 = arith.constant 0 : i32
    return %arg0, %c0_i32, %c0_i32_0 : i32, i32, i32
  }
  func.func @transform_9(%arg0: i32) -> (i32, i32, i32) {
    %c0_i32 = arith.constant 0 : i32
    %c0_i32_0 = arith.constant 0 : i32
    %c0_i32_1 = arith.constant 0 : i32
    return %arg0, %c0_i32, %c0_i32_0 : i32, i32, i32
  }
}

</mosaic_0001>

<bundles_post_ra>
// kernel: tpu_custom_call.1
= control target key start
LH: loop header
LB: loop body
LE: loop exit
PB: predicated region body
PF: predicated region fallthrough
CT: control target
= control target key end

     0   :  { %s19819_s0 = inlined_call_operand.hbm [shape: f32[16,256], index: 0, kind: input, shape index: {}]   ;;  %s19820_s1 = inlined_call_operand.hbm [shape: bf16[2,256,512], index: 1, kind: input, shape index: {}]   ;;  %s19821_s2 = inlined_call_operand.hbm [shape: f32[2,1,512], index: 2, kind: input, shape index: {}]   ;;  %s19822_s3 = inlined_call_operand.hbm [shape: bf16[2,512,1024], index: 3, kind: input, shape index: {}]   ;;  %s19823_s4 = inlined_call_operand.hbm [shape: f32[2,1,1024], index: 4, kind: input, shape index: {}]   ;;  %s19824_s5 = inlined_call_operand.hbm [shape: bf16[2,1024,2048], index: 5, kind: input, shape index: {}]   ;;  %s19825_s6 = inlined_call_operand.hbm [shape: f32[2,1,2048], index: 6, kind: input, shape index: {}]   ;;  %s19826_s7 = inlined_call_operand.hbm [shape: bf16[2,2048,256], index: 7, kind: input, shape index: {}]   ;;  %s19827_s8 = inlined_call_operand.hbm [shape: f32[2,1,256], index: 8, kind: input, shape index: {}]   ;;  %s19828_s9 = inlined_call_operand.hbm [shape: f32[2,16,256], index: 9, kind: output, shape index: {}]  }
   0x1   :  { %19850 = sst [smem:[#allocation29_spill]] %s19819_s0 }
   0x2   :  { %19851 = sst [smem:[#allocation30_spill]] %s19820_s1 }
   0x3   :  { %19852 = sst [smem:[#allocation31_spill]] %s19822_s3 }
   0x4   :  { %19853 = sst [smem:[#allocation32_spill]] %s19824_s5 }
   0x5   :  { %19854 = sst [smem:[#allocation33_spill]] %s19826_s7 }
   0x6   :  { %14 = vsyncpa [#allocation4], 0 }
   0x7   :  { %15 = vsyncpa [#allocation7], 0 }
   0x8   :  { %17 = vsyncpa [#allocation7 + $0x1], 0 }
   0x9   :  { %18 = vsyncpa [#allocation10], 0 }
   0xa   :  { %20 = vsyncpa [#allocation10 + $0x1], 0 }
   0xb   :  { %21 = vsyncpa [#allocation13], 0 }
   0xc   :  { %23 = vsyncpa [#allocation13 + $0x1], 0 }
   0xd   :  { %24 = vsyncpa [#allocation16], 0 }
   0xe   :  { %26 = vsyncpa [#allocation16 + $0x1], 0 }
   0xf   :  { %27 = vsyncpa [#allocation5], 0 }
  0x10   :  { %29 = vsyncpa [#allocation5 + $0x1], 0  ;;  %s16715_s30 = smov 0   ;;  %s16717_s10 = smov 0  }
  0x11   :  { %s16719_s11 = smov 0   ;;  %s16721_s12 = smov 0  }
  0x12 LB: > { %19855 = sst [smem:[#allocation25_spill]] %s16639_s11  ;;  %s16736_s13 = sadd.s32 1, %s16643_s12   ;;  %s16643_s12 = sphi %s16721_s12, %s19898_s12   ;;  %s16639_s11 = sphi %s16719_s11, %s19900_s11   ;;  %s16635_s10 = sphi %s16717_s10, %s19902_s10   ;;  %s16631_s30 = sphi %s16715_s30, %s19901_s30  }
  0x13   : > { %19856 = sst [smem:[#allocation26_spill]] %s16736_s13  ;;  %s63_s14 = sadd.s32 1, %s16639_s11 }
  0x14   : > { %s60_s15 = ssub.s32 %s16643_s12, %s16736_s13  ;;  %p19829_p0 = scmp.ne.s32.totalorder %s16639_s11, %s16635_s10 }
  0x15   : > { %p61_p1 = scmp.eq.s32.totalorder %s60_s15, 0  ;;  %p71_p2 = scmp.eq.s32.totalorder %s16643_s12, 0 }
  0x16   : > { %p15608_p5 = scmp.lt.s32.totalorder %s16643_s12, 2  ;;  %s16753_s17 = sand.u32 1, %s16643_s12  }
  0x17   : > { %s16745_s16 = scalar_select %p61_p1, %s16639_s11, %s63_s14  }
  0x18   : > { %p72_p3 = por %p71_p2, %p19829_p0  ;;  %s16756_s18 = sand.u32 1, %s16639_s11  }
  0x19   : > { %19857 = sst [smem:[#allocation27_spill]] %s16745_s16  ;;  %s13653_s19 = sshll.u32 %s16756_s18, 9 }
  0x1a   : > { %s15351_s20 = sshll.u32 %s16643_s12, 13  ;;  %s19858_s1 = sld [smem:[#allocation30_spill]] }
  0x1b   : > { %s325_s24 = scalar_lea.vmem [#allocation6], %s13653_s19  ;;  %p16765_p6 = pnand %p15608_p5, %p72_p3 }
  0x1c   : > { %s332_s25 = sshll.u32 %s325_s24, 4  ;;  %s19835_s27 = sshll.u32 %s16756_s18, 11  ;;  %s16769_s25 = int_to_ptr.vmem [resolvable:$true] %s332_s25 }
  0x1d   : > { %s19859_s26 = scalar_select %p16765_p6, 1, 0 }
  0x1e   : > { %s19832_s28 = scalar_lea.sflag [#allocation7], %s16753_s17  ;;  %p16777_p8 = pneg %p16765_p6 }
  0x20   : > { %s16763_s23 = scalar_lea.hbm %s19858_s1, %s15351_s20  ;;  %s16298_s20 = scalar_lea.hbm %s19858_s1, 16384 }
  0x21   : > { %s16293_s29 = scalar_lea.hbm %s16763_s23, 8192  ;;  %p16299_p11 = scmp.lt.u32.totalorder %s16763_s23, %s19858_s1 }
  0x22   : > { %p16294_p7 = scmp.ne.s32.totalorder %s16763_s23, %s16293_s29  ;;  %p16300_p12 = scmp.lt.u32.totalorder %s16298_s20, %s16293_s29 }
  0x23   : > { %s19860_s14 = scalar_select %p16777_p8, 1, 0 }
  0x24   : > { %p16296_p9 = pnand %p16777_p8, %p16294_p7  ;;  %p16301_p13 = por %p16300_p12, %p16299_p11 }
  0x25   : > { %p16302_p1 = scmp.lt.u32.totalorder %s16293_s29, %s16763_s23 }
  0x26   : > { %p16297_p10 = pneg %p16296_p9 }
  0x27   : > { %p16303_p2 = por %p16302_p1, %p16301_p13 }
  0x29   : > { %p16304_p3 = pnand %p16303_p2, %p16297_p10 }
  0x2b   : > { %16307 = shalt.err (!%p16304_p3)
}
  0x2c   : > { %s16308_s24 = scalar_lea.vmem %s16769_s25, 8192  ;;  %s16645_s15 = smov [#allocation6]  }
  0x2d   : > { %p16309_p5 = scmp.ne.s32.totalorder %s16769_s25, %s16308_s24  ;;  %s16313_s19 = sshll.u32 %s16645_s15, 4  ;;  %s16314_s19 = int_to_ptr.vmem [resolvable:$false] %s16313_s19 }
  0x2e   : > { %s16315_s21 = scalar_lea.vmem %s16314_s19, 16384  ;;  %p16316_p4 = scmp.lt.s32.totalorder %s16769_s25, %s16314_s19 }
  0x2f   : > { %p16311_p7 = pnand %p16309_p5, %p16777_p8  ;;  %p16317_p0 = scmp.lt.s32.totalorder %s16315_s21, %s16308_s24 }
  0x31   : > { %p16312_p9 = pneg %p16311_p7  ;;  %p16318_p11 = por %p16317_p0, %p16316_p4 }
  0x33   : > { %p16319_p12 = pnand %p16318_p11, %p16312_p9 }
  0x35   : > { %16322 = shalt.err (!%p16319_p12)
}
  0x36   : > { %s19833_s29 = smov 256   ;;  %s19834_s20 = smov 16  }
  0x37   : > { %15581 = dma.hbm_to_vmem [thread:$0]  (!%p16765_p6), %s16763_s23, 8192, %s16769_s25, %s19832_s28, %s19833_s29, %s19833_s29, %s19834_s20  }
  0x38   : > { %s19836_s22 = sshll.u32 %s16643_s12, 15  ;;  %s19861_s3 = sld [smem:[#allocation31_spill]] }
  0x39   : > { %s365_s21 = scalar_lea.vmem [#allocation9], %s19835_s27  ;;  %s19837_s16 = scalar_lea.sflag [#allocation10], %s16753_s17 }
  0x3a   : > { %s372_s1 = sshll.u32 %s365_s21, 4  ;;  %s16815_s1 = int_to_ptr.vmem [resolvable:$true] %s372_s1 }
  0x3e   : > { %s16811_s19 = scalar_lea.hbm %s19861_s3, %s19836_s22  ;;  %s16328_s24 = scalar_lea.hbm %s19861_s3, 65536 }
  0x3f   : > { %s16323_s13 = scalar_lea.hbm %s16811_s19, 32768  ;;  %p16329_p13 = scmp.lt.u32.totalorder %s16811_s19, %s19861_s3 }
  0x40   : > { %p16324_p0 = scmp.ne.s32.totalorder %s16811_s19, %s16323_s13  ;;  %p16330_p1 = scmp.lt.u32.totalorder %s16328_s24, %s16323_s13 }
  0x41   : > { %p16332_p3 = scmp.lt.u32.totalorder %s16323_s13, %s16811_s19 }
  0x42   : > { %p16326_p4 = pnand %p16324_p0, %p16777_p8  ;;  %p16331_p2 = por %p16330_p1, %p16329_p13 }
  0x44   : > { %p16327_p10 = pneg %p16326_p4  ;;  %p16333_p5 = por %p16332_p3, %p16331_p2 }
  0x46   : > { %p16334_p7 = pnand %p16333_p5, %p16327_p10 }
  0x48   : > { %16337 = shalt.err (!%p16334_p7)
}
  0x49   : > { %s16338_s21 = scalar_lea.vmem %s16815_s1, 32768  ;;  %s16648_s23 = smov [#allocation9]  }
  0x4a   : > { %p16339_p9 = scmp.ne.s32.totalorder %s16815_s1, %s16338_s21  ;;  %s16343_s25 = sshll.u32 %s16648_s23, 4  ;;  %s16344_s25 = int_to_ptr.vmem [resolvable:$false] %s16343_s25 }
  0x4b   : > { %s16345_s28 = scalar_lea.vmem %s16344_s25, 65536  ;;  %p16346_p0 = scmp.lt.s32.totalorder %s16815_s1, %s16344_s25 }
  0x4c   : > { %p16341_p11 = pnand %p16339_p9, %p16777_p8  ;;  %p16347_p4 = scmp.lt.s32.totalorder %s16345_s28, %s16338_s21 }
  0x4e   : > { %p16342_p12 = pneg %p16341_p11  ;;  %p16348_p13 = por %p16347_p4, %p16346_p0 }
  0x50   : > { %p16349_p1 = pnand %p16348_p13, %p16342_p12 }
  0x52   : > { %16352 = shalt.err (!%p16349_p1)
}
  0x53   : > { %s16649_s13 = smov 512   ;;  %s16650_s24 = smov 32  }
  0x54   : > { %15587 = dma.hbm_to_vmem [thread:$0]  (!%p16765_p6), %s16811_s19, 32768, %s16815_s1, %s19837_s16, %s16649_s13, %s16649_s13, %s16650_s24  }
  0x55   : > { %s13665_s15 = sshll.u32 %s16756_s18, 13  ;;  %s15355_s23 = sshll.u32 %s16643_s12, 17 }
  0x56   : > { %s19862_s5 = sld [smem:[#allocation32_spill]]  ;;  %s405_s29 = scalar_lea.vmem [#allocation12], %s13665_s15 }
  0x57   : > { %s412_s20 = sshll.u32 %s405_s29, 4  ;;  %s19839_s27 = scalar_lea.sflag [#allocation13], %s16753_s17  ;;  %s16848_s20 = int_to_ptr.vmem [resolvable:$true] %s412_s20 }
  0x5c   : > { %s16846_s28 = scalar_lea.hbm %s19862_s5, %s15355_s23  ;;  %s16358_s13 = scalar_lea.hbm %s19862_s5, 262144 }
  0x5d   : > { %s16353_s22 = scalar_lea.hbm %s16846_s28, 131072  ;;  %p16359_p5 = scmp.lt.u32.totalorder %s16846_s28, %s19862_s5 }
  0x5e   : > { %p16354_p10 = scmp.ne.s32.totalorder %s16846_s28, %s16353_s22  ;;  %p16360_p7 = scmp.lt.u32.totalorder %s16358_s13, %s16353_s22 }
  0x5f   : > { %p16362_p11 = scmp.lt.u32.totalorder %s16353_s22, %s16846_s28 }
  0x60   : > { %p16356_p2 = pnand %p16354_p10, %p16777_p8  ;;  %p16361_p9 = por %p16360_p7, %p16359_p5 }
  0x62   : > { %p16357_p3 = pneg %p16356_p2  ;;  %p16363_p12 = por %p16362_p11, %p16361_p9 }
  0x64   : > { %p16364_p0 = pnand %p16363_p12, %p16357_p3 }
  0x66   : > { %16367 = shalt.err (!%p16364_p0)
}
  0x67   : > { %s16368_s29 = scalar_lea.vmem %s16848_s20, 131072  ;;  %s16651_s15 = smov [#allocation12]  }
  0x68   : > { %p16369_p4 = scmp.ne.s32.totalorder %s16848_s20, %s16368_s29  ;;  %s16373_s25 = sshll.u32 %s16651_s15, 4  ;;  %s16374_s25 = int_to_ptr.vmem [resolvable:$false] %s16373_s25 }
  0x69   : > { %s16375_s21 = scalar_lea.vmem %s16374_s25, 262144  ;;  %p16376_p10 = scmp.lt.s32.totalorder %s16848_s20, %s16374_s25 }
  0x6a   : > { %p16371_p13 = pnand %p16369_p4, %p16777_p8  ;;  %p16377_p2 = scmp.lt.s32.totalorder %s16375_s21, %s16368_s29 }
  0x6c   : > { %p16372_p1 = pneg %p16371_p13  ;;  %p16378_p5 = por %p16377_p2, %p16376_p10 }
  0x6e   : > { %p16379_p7 = pnand %p16378_p5, %p16372_p1 }
  0x70   : > { %16382 = shalt.err (!%p16379_p7)
}
  0x71   : > { %s16652_s22 = smov 1024   ;;  %s16653_s1 = smov 64  }
  0x72   : > { %15593 = dma.hbm_to_vmem [thread:$0]  (!%p16765_p6), %s16846_s28, 131072, %s16848_s20, %s19839_s27, %s16652_s22, %s16652_s22, %s16653_s1  }
  0x73   : > { %s19863_s19 = sshll.u32 %s16643_s12, 15  ;;  %s19864_s7 = sld [smem:[#allocation33_spill]] }
  0x74   : > { %s19865_s29 = sshll.u32 %s16756_s18, 11  ;;  %s19838_s21 = scalar_lea.sflag [#allocation16], %s16753_s17 }
  0x75   : > { %s445_s15 = scalar_lea.vmem [#allocation15], %s19865_s29 }
  0x76   : > { %s452_s25 = sshll.u32 %s445_s15, 4  ;;  %s16883_s25 = int_to_ptr.vmem [resolvable:$true] %s452_s25 }
  0x79   : > { %s16879_s23 = scalar_lea.hbm %s19864_s7, %s19863_s19  ;;  %s16388_s22 = scalar_lea.hbm %s19864_s7, 65536 }
  0x7a   : > { %s16383_s16 = scalar_lea.hbm %s16879_s23, 32768  ;;  %p16389_p12 = scmp.lt.u32.totalorder %s16879_s23, %s19864_s7 }
  0x7b   : > { %p16384_p3 = scmp.ne.s32.totalorder %s16879_s23, %s16383_s16  ;;  %p16390_p0 = scmp.lt.u32.totalorder %s16388_s22, %s16383_s16 }
  0x7c   : > { %p16392_p13 = scmp.lt.u32.totalorder %s16383_s16, %s16879_s23 }
  0x7d   : > { %p16386_p9 = pnand %p16384_p3, %p16777_p8  ;;  %p16391_p4 = por %p16390_p0, %p16389_p12 }
  0x7f   : > { %p16387_p11 = pneg %p16386_p9  ;;  %p16393_p1 = por %p16392_p13, %p16391_p4 }
  0x81   : > { %p16394_p10 = pnand %p16393_p1, %p16387_p11 }
  0x83   : > { %16397 = shalt.err (!%p16394_p10)
}
  0x84   : > { %s16398_s13 = scalar_lea.vmem %s16883_s25, 32768  ;;  %s16654_s24 = smov [#allocation15]  }
  0x85   : > { %p16399_p2 = scmp.ne.s32.totalorder %s16883_s25, %s16398_s13  ;;  %s16403_s29 = sshll.u32 %s16654_s24, 4  ;;  %s16404_s29 = int_to_ptr.vmem [resolvable:$false] %s16403_s29 }
  0x86   : > { %s16405_s15 = scalar_lea.vmem %s16404_s29, 65536  ;;  %p16406_p3 = scmp.lt.s32.totalorder %s16883_s25, %s16404_s29 }
  0x87   : > { %p16401_p5 = pnand %p16399_p2, %p16777_p8  ;;  %p16407_p9 = scmp.lt.s32.totalorder %s16405_s15, %s16398_s13 }
  0x89   : > { %p16402_p7 = pneg %p16401_p5  ;;  %p16408_p12 = por %p16407_p9, %p16406_p3 }
  0x8b   : > { %p16409_p0 = pnand %p16408_p12, %p16402_p7 }
  0x8d   : > { %16412 = shalt.err (!%p16409_p0)
}
  0x8e   : > { %s16655_s16 = smov 128   ;;  %s16656_s20 = smov 8  }
  0x8f   : > { %15599 = dma.hbm_to_vmem [thread:$0]  (!%p16765_p6), %s16879_s23, 32768, %s16883_s25, %s19838_s21, %s16655_s16, %s16655_s16, %s16656_s20  }
  0x90   : > { %s16910_s28 = sadd.s32 4294967295, %s16643_s12   ;;  %s13649_s22 = sadd.s32 4294967294, %s16643_s12  }
  0x91   : > { %p76_p11 = scmp.ne.s32.totalorder %s16635_s10, %s16631_s30  ;;  %p19842_p4 = scmp.eq.s32.totalorder %s16910_s28, 0 }
  0x92   : > { %p282_p13 = scmp.eq.s32.totalorder %s16910_s28, 1  ;;  %p288_p1 = scmp.eq.s32.totalorder %s13649_s22, 1 }
  0x93   : > { %p13650_p10 = scmp.ge.s32.totalorder %s16643_s12, 1  ;;  %p16920_p2 = por %p19842_p4, %p76_p11 }
  0x94   : > { %p19867_p5 = scmp.ne.s32.totalorder %s16639_s11, %s16635_s10  ;;  %p16931_p3 = por %p288_p1, %p76_p11 }
  0x95   : > { %s19866_s1 = scalar_select %p16920_p2, 1, 0 }
  0x96   : > { %p16927_p7 = por %p282_p13, %p19867_p5  ;;  %p295_p9 = scmp.lt.s32.totalorder %s16643_s12, 3 }
  0x97   : > { %s19869_s25 = scalar_select %p16931_p3, 1, 0 }
  0x98   : > { %s19868_s23 = scalar_select %p16927_p7, 1, 0 }
  0x99   : > { %19870 = sst [smem:[#allocation28_spill]] %s19869_s25  ;;  %p16937_p0 = pnand %p13650_p10, %p295_p9 }
  0x9a   : > { %s16657_s13 = smov [#allocation3]   ;;  %s13656_s29 = sshll.u32 %s16756_s18, 2 }
  0x9b   : > { %s19871_s19 = scalar_select %p16937_p0, 1, 0 }
  0x9c   : > { %s307_s24 = sshll.u32 %s16657_s13, 4  ;;  %p15574_p13 = pneg %p16937_p0  ;;  %s16941_s24 = int_to_ptr.vmem [resolvable:$true] %s307_s24 }
  0x9d   : > { %s15352_s15 = sshll.u32 %s16643_s12, 6  ;;  %s346_s16 = scalar_lea.vmem [#allocation8], %s13656_s29 }
  0x9e   : > { %s354_s20 = sshll.u32 %s346_s16, 4  ;;  %p16949_p11 = pnand %p15574_p13, %p19842_p4  ;;  %s16958_s20 = int_to_ptr.vmem [resolvable:$true] %s354_s20 }
  0x9f   : > { %s16956_s3 = scalar_lea.hbm %s19821_s2, %s15352_s15  ;;  %s13662_s13 = sshll.u32 %s16756_s18, 3 }
  0xa0   : > { %s19873_s0 = sld [smem:[#allocation29_spill]]  ;;  %p16415_p10 = pneg %p16949_p11 }
  0xa6   : > { %s16413_s11 = scalar_lea.hbm %s19873_s0, 512 }
  0xa7   : > { %p16414_p1 = scmp.ne.s32.totalorder %s19873_s0, %s16413_s11  ;;  %p16420_p13 = scmp.lt.u32.totalorder %s16413_s11, %s19873_s0 }
  0xa9   : > { %p16416_p5 = pnand %p16415_p10, %p16414_p1 }
  0xab   : > { %p16417_p9 = pneg %p16416_p5 }
  0xad   : > { %p16422_p12 = pnand %p16420_p13, %p16417_p9 }
  0xaf   : > { %16425 = shalt.err (!%p16422_p12)
}
  0xb0   : > { %s16426_s21 = scalar_lea.vmem %s16941_s24, 512  ;;  %p16434_p2 = scmp.lt.s32.totalorder %s16941_s24, %s16941_s24 }
  0xb1   : > { %p16427_p4 = scmp.ne.s32.totalorder %s16941_s24, %s16426_s21  ;;  %p16435_p0 = scmp.lt.s32.totalorder %s16426_s21, %s16426_s21 }
  0xb3   : > { %p16429_p3 = pnand %p16427_p4, %p16415_p10  ;;  %p16436_p6 = por %p16435_p0, %p16434_p2 }
  0xb5   : > { %p16430_p7 = pneg %p16429_p3 }
  0xb7   : > { %p16437_p8 = pnand %p16436_p6, %p16430_p7 }
  0xb9   : > { %16440 = shalt.err (!%p16437_p8)
}
  0xba   : > { %s19874_s5 = smov 16   ;;  %s19875_s7 = smov 256  }
  0xbb   : > { %15577 = dma.hbm_to_vmem [thread:$0]  (!%p16949_p11), %s19873_s0, 512, %s16941_s24, [#allocation4], %s19875_s7, %s19875_s7, %s19874_s5  }
  0xbc   : > { %s16441_s15 = scalar_lea.hbm %s16956_s3, 64  ;;  %p19876_p2 = scmp.ne.s32.totalorder %s19860_s14, 0 }
  0xbd   : > { %p16442_p4 = scmp.ne.s32.totalorder %s16956_s3, %s16441_s15  ;;  %s16446_s16 = scalar_lea.hbm %s19821_s2, 128 }
  0xbe   : > { %p16447_p7 = scmp.lt.u32.totalorder %s16956_s3, %s19821_s2  ;;  %p16448_p3 = scmp.lt.u32.totalorder %s16446_s16, %s16441_s15 }
  0xbf   : > { %p16444_p6 = pnand %p16442_p4, %p19876_p2  ;;  %p16450_p0 = scmp.lt.u32.totalorder %s16441_s15, %s16956_s3 }
  0xc0   : > { %p16449_p12 = por %p16448_p3, %p16447_p7 }
  0xc1   : > { %p16445_p8 = pneg %p16444_p6 }
  0xc2   : > { %p16451_p1 = por %p16450_p0, %p16449_p12 }
  0xc4   : > { %p16452_p10 = pnand %p16451_p1, %p16445_p8 }
  0xc6   : > { %16455 = shalt.err (!%p16452_p10)
}
  0xc7   : > { %s16456_s24 = scalar_lea.vmem %s16958_s20, 64  ;;  %s16658_s5 = smov [#allocation8]  }
  0xc8   : > { %p16457_p11 = scmp.ne.s32.totalorder %s16958_s20, %s16456_s24  ;;  %s16461_s7 = sshll.u32 %s16658_s5, 4  ;;  %s16462_s7 = int_to_ptr.vmem [resolvable:$false] %s16461_s7 }
  0xc9   : > { %s16463_s11 = scalar_lea.vmem %s16462_s7, 128  ;;  %p16464_p13 = scmp.lt.s32.totalorder %s16958_s20, %s16462_s7 }
  0xca   : > { %p16459_p5 = pnand %p16457_p11, %p19876_p2  ;;  %p16465_p4 = scmp.lt.s32.totalorder %s16463_s11, %s16456_s24 }
  0xcc   : > { %p16460_p9 = pneg %p16459_p5  ;;  %p16466_p6 = por %p16465_p4, %p16464_p13 }
  0xce   : > { %p16467_p7 = pnand %p16466_p6, %p16460_p9 }
  0xd0   : > { %16470 = shalt.err (!%p16467_p7)
}
  0xd1   : > { %p19877_p8 = scmp.ne.s32.totalorder %s19859_s26, 0  ;;  %s19878_s25 = scalar_lea.sflag [#allocation7], %s16753_s17 }
  0xd2   : > { %s15354_s15 = sshll.u32 %s16643_s12, 7  ;;  %s386_s29 = scalar_lea.vmem [#allocation11], %s13662_s13 }
  0xd3   : > { %15584 = dma.hbm_to_vmem [thread:$0]  (!%p19877_p8), %s16956_s3, 64, %s16958_s20, %s19878_s25  }
  0xd4   : > { %s394_s22 = sshll.u32 %s386_s29, 4  ;;  %s392_s21 = scalar_lea.hbm %s19823_s4, %s15354_s15  ;;  %s395_s22 = int_to_ptr.vmem [resolvable:$true] %s394_s22 }
  0xd5   : > { %s16471_s24 = scalar_lea.hbm %s392_s21, 128  ;;  %s16476_s11 = scalar_lea.hbm %s19823_s4, 256 }
  0xd6   : > { %p16472_p3 = scmp.ne.s32.totalorder %s392_s21, %s16471_s24  ;;  %p16477_p1 = scmp.lt.u32.totalorder %s392_s21, %s19823_s4 }
  0xd7   : > { %p16478_p10 = scmp.lt.u32.totalorder %s16476_s11, %s16471_s24  ;;  %p16480_p5 = scmp.lt.u32.totalorder %s16471_s24, %s392_s21 }
  0xd8   : > { %p16474_p12 = pnand %p16472_p3, %p19876_p2 }
  0xd9   : > { %p16479_p11 = por %p16478_p10, %p16477_p1 }
  0xda   : > { %p16475_p0 = pneg %p16474_p12 }
  0xdb   : > { %p16481_p9 = por %p16480_p5, %p16479_p11 }
  0xdd   : > { %p16482_p13 = pnand %p16481_p9, %p16475_p0 }
  0xdf   : > { %16485 = shalt.err (!%p16482_p13)
}
  0xe0   : > { %s16486_s20 = scalar_lea.vmem %s395_s22, 128  ;;  %s16659_s13 = smov [#allocation11]  }
  0xe1   : > { %p16487_p4 = scmp.ne.s32.totalorder %s395_s22, %s16486_s20  ;;  %s16491_s25 = sshll.u32 %s16659_s13, 4  ;;  %s16492_s25 = int_to_ptr.vmem [resolvable:$false] %s16491_s25 }
  0xe2   : > { %s16493_s15 = scalar_lea.vmem %s16492_s25, 256  ;;  %p16494_p3 = scmp.lt.s32.totalorder %s395_s22, %s16492_s25 }
  0xe3   : > { %p16489_p6 = pnand %p16487_p4, %p19876_p2  ;;  %p16495_p12 = scmp.lt.s32.totalorder %s16493_s15, %s16486_s20 }
  0xe5   : > { %p16490_p7 = pneg %p16489_p6  ;;  %p16496_p8 = por %p16495_p12, %p16494_p3 }
  0xe7   : > { %p16497_p1 = pnand %p16496_p8, %p16490_p7 }
  0xe9   : > { %16500 = shalt.err (!%p16497_p1)
}
  0xea   : > { %p19879_p10 = scmp.ne.s32.totalorder %s19859_s26, 0  ;;  %s19880_s0 = scalar_lea.sflag [#allocation10], %s16753_s17 }
  0xeb   : > { %s13668_s29 = sshll.u32 %s16756_s18, 4  ;;  %s15356_s16 = sshll.u32 %s16643_s12, 8 }
  0xec   : > { %15590 = dma.hbm_to_vmem [thread:$0]  (!%p19879_p10), %s392_s21, 128, %s395_s22, %s19880_s0  }
  0xed   : > { %s17033_s5 = scalar_lea.hbm %s19825_s6, %s15356_s16  ;;  %s426_s7 = scalar_lea.vmem [#allocation14], %s13668_s29 }
  0xee   : > { %s434_s11 = sshll.u32 %s426_s7, 4  ;;  %s13674_s3 = sshll.u32 %s16756_s18, 1  ;;  %s435_s11 = int_to_ptr.vmem [resolvable:$true] %s434_s11 }
  0xef   : > { %s16501_s20 = scalar_lea.hbm %s17033_s5, 256  ;;  %s16506_s13 = scalar_lea.hbm %s19825_s6, 512 }
  0xf0   : > { %p16502_p8 = scmp.ne.s32.totalorder %s17033_s5, %s16501_s20  ;;  %p16507_p5 = scmp.lt.u32.totalorder %s17033_s5, %s19825_s6 }
  0xf1   : > { %p16508_p9 = scmp.lt.u32.totalorder %s16506_s13, %s16501_s20  ;;  %p16510_p4 = scmp.lt.u32.totalorder %s16501_s20, %s17033_s5 }
  0xf2   : > { %p16504_p0 = pnand %p16502_p8, %p19876_p2 }
  0xf3   : > { %p16509_p13 = por %p16508_p9, %p16507_p5 }
  0xf4   : > { %p16505_p11 = pneg %p16504_p0 }
  0xf5   : > { %p16511_p6 = por %p16510_p4, %p16509_p13 }
  0xf7   : > { %p16512_p7 = pnand %p16511_p6, %p16505_p11 }
  0xf9   : > { %16515 = shalt.err (!%p16512_p7)
}
  0xfa   : > { %s16516_s0 = scalar_lea.vmem %s435_s11, 256  ;;  %s16660_s29 = smov [#allocation14]  }
  0xfb   : > { %p16517_p3 = scmp.ne.s32.totalorder %s435_s11, %s16516_s0  ;;  %s16521_s16 = sshll.u32 %s16660_s29, 4  ;;  %s16522_s16 = int_to_ptr.vmem [resolvable:$false] %s16521_s16 }
  0xfc   : > { %s16523_s27 = scalar_lea.vmem %s16522_s16, 512  ;;  %p16524_p8 = scmp.lt.s32.totalorder %s435_s11, %s16522_s16 }
  0xfd   : > { %p16519_p12 = pnand %p16517_p3, %p19876_p2  ;;  %p16525_p0 = scmp.lt.s32.totalorder %s16523_s27, %s16516_s0 }
  0xff   : > { %p16520_p1 = pneg %p16519_p12  ;;  %p16526_p10 = por %p16525_p0, %p16524_p8 }
 0x101   : > { %p16527_p5 = pnand %p16526_p10, %p16520_p1 }
 0x103   : > { %16530 = shalt.err (!%p16527_p5)
}
 0x104   : > { %p19881_p9 = scmp.ne.s32.totalorder %s19859_s26, 0  ;;  %s19882_s24 = scalar_lea.sflag [#allocation13], %s16753_s17 }
 0x105   : > { %s15358_s7 = sshll.u32 %s16643_s12, 5  ;;  %s466_s20 = scalar_lea.vmem [#allocation17], %s13674_s3 }
 0x106   : > { %15596 = dma.hbm_to_vmem [thread:$0]  (!%p19881_p9), %s17033_s5, 256, %s435_s11, %s19882_s24  }
 0x107   : > { %s474_s22 = sshll.u32 %s466_s20, 4  ;;  %s472_s25 = scalar_lea.hbm %s19827_s8, %s15358_s7  ;;  %s475_s22 = int_to_ptr.vmem [resolvable:$true] %s474_s22 }
 0x108   : > { %s16531_s15 = scalar_lea.hbm %s472_s25, 32  ;;  %s16536_s16 = scalar_lea.hbm %s19827_s8, 64 }
 0x109   : > { %p16532_p10 = scmp.ne.s32.totalorder %s472_s25, %s16531_s15  ;;  %p16537_p4 = scmp.lt.u32.totalorder %s472_s25, %s19827_s8 }
 0x10a   : > { %p16538_p6 = scmp.lt.u32.totalorder %s16536_s16, %s16531_s15  ;;  %p16540_p3 = scmp.lt.u32.totalorder %s16531_s15, %s472_s25 }
 0x10b   : > { %p16534_p11 = pnand %p16532_p10, %p19876_p2 }
 0x10c   : > { %p16539_p7 = por %p16538_p6, %p16537_p4 }
 0x10d   : > { %p16535_p13 = pneg %p16534_p11 }
 0x10e   : > { %p16541_p12 = por %p16540_p3, %p16539_p7 }
 0x110   : > { %p16542_p1 = pnand %p16541_p12, %p16535_p13 }
 0x112   : > { %16545 = shalt.err (!%p16542_p1)
}
 0x113   : > { %s16546_s18 = scalar_lea.vmem %s475_s22, 32  ;;  %s16661_s11 = smov [#allocation17]  }
 0x114   : > { %p16547_p8 = scmp.ne.s32.totalorder %s475_s22, %s16546_s18  ;;  %s16551_s3 = sshll.u32 %s16661_s11, 4  ;;  %s16552_s3 = int_to_ptr.vmem [resolvable:$false] %s16551_s3 }
 0x115   : > { %s16553_s24 = scalar_lea.vmem %s16552_s3, 64  ;;  %p16554_p10 = scmp.lt.s32.totalorder %s475_s22, %s16552_s3 }
 0x116   : > { %p16549_p0 = pnand %p16547_p8, %p19876_p2  ;;  %p16555_p11 = scmp.lt.s32.totalorder %s16553_s24, %s16546_s18 }
 0x118   : > { %p16550_p5 = pneg %p16549_p0  ;;  %p16556_p9 = por %p16555_p11, %p16554_p10 }
 0x11a   : > { %p16557_p4 = pnand %p16556_p9, %p16550_p5 }
 0x11c   : > { %16560 = shalt.err (!%p16557_p4)
}
 0x11d   : > { %p19883_p6 = scmp.ne.s32.totalorder %s19859_s26, 0  ;;  %s19884_s7 = scalar_lea.sflag [#allocation16], %s16753_s17 }
 0x11e   : > { %p19885_p13 = scmp.ne.s32.totalorder %s19871_s19, 0 }
 0x11f   : > { %15602 = dma.hbm_to_vmem [thread:$0]  (!%p19883_p6), %s472_s25, 32, %s475_s22, %s19884_s7  }
 0x120   : > { %483 = sbr.rel (%p19885_p13) target bundleno = 3096 (0xc18), region = 56  ;;  %p19886_p2 = scmp.eq.s32.totalorder (!%p19885_p13), %s16910_s28, 0 }
 0x127   : > { %16606 = dma.done.wait (%p19886_p2), [#allocation4], 512   ;;  %p19887_p7 = pmov %p19886_p2 }
 0x128   : > { %s489_s14 = sand.u32 1, %s16910_s28   ;;  %s17083_s20 = sand.u32 1, %s16635_s10  }
 0x129   : > { %16608 = vsyncadd (%p19887_p7), [#allocation4], 4294966784  ;;  %s13679_s26 = sshll.u32 %s17083_s20, 9  ;;  %s490_s21 = scalar_lea.sflag [#allocation7], %s489_s14 }
 0x12a   : > { %s17086_s17 = scalar_lea.vmem [#allocation6], %s13679_s26  ;;  %p19888_p9 = scmp.ne.s32.totalorder %s19866_s1, 0 }
 0x12c   : > { %16610 = dma.done.wait (%p19888_p9), %s490_s21, 8256  }
 0x12d   : > { %16612 = vsyncadd (%p19888_p9), %s490_s21, 4294959040  ;;  %s13680_s19 = sshll.u32 %s17083_s20, 2  ;;  %s13681_s22 = sshll.u32 %s17083_s20, 11 }
 0x12e   : > { %s17094_s13 = scalar_lea.vmem [#allocation8], %s13680_s19  ;;  %s508_s25 = scalar_lea.sflag [#allocation10], %s489_s14 }
 0x12f   : > { %s17096_s15 = scalar_lea.vmem [#allocation9], %s13681_s22 }
 0x130   : > { %16614 = dma.done.wait (%p19888_p9), %s508_s25, 32896  }
 0x131   : > { %16616 = vsyncadd (%p19888_p9), %s508_s25, 4294934400  ;;  %s13682_s0 = sshll.u32 %s17083_s20, 3  ;;  %s13683_s29 = sshll.u32 %s17083_s20, 13 }
 0x132   : > { %s17104_s16 = scalar_lea.vmem [#allocation11], %s13682_s0  ;;  %s526_s27 = scalar_lea.sflag [#allocation13], %s489_s14 }
 0x133   : > { %s17106_s5 = scalar_lea.vmem [#allocation12], %s13683_s29 }
 0x134   : > { %16618 = dma.done.wait (%p19888_p9), %s526_s27, 131328  }
 0x135   : > { %16620 = vsyncadd (%p19888_p9), %s526_s27, 4294835968  ;;  %s13684_s18 = sshll.u32 %s17083_s20, 4  ;;  %s544_s3 = scalar_lea.sflag [#allocation16], %s489_s14 }
 0x136   : > { %s17113_s11 = scalar_lea.vmem [#allocation14], %s13684_s18  ;;  %s17115_s24 = scalar_lea.vmem [#allocation15], %s13681_s22 }
 0x137   : > { %16622 = dma.done.wait (%p19888_p9), %s544_s3, 32800  }
 0x138   : > { %16624 = vsyncadd (%p19888_p9), %s544_s3, 4294934496  ;;  %s13686_s7 = sshll.u32 %s17083_s20, 1  ;;  %s13687_s26 = sshll.u32 %s17083_s20, 5 }
 0x139   : > { %s17123_s21 = scalar_lea.vmem [#allocation17], %s13686_s7  ;;  %s17125_s19 = scalar_lea.vmem [#allocation18], %s13687_s26 }
 0x13a   : > { %p19889_p3 = scmp.ne.s32.totalorder %s16910_s28, 0 }
 0x13b   : > { %v630_v0 = vld [vmem:[#allocation3] sm:$0xff] (!%p19889_p3)  ;;  %v631_v1 = vld [vmem:[#allocation3 + $0x8] sm:$0xff] (!%p19889_p3)  ;;  %v632_v2 = vld [vmem:[#allocation3 + $0x10] sm:$0xff] (!%p19889_p3) }
 0x13c   : > { %629 = sbr.rel (%p19889_p3) target bundleno = 323 (0x143), region = 96  ;;  %634 = vst [vmem:[#allocation2] sm:$0xff] (!%p19889_p3), %v630_v0  ;;  %635 = vst [vmem:[#allocation2 + $0x8] sm:$0xff] (!%p19889_p3), %v631_v1  ;;  %v633_v3 = vld [vmem:[#allocation3 + $0x18] sm:$0xff] (!%p19889_p3) }
 0x13d   : > { %636 = vst [vmem:[#allocation2 + $0x10] sm:$0xff] (!%p19889_p3), %v632_v2  ;;  %637 = vst [vmem:[#allocation2 + $0x18] sm:$0xff] (!%p19889_p3), %v633_v3 }
 0x143 PF: > { %v15654_v4 = vld [vmem:[%s17086_s17 + $0x4] ss:$16 sps:$4 sm:$0xff]   ;;  %v15656_v5 = vld [vmem:[%s17086_s17] ss:$16 sps:$4 sm:$0xff]   ;;  %v639_v17 = vld [vmem:[#allocation2 + $0x8] sm:$0xff]  ;;  %s13392_s1 = sadd.s32 1, %s16910_s28 }
 0x144   : > { %1050 = vmatprep.subr.bf16.mxu1 %v15654_v4  ;;  %v15657_v6 = vld [vmem:[%s17086_s17 + $0x24] ss:$16 sps:$4 sm:$0xff]   ;;  %v15659_v7 = vld [vmem:[%s17086_s17 + $0x20] ss:$16 sps:$4 sm:$0xff]   ;;  %v641_v18 = vld [vmem:[#allocation2 + $0x18] sm:$0xff]  ;;  %p15345_p12 = scmp.ge.s32.totalorder %s13392_s1, 2 }
 0x145   : > { %1051 = vmatpush1.bf16.msra.mxu1 %v15656_v5  ;;  %v15660_v8 = vld [vmem:[%s17086_s17 + $0x44] ss:$16 sps:$4 sm:$0xff]   ;;  %v15662_v9 = vld [vmem:[%s17086_s17 + $0x40] ss:$16 sps:$4 sm:$0xff]   ;;  %v643_v19 = vpack.c.bf16 %v641_v18, %v639_v17  ;;  %v15704_v41 = vld [vmem:[%s17086_s17 + $0xc] ss:$16 sps:$4 sm:$0xff]  }
 0x146   : > { %1052 = vmatprep.subr.bf16.mxu1 %v15657_v6  ;;  %v15663_v10 = vld [vmem:[%s17086_s17 + $0x64] ss:$16 sps:$4 sm:$0xff]   ;;  %v15665_v11 = vld [vmem:[%s17086_s17 + $0x60] ss:$16 sps:$4 sm:$0xff]   ;;  %v15702_v42 = vld [vmem:[%s17086_s17 + $0x8] ss:$16 sps:$4 sm:$0xff]  }
 0x147   : > { %v15666_v12 = vld [vmem:[%s17086_s17 + $0x84] ss:$16 sps:$4 sm:$0xff]   ;;  %v15668_v13 = vld [vmem:[%s17086_s17 + $0x80] ss:$16 sps:$4 sm:$0xff]   ;;  %1082 = vmatprep.mubr.bf16.mxu1 %v643_v19  ;;  %v15707_v44 = vld [vmem:[%s17086_s17 + $0x2c] ss:$16 sps:$4 sm:$0xff]  }
 0x148   : > { %v15669_v14 = vld [vmem:[%s17086_s17 + $0xa4] ss:$16 sps:$4 sm:$0xff]   ;;  %v15671_v15 = vld [vmem:[%s17086_s17 + $0xa0] ss:$16 sps:$4 sm:$0xff]   ;;  %v15705_v45 = vld [vmem:[%s17086_s17 + $0x28] ss:$16 sps:$4 sm:$0xff]  }
 0x149   : > { %1053 = vmatpush1.bf16.msra.mxu1 %v15659_v7  ;;  %v15672_v16 = vld [vmem:[%s17086_s17 + $0xc4] ss:$16 sps:$4 sm:$0xff]   ;;  %v15674_v20 = vld [vmem:[%s17086_s17 + $0xc0] ss:$16 sps:$4 sm:$0xff]   ;;  %v15710_v46 = vld [vmem:[%s17086_s17 + $0x4c] ss:$16 sps:$4 sm:$0xff]  }
 0x14a   : > { %1054 = vmatprep.subr.bf16.mxu1 %v15660_v8  ;;  %v15675_v21 = vld [vmem:[%s17086_s17 + $0xe4] ss:$16 sps:$4 sm:$0xff]   ;;  %v15677_v22 = vld [vmem:[%s17086_s17 + $0xe0] ss:$16 sps:$4 sm:$0xff]   ;;  %v15708_v47 = vld [vmem:[%s17086_s17 + $0x48] ss:$16 sps:$4 sm:$0xff]  }
 0x14b   : > { %v15678_v23 = vld [vmem:[%s17086_s17 + $0x104] ss:$16 sps:$4 sm:$0xff]   ;;  %v15680_v24 = vld [vmem:[%s17086_s17 + $0x100] ss:$16 sps:$4 sm:$0xff]   ;;  %v15713_v48 = vld [vmem:[%s17086_s17 + $0x6c] ss:$16 sps:$4 sm:$0xff]  }
 0x14c   : > { %v15681_v25 = vld [vmem:[%s17086_s17 + $0x124] ss:$16 sps:$4 sm:$0xff]   ;;  %v15683_v26 = vld [vmem:[%s17086_s17 + $0x120] ss:$16 sps:$4 sm:$0xff]   ;;  %v15711_v49 = vld [vmem:[%s17086_s17 + $0x68] ss:$16 sps:$4 sm:$0xff]  }
 0x14d   : > { %1055 = vmatpush1.bf16.msra.mxu1 %v15662_v9  ;;  %v15684_v27 = vld [vmem:[%s17086_s17 + $0x144] ss:$16 sps:$4 sm:$0xff]   ;;  %v15686_v28 = vld [vmem:[%s17086_s17 + $0x140] ss:$16 sps:$4 sm:$0xff]   ;;  %v15716_v50 = vld [vmem:[%s17086_s17 + $0x8c] ss:$16 sps:$4 sm:$0xff]  }
 0x14e   : > { %1056 = vmatprep.subr.bf16.mxu1 %v15663_v10  ;;  %v15687_v29 = vld [vmem:[%s17086_s17 + $0x164] ss:$16 sps:$4 sm:$0xff]   ;;  %v15689_v30 = vld [vmem:[%s17086_s17 + $0x160] ss:$16 sps:$4 sm:$0xff]   ;;  %v15714_v51 = vld [vmem:[%s17086_s17 + $0x88] ss:$16 sps:$4 sm:$0xff]  }
 0x14f   : > { %v15690_v31 = vld [vmem:[%s17086_s17 + $0x184] ss:$16 sps:$4 sm:$0xff]   ;;  %v15692_v32 = vld [vmem:[%s17086_s17 + $0x180] ss:$16 sps:$4 sm:$0xff]   ;;  %v15719_v52 = vld [vmem:[%s17086_s17 + $0xac] ss:$16 sps:$4 sm:$0xff]  }
 0x150   : > { %v15693_v33 = vld [vmem:[%s17086_s17 + $0x1a4] ss:$16 sps:$4 sm:$0xff]   ;;  %v15695_v34 = vld [vmem:[%s17086_s17 + $0x1a0] ss:$16 sps:$4 sm:$0xff]   ;;  %v15717_v53 = vld [vmem:[%s17086_s17 + $0xa8] ss:$16 sps:$4 sm:$0xff]  }
 0x151   : > { %1057 = vmatpush1.bf16.msra.mxu1 %v15665_v11  ;;  %v15696_v35 = vld [vmem:[%s17086_s17 + $0x1c4] ss:$16 sps:$4 sm:$0xff]   ;;  %v15698_v36 = vld [vmem:[%s17086_s17 + $0x1c0] ss:$16 sps:$4 sm:$0xff]   ;;  %v15722_v54 = vld [vmem:[%s17086_s17 + $0xcc] ss:$16 sps:$4 sm:$0xff]  }
 0x152   : > { %1058 = vmatprep.subr.bf16.mxu1 %v15666_v12  ;;  %v15699_v37 = vld [vmem:[%s17086_s17 + $0x1e4] ss:$16 sps:$4 sm:$0xff]   ;;  %v15701_v38 = vld [vmem:[%s17086_s17 + $0x1e0] ss:$16 sps:$4 sm:$0xff]   ;;  %v15720_v55 = vld [vmem:[%s17086_s17 + $0xc8] ss:$16 sps:$4 sm:$0xff]  }
 0x153   : > { %v638_v39 = vld [vmem:[#allocation2] sm:$0xff]  ;;  %v640_v40 = vld [vmem:[#allocation2 + $0x10] sm:$0xff]  ;;  %v15725_v56 = vld [vmem:[%s17086_s17 + $0xec] ss:$16 sps:$4 sm:$0xff]  }
 0x154   : > { %v17163_v43 = vpack.c.bf16 %v640_v40, %v638_v39  ;;  %v15723_v57 = vld [vmem:[%s17086_s17 + $0xe8] ss:$16 sps:$4 sm:$0xff]   ;;  %v15728_v58 = vld [vmem:[%s17086_s17 + $0x10c] ss:$16 sps:$4 sm:$0xff]  }
 0x155   : > { %1059 = vmatpush1.bf16.msra.mxu1 %v15668_v13  ;;  %v15726_v59 = vld [vmem:[%s17086_s17 + $0x108] ss:$16 sps:$4 sm:$0xff]   ;;  %v15731_v60 = vld [vmem:[%s17086_s17 + $0x12c] ss:$16 sps:$4 sm:$0xff]  }
 0x156   : > { %1060 = vmatprep.subr.bf16.mxu1 %v15669_v14  ;;  %v15729_v61 = vld [vmem:[%s17086_s17 + $0x128] ss:$16 sps:$4 sm:$0xff]   ;;  %v15734_v62 = vld [vmem:[%s17086_s17 + $0x14c] ss:$16 sps:$4 sm:$0xff]  }
 0x157   : > { %v15732_v63 = vld [vmem:[%s17086_s17 + $0x148] ss:$16 sps:$4 sm:$0xff]   ;;  %v15737_v0 = vld [vmem:[%s17086_s17 + $0x16c] ss:$16 sps:$4 sm:$0xff]  }
 0x158   : > { %v15735_v1 = vld [vmem:[%s17086_s17 + $0x168] ss:$16 sps:$4 sm:$0xff]   ;;  %v15740_v2 = vld [vmem:[%s17086_s17 + $0x18c] ss:$16 sps:$4 sm:$0xff]  }
 0x159   : > { %1061 = vmatpush1.bf16.msra.mxu1 %v15671_v15  ;;  %v15738_v3 = vld [vmem:[%s17086_s17 + $0x188] ss:$16 sps:$4 sm:$0xff]   ;;  %v15743_v4 = vld [vmem:[%s17086_s17 + $0x1ac] ss:$16 sps:$4 sm:$0xff]  }
 0x15a   : > { %1062 = vmatprep.subr.bf16.mxu1 %v15672_v16  ;;  %v15741_v5 = vld [vmem:[%s17086_s17 + $0x1a8] ss:$16 sps:$4 sm:$0xff]   ;;  %v15746_v6 = vld [vmem:[%s17086_s17 + $0x1cc] ss:$16 sps:$4 sm:$0xff]  }
 0x15b   : > { %v15744_v7 = vld [vmem:[%s17086_s17 + $0x1c8] ss:$16 sps:$4 sm:$0xff]   ;;  %v15749_v8 = vld [vmem:[%s17086_s17 + $0x1ec] ss:$16 sps:$4 sm:$0xff]  }
 0x15c   : > { %v1196_v9 = vld [vmem:[%s17096_s15] sm:$0xff] }
 0x15d   : > { %1063 = vmatpush1.bf16.msra.mxu1 %v15674_v20  ;;  %v1200_v10 = vld [vmem:[%s17096_s15 + $0x20] sm:$0xff] }
 0x15e   : > { %1064 = vmatprep.subr.bf16.mxu1 %v15675_v21  ;;  %v15747_v11 = vld [vmem:[%s17086_s17 + $0x1e8] ss:$16 sps:$4 sm:$0xff]   ;;  %v13762_v14 = vcombine.high %v1196_v9, %v1200_v10  ;;  %v13761_v15 = vcombine.low %v1196_v9, %v1200_v10 }
 0x15f   : > { %v1204_v12 = vld [vmem:[%s17096_s15 + $0x40] sm:$0xff] }
 0x160   : > { %v1208_v13 = vld [vmem:[%s17096_s15 + $0x60] sm:$0xff] }
 0x161   : > { %1065 = vmatpush1.bf16.msra.mxu1 %v15677_v22  ;;  %v1212_v16 = vld [vmem:[%s17096_s15 + $0x80] sm:$0xff]  ;;  %v13770_v18 = vcombine.high %v1204_v12, %v1208_v13 }
 0x162   : > { %1066 = vmatprep.subr.bf16.mxu1 %v15678_v23  ;;  %v1216_v17 = vld [vmem:[%s17096_s15 + $0xa0] sm:$0xff] }
 0x163   : > { %v1220_v20 = vld [vmem:[%s17096_s15 + $0xc0] sm:$0xff]  ;;  %v13778_v22 = vcombine.high %v1212_v16, %v1216_v17  ;;  %v13777_v23 = vcombine.low %v1212_v16, %v1216_v17 }
 0x164   : > { %v1224_v21 = vld [vmem:[%s17096_s15 + $0xe0] sm:$0xff] }
 0x165   : > { %1067 = vmatpush1.bf16.msra.mxu1 %v15680_v24  ;;  %v13786_v24 = vcombine.high %v1220_v20, %v1224_v21 }
 0x166   : > { %1068 = vmatprep.subr.bf16.mxu1 %v15681_v25  ;;  %v1228_v25 = vld [vmem:[%s17096_s15 + $0x100] sm:$0xff] }
 0x169   : > { %1069 = vmatpush1.bf16.msra.mxu1 %v15683_v26  ;;  %v1232_v26 = vld [vmem:[%s17096_s15 + $0x120] sm:$0xff] }
 0x16a   : > { %1070 = vmatprep.subr.bf16.mxu1 %v15684_v27  ;;  %v13785_v27 = vcombine.low %v1220_v20, %v1224_v21  ;;  %v1342_v20 = vld [vmem:[%s17096_s15 + $0x490] sm:$0xff] }
 0x16b   : > { %v1346_v21 = vld [vmem:[%s17096_s15 + $0x4b0] sm:$0xff] }
 0x16d   : > { %1071 = vmatpush1.bf16.msra.mxu1 %v15686_v28  ;;  %v13794_v28 = vcombine.high %v1228_v25, %v1232_v26 }
 0x16e   : > { %1072 = vmatprep.subr.bf16.mxu1 %v15687_v29  ;;  %v1236_v29 = vld [vmem:[%s17096_s15 + $0x140] sm:$0xff] }
 0x171   : > { %1073 = vmatpush1.bf16.msra.mxu1 %v15689_v30  ;;  %v1240_v30 = vld [vmem:[%s17096_s15 + $0x160] sm:$0xff] }
 0x172   : > { %1074 = vmatprep.subr.bf16.mxu1 %v15690_v31  ;;  %v13793_v31 = vcombine.low %v1228_v25, %v1232_v26  ;;  %v1350_v26 = vld [vmem:[%s17096_s15 + $0x4d0] sm:$0xff] }
 0x175   : > { %1075 = vmatpush1.bf16.msra.mxu1 %v15692_v32  ;;  %v13802_v32 = vcombine.high %v1236_v29, %v1240_v30 }
 0x176   : > { %1076 = vmatprep.subr.bf16.mxu1 %v15693_v33  ;;  %v1244_v33 = vld [vmem:[%s17096_s15 + $0x180] sm:$0xff] }
 0x179   : > { %1077 = vmatpush1.bf16.msra.mxu1 %v15695_v34  ;;  %v1248_v34 = vld [vmem:[%s17096_s15 + $0x1a0] sm:$0xff] }
 0x17a   : > { %1078 = vmatprep.subr.bf16.mxu1 %v15696_v35  ;;  %v13801_v35 = vcombine.low %v1236_v29, %v1240_v30  ;;  %v13809_v39 = vcombine.low %v1244_v33, %v1248_v34  ;;  %v1358_v30 = vld [vmem:[%s17096_s15 + $0x510] sm:$0xff] }
 0x17d   : > { %1079 = vmatpush1.bf16.msra.mxu1 %v15698_v36  ;;  %v13810_v36 = vcombine.high %v1244_v33, %v1248_v34  ;;  %v1366_v34 = vld [vmem:[%s17096_s15 + $0x550] sm:$0xff] }
 0x17e   : > { %1080 = vmatprep.subr.bf16.mxu1 %v15699_v37  ;;  %v1252_v37 = vld [vmem:[%s17096_s15 + $0x1c0] sm:$0xff] }
 0x181   : > { %1081 = vmatpush1.bf16.msra.mxu1 %v15701_v38  ;;  %v1256_v38 = vld [vmem:[%s17096_s15 + $0x1e0] sm:$0xff] }
 0x182   : > { %1093 = vmatprep.subr.bf16.mxu1 %v15704_v41  ;;  %v13818_v40 = vcombine.high %v1252_v37, %v1256_v38  ;;  %v1260_v41 = vld [vmem:[%s17096_s15 + $0x200] sm:$0xff] }
 0x184   : > { %1083 = vmatmul.mubr.bf16.vlgmr.msra.gmra.mrb[0].mxu1 %v17163_v43 }
 0x185   : > { %1094 = vmatpush1.bf16.msra.mxu1 %v15702_v42  ;;  %1125 = vmatprep.mubr.bf16.mxu1 %v643_v19  ;;  %v13769_v19 = vcombine.low %v1204_v12, %v1208_v13  ;;  %v1264_v42 = vld [vmem:[%s17096_s15 + $0x220] sm:$0xff]  ;;  %v1334_v12 = vld [vmem:[%s17096_s15 + $0x450] sm:$0xff] }
 0x186   : > { %1095 = vmatprep.subr.bf16.mxu1 %v15707_v44  ;;  %v13826_v44 = vcombine.high %v1260_v41, %v1264_v42  ;;  %v1338_v13 = vld [vmem:[%s17096_s15 + $0x470] sm:$0xff] }
 0x187   : > { %v13902_v16 = vcombine.high %v1334_v12, %v1338_v13  ;;  %v13901_v17 = vcombine.low %v1334_v12, %v1338_v13  ;;  %v1446_v13 = vld [vmem:[%s17096_s15 + $0x7d0] sm:$0xff] }
 0x189   : > { %1096 = vmatpush1.bf16.msra.mxu1 %v15705_v45  ;;  %v1268_v45 = vld [vmem:[%s17096_s15 + $0x240] sm:$0xff] }
 0x18a   : > { %1097 = vmatprep.subr.bf16.mxu1 %v15710_v46  ;;  %v1272_v46 = vld [vmem:[%s17096_s15 + $0x260] sm:$0xff] }
 0x18d   : > { %1098 = vmatpush1.bf16.msra.mxu1 %v15708_v47  ;;  %v13825_v47 = vcombine.low %v1260_v41, %v1264_v42  ;;  %v1382_v42 = vld [vmem:[%s17096_s15 + $0x5d0] sm:$0xff] }
 0x18e   : > { %1099 = vmatprep.subr.bf16.mxu1 %v15713_v48  ;;  %v13834_v48 = vcombine.high %v1268_v45, %v1272_v46 }
 0x191   : > { %1100 = vmatpush1.bf16.msra.mxu1 %v15711_v49  ;;  %v1276_v49 = vld [vmem:[%s17096_s15 + $0x280] sm:$0xff] }
 0x192   : > { %1101 = vmatprep.subr.bf16.mxu1 %v15716_v50  ;;  %v1280_v50 = vld [vmem:[%s17096_s15 + $0x2a0] sm:$0xff] }
 0x195   : > { %1102 = vmatpush1.bf16.msra.mxu1 %v15714_v51  ;;  %v13833_v51 = vcombine.low %v1268_v45, %v1272_v46  ;;  %v1390_v46 = vld [vmem:[%s17096_s15 + $0x610] sm:$0xff] }
 0x196   : > { %1103 = vmatprep.subr.bf16.mxu1 %v15719_v52  ;;  %v13842_v52 = vcombine.high %v1276_v49, %v1280_v50 }
 0x199   : > { %1104 = vmatpush1.bf16.msra.mxu1 %v15717_v53  ;;  %v1284_v53 = vld [vmem:[%s17096_s15 + $0x2c0] sm:$0xff] }
 0x19a   : > { %1105 = vmatprep.subr.bf16.mxu1 %v15722_v54  ;;  %v1288_v54 = vld [vmem:[%s17096_s15 + $0x2e0] sm:$0xff] }
 0x19d   : > { %1106 = vmatpush1.bf16.msra.mxu1 %v15720_v55  ;;  %v13841_v55 = vcombine.low %v1276_v49, %v1280_v50  ;;  %v1398_v50 = vld [vmem:[%s17096_s15 + $0x650] sm:$0xff] }
 0x19e   : > { %1107 = vmatprep.subr.bf16.mxu1 %v15725_v56  ;;  %v13850_v56 = vcombine.high %v1284_v53, %v1288_v54 }
 0x1a1   : > { %1108 = vmatpush1.bf16.msra.mxu1 %v15723_v57  ;;  %v1292_v57 = vld [vmem:[%s17096_s15 + $0x300] sm:$0xff] }
 0x1a2   : > { %1109 = vmatprep.subr.bf16.mxu1 %v15728_v58  ;;  %v1296_v58 = vld [vmem:[%s17096_s15 + $0x320] sm:$0xff] }
 0x1a5   : > { %1110 = vmatpush1.bf16.msra.mxu1 %v15726_v59  ;;  %v13849_v59 = vcombine.low %v1284_v53, %v1288_v54  ;;  %v1406_v54 = vld [vmem:[%s17096_s15 + $0x690] sm:$0xff] }
 0x1a6   : > { %1111 = vmatprep.subr.bf16.mxu1 %v15731_v60  ;;  %v13858_v60 = vcombine.high %v1292_v57, %v1296_v58 }
 0x1a9   : > { %1112 = vmatpush1.bf16.msra.mxu1 %v15729_v61  ;;  %v1300_v61 = vld [vmem:[%s17096_s15 + $0x340] sm:$0xff] }
 0x1aa   : > { %1113 = vmatprep.subr.bf16.mxu1 %v15734_v62  ;;  %v1304_v62 = vld [vmem:[%s17096_s15 + $0x360] sm:$0xff] }
 0x1ab   : > { %v13865_v10 = vcombine.low %v1300_v61, %v1304_v62 }
 0x1ad   : > { %1114 = vmatpush1.bf16.msra.mxu1 %v15732_v63  ;;  %v17226_v63 = vld [vmem:[%s17096_s15 + $0x400] sm:$0xff] }
 0x1ae   : > { %1115 = vmatprep.subr.bf16.mxu1 %v15737_v0  ;;  %v17229_v0 = vld [vmem:[%s17096_s15 + $0x420] sm:$0xff] }
 0x1af   : > { %v13890_v25 = vcombine.high %v17226_v63, %v17229_v0 }
 0x1b1   : > { %1116 = vmatpush1.bf16.msra.mxu1 %v15735_v1  ;;  %v13857_v1 = vcombine.low %v1292_v57, %v1296_v58  ;;  %v1414_v58 = vld [vmem:[%s17096_s15 + $0x6d0] sm:$0xff] }
 0x1b2   : > { %1117 = vmatprep.subr.bf16.mxu1 %v15740_v2  ;;  %v13866_v2 = vcombine.high %v1300_v61, %v1304_v62  ;;  %v1422_v62 = vld [vmem:[%s17096_s15 + $0x710] sm:$0xff] }
 0x1b5   : > { %1118 = vmatpush1.bf16.msra.mxu1 %v15738_v3  ;;  %v13889_v3 = vcombine.low %v17226_v63, %v17229_v0  ;;  %v1364_v0 = vld [vmem:[%s17096_s15 + $0x540] sm:$0xff] }
 0x1b6   : > { %1119 = vmatprep.subr.bf16.mxu1 %v15743_v4  ;;  %v1326_v4 = vld [vmem:[%s17096_s15 + $0x410] sm:$0xff] }
 0x1b9   : > { %1120 = vmatpush1.bf16.msra.mxu1 %v15741_v5  ;;  %v1330_v5 = vld [vmem:[%s17096_s15 + $0x430] sm:$0xff] }
 0x1ba   : > { %1121 = vmatprep.subr.bf16.mxu1 %v15746_v6  ;;  %v1308_v6 = vld [vmem:[%s17096_s15 + $0x380] sm:$0xff]  ;;  %v13893_v9 = vcombine.low %v1326_v4, %v1330_v5 }
 0x1bd   : > { %1122 = vmatpush1.bf16.msra.mxu1 %v15744_v7  ;;  %v1312_v7 = vld [vmem:[%s17096_s15 + $0x3a0] sm:$0xff] }
 0x1be   : > { %1123 = vmatprep.subr.bf16.mxu1 %v15749_v8  ;;  %v13894_v8 = vcombine.high %v1326_v4, %v1330_v5  ;;  %v1430_v5 = vld [vmem:[%s17096_s15 + $0x750] sm:$0xff] }
 0x1c0   : > { %2989 = vmatprep.subr.bf16.mxu0 %v13894_v8 }
 0x1c1   : > { %1124 = vmatpush1.bf16.msra.mxu1 %v15747_v11  ;;  %v13874_v11 = vcombine.high %v1308_v6, %v1312_v7  ;;  %2990 = vmatpush1.bf16.msra.mxu0 %v13893_v9  ;;  %v1438_v9 = vld [vmem:[%s17096_s15 + $0x790] sm:$0xff] }
 0x1c2   : > { %2774 = vmatprep.subr.bf16.mxu1 %v13762_v14  ;;  %v1316_v14 = vld [vmem:[%s17096_s15 + $0x3c0] sm:$0xff]  ;;  %2991 = vmatprep.subr.bf16.mxu0 %v13902_v16 }
 0x1c4   : > { %1126 = vmatmul.mubr.bf16.vlgmr.msra.gmra.mrb[4].mxu1 %v17163_v43  ;;  %v13817_v43 = vcombine.low %v1252_v37, %v1256_v38  ;;  %v1374_v38 = vld [vmem:[%s17096_s15 + $0x590] sm:$0xff] }
 0x1c5   : > { %2775 = vmatpush1.bf16.msra.mxu1 %v13761_v15  ;;  %v1320_v15 = vld [vmem:[%s17096_s15 + $0x3e0] sm:$0xff]  ;;  %2992 = vmatpush1.bf16.msra.mxu0 %v13901_v17  ;;  %v710_v17 = vlaneseq }
 0x1c6   : > { %2776 = vmatprep.subr.bf16.mxu1 %v13770_v18  ;;  %v13873_v18 = vcombine.low %v1308_v6, %v1312_v7  ;;  %v1434_v6 = vld [vmem:[%s17096_s15 + $0x770] sm:$0xff] }
 0x1c7   : > { %v13998_v7 = vcombine.high %v1430_v5, %v1434_v6  ;;  %v13997_v8 = vcombine.low %v1430_v5, %v1434_v6  ;;  %v1352_v5 = vld [vmem:[%s17096_s15 + $0x4e0] sm:$0xff] }
 0x1c9   : > { %2777 = vmatpush1.bf16.msra.mxu1 %v13769_v19  ;;  %v13882_v19 = vcombine.high %v1316_v14, %v1320_v15 }
 0x1ca   : > { %2778 = vmatprep.subr.bf16.mxu1 %v13778_v22  ;;  %v13910_v22 = vcombine.high %v1342_v20, %v1346_v21 }
 0x1cc   : > { %2993 = vmatprep.subr.bf16.mxu0 %v13910_v22 }
 0x1cd   : > { %2779 = vmatpush1.bf16.msra.mxu1 %v13777_v23  ;;  %v13909_v23 = vcombine.low %v1342_v20, %v1346_v21  ;;  %v17277_v20 = vld [vmem:[%s17094_s13] sm:$0xf] }
 0x1ce   : > { %2780 = vmatprep.subr.bf16.mxu1 %v13786_v24  ;;  %v13881_v24 = vcombine.low %v1316_v14, %v1320_v15  ;;  %v1450_v14 = vld [vmem:[%s17096_s15 + $0x7f0] sm:$0xff] }
 0x1cf   : > { %2994 = vmatpush1.bf16.msra.mxu0 %v13909_v23  ;;  %v14014_v15 = vcombine.high %v1446_v13, %v1450_v14  ;;  %v14013_v16 = vcombine.low %v1446_v13, %v1450_v14  ;;  %v1372_v13 = vld [vmem:[%s17096_s15 + $0x580] sm:$0xff] }
 0x1d0   : > { %v1376_v14 = vld [vmem:[%s17096_s15 + $0x5a0] sm:$0xff] }
 0x1d1   : > { %2781 = vmatpush1.bf16.msra.mxu1 %v13785_v27  ;;  %v1354_v27 = vld [vmem:[%s17096_s15 + $0x4f0] sm:$0xff] }
 0x1d2   : > { %2782 = vmatprep.subr.bf16.mxu1 %v13794_v28  ;;  %v13918_v28 = vcombine.high %v1350_v26, %v1354_v27  ;;  %v13917_v29 = vcombine.low %v1350_v26, %v1354_v27 }
 0x1d4   : > { %2995 = vmatprep.subr.bf16.mxu0 %v13918_v28 }
 0x1d5   : > { %2783 = vmatpush1.bf16.msra.mxu1 %v13793_v31  ;;  %2996 = vmatpush1.bf16.msra.mxu0 %v13917_v29  ;;  %v1362_v31 = vld [vmem:[%s17096_s15 + $0x530] sm:$0xff] }
 0x1d6   : > { %2784 = vmatprep.subr.bf16.mxu1 %v13802_v32  ;;  %v13926_v32 = vcombine.high %v1358_v30, %v1362_v31  ;;  %v13925_v33 = vcombine.low %v1358_v30, %v1362_v31 }
 0x1d8   : > { %2997 = vmatprep.subr.bf16.mxu0 %v13926_v32 }
 0x1d9   : > { %2785 = vmatpush1.bf16.msra.mxu1 %v13801_v35  ;;  %2998 = vmatpush1.bf16.msra.mxu0 %v13925_v33  ;;  %v1370_v35 = vld [vmem:[%s17096_s15 + $0x570] sm:$0xff] }
 0x1da   : > { %2786 = vmatprep.subr.bf16.mxu1 %v13810_v36  ;;  %v13934_v36 = vcombine.high %v1366_v34, %v1370_v35  ;;  %v13933_v37 = vcombine.low %v1366_v34, %v1370_v35 }
 0x1dc   : > { %2999 = vmatprep.subr.bf16.mxu0 %v13934_v36 }
 0x1dd   : > { %2787 = vmatpush1.bf16.msra.mxu1 %v13809_v39  ;;  %3000 = vmatpush1.bf16.msra.mxu0 %v13933_v37  ;;  %v1378_v39 = vld [vmem:[%s17096_s15 + $0x5b0] sm:$0xff] }
 0x1de   : > { %2788 = vmatprep.subr.bf16.mxu1 %v13818_v40  ;;  %v13942_v40 = vcombine.high %v1374_v38, %v1378_v39  ;;  %v13941_v41 = vcombine.low %v1374_v38, %v1378_v39 }
 0x1e0   : > { %3001 = vmatprep.subr.bf16.mxu0 %v13942_v40 }
 0x1e1   : > { %2789 = vmatpush1.bf16.msra.mxu1 %v13817_v43  ;;  %3002 = vmatpush1.bf16.msra.mxu0 %v13941_v41  ;;  %v1386_v43 = vld [vmem:[%s17096_s15 + $0x5f0] sm:$0xff] }
 0x1e2   : > { %2790 = vmatprep.subr.bf16.mxu1 %v13826_v44  ;;  %v13950_v44 = vcombine.high %v1382_v42, %v1386_v43  ;;  %v13949_v45 = vcombine.low %v1382_v42, %v1386_v43 }
 0x1e4   : > { %3003 = vmatprep.subr.bf16.mxu0 %v13950_v44 }
 0x1e5   : > { %2791 = vmatpush1.bf16.msra.mxu1 %v13825_v47  ;;  %3004 = vmatpush1.bf16.msra.mxu0 %v13949_v45  ;;  %v1394_v47 = vld [vmem:[%s17096_s15 + $0x630] sm:$0xff] }
 0x1e6   : > { %2792 = vmatprep.subr.bf16.mxu1 %v13834_v48  ;;  %v13958_v48 = vcombine.high %v1390_v46, %v1394_v47  ;;  %v13957_v49 = vcombine.low %v1390_v46, %v1394_v47 }
 0x1e8   : > { %3005 = vmatprep.subr.bf16.mxu0 %v13958_v48 }
 0x1e9   : > { %2793 = vmatpush1.bf16.msra.mxu1 %v13833_v51  ;;  %3006 = vmatpush1.bf16.msra.mxu0 %v13957_v49  ;;  %v1402_v51 = vld [vmem:[%s17096_s15 + $0x670] sm:$0xff] }
 0x1ea   : > { %2794 = vmatprep.subr.bf16.mxu1 %v13842_v52  ;;  %v13966_v52 = vcombine.high %v1398_v50, %v1402_v51  ;;  %v13965_v53 = vcombine.low %v1398_v50, %v1402_v51 }
 0x1ec   : > { %3007 = vmatprep.subr.bf16.mxu0 %v13966_v52 }
 0x1ed   : > { %2795 = vmatpush1.bf16.msra.mxu1 %v13841_v55  ;;  %3008 = vmatpush1.bf16.msra.mxu0 %v13965_v53  ;;  %v1410_v55 = vld [vmem:[%s17096_s15 + $0x6b0] sm:$0xff] }
 0x1ee   : > { %2796 = vmatprep.subr.bf16.mxu1 %v13850_v56  ;;  %v13974_v56 = vcombine.high %v1406_v54, %v1410_v55  ;;  %v13973_v57 = vcombine.low %v1406_v54, %v1410_v55 }
 0x1f0   : > { %3009 = vmatprep.subr.bf16.mxu0 %v13974_v56  ;;  %v1332_v56 = vld [vmem:[%s17096_s15 + $0x440] sm:$0xff] }
 0x1f1   : > { %2797 = vmatpush1.bf16.msra.mxu1 %v13849_v59  ;;  %3010 = vmatpush1.bf16.msra.mxu0 %v13973_v57  ;;  %v1418_v59 = vld [vmem:[%s17096_s15 + $0x6f0] sm:$0xff]  ;;  %v1336_v57 = vld [vmem:[%s17096_s15 + $0x460] sm:$0xff] }
 0x1f2   : > { %2798 = vmatprep.subr.bf16.mxu1 %v13858_v60  ;;  %v13982_v60 = vcombine.high %v1414_v58, %v1418_v59  ;;  %v13981_v61 = vcombine.low %v1414_v58, %v1418_v59 }
 0x1f4   : > { %3011 = vmatprep.subr.bf16.mxu0 %v13982_v60  ;;  %v13898_v60 = vcombine.high %v1332_v56, %v1336_v57 }
 0x1f5   : > { %2799 = vmatpush1.bf16.msra.mxu1 %v13857_v1  ;;  %3012 = vmatpush1.bf16.msra.mxu0 %v13981_v61  ;;  %v1426_v1 = vld [vmem:[%s17096_s15 + $0x730] sm:$0xff]  ;;  %v1340_v61 = vld [vmem:[%s17096_s15 + $0x480] sm:$0xff] }
 0x1f6   : > { %2800 = vmatprep.subr.bf16.mxu1 %v13866_v2  ;;  %v13990_v2 = vcombine.high %v1422_v62, %v1426_v1  ;;  %v13989_v4 = vcombine.low %v1422_v62, %v1426_v1  ;;  %v1344_v62 = vld [vmem:[%s17096_s15 + $0x4a0] sm:$0xff]  ;;  %v13897_v1 = vcombine.low %v1332_v56, %v1336_v57 }
 0x1f7   : > { %v13905_v6 = vcombine.low %v1340_v61, %v1344_v62 }
 0x1f8   : > { %3013 = vmatprep.subr.bf16.mxu0 %v13990_v2  ;;  %v13906_v2 = vcombine.high %v1340_v61, %v1344_v62  ;;  %v1428_v62 = vld [vmem:[%s17096_s15 + $0x740] sm:$0xff] }
 0x1f9   : > { %2801 = vmatpush1.bf16.msra.mxu1 %v13865_v10  ;;  %3014 = vmatpush1.bf16.msra.mxu0 %v13989_v4  ;;  %v1442_v10 = vld [vmem:[%s17096_s15 + $0x7b0] sm:$0xff]  ;;  %v1348_v4 = vld [vmem:[%s17096_s15 + $0x4c0] sm:$0xff] }
 0x1fa   : > { %2802 = vmatprep.subr.bf16.mxu1 %v13874_v11  ;;  %3015 = vmatprep.subr.bf16.mxu0 %v13998_v7  ;;  %v14006_v11 = vcombine.high %v1438_v9, %v1442_v10  ;;  %v14005_v12 = vcombine.low %v1438_v9, %v1442_v10  ;;  %v13914_v7 = vcombine.high %v1348_v4, %v1352_v5  ;;  %v1360_v9 = vld [vmem:[%s17096_s15 + $0x520] sm:$0xff] }
 0x1fb   : > { %v13913_v10 = vcombine.low %v1348_v4, %v1352_v5  ;;  %v1436_v5 = vld [vmem:[%s17096_s15 + $0x780] sm:$0xff] }
 0x1fd   : > { %2803 = vmatpush1.bf16.msra.mxu1 %v13873_v18  ;;  %3016 = vmatpush1.bf16.msra.mxu0 %v13997_v8  ;;  %v17271_v18 = vshrl.u32 %v710_v17, 7  ;;  %v1356_v8 = vld [vmem:[%s17096_s15 + $0x500] sm:$0xff] }
 0x1fe   : > { %2804 = vmatprep.subr.bf16.mxu1 %v13882_v19  ;;  %3017 = vmatprep.subr.bf16.mxu0 %v14006_v11  ;;  %v13922_v63 = vcombine.high %v1356_v8, %v1360_v9  ;;  %v13921_v11 = vcombine.low %v1356_v8, %v1360_v9  ;;  %v1380_v17 = vld [vmem:[%s17096_s15 + $0x5c0] sm:$0xff] }
 0x1ff   : > { %v17274_v19 = vsub.s32 0, %v17271_v18  ;;  %v17280_v21 = vsub.s32 1, %v17271_v18 }
 0x201   : > { %2805 = vmatpush1.bf16.msra.mxu1 %v13881_v24  ;;  %3018 = vmatpush1.bf16.msra.mxu0 %v14005_v12  ;;  %v713_v22 = vrot.slane %v17277_v20, %v17274_v19  ;;  %v717_v23 = vrot.slane %v17277_v20, %v17280_v21 }
 0x202   : > { %2817 = vmatprep.subr.bf16.mxu1 %v13890_v25  ;;  %3019 = vmatprep.subr.bf16.mxu0 %v14014_v15 }
 0x205   : > { %3020 = vmatpush1.bf16.msra.mxu0 %v14013_v16  ;;  %v13938_v16 = vcombine.high %v1372_v13, %v1376_v14 }
 0x257   : > { %v1084_v24 = vpop.f32.mrb[0].mxu1 }
 0x258   : > { %v1085_v25 = vadd.f32 %v1084_v24, %v713_v22  ;;  %v1086_v26 = vpop.f32.mrb[1].mxu1 }
 0x259   : > { %v1087_v27 = vadd.f32 %v1086_v26, %v717_v23  ;;  %v1088_v28 = vpop.f32.mrb[2].mxu1  ;;  %v1392_v26 = vld [vmem:[%s17096_s15 + $0x620] sm:$0xff] }
 0x25a   : > { %v1144_v29 = vmul.f32 1.442695, %v1085_v25  ;;  %v1089_v30 = vadd.f32 %v1088_v28, %v713_v22  ;;  %v1090_v31 = vpop.f32.mrb[3].mxu1  ;;  %vm1136_vm0 = vcmp.gt.f32.partialorder %v1085_v25, 0.0  ;;  %v1384_v22 = vld [vmem:[%s17096_s15 + $0x5e0] sm:$0xff] }
 0x25b   : > { %v1146_v32 = vmul.f32 1.442695, %v1087_v27  ;;  %v1091_v33 = vadd.f32 %v1090_v31, %v717_v23  ;;  %vm1137_vm1 = vcmp.gt.f32.partialorder %v1087_v27, 0.0  ;;  %v13937_v23 = vcombine.low %v1372_v13, %v1376_v14 }
 0x25c   : > { %16134 = vpow2.f32 %v1144_v29  ;;  %v1152_v34 = vmul.f32 1.442695, %v1089_v30  ;;  %vm1140_vm2 = vcmp.gt.f32.partialorder %v1089_v30, 0.0  ;;  %v13946_v24 = vcombine.high %v1380_v17, %v1384_v22  ;;  %v1396_v29 = vld [vmem:[%s17096_s15 + $0x640] sm:$0xff] }
 0x25d   : > { %16136 = vpow2.f32 %v1146_v32  ;;  %v1154_v35 = vmul.f32 1.442695, %v1091_v33  ;;  %vm1141_vm3 = vcmp.gt.f32.partialorder %v1091_v33, 0.0  ;;  %v17314_v31 = vsub.s32 2, %v17271_v18 }
 0x25e   : > { %16138 = vpow2.f32 %v1152_v34 }
 0x25f   : > { %16140 = vpow2.f32 %v1154_v35  ;;  %v1404_v35 = vld [vmem:[%s17096_s15 + $0x680] sm:$0xff] }
 0x266   : > { %v16135_v36 = vpop.eup %16134 }
 0x267   : > { %v16137_v37 = vpop.eup %16136  ;;  %v13753_v38 = vadd.f32 -1.0, %v16135_v36  ;;  %v1408_v36 = vld [vmem:[%s17096_s15 + $0x6a0] sm:$0xff] }
 0x268   : > { %v16139_v39 = vpop.eup %16138  ;;  %v13754_v40 = vadd.f32 -1.0, %v16137_v37  ;;  %v721_v37 = vrot.slane %v17277_v20, %v17314_v31 }
 0x269   : > { %v16141_v41 = vpop.eup %16140  ;;  %v1168_v42 = vmul.f32 1.6732632, %v13753_v38  ;;  %v13757_v43 = vadd.f32 -1.0, %v16139_v39 }
 0x26a   : > { %v1169_v44 = vmul.f32 1.6732632, %v13754_v40  ;;  %v13758_v45 = vadd.f32 -1.0, %v16141_v41  ;;  %v13970_v40 = vcombine.high %v1404_v35, %v1408_v36 }
 0x26b   : > { %v1176_v46 = vsel %vm1136_vm0, %v1085_v25, %v1168_v42  ;;  %v1172_v47 = vmul.f32 1.6732632, %v13757_v43  ;;  %v1388_v25 = vld [vmem:[%s17096_s15 + $0x600] sm:$0xff] }
 0x26c   : > { %v1177_v48 = vsel %vm1137_vm1, %v1087_v27, %v1169_v44  ;;  %v1173_v49 = vmul.f32 1.6732632, %v13758_v45  ;;  %v1184_v51 = vmul.f32 1.050701, %v1176_v46  ;;  %v13945_v27 = vcombine.low %v1380_v17, %v1384_v22  ;;  %v1412_v42 = vld [vmem:[%s17096_s15 + $0x6c0] sm:$0xff] }
 0x26d   : > { %v1180_v50 = vsel %vm1140_vm2, %v1089_v30, %v1172_v47  ;;  %v1185_v54 = vmul.f32 1.050701, %v1177_v48  ;;  %v13954_v28 = vcombine.high %v1388_v25, %v1392_v26  ;;  %v1400_v30 = vld [vmem:[%s17096_s15 + $0x660] sm:$0xff]  ;;  %v13953_v32 = vcombine.low %v1388_v25, %v1392_v26  ;;  %v1197_v26 = vld [vmem:[%s17096_s15 + $0x8] sm:$0xff] }
 0x26e   : > { %v1188_v52 = vmul.f32 1.050701, %v1180_v50  ;;  %v1181_v53 = vsel %vm1141_vm3, %v1091_v33, %v1173_v49  ;;  %v17317_v33 = vsub.s32 3, %v17271_v18  ;;  %v13962_v34 = vcombine.high %v1396_v29, %v1400_v30  ;;  %v1416_v43 = vld [vmem:[%s17096_s15 + $0x6e0] sm:$0xff] }
 0x26f   : > { %v1189_v55 = vmul.f32 1.050701, %v1181_v53  ;;  %v13961_v38 = vcombine.low %v1396_v29, %v1400_v30  ;;  %v13969_v48 = vcombine.low %v1404_v35, %v1408_v36 }
 0x270   : > { %v17288_v58 = vpack.c.bf16 %v1188_v52, %v1184_v51  ;;  %v725_v39 = vrot.slane %v17277_v20, %v17317_v33  ;;  %v13978_v52 = vcombine.high %v1412_v42, %v1416_v43 }
 0x271   : > { %v17290_v59 = vpack.c.bf16 %v1189_v55, %v1185_v54  ;;  %v1420_v54 = vld [vmem:[%s17096_s15 + $0x700] sm:$0xff] }
 0x272   : > { %v1424_v55 = vld [vmem:[%s17096_s15 + $0x720] sm:$0xff] }
 0x273   : > { %2806 = vmatprep.mubr.bf16.mxu1 %v17290_v59  ;;  %v13986_v61 = vcombine.high %v1420_v54, %v1424_v55 }
 0x274   : > { %2807 = vmatmul.mubr.bf16.vlgmr.msra.gmra.mrb[8].mxu1 %v17288_v58 }
 0x275   : > { %2818 = vmatpush1.bf16.msra.mxu1 %v13889_v3  ;;  %v1368_v3 = vld [vmem:[%s17096_s15 + $0x560] sm:$0xff] }
 0x276   : > { %2819 = vmatprep.subr.bf16.mxu1 %v13898_v60  ;;  %v13930_v12 = vcombine.high %v1364_v0, %v1368_v3  ;;  %v13929_v15 = vcombine.low %v1364_v0, %v1368_v3  ;;  %v13977_v60 = vcombine.low %v1412_v42, %v1416_v43  ;;  %v1444_v0 = vld [vmem:[%s17096_s15 + $0x7c0] sm:$0xff] }
 0x277   : > { %v1448_v3 = vld [vmem:[%s17096_s15 + $0x7e0] sm:$0xff] }
 0x279   : > { %2820 = vmatpush1.bf16.msra.mxu1 %v13897_v1  ;;  %v1432_v1 = vld [vmem:[%s17096_s15 + $0x760] sm:$0xff] }
 0x27a   : > { %2821 = vmatprep.subr.bf16.mxu1 %v13906_v2  ;;  %v13985_v2 = vcombine.low %v1420_v54, %v1424_v55  ;;  %v13994_v4 = vcombine.high %v1428_v62, %v1432_v1  ;;  %v1233_v54 = vld [vmem:[%s17096_s15 + $0x128] sm:$0xff] }
 0x27d   : > { %2822 = vmatpush1.bf16.msra.mxu1 %v13905_v6  ;;  %v1440_v6 = vld [vmem:[%s17096_s15 + $0x7a0] sm:$0xff] }
 0x27e   : > { %2823 = vmatprep.subr.bf16.mxu1 %v13914_v7  ;;  %v13993_v7 = vcombine.low %v1428_v62, %v1432_v1  ;;  %v14002_v9 = vcombine.high %v1436_v5, %v1440_v6  ;;  %v1245_v1 = vld [vmem:[%s17096_s15 + $0x188] sm:$0xff] }
 0x281   : > { %2824 = vmatpush1.bf16.msra.mxu1 %v13913_v10 }
 0x282   : > { %2825 = vmatprep.subr.bf16.mxu1 %v13922_v63 }
 0x285   : > { %2826 = vmatpush1.bf16.msra.mxu1 %v13921_v11 }
 0x286   : > { %2827 = vmatprep.subr.bf16.mxu1 %v13930_v12 }
 0x289   : > { %2828 = vmatpush1.bf16.msra.mxu1 %v13929_v15 }
 0x28a   : > { %2829 = vmatprep.subr.bf16.mxu1 %v13938_v16  ;;  %v14001_v16 = vcombine.low %v1436_v5, %v1440_v6  ;;  %v1253_v6 = vld [vmem:[%s17096_s15 + $0x1c8] sm:$0xff] }
 0x28d   : > { %2830 = vmatpush1.bf16.msra.mxu1 %v13937_v23  ;;  %v14010_v23 = vcombine.high %v1444_v0, %v1448_v3 }
 0x28e   : > { %2831 = vmatprep.subr.bf16.mxu1 %v13946_v24 }
 0x291   : > { %2832 = vmatpush1.bf16.msra.mxu1 %v13945_v27  ;;  %v1201_v27 = vld [vmem:[%s17096_s15 + $0x28] sm:$0xff] }
 0x292   : > { %2833 = vmatprep.subr.bf16.mxu1 %v13954_v28 }
 0x295   : > { %2834 = vmatpush1.bf16.msra.mxu1 %v13953_v32  ;;  %v14009_v32 = vcombine.low %v1444_v0, %v1448_v3 }
 0x296   : > { %2835 = vmatprep.subr.bf16.mxu1 %v13962_v34 }
 0x297   : > { %v1127_v41 = vpop.f32.mrb[4].mxu1 }
 0x298   : > { %v1128_v44 = vadd.f32 %v1127_v41, %v721_v37  ;;  %v1129_v45 = vpop.f32.mrb[5].mxu1  ;;  %v1209_v41 = vld [vmem:[%s17096_s15 + $0x68] sm:$0xff] }
 0x299   : > { %v1130_v46 = vadd.f32 %v1129_v45, %v725_v39  ;;  %2836 = vmatpush1.bf16.msra.mxu1 %v13961_v38  ;;  %v1131_v47 = vpop.f32.mrb[6].mxu1 }
 0x29a   : > { %v1148_v49 = vmul.f32 1.442695, %v1128_v44  ;;  %v1132_v50 = vadd.f32 %v1131_v47, %v721_v37  ;;  %v1133_v51 = vpop.f32.mrb[7].mxu1  ;;  %2837 = vmatprep.subr.bf16.mxu1 %v13970_v40  ;;  %vm1138_vm4 = vcmp.gt.f32.partialorder %v1128_v44, 0.0  ;;  %v13764_v37 = vcombine.high %v1197_v26, %v1201_v27  ;;  %v1205_v40 = vld [vmem:[%s17096_s15 + $0x48] sm:$0xff] }
 0x29b   : > { %v1150_v20 = vmul.f32 1.442695, %v1130_v46  ;;  %v1134_v53 = vadd.f32 %v1133_v51, %v725_v39  ;;  %vm1139_vm5 = vcmp.gt.f32.partialorder %v1130_v46, 0.0  ;;  %v13772_v45 = vcombine.high %v1205_v40, %v1209_v41  ;;  %v1217_v47 = vld [vmem:[%s17096_s15 + $0xa8] sm:$0xff] }
 0x29c   : > { %16142 = vpow2.f32 %v1148_v49  ;;  %v1156_v56 = vmul.f32 1.442695, %v1132_v50  ;;  %vm1142_vm6 = vcmp.gt.f32.partialorder %v1132_v50, 0.0  ;;  %v1225_v51 = vld [vmem:[%s17096_s15 + $0xe8] sm:$0xff] }
 0x29d   : > { %16144 = vpow2.f32 %v1150_v20  ;;  %v1158_v57 = vmul.f32 1.442695, %v1134_v53  ;;  %2838 = vmatpush1.bf16.msra.mxu1 %v13969_v48  ;;  %vm1143_vm7 = vcmp.gt.f32.partialorder %v1134_v53, 0.0  ;;  %v13771_v48 = vcombine.low %v1205_v40, %v1209_v41  ;;  %v1313_v40 = vld [vmem:[%s17096_s15 + $0x3a8] sm:$0xff] }
 0x29e   : > { %16146 = vpow2.f32 %v1156_v56  ;;  %2839 = vmatprep.subr.bf16.mxu1 %v13978_v52 }
 0x29f   : > { %16148 = vpow2.f32 %v1158_v57  ;;  %v1237_v57 = vld [vmem:[%s17096_s15 + $0x148] sm:$0xff] }
 0x2a1   : > { %2840 = vmatpush1.bf16.msra.mxu1 %v13977_v60  ;;  %v1241_v60 = vld [vmem:[%s17096_s15 + $0x168] sm:$0xff] }
 0x2a2   : > { %2841 = vmatprep.subr.bf16.mxu1 %v13986_v61  ;;  %v13804_v62 = vcombine.high %v1237_v57, %v1241_v60 }
 0x2a5   : > { %2842 = vmatpush1.bf16.msra.mxu1 %v13985_v2  ;;  %v1249_v2 = vld [vmem:[%s17096_s15 + $0x1a8] sm:$0xff] }
 0x2a6   : > { %v16143_v8 = vpop.eup %16142  ;;  %2843 = vmatprep.subr.bf16.mxu1 %v13994_v4  ;;  %v13803_v4 = vcombine.low %v1237_v57, %v1241_v60  ;;  %v13812_v5 = vcombine.high %v1245_v1, %v1249_v2  ;;  %v1329_v57 = vld [vmem:[%s17096_s15 + $0x428] sm:$0xff] }
 0x2a7   : > { %v16145_v10 = vpop.eup %16144  ;;  %v13755_v63 = vadd.f32 -1.0, %v16143_v8  ;;  %v13811_v8 = vcombine.low %v1245_v1, %v1249_v2  ;;  %v3286_v2 = vld [vmem:[%s17106_s5 + $0x180] sm:$0xff] }
 0x2a8   : > { %v16147_v11 = vpop.eup %16146  ;;  %v13756_v12 = vadd.f32 -1.0, %v16145_v10  ;;  %v1261_v10 = vld [vmem:[%s17096_s15 + $0x208] sm:$0xff] }
 0x2a9   : > { %v16149_v13 = vpop.eup %16148  ;;  %v1170_v14 = vmul.f32 1.6732632, %v13755_v63  ;;  %v13759_v15 = vadd.f32 -1.0, %v16147_v11  ;;  %2844 = vmatpush1.bf16.msra.mxu1 %v13993_v7  ;;  %v1257_v7 = vld [vmem:[%s17096_s15 + $0x1e8] sm:$0xff] }
 0x2aa   : > { %v1171_v17 = vmul.f32 1.6732632, %v13756_v12  ;;  %v13760_v22 = vadd.f32 -1.0, %v16149_v13  ;;  %2845 = vmatprep.subr.bf16.mxu1 %v14002_v9  ;;  %v13820_v9 = vcombine.high %v1253_v6, %v1257_v7  ;;  %v1265_v63 = vld [vmem:[%s17096_s15 + $0x228] sm:$0xff]  ;;  %v13819_v0 = vcombine.low %v1253_v6, %v1257_v7 }
 0x2ab   : > { %v1178_v24 = vsel %vm1138_vm4, %v1128_v44, %v1170_v14  ;;  %v1174_v25 = vmul.f32 1.6732632, %v13759_v15  ;;  %v13763_v44 = vcombine.low %v1197_v26, %v1201_v27  ;;  %v13828_v3 = vcombine.high %v1261_v10, %v1265_v63  ;;  %v1269_v11 = vld [vmem:[%s17096_s15 + $0x248] sm:$0xff] }
 0x2ac   : > { %v1179_v28 = vsel %vm1139_vm5, %v1130_v46, %v1171_v17  ;;  %v1175_v29 = vmul.f32 1.6732632, %v13760_v22  ;;  %v1186_v34 = vmul.f32 1.050701, %v1178_v24  ;;  %v1213_v46 = vld [vmem:[%s17096_s15 + $0x88] sm:$0xff]  ;;  %v13827_v13 = vcombine.low %v1261_v10, %v1265_v63  ;;  %v3302_v63 = vld [vmem:[%s17106_s5 + $0x200] sm:$0xff] }
 0x2ad   : > { %v1182_v30 = vsel %vm1142_vm6, %v1132_v50, %v1174_v25  ;;  %2846 = vmatpush1.bf16.msra.mxu1 %v14001_v16  ;;  %v1187_v38 = vmul.f32 1.050701, %v1179_v28  ;;  %v13780_v49 = vcombine.high %v1213_v46, %v1217_v47  ;;  %v1221_v50 = vld [vmem:[%s17096_s15 + $0xc8] sm:$0xff]  ;;  %v13779_v52 = vcombine.low %v1213_v46, %v1217_v47  ;;  %v3254_v47 = vld [vmem:[%s17106_s5 + $0x80] sm:$0xff] }
 0x2ae   : > { %v1190_v35 = vmul.f32 1.050701, %v1182_v30  ;;  %v1183_v36 = vsel %vm1143_vm7, %v1134_v53, %v1175_v29  ;;  %2847 = vmatprep.subr.bf16.mxu1 %v14010_v23  ;;  %v13788_v20 = vcombine.high %v1221_v50, %v1225_v51  ;;  %v1229_v53 = vld [vmem:[%s17096_s15 + $0x108] sm:$0xff]  ;;  %v13787_v55 = vcombine.low %v1221_v50, %v1225_v51 }
 0x2af   : > { %v1191_v39 = vmul.f32 1.050701, %v1183_v36  ;;  %v13796_v56 = vcombine.high %v1229_v53, %v1233_v54  ;;  %v13795_v61 = vcombine.low %v1229_v53, %v1233_v54  ;;  %v1273_v12 = vld [vmem:[%s17096_s15 + $0x268] sm:$0xff]  ;;  %v3270_v54 = vld [vmem:[%s17106_s5 + $0x100] sm:$0xff] }
 0x2b0   : > { %v17339_v42 = vpack.c.bf16 %v1190_v35, %v1186_v34  ;;  %v13836_v14 = vcombine.high %v1269_v11, %v1273_v12  ;;  %v1277_v15 = vld [vmem:[%s17096_s15 + $0x288] sm:$0xff]  ;;  %v13835_v17 = vcombine.low %v1269_v11, %v1273_v12 }
 0x2b1   : > { %v17341_v43 = vpack.c.bf16 %v1191_v39, %v1187_v38  ;;  %2848 = vmatpush1.bf16.msra.mxu1 %v14009_v32  ;;  %v1281_v16 = vld [vmem:[%s17096_s15 + $0x2a8] sm:$0xff]  ;;  %v3246_v38 = vld [vmem:[%s17106_s5 + $0x40] sm:$0xff] }
 0x2b2   : > { %2860 = vmatprep.subr.bf16.mxu1 %v13764_v37  ;;  %v13844_v22 = vcombine.high %v1277_v15, %v1281_v16  ;;  %v1285_v23 = vld [vmem:[%s17096_s15 + $0x2c8] sm:$0xff]  ;;  %v13843_v25 = vcombine.low %v1277_v15, %v1281_v16  ;;  %v3238_v37 = vld [vmem:[%s17106_s5] sm:$0xff] }
 0x2b3   : > { %2849 = vmatprep.mubr.bf16.mxu1 %v17341_v43  ;;  %3021 = vmatprep.mubr.bf16.mxu0 %v17341_v43  ;;  %v1289_v24 = vld [vmem:[%s17096_s15 + $0x2e8] sm:$0xff]  ;;  %v14034_v41 = vcombine.high %v3238_v37, %v3246_v38  ;;  %v3318_v16 = vld [vmem:[%s17106_s5 + $0x280] sm:$0xff] }
 0x2b4   : > { %2850 = vmatmul.mubr.bf16.vlgmr.msra.gmra.mrb[8].mxu1 %v17339_v42  ;;  %3022 = vmatmul.mubr.bf16.vlgmr.msra.gmra.mrb[0].mxu0 %v17339_v42  ;;  %v13852_v26 = vcombine.high %v1285_v23, %v1289_v24  ;;  %v1293_v27 = vld [vmem:[%s17096_s15 + $0x308] sm:$0xff]  ;;  %v13851_v29 = vcombine.low %v1285_v23, %v1289_v24 }
 0x2b5   : > { %2861 = vmatpush1.bf16.msra.mxu1 %v13763_v44  ;;  %2892 = vmatprep.mubr.bf16.mxu1 %v17290_v59  ;;  %v1297_v28 = vld [vmem:[%s17096_s15 + $0x328] sm:$0xff]  ;;  %v14033_v44 = vcombine.low %v3238_v37, %v3246_v38  ;;  %v3350_v38 = vld [vmem:[%s17106_s5 + $0x380] sm:$0xff] }
 0x2b6   : > { %2862 = vmatprep.subr.bf16.mxu1 %v13772_v45  ;;  %v13860_v30 = vcombine.high %v1293_v27, %v1297_v28  ;;  %v1301_v32 = vld [vmem:[%s17096_s15 + $0x348] sm:$0xff]  ;;  %v13859_v35 = vcombine.low %v1293_v27, %v1297_v28  ;;  %9466 = vmatprep.subr.bf16.mxu0 %v14034_v41  ;;  %v3334_v28 = vld [vmem:[%s17106_s5 + $0x300] sm:$0xff] }
 0x2b7   : > { %v1305_v34 = vld [vmem:[%s17096_s15 + $0x368] sm:$0xff]  ;;  %9467 = vmatpush1.bf16.msra.mxu0 %v14033_v44 }
 0x2b8   : > { %v13868_v36 = vcombine.high %v1301_v32, %v1305_v34  ;;  %v1309_v39 = vld [vmem:[%s17096_s15 + $0x388] sm:$0xff]  ;;  %v13867_v45 = vcombine.low %v1301_v32, %v1305_v34 }
 0x2b9   : > { %2863 = vmatpush1.bf16.msra.mxu1 %v13771_v48  ;;  %v13876_v46 = vcombine.high %v1309_v39, %v1313_v40  ;;  %v3262_v48 = vld [vmem:[%s17106_s5 + $0xc0] sm:$0xff]  ;;  %v1321_v50 = vld [vmem:[%s17096_s15 + $0x3e8] sm:$0xff] }
 0x2ba   : > { %2864 = vmatprep.subr.bf16.mxu1 %v13780_v49  ;;  %v1317_v49 = vld [vmem:[%s17096_s15 + $0x3c8] sm:$0xff]  ;;  %v14050_v51 = vcombine.high %v3254_v47, %v3262_v48 }
 0x2bb   : > { %v13884_v53 = vcombine.high %v1317_v49, %v1321_v50  ;;  %v1337_v6 = vld [vmem:[%s17096_s15 + $0x468] sm:$0xff] }
 0x2bc   : > { %9468 = vmatprep.subr.bf16.mxu0 %v14050_v51  ;;  %v1345_v11 = vld [vmem:[%s17096_s15 + $0x4a8] sm:$0xff] }
 0x2bd   : > { %2865 = vmatpush1.bf16.msra.mxu1 %v13779_v52  ;;  %v14049_v52 = vcombine.low %v3254_v47, %v3262_v48  ;;  %v1353_v23 = vld [vmem:[%s17096_s15 + $0x4e8] sm:$0xff]  ;;  %v3366_v48 = vld [vmem:[%s17106_s5 + $0x400] sm:$0xff] }
 0x2be   : > { %2866 = vmatprep.subr.bf16.mxu1 %v13788_v20  ;;  %v13875_v20 = vcombine.low %v1309_v39, %v1313_v40  ;;  %v1361_v32 = vld [vmem:[%s17096_s15 + $0x528] sm:$0xff]  ;;  %v3358_v39 = vld [vmem:[%s17106_s5 + $0x3c0] sm:$0xff] }
 0x2bf   : > { %9469 = vmatpush1.bf16.msra.mxu0 %v14049_v52  ;;  %v1365_v40 = vld [vmem:[%s17096_s15 + $0x548] sm:$0xff]  ;;  %v14146_v44 = vcombine.high %v3350_v38, %v3358_v39 }
 0x2c0   : > { %v1369_v41 = vld [vmem:[%s17096_s15 + $0x568] sm:$0xff] }
 0x2c1   : > { %2867 = vmatpush1.bf16.msra.mxu1 %v13787_v55  ;;  %v3278_v55 = vld [vmem:[%s17106_s5 + $0x140] sm:$0xff]  ;;  %v13932_v47 = vcombine.high %v1365_v40, %v1369_v41  ;;  %v1377_v51 = vld [vmem:[%s17096_s15 + $0x5a8] sm:$0xff] }
 0x2c2   : > { %2868 = vmatprep.subr.bf16.mxu1 %v13796_v56  ;;  %v1325_v56 = vld [vmem:[%s17096_s15 + $0x408] sm:$0xff]  ;;  %v14066_v60 = vcombine.high %v3270_v54, %v3278_v55 }
 0x2c3   : > { %v13892_v1 = vcombine.high %v1325_v56, %v1329_v57 }
 0x2c4   : > { %9470 = vmatprep.subr.bf16.mxu0 %v14066_v60  ;;  %v1385_v60 = vld [vmem:[%s17096_s15 + $0x5e8] sm:$0xff] }
 0x2c5   : > { %2869 = vmatpush1.bf16.msra.mxu1 %v13795_v61  ;;  %v14065_v61 = vcombine.low %v3270_v54, %v3278_v55  ;;  %v3382_v55 = vld [vmem:[%s17106_s5 + $0x480] sm:$0xff] }
 0x2c6   : > { %2870 = vmatprep.subr.bf16.mxu1 %v13804_v62  ;;  %v13883_v62 = vcombine.low %v1317_v49, %v1321_v50  ;;  %v3374_v49 = vld [vmem:[%s17106_s5 + $0x440] sm:$0xff]  ;;  %v1373_v50 = vld [vmem:[%s17096_s15 + $0x588] sm:$0xff] }
 0x2c7   : > { %9471 = vmatpush1.bf16.msra.mxu0 %v14065_v61  ;;  %v14162_v52 = vcombine.high %v3366_v48, %v3374_v49  ;;  %v13940_v54 = vcombine.high %v1373_v50, %v1377_v51 }
 0x2c9   : > { %2871 = vmatpush1.bf16.msra.mxu1 %v13803_v4  ;;  %v3294_v4 = vld [vmem:[%s17106_s5 + $0x1c0] sm:$0xff] }
 0x2ca   : > { %2872 = vmatprep.subr.bf16.mxu1 %v13812_v5  ;;  %v1333_v5 = vld [vmem:[%s17096_s15 + $0x448] sm:$0xff]  ;;  %v14082_v7 = vcombine.high %v3286_v2, %v3294_v4 }
 0x2cb   : > { %v13900_v10 = vcombine.high %v1333_v5, %v1337_v6 }
 0x2cc   : > { %9472 = vmatprep.subr.bf16.mxu0 %v14082_v7  ;;  %v1393_v7 = vld [vmem:[%s17096_s15 + $0x628] sm:$0xff] }
 0x2cd   : > { %2873 = vmatpush1.bf16.msra.mxu1 %v13811_v8  ;;  %v14081_v8 = vcombine.low %v3286_v2, %v3294_v4  ;;  %v3398_v4 = vld [vmem:[%s17106_s5 + $0x500] sm:$0xff] }
 0x2ce   : > { %2874 = vmatprep.subr.bf16.mxu1 %v13820_v9  ;;  %v13891_v9 = vcombine.low %v1325_v56, %v1329_v57  ;;  %v3390_v56 = vld [vmem:[%s17106_s5 + $0x4c0] sm:$0xff]  ;;  %v1381_v57 = vld [vmem:[%s17096_s15 + $0x5c8] sm:$0xff] }
 0x2cf   : > { %9473 = vmatpush1.bf16.msra.mxu0 %v14081_v8  ;;  %v14178_v61 = vcombine.high %v3382_v55, %v3390_v56  ;;  %v13948_v2 = vcombine.high %v1381_v57, %v1385_v60 }
 0x2d1   : > { %2875 = vmatpush1.bf16.msra.mxu1 %v13819_v0  ;;  %v3310_v0 = vld [vmem:[%s17106_s5 + $0x240] sm:$0xff] }
 0x2d2   : > { %2876 = vmatprep.subr.bf16.mxu1 %v13828_v3  ;;  %v1341_v3 = vld [vmem:[%s17096_s15 + $0x488] sm:$0xff]  ;;  %v14098_v12 = vcombine.high %v3302_v63, %v3310_v0 }
 0x2d3   : > { %v13908_v15 = vcombine.high %v1341_v3, %v1345_v11 }
 0x2d4   : > { %9474 = vmatprep.subr.bf16.mxu0 %v14098_v12  ;;  %v1401_v12 = vld [vmem:[%s17096_s15 + $0x668] sm:$0xff] }
 0x2d5   : > { %2877 = vmatpush1.bf16.msra.mxu1 %v13827_v13  ;;  %v14097_v13 = vcombine.low %v3302_v63, %v3310_v0  ;;  %v3414_v0 = vld [vmem:[%s17106_s5 + $0x580] sm:$0xff] }
 0x2d6   : > { %2878 = vmatprep.subr.bf16.mxu1 %v13836_v14  ;;  %v13899_v14 = vcombine.low %v1333_v5, %v1337_v6  ;;  %v3406_v5 = vld [vmem:[%s17106_s5 + $0x540] sm:$0xff]  ;;  %v1389_v6 = vld [vmem:[%s17096_s15 + $0x608] sm:$0xff] }
 0x2d7   : > { %9475 = vmatpush1.bf16.msra.mxu0 %v14097_v13  ;;  %v14194_v8 = vcombine.high %v3398_v4, %v3406_v5  ;;  %v13956_v63 = vcombine.high %v1389_v6, %v1393_v7 }
 0x2d9   : > { %2879 = vmatpush1.bf16.msra.mxu1 %v13835_v17  ;;  %v3326_v17 = vld [vmem:[%s17106_s5 + $0x2c0] sm:$0xff] }
 0x2da   : > { %2880 = vmatprep.subr.bf16.mxu1 %v13844_v22  ;;  %v1349_v22 = vld [vmem:[%s17096_s15 + $0x4c8] sm:$0xff]  ;;  %v14114_v24 = vcombine.high %v3318_v16, %v3326_v17 }
 0x2db   : > { %v13916_v27 = vcombine.high %v1349_v22, %v1353_v23 }
 0x2dc   : > { %9476 = vmatprep.subr.bf16.mxu0 %v14114_v24  ;;  %v1409_v24 = vld [vmem:[%s17096_s15 + $0x6a8] sm:$0xff] }
 0x2dd   : > { %2881 = vmatpush1.bf16.msra.mxu1 %v13843_v25  ;;  %v14113_v25 = vcombine.low %v3318_v16, %v3326_v17  ;;  %v3430_v17 = vld [vmem:[%s17106_s5 + $0x600] sm:$0xff] }
 0x2de   : > { %2882 = vmatprep.subr.bf16.mxu1 %v13852_v26  ;;  %v13907_v26 = vcombine.low %v1341_v3, %v1345_v11  ;;  %v3422_v3 = vld [vmem:[%s17106_s5 + $0x5c0] sm:$0xff]  ;;  %v1397_v11 = vld [vmem:[%s17096_s15 + $0x648] sm:$0xff] }
 0x2df   : > { %9477 = vmatpush1.bf16.msra.mxu0 %v14113_v25  ;;  %v14210_v13 = vcombine.high %v3414_v0, %v3422_v3  ;;  %v13964_v16 = vcombine.high %v1397_v11, %v1401_v12 }
 0x2e1   : > { %2883 = vmatpush1.bf16.msra.mxu1 %v13851_v29  ;;  %v3342_v29 = vld [vmem:[%s17106_s5 + $0x340] sm:$0xff] }
 0x2e2   : > { %2884 = vmatprep.subr.bf16.mxu1 %v13860_v30  ;;  %v1357_v30 = vld [vmem:[%s17096_s15 + $0x508] sm:$0xff]  ;;  %v14130_v34 = vcombine.high %v3334_v28, %v3342_v29 }
 0x2e3   : > { %v13924_v37 = vcombine.high %v1357_v30, %v1361_v32 }
 0x2e4   : > { %9478 = vmatprep.subr.bf16.mxu0 %v14130_v34  ;;  %v1417_v34 = vld [vmem:[%s17096_s15 + $0x6e8] sm:$0xff] }
 0x2e5   : > { %2885 = vmatpush1.bf16.msra.mxu1 %v13859_v35  ;;  %v14129_v35 = vcombine.low %v3334_v28, %v3342_v29  ;;  %v3446_v29 = vld [vmem:[%s17106_s5 + $0x680] sm:$0xff] }
 0x2e6   : > { %2886 = vmatprep.subr.bf16.mxu1 %v13868_v36  ;;  %v13915_v36 = vcombine.low %v1349_v22, %v1353_v23  ;;  %v3438_v22 = vld [vmem:[%s17106_s5 + $0x640] sm:$0xff]  ;;  %v1405_v23 = vld [vmem:[%s17096_s15 + $0x688] sm:$0xff] }
 0x2e7   : > { %9479 = vmatpush1.bf16.msra.mxu0 %v14129_v35  ;;  %v14226_v25 = vcombine.high %v3430_v17, %v3438_v22  ;;  %v13972_v28 = vcombine.high %v1405_v23, %v1409_v24 }
 0x2e8   : > { %9480 = vmatprep.subr.bf16.mxu0 %v14146_v44  ;;  %v1425_v44 = vld [vmem:[%s17096_s15 + $0x728] sm:$0xff] }
 0x2e9   : > { %2887 = vmatpush1.bf16.msra.mxu1 %v13867_v45  ;;  %v14145_v45 = vcombine.low %v3350_v38, %v3358_v39  ;;  %v3462_v39 = vld [vmem:[%s17106_s5 + $0x700] sm:$0xff] }
 0x2ea   : > { %2888 = vmatprep.subr.bf16.mxu1 %v13876_v46  ;;  %v13923_v46 = vcombine.low %v1357_v30, %v1361_v32  ;;  %v3454_v30 = vld [vmem:[%s17106_s5 + $0x6c0] sm:$0xff]  ;;  %v1413_v32 = vld [vmem:[%s17096_s15 + $0x6c8] sm:$0xff] }
 0x2eb   : > { %9481 = vmatpush1.bf16.msra.mxu0 %v14145_v45  ;;  %v14242_v35 = vcombine.high %v3446_v29, %v3454_v30  ;;  %v13980_v38 = vcombine.high %v1413_v32, %v1417_v34 }
 0x2ec   : > { %9482 = vmatprep.subr.bf16.mxu0 %v14162_v52  ;;  %v1433_v52 = vld [vmem:[%s17096_s15 + $0x768] sm:$0xff] }
 0x2ed   : > { %2889 = vmatpush1.bf16.msra.mxu1 %v13875_v20  ;;  %v14161_v20 = vcombine.low %v3366_v48, %v3374_v49  ;;  %v3478_v49 = vld [vmem:[%s17106_s5 + $0x780] sm:$0xff] }
 0x2ee   : > { %2890 = vmatprep.subr.bf16.mxu1 %v13884_v53  ;;  %v13931_v53 = vcombine.low %v1365_v40, %v1369_v41  ;;  %v3470_v40 = vld [vmem:[%s17106_s5 + $0x740] sm:$0xff]  ;;  %v1421_v41 = vld [vmem:[%s17096_s15 + $0x708] sm:$0xff] }
 0x2ef   : > { %9483 = vmatpush1.bf16.msra.mxu0 %v14161_v20  ;;  %v14258_v45 = vcombine.high %v3462_v39, %v3470_v40  ;;  %v13988_v48 = vcombine.high %v1421_v41, %v1425_v44 }
 0x2f0   : > { %9484 = vmatprep.subr.bf16.mxu0 %v14178_v61 }
 0x2f1   : > { %2891 = vmatpush1.bf16.msra.mxu1 %v13883_v62  ;;  %v14177_v62 = vcombine.low %v3382_v55, %v3390_v56  ;;  %v1437_v56 = vld [vmem:[%s17096_s15 + $0x788] sm:$0xff] }
 0x2f2   : > { %2903 = vmatprep.subr.bf16.mxu1 %v13892_v1  ;;  %v13939_v1 = vcombine.low %v1373_v50, %v1377_v51  ;;  %v3486_v50 = vld [vmem:[%s17106_s5 + $0x7c0] sm:$0xff]  ;;  %v1429_v51 = vld [vmem:[%s17096_s15 + $0x748] sm:$0xff] }
 0x2f3   : > { %9485 = vmatpush1.bf16.msra.mxu0 %v14177_v62  ;;  %v14274_v20 = vcombine.high %v3478_v49, %v3486_v50  ;;  %v13996_v55 = vcombine.high %v1429_v51, %v1433_v52  ;;  %v1445_v62 = vld [vmem:[%s17096_s15 + $0x7c8] sm:$0xff] }
 0x2f4   : > { %2893 = vmatmul.mubr.bf16.vlgmr.msra.gmra.mrb[12].mxu1 %v17288_v58  ;;  %9486 = vmatprep.subr.bf16.mxu0 %v14194_v8 }
 0x2f5   : > { %2904 = vmatpush1.bf16.msra.mxu1 %v13891_v9  ;;  %2935 = vmatprep.mubr.bf16.mxu1 %v17341_v43  ;;  %v14193_v9 = vcombine.low %v3398_v4, %v3406_v5  ;;  %v1198_v5 = vld [vmem:[%s17096_s15 + $0x10] sm:$0xff] }
 0x2f6   : > { %2905 = vmatprep.subr.bf16.mxu1 %v13900_v10  ;;  %v13947_v10 = vcombine.low %v1381_v57, %v1385_v60  ;;  %v1441_v57 = vld [vmem:[%s17096_s15 + $0x7a8] sm:$0xff]  ;;  %v13995_v60 = vcombine.low %v1429_v51, %v1433_v52  ;;  %v1282_v51 = vld [vmem:[%s17096_s15 + $0x2b0] sm:$0xff] }
 0x2f7   : > { %9487 = vmatpush1.bf16.msra.mxu0 %v14193_v9  ;;  %v14004_v61 = vcombine.high %v1437_v56, %v1441_v57  ;;  %v1206_v9 = vld [vmem:[%s17096_s15 + $0x50] sm:$0xff] }
 0x2f8   : > { %9488 = vmatprep.subr.bf16.mxu0 %v14210_v13 }
 0x2f9   : > { %2906 = vmatpush1.bf16.msra.mxu1 %v13899_v14  ;;  %v14209_v14 = vcombine.low %v3414_v0, %v3422_v3  ;;  %v1214_v3 = vld [vmem:[%s17096_s15 + $0x90] sm:$0xff] }
 0x2fa   : > { %2907 = vmatprep.subr.bf16.mxu1 %v13908_v15  ;;  %v13955_v15 = vcombine.low %v1389_v6, %v1393_v7  ;;  %v1202_v6 = vld [vmem:[%s17096_s15 + $0x30] sm:$0xff] }
 0x2fb   : > { %9489 = vmatpush1.bf16.msra.mxu0 %v14209_v14  ;;  %v13766_v8 = vcombine.high %v1198_v5, %v1202_v6  ;;  %v1222_v14 = vld [vmem:[%s17096_s15 + $0xd0] sm:$0xff] }
 0x2fc   : > { %9490 = vmatprep.subr.bf16.mxu0 %v14226_v25 }
 0x2fd   : > { %2908 = vmatpush1.bf16.msra.mxu1 %v13907_v26  ;;  %v14225_v26 = vcombine.low %v3430_v17, %v3438_v22  ;;  %v1230_v22 = vld [vmem:[%s17096_s15 + $0x110] sm:$0xff] }
 0x2fe   : > { %2909 = vmatprep.subr.bf16.mxu1 %v13916_v27  ;;  %v13963_v27 = vcombine.low %v1397_v11, %v1401_v12  ;;  %v1218_v11 = vld [vmem:[%s17096_s15 + $0xb0] sm:$0xff] }
 0x2ff   : > { %9491 = vmatpush1.bf16.msra.mxu0 %v14225_v26  ;;  %v13782_v13 = vcombine.high %v1214_v3, %v1218_v11  ;;  %v1238_v26 = vld [vmem:[%s17096_s15 + $0x150] sm:$0xff] }
 0x300   : > { %9492 = vmatprep.subr.bf16.mxu0 %v14242_v35 }
 0x301   : > { %2910 = vmatpush1.bf16.msra.mxu1 %v13915_v36  ;;  %v14241_v36 = vcombine.low %v3446_v29, %v3454_v30  ;;  %v1246_v30 = vld [vmem:[%s17096_s15 + $0x190] sm:$0xff] }
 0x302   : > { %2911 = vmatprep.subr.bf16.mxu1 %v13924_v37  ;;  %v13971_v37 = vcombine.low %v1405_v23, %v1409_v24  ;;  %v1234_v23 = vld [vmem:[%s17096_s15 + $0x130] sm:$0xff] }
 0x303   : > { %9493 = vmatpush1.bf16.msra.mxu0 %v14241_v36  ;;  %v13798_v25 = vcombine.high %v1230_v22, %v1234_v23  ;;  %v1254_v36 = vld [vmem:[%s17096_s15 + $0x1d0] sm:$0xff] }
 0x304   : > { %9494 = vmatprep.subr.bf16.mxu0 %v14258_v45 }
 0x305   : > { %2912 = vmatpush1.bf16.msra.mxu1 %v13923_v46  ;;  %v14257_v46 = vcombine.low %v3462_v39, %v3470_v40  ;;  %v1262_v40 = vld [vmem:[%s17096_s15 + $0x210] sm:$0xff] }
 0x306   : > { %2913 = vmatprep.subr.bf16.mxu1 %v13932_v47  ;;  %v13979_v47 = vcombine.low %v1413_v32, %v1417_v34  ;;  %v1250_v32 = vld [vmem:[%s17096_s15 + $0x1b0] sm:$0xff] }
 0x307   : > { %9495 = vmatpush1.bf16.msra.mxu0 %v14257_v46  ;;  %v13814_v35 = vcombine.high %v1246_v30, %v1250_v32  ;;  %v1270_v46 = vld [vmem:[%s17096_s15 + $0x250] sm:$0xff] }
 0x308   : > { %9496 = vmatprep.subr.bf16.mxu0 %v14274_v20 }
 0x309   : > { %2914 = vmatpush1.bf16.msra.mxu1 %v13931_v53  ;;  %v14273_v53 = vcombine.low %v3478_v49, %v3486_v50  ;;  %v1278_v50 = vld [vmem:[%s17096_s15 + $0x290] sm:$0xff] }
 0x30a   : > { %2915 = vmatprep.subr.bf16.mxu1 %v13940_v54  ;;  %v13987_v54 = vcombine.low %v1421_v41, %v1425_v44  ;;  %v1266_v41 = vld [vmem:[%s17096_s15 + $0x230] sm:$0xff]  ;;  %v13846_v20 = vcombine.high %v1278_v50, %v1282_v51 }
 0x30b   : > { %9497 = vmatpush1.bf16.msra.mxu0 %v14273_v53  ;;  %v13830_v45 = vcombine.high %v1262_v40, %v1266_v41  ;;  %v1286_v53 = vld [vmem:[%s17096_s15 + $0x2d0] sm:$0xff] }
 0x30d   : > { %2916 = vmatpush1.bf16.msra.mxu1 %v13939_v1  ;;  %v1449_v1 = vld [vmem:[%s17096_s15 + $0x7e8] sm:$0xff] }
 0x30e   : > { %2917 = vmatprep.subr.bf16.mxu1 %v13948_v2  ;;  %v14003_v2 = vcombine.low %v1437_v56, %v1441_v57  ;;  %v14012_v4 = vcombine.high %v1445_v62, %v1449_v1  ;;  %v14011_v7 = vcombine.low %v1445_v62, %v1449_v1  ;;  %v1294_v57 = vld [vmem:[%s17096_s15 + $0x310] sm:$0xff] }
 0x30f   : > { %v1302_v1 = vld [vmem:[%s17096_s15 + $0x350] sm:$0xff] }
 0x311   : > { %2918 = vmatpush1.bf16.msra.mxu1 %v13947_v10  ;;  %v1210_v10 = vld [vmem:[%s17096_s15 + $0x70] sm:$0xff] }
 0x312   : > { %2919 = vmatprep.subr.bf16.mxu1 %v13956_v63  ;;  %v13765_v63 = vcombine.low %v1198_v5, %v1202_v6  ;;  %v13774_v0 = vcombine.high %v1206_v9, %v1210_v10  ;;  %v13773_v12 = vcombine.low %v1206_v9, %v1210_v10  ;;  %v17473_v5 = vld [vmem:[%s17106_s5 + $0x800] sm:$0xff] }
 0x313   : > { %v1314_v9 = vld [vmem:[%s17096_s15 + $0x3b0] sm:$0xff] }
 0x315   : > { %2920 = vmatpush1.bf16.msra.mxu1 %v13955_v15  ;;  %v1226_v15 = vld [vmem:[%s17096_s15 + $0xf0] sm:$0xff] }
 0x316   : > { %2921 = vmatprep.subr.bf16.mxu1 %v13964_v16  ;;  %v13781_v16 = vcombine.low %v1214_v3, %v1218_v11  ;;  %v13790_v17 = vcombine.high %v1222_v14, %v1226_v15  ;;  %v13789_v24 = vcombine.low %v1222_v14, %v1226_v15  ;;  %v1318_v11 = vld [vmem:[%s17096_s15 + $0x3d0] sm:$0xff]  ;;  %v1199_v15 = vld [vmem:[%s17096_s15 + $0x18] sm:$0xff] }
 0x319   : > { %2922 = vmatpush1.bf16.msra.mxu1 %v13963_v27  ;;  %v1242_v27 = vld [vmem:[%s17096_s15 + $0x170] sm:$0xff] }
 0x31a   : > { %2923 = vmatprep.subr.bf16.mxu1 %v13972_v28  ;;  %v13797_v28 = vcombine.low %v1230_v22, %v1234_v23  ;;  %v13806_v29 = vcombine.high %v1238_v26, %v1242_v27  ;;  %v13805_v34 = vcombine.low %v1238_v26, %v1242_v27  ;;  %v1207_v23 = vld [vmem:[%s17096_s15 + $0x58] sm:$0xff] }
 0x31b   : > { %v1215_v27 = vld [vmem:[%s17096_s15 + $0x98] sm:$0xff] }
 0x31d   : > { %2924 = vmatpush1.bf16.msra.mxu1 %v13971_v37  ;;  %v1258_v37 = vld [vmem:[%s17096_s15 + $0x1f0] sm:$0xff] }
 0x31e   : > { %2925 = vmatprep.subr.bf16.mxu1 %v13980_v38  ;;  %v13813_v38 = vcombine.low %v1246_v30, %v1250_v32  ;;  %v13822_v39 = vcombine.high %v1254_v36, %v1258_v37  ;;  %v13821_v44 = vcombine.low %v1254_v36, %v1258_v37  ;;  %v1223_v32 = vld [vmem:[%s17096_s15 + $0xd8] sm:$0xff] }
 0x31f   : > { %v1231_v37 = vld [vmem:[%s17096_s15 + $0x118] sm:$0xff] }
 0x321   : > { %2926 = vmatpush1.bf16.msra.mxu1 %v13979_v47  ;;  %v1274_v47 = vld [vmem:[%s17096_s15 + $0x270] sm:$0xff] }
 0x322   : > { %2927 = vmatprep.subr.bf16.mxu1 %v13988_v48  ;;  %v13829_v48 = vcombine.low %v1262_v40, %v1266_v41  ;;  %v13838_v49 = vcombine.high %v1270_v46, %v1274_v47  ;;  %v13837_v52 = vcombine.low %v1270_v46, %v1274_v47  ;;  %v1239_v40 = vld [vmem:[%s17096_s15 + $0x158] sm:$0xff] }
 0x323   : > { %v1243_v41 = vld [vmem:[%s17096_s15 + $0x178] sm:$0xff] }
 0x324   : > { %v13808_v46 = vcombine.high %v1239_v40, %v1243_v41  ;;  %v1247_v47 = vld [vmem:[%s17096_s15 + $0x198] sm:$0xff] }
 0x325   : > { %2928 = vmatpush1.bf16.msra.mxu1 %v13987_v54  ;;  %v1290_v54 = vld [vmem:[%s17096_s15 + $0x2f0] sm:$0xff] }
 0x326   : > { %2929 = vmatprep.subr.bf16.mxu1 %v13996_v55  ;;  %v13845_v55 = vcombine.low %v1278_v50, %v1282_v51  ;;  %v13854_v56 = vcombine.high %v1286_v53, %v1290_v54  ;;  %v13807_v50 = vcombine.low %v1239_v40, %v1243_v41 }
 0x329   : > { %2930 = vmatpush1.bf16.msra.mxu1 %v13995_v60  ;;  %v1298_v60 = vld [vmem:[%s17096_s15 + $0x330] sm:$0xff] }
 0x32a   : > { %2931 = vmatprep.subr.bf16.mxu1 %v14004_v61  ;;  %v13853_v61 = vcombine.low %v1286_v53, %v1290_v54  ;;  %v13862_v62 = vcombine.high %v1294_v57, %v1298_v60  ;;  %v1255_v54 = vld [vmem:[%s17096_s15 + $0x1d8] sm:$0xff] }
 0x32d   : > { %2932 = vmatpush1.bf16.msra.mxu1 %v14003_v2  ;;  %v1306_v2 = vld [vmem:[%s17096_s15 + $0x370] sm:$0xff] }
 0x32e   : > { %2933 = vmatprep.subr.bf16.mxu1 %v14012_v4  ;;  %v13861_v4 = vcombine.low %v1294_v57, %v1298_v60  ;;  %v13870_v6 = vcombine.high %v1302_v1, %v1306_v2 }
 0x331   : > { %2934 = vmatpush1.bf16.msra.mxu1 %v14011_v7  ;;  %v17476_v7 = vld [vmem:[%s17106_s5 + $0x840] sm:$0xff] }
 0x332   : > { %2946 = vmatprep.subr.bf16.mxu1 %v13766_v8  ;;  %v1310_v8 = vld [vmem:[%s17096_s15 + $0x390] sm:$0xff]  ;;  %v14289_v10 = vcombine.low %v17473_v5, %v17476_v7 }
 0x333   : > { %v13878_v3 = vcombine.high %v1310_v8, %v1314_v9 }
 0x334   : > { %2936 = vmatmul.mubr.bf16.vlgmr.msra.gmra.mrb[12].mxu1 %v17339_v42 }
 0x335   : > { %2947 = vmatpush1.bf16.msra.mxu1 %v13765_v63  ;;  %2978 = vmatprep.mubr.bf16.mxu1 %v17290_v59  ;;  %v14290_v63 = vcombine.high %v17473_v5, %v17476_v7 }
 0x336   : > { %2948 = vmatprep.subr.bf16.mxu1 %v13774_v0  ;;  %v13869_v0 = vcombine.low %v1302_v1, %v1306_v2 }
 0x337   : > { %9509 = vmatprep.subr.bf16.mxu0 %v14290_v63 }
 0x339   : > { %2949 = vmatpush1.bf16.msra.mxu1 %v13773_v12  ;;  %v1322_v12 = vld [vmem:[%s17096_s15 + $0x3f0] sm:$0xff] }
 0x33a   : > { %2950 = vmatprep.subr.bf16.mxu1 %v13782_v13  ;;  %v13877_v13 = vcombine.low %v1310_v8, %v1314_v9  ;;  %v13886_v14 = vcombine.high %v1318_v11, %v1322_v12 }
 0x33d   : > { %2951 = vmatpush1.bf16.msra.mxu1 %v13781_v16  ;;  %v1203_v16 = vld [vmem:[%s17096_s15 + $0x38] sm:$0xff] }
 0x33e   : > { %2952 = vmatprep.subr.bf16.mxu1 %v13790_v17  ;;  %v13885_v17 = vcombine.low %v1318_v11, %v1322_v12  ;;  %v13768_v22 = vcombine.high %v1199_v15, %v1203_v16  ;;  %v1263_v11 = vld [vmem:[%s17096_s15 + $0x218] sm:$0xff] }
 0x33f   : > { %v1267_v12 = vld [vmem:[%s17096_s15 + $0x238] sm:$0xff] }
 0x341   : > { %2953 = vmatpush1.bf16.msra.mxu1 %v13789_v24  ;;  %v1211_v24 = vld [vmem:[%s17096_s15 + $0x78] sm:$0xff] }
 0x342   : > { %2954 = vmatprep.subr.bf16.mxu1 %v13798_v25  ;;  %v13767_v25 = vcombine.low %v1199_v15, %v1203_v16  ;;  %v13776_v26 = vcombine.high %v1207_v23, %v1211_v24  ;;  %v13832_v16 = vcombine.high %v1263_v11, %v1267_v12 }
 0x345   : > { %2955 = vmatpush1.bf16.msra.mxu1 %v13797_v28  ;;  %v1219_v28 = vld [vmem:[%s17096_s15 + $0xb8] sm:$0xff] }
 0x346   : > { %2956 = vmatprep.subr.bf16.mxu1 %v13806_v29  ;;  %v13775_v29 = vcombine.low %v1207_v23, %v1211_v24  ;;  %v13784_v30 = vcombine.high %v1215_v27, %v1219_v28  ;;  %v13831_v23 = vcombine.low %v1263_v11, %v1267_v12 }
 0x349   : > { %2957 = vmatpush1.bf16.msra.mxu1 %v13805_v34  ;;  %v1227_v34 = vld [vmem:[%s17096_s15 + $0xf8] sm:$0xff] }
 0x34a   : > { %2958 = vmatprep.subr.bf16.mxu1 %v13814_v35  ;;  %v13783_v35 = vcombine.low %v1215_v27, %v1219_v28  ;;  %v13792_v36 = vcombine.high %v1223_v32, %v1227_v34 }
 0x34d   : > { %2959 = vmatpush1.bf16.msra.mxu1 %v13813_v38  ;;  %v1235_v38 = vld [vmem:[%s17096_s15 + $0x138] sm:$0xff] }
 0x34e   : > { %2960 = vmatprep.subr.bf16.mxu1 %v13822_v39  ;;  %v13791_v39 = vcombine.low %v1223_v32, %v1227_v34  ;;  %v1287_v34 = vld [vmem:[%s17096_s15 + $0x2d8] sm:$0xff] }
 0x351   : > { %2961 = vmatpush1.bf16.msra.mxu1 %v13821_v44  ;;  %v13799_v44 = vcombine.low %v1231_v37, %v1235_v38 }
 0x352   : > { %2962 = vmatprep.subr.bf16.mxu1 %v13830_v45  ;;  %v17501_v45 = vld [vmem:[%s17104_s16] sm:$0xff] }
 0x353   : > { %v1461_v51 = vrot.slane %v17501_v45, %v17280_v21 }
 0x355   : > { %2963 = vmatpush1.bf16.msra.mxu1 %v13829_v48  ;;  %v1251_v48 = vld [vmem:[%s17096_s15 + $0x1b8] sm:$0xff] }
 0x356   : > { %2964 = vmatprep.subr.bf16.mxu1 %v13838_v49  ;;  %v1457_v49 = vrot.slane %v17501_v45, %v17274_v19  ;;  %v13815_v2 = vcombine.low %v1247_v47, %v1251_v48 }
 0x359   : > { %2965 = vmatpush1.bf16.msra.mxu1 %v13837_v52  ;;  %v13816_v52 = vcombine.high %v1247_v47, %v1251_v48 }
 0x35a   : > { %2966 = vmatprep.subr.bf16.mxu1 %v13846_v20 }
 0x35d   : > { %2967 = vmatpush1.bf16.msra.mxu1 %v13845_v55  ;;  %v1259_v55 = vld [vmem:[%s17096_s15 + $0x1f8] sm:$0xff] }
 0x35e   : > { %2968 = vmatprep.subr.bf16.mxu1 %v13854_v56  ;;  %v13824_v63 = vcombine.high %v1255_v54, %v1259_v55  ;;  %v13823_v15 = vcombine.low %v1255_v54, %v1259_v55 }
 0x361   : > { %2969 = vmatpush1.bf16.msra.mxu1 %v13853_v61 }
 0x362   : > { %2970 = vmatprep.subr.bf16.mxu1 %v13862_v62 }
 0x365   : > { %2971 = vmatpush1.bf16.msra.mxu1 %v13861_v4 }
 0x366   : > { %2972 = vmatprep.subr.bf16.mxu1 %v13870_v6 }
 0x369   : > { %2973 = vmatpush1.bf16.msra.mxu1 %v13869_v0 }
 0x36a   : > { %2974 = vmatprep.subr.bf16.mxu1 %v13878_v3 }
 0x36d   : > { %2975 = vmatpush1.bf16.msra.mxu1 %v13877_v13 }
 0x36e   : > { %2976 = vmatprep.subr.bf16.mxu1 %v13886_v14 }
 0x371   : > { %2977 = vmatpush1.bf16.msra.mxu1 %v13885_v17  ;;  %v1271_v17 = vld [vmem:[%s17096_s15 + $0x258] sm:$0xff] }
 0x372   : > { %3032 = vmatprep.subr.bf16.mxu1 %v13768_v22  ;;  %v1275_v22 = vld [vmem:[%s17096_s15 + $0x278] sm:$0xff] }
 0x373   : > { %v13840_v24 = vcombine.high %v1271_v17, %v1275_v22  ;;  %v13839_v27 = vcombine.low %v1271_v17, %v1275_v22  ;;  %v3534_v17 = vld [vmem:[%s17106_s5 + $0x940] sm:$0xff] }
 0x374   : > { %2979 = vmatmul.mubr.bf16.vlgmr.msra.gmra.mrb[16].mxu1 %v17288_v58  ;;  %v17543_v22 = vld [vmem:[%s17106_s5 + $0x1000] sm:$0xff] }
 0x375   : > { %3033 = vmatpush1.bf16.msra.mxu1 %v13767_v25  ;;  %3064 = vmatprep.mubr.bf16.mxu1 %v17290_v59  ;;  %v13800_v59 = vcombine.high %v1231_v37, %v1235_v38  ;;  %v1279_v25 = vld [vmem:[%s17096_s15 + $0x298] sm:$0xff] }
 0x376   : > { %3034 = vmatprep.subr.bf16.mxu1 %v13776_v26  ;;  %v1283_v26 = vld [vmem:[%s17096_s15 + $0x2b8] sm:$0xff] }
 0x377   : > { %v13847_v40 = vcombine.low %v1279_v25, %v1283_v26 }
 0x379   : > { %3035 = vmatpush1.bf16.msra.mxu1 %v13775_v29  ;;  %v13848_v29 = vcombine.high %v1279_v25, %v1283_v26 }
 0x37a   : > { %3036 = vmatprep.subr.bf16.mxu1 %v13784_v30 }
 0x37d   : > { %3037 = vmatpush1.bf16.msra.mxu1 %v13783_v35  ;;  %v1291_v35 = vld [vmem:[%s17096_s15 + $0x2f8] sm:$0xff] }
 0x37e   : > { %3038 = vmatprep.subr.bf16.mxu1 %v13792_v36  ;;  %v13855_v54 = vcombine.low %v1287_v34, %v1291_v35 }
 0x381   : > { %3039 = vmatpush1.bf16.msra.mxu1 %v13791_v39 }
 0x382   : > { %3040 = vmatprep.subr.bf16.mxu1 %v13800_v59 }
 0x385   : > { %3041 = vmatpush1.bf16.msra.mxu1 %v13799_v44 }
 0x386   : > { %3042 = vmatprep.subr.bf16.mxu1 %v13808_v46  ;;  %v13856_v46 = vcombine.high %v1287_v34, %v1291_v35  ;;  %v3550_v34 = vld [vmem:[%s17106_s5 + $0x9c0] sm:$0xff] }
 0x387   : > { %v2851_v20 = vpop.f32.mrb[8].mxu1  ;;  %v17509_v53 = vpop.f32.mrb[0].mxu0 }
 0x388   : > { %v15360_v56 = vadd.f32 %v2851_v20, %v1457_v49  ;;  %v2853_v57 = vpop.f32.mrb[9].mxu1  ;;  %v17513_v60 = vpop.f32.mrb[1].mxu0 }
 0x389   : > { %v15361_v61 = vadd.f32 %v2853_v57, %v1461_v51  ;;  %3043 = vmatpush1.bf16.msra.mxu1 %v13807_v50  ;;  %v2855_v62 = vpop.f32.mrb[10].mxu1  ;;  %v17515_v1 = vpop.f32.mrb[2].mxu0  ;;  %v1299_v50 = vld [vmem:[%s17096_s15 + $0x338] sm:$0xff] }
 0x38a   : > { %v3134_v4 = vmul.f32 1.442695, %v15360_v56  ;;  %v15362_v6 = vadd.f32 %v2855_v62, %v1457_v49  ;;  %v2857_v8 = vpop.f32.mrb[11].mxu1  ;;  %v17517_v9 = vpop.f32.mrb[3].mxu0  ;;  %3044 = vmatprep.subr.bf16.mxu1 %v13816_v52  ;;  %vm3118_vm8 = vcmp.gt.f32.partialorder %v15360_v56, 0.0  ;;  %v1295_v49 = vld [vmem:[%s17096_s15 + $0x318] sm:$0xff] }
 0x38b   : > { %v3136_v0 = vmul.f32 1.442695, %v15361_v61  ;;  %v15363_v3 = vadd.f32 %v2857_v8, %v1461_v51  ;;  %vm3119_vm9 = vcmp.gt.f32.partialorder %v15361_v61, 0.0  ;;  %v13863_v12 = vcombine.low %v1295_v49, %v1299_v50 }
 0x38c   : > { %16150 = vpow2.f32 %v3134_v4  ;;  %v3150_v13 = vmul.f32 1.442695, %v15362_v6  ;;  %vm3126_vm10 = vcmp.gt.f32.partialorder %v15362_v6, 0.0  ;;  %v1307_v4 = vld [vmem:[%s17096_s15 + $0x378] sm:$0xff] }
 0x38d   : > { %16152 = vpow2.f32 %v3136_v0  ;;  %v3152_v14 = vmul.f32 1.442695, %v15363_v3  ;;  %3045 = vmatpush1.bf16.msra.mxu1 %v13815_v2  ;;  %vm3127_vm11 = vcmp.gt.f32.partialorder %v15363_v3, 0.0  ;;  %v1303_v2 = vld [vmem:[%s17096_s15 + $0x358] sm:$0xff] }
 0x38e   : > { %16154 = vpow2.f32 %v3150_v13  ;;  %3046 = vmatprep.subr.bf16.mxu1 %v13824_v63  ;;  %v3510_v63 = vld [vmem:[%s17106_s5 + $0x880] sm:$0xff]  ;;  %v1311_v13 = vld [vmem:[%s17096_s15 + $0x398] sm:$0xff] }
 0x38f   : > { %16156 = vpow2.f32 %v3152_v14  ;;  %v1315_v14 = vld [vmem:[%s17096_s15 + $0x3b8] sm:$0xff] }
 0x390   : > { %v13879_v35 = vcombine.low %v1311_v13, %v1315_v14 }
 0x391   : > { %3047 = vmatpush1.bf16.msra.mxu1 %v13823_v15 }
 0x392   : > { %3048 = vmatprep.subr.bf16.mxu1 %v13832_v16  ;;  %v3526_v16 = vld [vmem:[%s17106_s5 + $0x900] sm:$0xff] }
 0x393   : > { %v14321_v5 = vcombine.low %v3526_v16, %v3534_v17 }
 0x395   : > { %3049 = vmatpush1.bf16.msra.mxu1 %v13831_v23  ;;  %v17546_v23 = vld [vmem:[%s17106_s5 + $0x1040] sm:$0xff] }
 0x396   : > { %v16151_v28 = vpop.eup %16150  ;;  %3050 = vmatprep.subr.bf16.mxu1 %v13840_v24  ;;  %v13871_v24 = vcombine.low %v1303_v2, %v1307_v4  ;;  %v14545_v26 = vcombine.low %v17543_v22, %v17546_v23 }
 0x397   : > { %v16153_v30 = vpop.eup %16152  ;;  %v14017_v32 = vadd.f32 -1.0, %v16151_v28  ;;  %v1319_v28 = vld [vmem:[%s17096_s15 + $0x3d8] sm:$0xff] }
 0x398   : > { %v16155_v36 = vpop.eup %16154  ;;  %v14018_v37 = vadd.f32 -1.0, %v16153_v30  ;;  %v1323_v30 = vld [vmem:[%s17096_s15 + $0x3f8] sm:$0xff] }
 0x399   : > { %v16157_v38 = vpop.eup %16156  ;;  %v3182_v39 = vmul.f32 1.6732632, %v14017_v32  ;;  %v14025_v59 = vadd.f32 -1.0, %v16155_v36  ;;  %3051 = vmatpush1.bf16.msra.mxu1 %v13839_v27  ;;  %v13880_v27 = vcombine.high %v1311_v13, %v1315_v14  ;;  %v3542_v32 = vld [vmem:[%s17106_s5 + $0x980] sm:$0xff]  ;;  %v13888_v7 = vcombine.high %v1319_v28, %v1323_v30  ;;  %v1359_v13 = vld [vmem:[%s17096_s15 + $0x518] sm:$0xff] }
 0x39a   : > { %v3183_v41 = vmul.f32 1.6732632, %v14018_v37  ;;  %v14026_v44 = vadd.f32 -1.0, %v16157_v38  ;;  %3052 = vmatprep.subr.bf16.mxu1 %v13848_v29  ;;  %v14322_v29 = vcombine.high %v3526_v16, %v3534_v17  ;;  %v14338_v36 = vcombine.high %v3542_v32, %v3550_v34  ;;  %v1331_v37 = vld [vmem:[%s17096_s15 + $0x438] sm:$0xff]  ;;  %v3558_v38 = vld [vmem:[%s17106_s5 + $0xa00] sm:$0xff] }
 0x39b   : > { %v3198_v47 = vsel %vm3118_vm8, %v15360_v56, %v3182_v39  ;;  %v3190_v48 = vmul.f32 1.6732632, %v14025_v59  ;;  %v13864_v56 = vcombine.high %v1295_v49, %v1299_v50  ;;  %v3566_v39 = vld [vmem:[%s17106_s5 + $0xa40] sm:$0xff]  ;;  %v13887_v59 = vcombine.low %v1319_v28, %v1323_v30  ;;  %v1363_v14 = vld [vmem:[%s17096_s15 + $0x538] sm:$0xff] }
 0x39c   : > { %v3199_v51 = vsel %vm3119_vm9, %v15361_v61, %v3183_v41  ;;  %v3191_v52 = vmul.f32 1.6732632, %v14026_v44  ;;  %v3214_v55 = vmul.f32 1.050701, %v3198_v47  ;;  %v14354_v44 = vcombine.high %v3558_v38, %v3566_v39  ;;  %v1339_v47 = vld [vmem:[%s17096_s15 + $0x478] sm:$0xff]  ;;  %v3582_v49 = vld [vmem:[%s17106_s5 + $0xac0] sm:$0xff] }
 0x39d   : > { %v3206_v20 = vsel %vm3126_vm10, %v15362_v6, %v3190_v48  ;;  %3053 = vmatpush1.bf16.msra.mxu1 %v13847_v40  ;;  %v3215_v61 = vmul.f32 1.050701, %v3199_v51  ;;  %v3518_v6 = vld [vmem:[%s17106_s5 + $0x8c0] sm:$0xff]  ;;  %v14337_v40 = vcombine.low %v3542_v32, %v3550_v34  ;;  %v1367_v28 = vld [vmem:[%s17096_s15 + $0x558] sm:$0xff] }
 0x39e   : > { %v3222_v57 = vmul.f32 1.050701, %v3206_v20  ;;  %v3207_v62 = vsel %vm3127_vm11, %v15363_v3, %v3191_v52  ;;  %3054 = vmatprep.subr.bf16.mxu1 %v13856_v46  ;;  %v13872_v3 = vcombine.high %v1303_v2, %v1307_v4  ;;  %v14306_v15 = vcombine.high %v3510_v63, %v3518_v6  ;;  %v1335_v46 = vld [vmem:[%s17096_s15 + $0x458] sm:$0xff]  ;;  %v3574_v48 = vld [vmem:[%s17106_s5 + $0xa80] sm:$0xff] }
 0x39f   : > { %v3223_v8 = vmul.f32 1.050701, %v3207_v62  ;;  %v14305_v25 = vcombine.low %v3510_v63, %v3518_v6  ;;  %v13904_v51 = vcombine.high %v1335_v46, %v1339_v47  ;;  %v14353_v52 = vcombine.low %v3558_v38, %v3566_v39  ;;  %v1343_v20 = vld [vmem:[%s17096_s15 + $0x498] sm:$0xff]  ;;  %v3598_v62 = vld [vmem:[%s17106_s5 + $0xb40] sm:$0xff] }
 0x3a0   : > { %v17533_v0 = vpack.c.bf16 %v3222_v57, %v3214_v55  ;;  %v14370_v55 = vcombine.high %v3574_v48, %v3582_v49  ;;  %v3590_v57 = vld [vmem:[%s17106_s5 + $0xb00] sm:$0xff]  ;;  %v14369_v4 = vcombine.low %v3574_v48, %v3582_v49 }
 0x3a1   : > { %v17535_v11 = vpack.c.bf16 %v3223_v8, %v3215_v61  ;;  %3055 = vmatpush1.bf16.msra.mxu1 %v13855_v54  ;;  %v1347_v54 = vld [vmem:[%s17096_s15 + $0x4b8] sm:$0xff]  ;;  %v14386_v63 = vcombine.high %v3590_v57, %v3598_v62  ;;  %v3606_v6 = vld [vmem:[%s17106_s5 + $0xb80] sm:$0xff] }
 0x3a2   : > { %3056 = vmatprep.subr.bf16.mxu1 %v13864_v56  ;;  %v13903_v56 = vcombine.low %v1335_v46, %v1339_v47  ;;  %v13912_v2 = vcombine.high %v1343_v20, %v1347_v54  ;;  %v1351_v61 = vld [vmem:[%s17096_s15 + $0x4d8] sm:$0xff]  ;;  %v3622_v16 = vld [vmem:[%s17106_s5 + $0xc00] sm:$0xff] }
 0x3a3   : > { %9498 = vmatprep.mubr.bf16.mxu0 %v17535_v11  ;;  %v1355_v8 = vld [vmem:[%s17096_s15 + $0x4f8] sm:$0xff]  ;;  %v3630_v17 = vld [vmem:[%s17106_s5 + $0xc40] sm:$0xff] }
 0x3a4   : > { %9499 = vmatmul.mubr.bf16.vlgmr.msra.gmra.mrb[4].mxu0 %v17533_v0  ;;  %v14418_v30 = vcombine.high %v3622_v16, %v3630_v17  ;;  %v3638_v32 = vld [vmem:[%s17106_s5 + $0xc80] sm:$0xff]  ;;  %v1387_v46 = vld [vmem:[%s17096_s15 + $0x5f8] sm:$0xff] }
 0x3a5   : > { %3057 = vmatpush1.bf16.msra.mxu1 %v13863_v12  ;;  %9510 = vmatpush1.bf16.msra.mxu0 %v14289_v10  ;;  %v1327_v10 = vld [vmem:[%s17096_s15 + $0x418] sm:$0xff]  ;;  %v13911_v12 = vcombine.low %v1343_v20, %v1347_v54  ;;  %v3646_v34 = vld [vmem:[%s17106_s5 + $0xcc0] sm:$0xff] }
 0x3a6   : > { %3058 = vmatprep.subr.bf16.mxu1 %v13872_v3  ;;  %9511 = vmatprep.subr.bf16.mxu0 %v14306_v15  ;;  %v13896_v41 = vcombine.high %v1327_v10, %v1331_v37  ;;  %v13895_v50 = vcombine.low %v1327_v10, %v1331_v37  ;;  %v14385_v3 = vcombine.low %v3590_v57, %v3598_v62  ;;  %v1375_v10 = vld [vmem:[%s17096_s15 + $0x598] sm:$0xff]  ;;  %v3654_v38 = vld [vmem:[%s17106_s5 + $0xd00] sm:$0xff] }
 0x3a7   : > { %v14434_v37 = vcombine.high %v3638_v32, %v3646_v34  ;;  %v3662_v39 = vld [vmem:[%s17106_s5 + $0xd40] sm:$0xff]  ;;  %v1391_v20 = vld [vmem:[%s17096_s15 + $0x618] sm:$0xff] }
 0x3a8   : > { %v14450_v47 = vcombine.high %v3654_v38, %v3662_v39  ;;  %v3670_v48 = vld [vmem:[%s17106_s5 + $0xd80] sm:$0xff]  ;;  %v1395_v54 = vld [vmem:[%s17096_s15 + $0x638] sm:$0xff] }
 0x3a9   : > { %3059 = vmatpush1.bf16.msra.mxu1 %v13871_v24  ;;  %9512 = vmatpush1.bf16.msra.mxu0 %v14305_v25  ;;  %v13919_v24 = vcombine.low %v1351_v61, %v1355_v8  ;;  %v13928_v25 = vcombine.high %v1359_v13, %v1363_v14  ;;  %v3678_v49 = vld [vmem:[%s17106_s5 + $0xdc0] sm:$0xff] }
 0x3aa   : > { %3060 = vmatprep.subr.bf16.mxu1 %v13880_v27  ;;  %9513 = vmatprep.subr.bf16.mxu0 %v14322_v29  ;;  %v1371_v29 = vld [vmem:[%s17096_s15 + $0x578] sm:$0xff]  ;;  %v3686_v57 = vld [vmem:[%s17106_s5 + $0xe00] sm:$0xff] }
 0x3ab   : > { %v3694_v62 = vld [vmem:[%s17106_s5 + $0xe40] sm:$0xff] }
 0x3ad   : > { %3061 = vmatpush1.bf16.msra.mxu1 %v13879_v35  ;;  %9514 = vmatpush1.bf16.msra.mxu0 %v14321_v5  ;;  %v13927_v35 = vcombine.low %v1359_v13, %v1363_v14  ;;  %v13936_v5 = vcombine.high %v1367_v28, %v1371_v29  ;;  %v1407_v13 = vld [vmem:[%s17096_s15 + $0x698] sm:$0xff] }
 0x3ae   : > { %3062 = vmatprep.subr.bf16.mxu1 %v13888_v7  ;;  %9515 = vmatprep.subr.bf16.mxu0 %v14338_v36  ;;  %v14417_v7 = vcombine.low %v3622_v16, %v3630_v17  ;;  %v1379_v36 = vld [vmem:[%s17096_s15 + $0x5b8] sm:$0xff]  ;;  %v3718_v16 = vld [vmem:[%s17106_s5 + $0xf00] sm:$0xff] }
 0x3af   : > { %v1411_v14 = vld [vmem:[%s17096_s15 + $0x6b8] sm:$0xff]  ;;  %v3726_v17 = vld [vmem:[%s17106_s5 + $0xf40] sm:$0xff] }
 0x3b1   : > { %3063 = vmatpush1.bf16.msra.mxu1 %v13887_v59  ;;  %9516 = vmatpush1.bf16.msra.mxu0 %v14337_v40  ;;  %v13935_v59 = vcombine.low %v1367_v28, %v1371_v29  ;;  %v13944_v40 = vcombine.high %v1375_v10, %v1379_v36  ;;  %v1415_v28 = vld [vmem:[%s17096_s15 + $0x6d8] sm:$0xff] }
 0x3b2   : > { %3075 = vmatprep.subr.bf16.mxu1 %v13896_v41  ;;  %9517 = vmatprep.subr.bf16.mxu0 %v14354_v44  ;;  %v14433_v41 = vcombine.low %v3638_v32, %v3646_v34  ;;  %v1383_v44 = vld [vmem:[%s17096_s15 + $0x5d8] sm:$0xff]  ;;  %v3734_v32 = vld [vmem:[%s17106_s5 + $0xf80] sm:$0xff] }
 0x3b3   : > { %v1419_v29 = vld [vmem:[%s17096_s15 + $0x6f8] sm:$0xff]  ;;  %v3742_v34 = vld [vmem:[%s17106_s5 + $0xfc0] sm:$0xff] }
 0x3b4   : > { %3065 = vmatmul.mubr.bf16.vlgmr.msra.gmra.mrb[20].mxu1 %v17288_v58  ;;  %v3614_v58 = vld [vmem:[%s17106_s5 + $0xbc0] sm:$0xff] }
 0x3b5   : > { %3076 = vmatpush1.bf16.msra.mxu1 %v13895_v50  ;;  %3107 = vmatprep.mubr.bf16.mxu1 %v17341_v43  ;;  %v13920_v43 = vcombine.high %v1351_v61, %v1355_v8  ;;  %v14402_v15 = vcombine.high %v3606_v6, %v3614_v58  ;;  %v14401_v27 = vcombine.low %v3606_v6, %v3614_v58  ;;  %v1399_v61 = vld [vmem:[%s17096_s15 + $0x658] sm:$0xff]  ;;  %v3702_v6 = vld [vmem:[%s17106_s5 + $0xe80] sm:$0xff] }
 0x3b6   : > { %3077 = vmatprep.subr.bf16.mxu1 %v13904_v51  ;;  %9518 = vmatpush1.bf16.msra.mxu0 %v14353_v52  ;;  %v13943_v50 = vcombine.low %v1375_v10, %v1379_v36  ;;  %v13952_v51 = vcombine.high %v1383_v44, %v1387_v46  ;;  %v14449_v52 = vcombine.low %v3654_v38, %v3662_v39  ;;  %v1403_v8 = vld [vmem:[%s17096_s15 + $0x678] sm:$0xff]  ;;  %v3710_v58 = vld [vmem:[%s17106_s5 + $0xec0] sm:$0xff] }
 0x3b7   : > { %9519 = vmatprep.subr.bf16.mxu0 %v14370_v55  ;;  %v14466_v55 = vcombine.high %v3670_v48, %v3678_v49  ;;  %v1423_v10 = vld [vmem:[%s17096_s15 + $0x718] sm:$0xff]  ;;  %v13983_v38 = vcombine.low %v1415_v28, %v1419_v29 }
 0x3b8   : > { %v1427_v36 = vld [vmem:[%s17096_s15 + $0x738] sm:$0xff] }
 0x3b9   : > { %3078 = vmatpush1.bf16.msra.mxu1 %v13903_v56  ;;  %v13951_v56 = vcombine.low %v1383_v44, %v1387_v46  ;;  %v13992_v39 = vcombine.high %v1423_v10, %v1427_v36  ;;  %v14546_v44 = vcombine.high %v17543_v22, %v17546_v23  ;;  %v13991_v46 = vcombine.low %v1423_v10, %v1427_v36  ;;  %v3351_v36 = vld [vmem:[%s17106_s5 + $0x388] sm:$0xff] }
 0x3ba   : > { %3079 = vmatprep.subr.bf16.mxu1 %v13912_v2  ;;  %9520 = vmatpush1.bf16.msra.mxu0 %v14369_v4  ;;  %v13960_v2 = vcombine.high %v1391_v20, %v1395_v54  ;;  %v14465_v4 = vcombine.low %v3670_v48, %v3678_v49  ;;  %v1439_v48 = vld [vmem:[%s17096_s15 + $0x798] sm:$0xff] }
 0x3bb   : > { %9521 = vmatprep.subr.bf16.mxu0 %v14386_v63  ;;  %v14482_v63 = vcombine.high %v3686_v57, %v3694_v62  ;;  %v1443_v49 = vld [vmem:[%s17096_s15 + $0x7b8] sm:$0xff] }
 0x3bd   : > { %3080 = vmatpush1.bf16.msra.mxu1 %v13911_v12  ;;  %v13959_v12 = vcombine.low %v1391_v20, %v1395_v54  ;;  %v1451_v20 = vld [vmem:[%s17096_s15 + $0x7f8] sm:$0xff]  ;;  %v14007_v54 = vcombine.low %v1439_v48, %v1443_v49 }
 0x3be   : > { %3081 = vmatprep.subr.bf16.mxu1 %v13920_v43  ;;  %9522 = vmatpush1.bf16.msra.mxu0 %v14385_v3  ;;  %v13968_v43 = vcombine.high %v1399_v61, %v1403_v8  ;;  %v14481_v3 = vcombine.low %v3686_v57, %v3694_v62  ;;  %v3239_v57 = vld [vmem:[%s17106_s5 + $0x8] sm:$0xff] }
 0x3bf   : > { %9523 = vmatprep.subr.bf16.mxu0 %v14402_v15  ;;  %v14498_v15 = vcombine.high %v3702_v6, %v3710_v58  ;;  %v3247_v62 = vld [vmem:[%s17106_s5 + $0x48] sm:$0xff] }
 0x3c1   : > { %3082 = vmatpush1.bf16.msra.mxu1 %v13919_v24  ;;  %v13967_v24 = vcombine.low %v1399_v61, %v1403_v8  ;;  %v3263_v61 = vld [vmem:[%s17106_s5 + $0xc8] sm:$0xff]  ;;  %v14035_v8 = vcombine.low %v3239_v57, %v3247_v62 }
 0x3c2   : > { %3083 = vmatprep.subr.bf16.mxu1 %v13928_v25  ;;  %9524 = vmatpush1.bf16.msra.mxu0 %v14401_v27  ;;  %v13976_v25 = vcombine.high %v1407_v13, %v1411_v14  ;;  %v14497_v27 = vcombine.low %v3702_v6, %v3710_v58  ;;  %v3271_v6 = vld [vmem:[%s17106_s5 + $0x108] sm:$0xff] }
 0x3c3   : > { %9525 = vmatprep.subr.bf16.mxu0 %v14418_v30  ;;  %v14514_v30 = vcombine.high %v3718_v16, %v3726_v17  ;;  %v3279_v58 = vld [vmem:[%s17106_s5 + $0x148] sm:$0xff] }
 0x3c5   : > { %3084 = vmatpush1.bf16.msra.mxu1 %v13927_v35  ;;  %v13975_v35 = vcombine.low %v1407_v13, %v1411_v14  ;;  %v3295_v13 = vld [vmem:[%s17106_s5 + $0x1c8] sm:$0xff]  ;;  %v14067_v14 = vcombine.low %v3271_v6, %v3279_v58 }
 0x3c6   : > { %3085 = vmatprep.subr.bf16.mxu1 %v13936_v5  ;;  %9526 = vmatpush1.bf16.msra.mxu0 %v14417_v7  ;;  %v13984_v5 = vcombine.high %v1415_v28, %v1419_v29  ;;  %v14513_v7 = vcombine.low %v3718_v16, %v3726_v17  ;;  %v3303_v16 = vld [vmem:[%s17106_s5 + $0x208] sm:$0xff] }
 0x3c7   : > { %9527 = vmatprep.subr.bf16.mxu0 %v14434_v37  ;;  %v14530_v37 = vcombine.high %v3734_v32, %v3742_v34  ;;  %v3311_v17 = vld [vmem:[%s17106_s5 + $0x248] sm:$0xff] }
 0x3c8   : > { %v14099_v28 = vcombine.low %v3303_v16, %v3311_v17 }
 0x3c9   : > { %3086 = vmatpush1.bf16.msra.mxu1 %v13935_v59  ;;  %v14529_v59 = vcombine.low %v3734_v32, %v3742_v34  ;;  %v3343_v32 = vld [vmem:[%s17106_s5 + $0x348] sm:$0xff]  ;;  %v1465_v34 = vrot.slane %v17501_v45, %v17314_v31 }
 0x3ca   : > { %3087 = vmatprep.subr.bf16.mxu1 %v13944_v40  ;;  %9528 = vmatpush1.bf16.msra.mxu0 %v14433_v41  ;;  %v1431_v40 = vld [vmem:[%s17096_s15 + $0x758] sm:$0xff] }
 0x3cb   : > { %9529 = vmatprep.subr.bf16.mxu0 %v14450_v47  ;;  %v1435_v41 = vld [vmem:[%s17096_s15 + $0x778] sm:$0xff] }
 0x3cc   : > { %v14000_v47 = vcombine.high %v1431_v40, %v1435_v41 }
 0x3cd   : > { %3088 = vmatpush1.bf16.msra.mxu1 %v13943_v50  ;;  %v13999_v50 = vcombine.low %v1431_v40, %v1435_v41 }
 0x3ce   : > { %3089 = vmatprep.subr.bf16.mxu1 %v13952_v51  ;;  %9530 = vmatpush1.bf16.msra.mxu0 %v14449_v52  ;;  %v14008_v51 = vcombine.high %v1439_v48, %v1443_v49  ;;  %v1447_v52 = vld [vmem:[%s17096_s15 + $0x7d8] sm:$0xff] }
 0x3cf   : > { %9531 = vmatprep.subr.bf16.mxu0 %v14466_v55  ;;  %v14016_v55 = vcombine.high %v1447_v52, %v1451_v20 }
 0x3d1   : > { %3090 = vmatpush1.bf16.msra.mxu1 %v13951_v56  ;;  %v14015_v56 = vcombine.low %v1447_v52, %v1451_v20 }
 0x3d2   : > { %3091 = vmatprep.subr.bf16.mxu1 %v13960_v2  ;;  %9532 = vmatpush1.bf16.msra.mxu0 %v14465_v4  ;;  %v14036_v2 = vcombine.high %v3239_v57, %v3247_v62  ;;  %v3255_v4 = vld [vmem:[%s17106_s5 + $0x88] sm:$0xff] }
 0x3d3   : > { %9533 = vmatprep.subr.bf16.mxu0 %v14482_v63  ;;  %v14052_v63 = vcombine.high %v3255_v4, %v3263_v61  ;;  %v3383_v57 = vld [vmem:[%s17106_s5 + $0x488] sm:$0xff] }
 0x3d4   : > { %v3391_v62 = vld [vmem:[%s17106_s5 + $0x4c8] sm:$0xff] }
 0x3d5   : > { %3092 = vmatpush1.bf16.msra.mxu1 %v13959_v12  ;;  %v14051_v12 = vcombine.low %v3255_v4, %v3263_v61  ;;  %v3399_v4 = vld [vmem:[%s17106_s5 + $0x508] sm:$0xff] }
 0x3d6   : > { %3093 = vmatprep.subr.bf16.mxu1 %v13968_v43  ;;  %9534 = vmatpush1.bf16.msra.mxu0 %v14481_v3  ;;  %v14068_v43 = vcombine.high %v3271_v6, %v3279_v58  ;;  %v3287_v3 = vld [vmem:[%s17106_s5 + $0x188] sm:$0xff] }
 0x3d7   : > { %9535 = vmatprep.subr.bf16.mxu0 %v14498_v15  ;;  %v14084_v15 = vcombine.high %v3287_v3, %v3295_v13  ;;  %v3407_v61 = vld [vmem:[%s17106_s5 + $0x548] sm:$0xff] }
 0x3d8   : > { %v14196_v6 = vcombine.high %v3399_v4, %v3407_v61 }
 0x3d9   : > { %3094 = vmatpush1.bf16.msra.mxu1 %v13967_v24  ;;  %v14100_v24 = vcombine.high %v3303_v16, %v3311_v17 }
 0x3da   : > { %3095 = vmatprep.subr.bf16.mxu1 %v13976_v25  ;;  %9536 = vmatpush1.bf16.msra.mxu0 %v14497_v27  ;;  %v3319_v25 = vld [vmem:[%s17106_s5 + $0x288] sm:$0xff] }
 0x3db   : > { %9537 = vmatprep.subr.bf16.mxu0 %v14514_v30  ;;  %v3327_v27 = vld [vmem:[%s17106_s5 + $0x2c8] sm:$0xff] }
 0x3dc   : > { %v14116_v29 = vcombine.high %v3319_v25, %v3327_v27  ;;  %v3335_v30 = vld [vmem:[%s17106_s5 + $0x308] sm:$0xff] }
 0x3dd   : > { %3096 = vmatpush1.bf16.msra.mxu1 %v13975_v35  ;;  %v1469_v35 = vrot.slane %v17501_v45, %v17317_v33  ;;  %v14131_v41 = vcombine.low %v3335_v30, %v3343_v32 }
 0x3de   : > { %3097 = vmatprep.subr.bf16.mxu1 %v13984_v5  ;;  %9538 = vmatpush1.bf16.msra.mxu0 %v14513_v7  ;;  %v14115_v5 = vcombine.low %v3319_v25, %v3327_v27  ;;  %v14132_v7 = vcombine.high %v3335_v30, %v3343_v32  ;;  %v3431_v30 = vld [vmem:[%s17106_s5 + $0x608] sm:$0xff] }
 0x3df   : > { %9539 = vmatprep.subr.bf16.mxu0 %v14530_v37  ;;  %v3359_v37 = vld [vmem:[%s17106_s5 + $0x3c8] sm:$0xff] }
 0x3e0   : > { %v14148_v45 = vcombine.high %v3351_v36, %v3359_v37  ;;  %v3439_v32 = vld [vmem:[%s17106_s5 + $0x648] sm:$0xff] }
 0x3e1   : > { %3098 = vmatpush1.bf16.msra.mxu1 %v13983_v38 }
 0x3e2   : > { %3099 = vmatprep.subr.bf16.mxu1 %v13992_v39  ;;  %9540 = vmatpush1.bf16.msra.mxu0 %v14529_v59 }
 0x3e3   : > { %9552 = vmatprep.subr.bf16.mxu0 %v14546_v44 }
 0x3e5   : > { %3100 = vmatpush1.bf16.msra.mxu1 %v13991_v46 }
 0x3e6   : > { %3101 = vmatprep.subr.bf16.mxu1 %v14000_v47 }
 0x3e9   : > { %3102 = vmatpush1.bf16.msra.mxu1 %v13999_v50  ;;  %v3367_v50 = vld [vmem:[%s17106_s5 + $0x408] sm:$0xff] }
 0x3ea   : > { %3103 = vmatprep.subr.bf16.mxu1 %v14008_v51  ;;  %v3375_v51 = vld [vmem:[%s17106_s5 + $0x448] sm:$0xff] }
 0x3ed   : > { %3104 = vmatpush1.bf16.msra.mxu1 %v14007_v54  ;;  %v14147_v54 = vcombine.low %v3351_v36, %v3359_v37 }
 0x3ee   : > { %3105 = vmatprep.subr.bf16.mxu1 %v14016_v55  ;;  %v14164_v55 = vcombine.high %v3367_v50, %v3375_v51 }
 0x3f1   : > { %3106 = vmatpush1.bf16.msra.mxu1 %v14015_v56  ;;  %v14163_v56 = vcombine.low %v3367_v50, %v3375_v51  ;;  %v3463_v51 = vld [vmem:[%s17106_s5 + $0x708] sm:$0xff] }
 0x3f2   : > { %9638 = vmatprep.subr.bf16.mxu1 %v14036_v2  ;;  %v14180_v2 = vcombine.high %v3383_v57, %v3391_v62 }
 0x3f4   : > { %3108 = vmatmul.mubr.bf16.vlgmr.msra.gmra.mrb[20].mxu1 %v17339_v42  ;;  %v14083_v42 = vcombine.low %v3287_v3, %v3295_v13  ;;  %v3423_v3 = vld [vmem:[%s17106_s5 + $0x5c8] sm:$0xff] }
 0x3f5   : > { %9639 = vmatpush1.bf16.msra.mxu1 %v14035_v8  ;;  %9670 = vmatprep.mubr.bf16.mxu1 %v17535_v11  ;;  %v14179_v8 = vcombine.low %v3383_v57, %v3391_v62 }
 0x3f6   : > { %9640 = vmatprep.subr.bf16.mxu1 %v14052_v63 }
 0x3f9   : > { %9641 = vmatpush1.bf16.msra.mxu1 %v14051_v12 }
 0x3fa   : > { %9642 = vmatprep.subr.bf16.mxu1 %v14068_v43  ;;  %v3415_v43 = vld [vmem:[%s17106_s5 + $0x588] sm:$0xff] }
 0x3fb   : > { %v14212_v27 = vcombine.high %v3415_v43, %v3423_v3 }
 0x3fd   : > { %9643 = vmatpush1.bf16.msra.mxu1 %v14067_v14 }
 0x3fe   : > { %9644 = vmatprep.subr.bf16.mxu1 %v14084_v15 }
 0x401   : > { %9645 = vmatpush1.bf16.msra.mxu1 %v14083_v42  ;;  %v14195_v42 = vcombine.low %v3399_v4, %v3407_v61  ;;  %v3487_v4 = vld [vmem:[%s17106_s5 + $0x7c8] sm:$0xff]  ;;  %v3798_v61 = vld [vmem:[%s17106_s5 + $0x1180] sm:$0xff] }
 0x402   : > { %9646 = vmatprep.subr.bf16.mxu1 %v14100_v24 }
 0x405   : > { %9647 = vmatpush1.bf16.msra.mxu1 %v14099_v28 }
 0x406   : > { %9648 = vmatprep.subr.bf16.mxu1 %v14116_v29 }
 0x407   : > { %v2937_v10 = vpop.f32.mrb[12].mxu1 }
 0x408   : > { %v15364_v38 = vadd.f32 %v2937_v10, %v1465_v34  ;;  %v2939_v39 = vpop.f32.mrb[13].mxu1 }
 0x409   : > { %v15365_v59 = vadd.f32 %v2939_v39, %v1469_v35  ;;  %v2941_v40 = vpop.f32.mrb[14].mxu1  ;;  %9649 = vmatpush1.bf16.msra.mxu1 %v14115_v5  ;;  %v3447_v39 = vld [vmem:[%s17106_s5 + $0x688] sm:$0xff] }
 0x40a   : > { %v3138_v44 = vmul.f32 1.442695, %v15364_v38  ;;  %v15366_v46 = vadd.f32 %v2941_v40, %v1465_v34  ;;  %v2943_v47 = vpop.f32.mrb[15].mxu1  ;;  %9650 = vmatprep.subr.bf16.mxu1 %v14132_v7  ;;  %vm3120_vm12 = vcmp.gt.f32.partialorder %v15364_v38, 0.0  ;;  %v14211_v7 = vcombine.low %v3415_v43, %v3423_v3  ;;  %v3455_v40 = vld [vmem:[%s17106_s5 + $0x6c8] sm:$0xff]  ;;  %v3822_v43 = vld [vmem:[%s17106_s5 + $0x1240] sm:$0xff] }
 0x40b   : > { %v3140_v48 = vmul.f32 1.442695, %v15365_v59  ;;  %v15367_v49 = vadd.f32 %v2943_v47, %v1469_v35  ;;  %vm3121_vm13 = vcmp.gt.f32.partialorder %v15365_v59, 0.0  ;;  %v3774_v47 = vld [vmem:[%s17106_s5 + $0x10c0] sm:$0xff] }
 0x40c   : > { %16158 = vpow2.f32 %v3138_v44  ;;  %v3154_v52 = vmul.f32 1.442695, %v15366_v46  ;;  %vm3128_vm14 = vcmp.gt.f32.partialorder %v15366_v46, 0.0  ;;  %v3766_v44 = vld [vmem:[%s17106_s5 + $0x1080] sm:$0xff] }
 0x40d   : > { %16160 = vpow2.f32 %v3140_v48  ;;  %v3156_v20 = vmul.f32 1.442695, %v15367_v49  ;;  %9651 = vmatpush1.bf16.msra.mxu1 %v14131_v41  ;;  %vm3129_vm15 = vcmp.gt.f32.partialorder %v15367_v49, 0.0  ;;  %v14227_v48 = vcombine.low %v3431_v30, %v3439_v32 }
 0x40e   : > { %16162 = vpow2.f32 %v3154_v52  ;;  %9652 = vmatprep.subr.bf16.mxu1 %v14148_v45  ;;  %v14562_v50 = vcombine.high %v3766_v44, %v3774_v47  ;;  %v3471_v52 = vld [vmem:[%s17106_s5 + $0x748] sm:$0xff]  ;;  %v14561_v57 = vcombine.low %v3766_v44, %v3774_v47 }
 0x40f   : > { %16164 = vpow2.f32 %v3156_v20  ;;  %v3782_v20 = vld [vmem:[%s17106_s5 + $0x1100] sm:$0xff]  ;;  %v14260_v62 = vcombine.high %v3463_v51, %v3471_v52 }
 0x411   : > { %9653 = vmatpush1.bf16.msra.mxu1 %v14147_v54  ;;  %v3790_v54 = vld [vmem:[%s17106_s5 + $0x1140] sm:$0xff] }
 0x412   : > { %9654 = vmatprep.subr.bf16.mxu1 %v14164_v55  ;;  %v14243_v55 = vcombine.low %v3447_v39, %v3455_v40 }
 0x415   : > { %9655 = vmatpush1.bf16.msra.mxu1 %v14163_v56  ;;  %v14578_v56 = vcombine.high %v3782_v20, %v3790_v54 }
 0x416   : > { %v16159_v63 = vpop.eup %16158  ;;  %9656 = vmatprep.subr.bf16.mxu1 %v14180_v2  ;;  %v3479_v2 = vld [vmem:[%s17106_s5 + $0x788] sm:$0xff] }
 0x417   : > { %v16161_v58 = vpop.eup %16160  ;;  %v14019_v12 = vadd.f32 -1.0, %v16159_v63  ;;  %v14259_v63 = vcombine.low %v3463_v51, %v3471_v52  ;;  %v14276_v22 = vcombine.high %v3479_v2, %v3487_v4  ;;  %v14275_v3 = vcombine.low %v3479_v2, %v3487_v4  ;;  %v3886_v51 = vld [vmem:[%s17106_s5 + $0x1440] sm:$0xff] }
 0x418   : > { %v16163_v13 = vpop.eup %16162  ;;  %v14020_v14 = vadd.f32 -1.0, %v16161_v58  ;;  %v3503_v58 = vld [vmem:[%s17106_s5 + $0x848] sm:$0xff]  ;;  %v3894_v2 = vld [vmem:[%s17106_s5 + $0x1480] sm:$0xff] }
 0x419   : > { %v16165_v15 = vpop.eup %16164  ;;  %v3184_v16 = vmul.f32 1.6732632, %v14019_v12  ;;  %v14027_v17 = vadd.f32 -1.0, %v16163_v13  ;;  %9657 = vmatpush1.bf16.msra.mxu1 %v14179_v8  ;;  %v3806_v8 = vld [vmem:[%s17106_s5 + $0x11c0] sm:$0xff] }
 0x41a   : > { %v3185_v24 = vmul.f32 1.6732632, %v14020_v14  ;;  %v14028_v25 = vadd.f32 -1.0, %v16165_v15  ;;  %9658 = vmatprep.subr.bf16.mxu1 %v14196_v6  ;;  %v14577_v6 = vcombine.low %v3782_v20, %v3790_v54  ;;  %v14594_v23 = vcombine.high %v3798_v61, %v3806_v8  ;;  %v3814_v12 = vld [vmem:[%s17106_s5 + $0x1200] sm:$0xff] }
 0x41b   : > { %v3200_v28 = vsel %vm3120_vm12, %v15364_v38, %v3184_v16  ;;  %v3192_v29 = vmul.f32 1.6732632, %v14027_v17  ;;  %v14228_v38 = vcombine.high %v3431_v30, %v3439_v32  ;;  %v14593_v13 = vcombine.low %v3798_v61, %v3806_v8  ;;  %v3511_v16 = vld [vmem:[%s17106_s5 + $0x888] sm:$0xff]  ;;  %v3902_v4 = vld [vmem:[%s17106_s5 + $0x14c0] sm:$0xff] }
 0x41c   : > { %v3201_v34 = vsel %vm3121_vm13, %v15365_v59, %v3185_v24  ;;  %v3193_v35 = vmul.f32 1.6732632, %v14028_v25  ;;  %v3216_v10 = vmul.f32 1.050701, %v3200_v28  ;;  %v14610_v15 = vcombine.high %v3814_v12, %v3822_v43  ;;  %v3519_v17 = vld [vmem:[%s17106_s5 + $0x8c8] sm:$0xff]  ;;  %v3838_v24 = vld [vmem:[%s17106_s5 + $0x12c0] sm:$0xff] }
 0x41d   : > { %v3208_v5 = vsel %vm3128_vm14, %v15366_v46, %v3192_v29  ;;  %9659 = vmatpush1.bf16.msra.mxu1 %v14195_v42  ;;  %v3217_v59 = vmul.f32 1.050701, %v3201_v34  ;;  %v3830_v42 = vld [vmem:[%s17106_s5 + $0x1280] sm:$0xff]  ;;  %v14308_v28 = vcombine.high %v3511_v16, %v3519_v17  ;;  %v3527_v30 = vld [vmem:[%s17106_s5 + $0x908] sm:$0xff]  ;;  %v17701_v8 = vsub.s32 5, %v17271_v18 }
 0x41e   : > { %v3224_v36 = vmul.f32 1.050701, %v3208_v5  ;;  %v3209_v37 = vsel %vm3129_vm15, %v15367_v49, %v3193_v35  ;;  %9660 = vmatprep.subr.bf16.mxu1 %v14212_v27  ;;  %v14244_v49 = vcombine.high %v3447_v39, %v3455_v40  ;;  %v14609_v27 = vcombine.low %v3814_v12, %v3822_v43  ;;  %v3535_v32 = vld [vmem:[%s17106_s5 + $0x948] sm:$0xff]  ;;  %v3846_v34 = vld [vmem:[%s17106_s5 + $0x1300] sm:$0xff] }
 0x41f   : > { %v3225_v41 = vmul.f32 1.050701, %v3209_v37  ;;  %v14626_v29 = vcombine.high %v3830_v42, %v3838_v24  ;;  %v3854_v35 = vld [vmem:[%s17106_s5 + $0x1340] sm:$0xff]  ;;  %v14307_v5 = vcombine.low %v3511_v16, %v3519_v17  ;;  %v3543_v37 = vld [vmem:[%s17106_s5 + $0x988] sm:$0xff] }
 0x420   : > { %v17654_v45 = vpack.c.bf16 %v3224_v36, %v3216_v10  ;;  %v14324_v10 = vcombine.high %v3527_v30, %v3535_v32  ;;  %v14642_v36 = vcombine.high %v3846_v34, %v3854_v35  ;;  %v3862_v39 = vld [vmem:[%s17106_s5 + $0x1380] sm:$0xff] }
 0x421   : > { %v17656_v46 = vpack.c.bf16 %v3225_v41, %v3217_v59  ;;  %9661 = vmatpush1.bf16.msra.mxu1 %v14211_v7  ;;  %v14625_v7 = vcombine.low %v3830_v42, %v3838_v24  ;;  %v3870_v40 = vld [vmem:[%s17106_s5 + $0x13c0] sm:$0xff]  ;;  %v14323_v59 = vcombine.low %v3527_v30, %v3535_v32  ;;  %v14641_v41 = vcombine.low %v3846_v34, %v3854_v35  ;;  %v3607_v24 = vld [vmem:[%s17106_s5 + $0xb88] sm:$0xff] }
 0x422   : > { %9662 = vmatprep.subr.bf16.mxu1 %v14228_v38  ;;  %v3551_v38 = vld [vmem:[%s17106_s5 + $0x9c8] sm:$0xff]  ;;  %v14658_v47 = vcombine.high %v3862_v39, %v3870_v40  ;;  %v14657_v20 = vcombine.low %v3862_v39, %v3870_v40  ;;  %v3910_v43 = vld [vmem:[%s17106_s5 + $0x1500] sm:$0xff] }
 0x423   : > { %9541 = vmatprep.mubr.bf16.mxu0 %v17656_v46  ;;  %v14340_v44 = vcombine.high %v3543_v37, %v3551_v38  ;;  %v14339_v52 = vcombine.low %v3543_v37, %v3551_v38  ;;  %v3934_v30 = vld [vmem:[%s17106_s5 + $0x15c0] sm:$0xff] }
 0x424   : > { %9542 = vmatmul.mubr.bf16.vlgmr.msra.gmra.mrb[4].mxu0 %v17654_v45 }
 0x425   : > { %9663 = vmatpush1.bf16.msra.mxu1 %v14227_v48  ;;  %9553 = vmatpush1.bf16.msra.mxu0 %v14545_v26  ;;  %v3495_v26 = vld [vmem:[%s17106_s5 + $0x808] sm:$0xff] }
 0x426   : > { %9664 = vmatprep.subr.bf16.mxu1 %v14244_v49  ;;  %9554 = vmatprep.subr.bf16.mxu0 %v14562_v50  ;;  %v14292_v14 = vcombine.high %v3495_v26, %v3503_v58  ;;  %v14291_v25 = vcombine.low %v3495_v26, %v3503_v58  ;;  %v3559_v48 = vld [vmem:[%s17106_s5 + $0xa08] sm:$0xff]  ;;  %v3878_v50 = vld [vmem:[%s17106_s5 + $0x1400] sm:$0xff]  ;;  %v17706_v58 = vld [vmem:[%s17104_s16] sm:$0xff] }
 0x427   : > { %v3567_v49 = vld [vmem:[%s17106_s5 + $0xa48] sm:$0xff] }
 0x428   : > { %v14356_v54 = vcombine.high %v3559_v48, %v3567_v49  ;;  %v14355_v61 = vcombine.low %v3559_v48, %v3567_v49  ;;  %v3599_v26 = vld [vmem:[%s17106_s5 + $0xb48] sm:$0xff]  ;;  %v3950_v48 = vld [vmem:[%s17106_s5 + $0x1640] sm:$0xff] }
 0x429   : > { %9665 = vmatpush1.bf16.msra.mxu1 %v14243_v55  ;;  %9555 = vmatpush1.bf16.msra.mxu0 %v14561_v57  ;;  %v14674_v55 = vcombine.high %v3878_v50, %v3886_v51  ;;  %v3575_v57 = vld [vmem:[%s17106_s5 + $0xa88] sm:$0xff] }
 0x42a   : > { %9666 = vmatprep.subr.bf16.mxu1 %v14260_v62  ;;  %9556 = vmatprep.subr.bf16.mxu0 %v14578_v56  ;;  %v3583_v62 = vld [vmem:[%s17106_s5 + $0xac8] sm:$0xff]  ;;  %v17696_v56 = vsub.s32 4, %v17271_v18 }
 0x42c   : > { %v1473_v12 = vrot.slane %v17706_v58, %v17696_v56 }
 0x42d   : > { %9667 = vmatpush1.bf16.msra.mxu1 %v14259_v63  ;;  %9557 = vmatpush1.bf16.msra.mxu0 %v14577_v6  ;;  %v14673_v63 = vcombine.low %v3878_v50, %v3886_v51  ;;  %v14372_v6 = vcombine.high %v3575_v57, %v3583_v62 }
 0x42e   : > { %9668 = vmatprep.subr.bf16.mxu1 %v14276_v22  ;;  %9558 = vmatprep.subr.bf16.mxu0 %v14594_v23  ;;  %v14690_v22 = vcombine.high %v3894_v2, %v3902_v4  ;;  %v3591_v23 = vld [vmem:[%s17106_s5 + $0xb08] sm:$0xff] }
 0x42f   : > { %v14388_v16 = vcombine.high %v3591_v23, %v3599_v26  ;;  %v14387_v35 = vcombine.low %v3591_v23, %v3599_v26  ;;  %v3974_v23 = vld [vmem:[%s17106_s5 + $0x1700] sm:$0xff] }
 0x430   : > { %v3982_v26 = vld [vmem:[%s17106_s5 + $0x1740] sm:$0xff] }
 0x431   : > { %9669 = vmatpush1.bf16.msra.mxu1 %v14275_v3  ;;  %9559 = vmatpush1.bf16.msra.mxu0 %v14593_v13  ;;  %v3918_v3 = vld [vmem:[%s17106_s5 + $0x1540] sm:$0xff]  ;;  %v1477_v13 = vrot.slane %v17706_v58, %v17701_v8 }
 0x432   : > { %9681 = vmatprep.subr.bf16.mxu1 %v14292_v14  ;;  %9560 = vmatprep.subr.bf16.mxu0 %v14610_v15  ;;  %v14371_v14 = vcombine.low %v3575_v57, %v3583_v62  ;;  %v14689_v15 = vcombine.low %v3894_v2, %v3902_v4  ;;  %v14706_v42 = vcombine.high %v3910_v43, %v3918_v3  ;;  %v3958_v57 = vld [vmem:[%s17106_s5 + $0x1680] sm:$0xff] }
 0x433   : > { %v3966_v62 = vld [vmem:[%s17106_s5 + $0x16c0] sm:$0xff] }
 0x434   : > { %9671 = vmatmul.mubr.bf16.vlgmr.msra.gmra.mrb[24].mxu1 %v17533_v0 }
 0x435   : > { %9682 = vmatpush1.bf16.msra.mxu1 %v14291_v25  ;;  %9713 = vmatprep.mubr.bf16.mxu1 %v17656_v46  ;;  %v3615_v25 = vld [vmem:[%s17106_s5 + $0xbc8] sm:$0xff] }
 0x436   : > { %9561 = vmatpush1.bf16.msra.mxu0 %v14609_v27  ;;  %9683 = vmatprep.subr.bf16.mxu1 %v14308_v28  ;;  %v14404_v37 = vcombine.high %v3607_v24, %v3615_v25 }
 0x437   : > { %9562 = vmatprep.subr.bf16.mxu0 %v14626_v29  ;;  %v3926_v29 = vld [vmem:[%s17106_s5 + $0x1580] sm:$0xff] }
 0x438   : > { %v14722_v40 = vcombine.high %v3926_v29, %v3934_v30 }
 0x439   : > { %9684 = vmatpush1.bf16.msra.mxu1 %v14307_v5  ;;  %v14705_v5 = vcombine.low %v3910_v43, %v3918_v3  ;;  %v14753_v43 = vcombine.low %v3958_v57, %v3966_v62 }
 0x43a   : > { %9563 = vmatpush1.bf16.msra.mxu0 %v14625_v7  ;;  %9685 = vmatprep.subr.bf16.mxu1 %v14324_v10 }
 0x43b   : > { %9564 = vmatprep.subr.bf16.mxu0 %v14642_v36 }
 0x43d   : > { %9686 = vmatpush1.bf16.msra.mxu1 %v14323_v59  ;;  %v3623_v59 = vld [vmem:[%s17106_s5 + $0xc08] sm:$0xff] }
 0x43e   : > { %9565 = vmatpush1.bf16.msra.mxu0 %v14641_v41  ;;  %9687 = vmatprep.subr.bf16.mxu1 %v14340_v44  ;;  %v3631_v41 = vld [vmem:[%s17106_s5 + $0xc48] sm:$0xff] }
 0x43f   : > { %9566 = vmatprep.subr.bf16.mxu0 %v14658_v47  ;;  %v14419_v2 = vcombine.low %v3623_v59, %v3631_v41 }
 0x441   : > { %9688 = vmatpush1.bf16.msra.mxu1 %v14339_v52  ;;  %v14420_v52 = vcombine.high %v3623_v59, %v3631_v41  ;;  %v4006_v41 = vld [vmem:[%s17106_s5 + $0x1800] sm:$0xff] }
 0x442   : > { %9567 = vmatpush1.bf16.msra.mxu0 %v14657_v20  ;;  %9689 = vmatprep.subr.bf16.mxu1 %v14356_v54 }
 0x443   : > { %9568 = vmatprep.subr.bf16.mxu0 %v14674_v55  ;;  %v3647_v55 = vld [vmem:[%s17106_s5 + $0xcc8] sm:$0xff] }
 0x445   : > { %9690 = vmatpush1.bf16.msra.mxu1 %v14355_v61 }
 0x446   : > { %9569 = vmatpush1.bf16.msra.mxu0 %v14673_v63  ;;  %9691 = vmatprep.subr.bf16.mxu1 %v14372_v6  ;;  %v14754_v63 = vcombine.high %v3958_v57, %v3966_v62  ;;  %v3655_v6 = vld [vmem:[%s17106_s5 + $0xd08] sm:$0xff]  ;;  %v17765_v57 = vld [vmem:[%s17106_s5 + $0x10] sm:$0xff] }
 0x447   : > { %v2980_v17 = vpop.f32.mrb[16].mxu1  ;;  %9570 = vmatprep.subr.bf16.mxu0 %v14690_v22  ;;  %v3663_v22 = vld [vmem:[%s17106_s5 + $0xd48] sm:$0xff]  ;;  %v17768_v62 = vld [vmem:[%s17106_s5 + $0x50] sm:$0xff] }
 0x448   : > { %v2981_v27 = vadd.f32 %v2980_v17, %v1473_v12  ;;  %v2982_v28 = vpop.f32.mrb[17].mxu1  ;;  %v14452_v3 = vcombine.high %v3655_v6, %v3663_v22  ;;  %v3990_v17 = vld [vmem:[%s17106_s5 + $0x1780] sm:$0xff] }
 0x449   : > { %v2983_v32 = vadd.f32 %v2982_v28, %v1477_v13  ;;  %v2984_v34 = vpop.f32.mrb[18].mxu1  ;;  %9692 = vmatpush1.bf16.msra.mxu1 %v14371_v14  ;;  %v3671_v14 = vld [vmem:[%s17106_s5 + $0xd88] sm:$0xff] }
 0x44a   : > { %v17719_v7 = vadd.f32 %v17509_v53, %v2981_v27  ;;  %v2985_v10 = vadd.f32 %v2984_v34, %v1473_v12  ;;  %v2986_v36 = vpop.f32.mrb[19].mxu1  ;;  %9571 = vmatpush1.bf16.msra.mxu0 %v14689_v15  ;;  %9693 = vmatprep.subr.bf16.mxu1 %v14388_v16  ;;  %v3942_v53 = vld [vmem:[%s17106_s5 + $0x1600] sm:$0xff]  ;;  %v3679_v15 = vld [vmem:[%s17106_s5 + $0xdc8] sm:$0xff]  ;;  %v14451_v27 = vcombine.low %v3655_v6, %v3663_v22 }
 0x44b   : > { %v17722_v38 = vadd.f32 %v17513_v60, %v2983_v32  ;;  %v2987_v39 = vadd.f32 %v2986_v36, %v1477_v13  ;;  %9572 = vmatprep.subr.bf16.mxu0 %v14706_v42  ;;  %v14403_v60 = vcombine.low %v3607_v24, %v3615_v25  ;;  %v14738_v54 = vcombine.high %v3942_v53, %v3950_v48  ;;  %v3998_v42 = vld [vmem:[%s17106_s5 + $0x17c0] sm:$0xff]  ;;  %v3687_v36 = vld [vmem:[%s17106_s5 + $0xe08] sm:$0xff] }
 0x44c   : > { %v3142_v44 = vmul.f32 1.442695, %v17719_v7  ;;  %v17728_v47 = vadd.f32 %v17515_v1, %v2985_v10  ;;  %v14721_v1 = vcombine.low %v3926_v29, %v3934_v30  ;;  %v14737_v4 = vcombine.low %v3942_v53, %v3950_v48 }
 0x44d   : > { %v3144_v49 = vmul.f32 1.442695, %v17722_v38  ;;  %v17734_v50 = vadd.f32 %v17517_v9, %v2987_v39  ;;  %9694 = vmatpush1.bf16.msra.mxu1 %v14387_v35  ;;  %v3639_v9 = vld [vmem:[%s17106_s5 + $0xc88] sm:$0xff]  ;;  %v14770_v13 = vcombine.high %v3974_v23, %v3982_v26  ;;  %v14769_v30 = vcombine.low %v3974_v23, %v3982_v26 }
 0x44e   : > { %16166 = vpow2.f32 %v3142_v44  ;;  %v3158_v51 = vmul.f32 1.442695, %v17728_v47  ;;  %9573 = vmatpush1.bf16.msra.mxu0 %v14705_v5  ;;  %9695 = vmatprep.subr.bf16.mxu1 %v14404_v37  ;;  %v14436_v61 = vcombine.high %v3639_v9, %v3647_v55  ;;  %v14435_v12 = vcombine.low %v3639_v9, %v3647_v55  ;;  %v3695_v37 = vld [vmem:[%s17106_s5 + $0xe48] sm:$0xff]  ;;  %v4014_v44 = vld [vmem:[%s17106_s5 + $0x1840] sm:$0xff] }
 0x44f   : > { %16168 = vpow2.f32 %v3144_v49  ;;  %v3160_v20 = vmul.f32 1.442695, %v17734_v50  ;;  %9574 = vmatprep.subr.bf16.mxu0 %v14722_v40  ;;  %v14468_v32 = vcombine.high %v3671_v14, %v3679_v15  ;;  %v14786_v10 = vcombine.high %v3990_v17, %v3998_v42  ;;  %v3719_v26 = vld [vmem:[%s17106_s5 + $0xf08] sm:$0xff] }
 0x450   : > { %16170 = vpow2.f32 %v3158_v51  ;;  %vm3122_vm0 = vcmp.gt.f32.partialorder %v17719_v7, 0.0  ;;  %v14467_v59 = vcombine.low %v3671_v14, %v3679_v15  ;;  %vm3123_vm1 = vcmp.gt.f32.partialorder %v17722_v38, 0.0  ;;  %v4038_v14 = vld [vmem:[%s17106_s5 + $0x1900] sm:$0xff] }
 0x451   : > { %16172 = vpow2.f32 %v3160_v20  ;;  %9696 = vmatpush1.bf16.msra.mxu1 %v14403_v60  ;;  %v14785_v49 = vcombine.low %v3990_v17, %v3998_v42  ;;  %vm3130_vm2 = vcmp.gt.f32.partialorder %v17728_v47, 0.0  ;;  %vm3131_vm3 = vcmp.gt.f32.partialorder %v17734_v50, 0.0  ;;  %v3711_v20 = vld [vmem:[%s17106_s5 + $0xec8] sm:$0xff]  ;;  %v4046_v15 = vld [vmem:[%s17106_s5 + $0x1940] sm:$0xff] }
 0x452   : > { %9575 = vmatpush1.bf16.msra.mxu0 %v14721_v1  ;;  %9697 = vmatprep.subr.bf16.mxu1 %v14420_v52  ;;  %v14484_v1 = vcombine.high %v3687_v36, %v3695_v37  ;;  %v3735_v17 = vld [vmem:[%s17106_s5 + $0xf88] sm:$0xff] }
 0x453   : > { %9576 = vmatprep.subr.bf16.mxu0 %v14738_v54  ;;  %v14802_v54 = vcombine.high %v4006_v41, %v4014_v44  ;;  %v3743_v42 = vld [vmem:[%s17106_s5 + $0xfc8] sm:$0xff] }
 0x455   : > { %9698 = vmatpush1.bf16.msra.mxu1 %v14419_v2 }
 0x456   : > { %9577 = vmatpush1.bf16.msra.mxu0 %v14737_v4  ;;  %9699 = vmatprep.subr.bf16.mxu1 %v14436_v61  ;;  %v4022_v61 = vld [vmem:[%s17106_s5 + $0x1880] sm:$0xff] }
 0x457   : > { %9578 = vmatprep.subr.bf16.mxu0 %v14754_v63  ;;  %v4030_v63 = vld [vmem:[%s17106_s5 + $0x18c0] sm:$0xff] }
 0x458   : > { %v16167_v16 = vpop.eup %16166 }
 0x459   : > { %v16169_v24 = vpop.eup %16168  ;;  %v14021_v25 = vadd.f32 -1.0, %v16167_v16  ;;  %9700 = vmatpush1.bf16.msra.mxu1 %v14435_v12  ;;  %v3727_v12 = vld [vmem:[%s17106_s5 + $0xf48] sm:$0xff] }
 0x45a   : > { %v16171_v28 = vpop.eup %16170  ;;  %v14022_v29 = vadd.f32 -1.0, %v16169_v24  ;;  %9579 = vmatpush1.bf16.msra.mxu0 %v14753_v43  ;;  %9701 = vmatprep.subr.bf16.mxu1 %v14452_v3  ;;  %v14801_v43 = vcombine.low %v4006_v41, %v4014_v44  ;;  %v14818_v3 = vcombine.high %v4022_v61, %v4030_v63  ;;  %v14516_v16 = vcombine.high %v3719_v26, %v3727_v12 }
 0x45b   : > { %v16173_v34 = vpop.eup %16172  ;;  %v3186_v35 = vmul.f32 1.6732632, %v14021_v25  ;;  %v14029_v5 = vadd.f32 -1.0, %v16171_v28  ;;  %9580 = vmatprep.subr.bf16.mxu0 %v14770_v13  ;;  %v14817_v24 = vcombine.low %v4022_v61, %v4030_v63  ;;  %v14834_v25 = vcombine.high %v4038_v14, %v4046_v15  ;;  %v4054_v28 = vld [vmem:[%s17106_s5 + $0x1980] sm:$0xff] }
 0x45c   : > { %v3187_v39 = vmul.f32 1.6732632, %v14022_v29  ;;  %v14030_v40 = vadd.f32 -1.0, %v16173_v34  ;;  %v4062_v29 = vld [vmem:[%s17106_s5 + $0x19c0] sm:$0xff]  ;;  %v3759_v34 = vld [vmem:[%s17106_s5 + $0x1048] sm:$0xff] }
 0x45d   : > { %v3202_v53 = vsel %vm3122_vm0, %v17719_v7, %v3186_v35  ;;  %v3194_v48 = vmul.f32 1.6732632, %v14029_v5  ;;  %9702 = vmatpush1.bf16.msra.mxu1 %v14451_v27  ;;  %v3703_v7 = vld [vmem:[%s17106_s5 + $0xe88] sm:$0xff]  ;;  %v14515_v27 = vcombine.low %v3719_v26, %v3727_v12  ;;  %v14833_v35 = vcombine.low %v4038_v14, %v4046_v15  ;;  %v4118_v63 = vld [vmem:[%s17106_s5 + $0x1b80] sm:$0xff] }
 0x45e   : > { %v3203_v60 = vsel %vm3123_vm1, %v17722_v38, %v3187_v39  ;;  %v3195_v51 = vmul.f32 1.6732632, %v14030_v40  ;;  %9581 = vmatpush1.bf16.msra.mxu0 %v14769_v30  ;;  %9703 = vmatprep.subr.bf16.mxu1 %v14468_v32  ;;  %v3218_v9 = vmul.f32 1.050701, %v3202_v53  ;;  %v14500_v22 = vcombine.high %v3703_v7, %v3711_v20  ;;  %v3751_v32 = vld [vmem:[%s17106_s5 + $0x1008] sm:$0xff]  ;;  %v4134_v15 = vld [vmem:[%s17106_s5 + $0x1c00] sm:$0xff] }
 0x45f   : > { %v3210_v52 = vsel %vm3130_vm2, %v17728_v47, %v3194_v48  ;;  %9582 = vmatprep.subr.bf16.mxu0 %v14786_v10  ;;  %v3219_v2 = vmul.f32 1.050701, %v3203_v60  ;;  %v14483_v47 = vcombine.low %v3687_v36, %v3695_v37  ;;  %v14499_v13 = vcombine.low %v3703_v7, %v3711_v20  ;;  %v4070_v36 = vld [vmem:[%s17106_s5 + $0x1a00] sm:$0xff]  ;;  %v3767_v40 = vld [vmem:[%s17106_s5 + $0x1088] sm:$0xff] }
 0x460   : > { %v3226_v55 = vmul.f32 1.050701, %v3210_v52  ;;  %v3211_v38 = vsel %vm3131_vm3, %v17734_v50, %v3195_v51  ;;  %v14037_v50 = vcombine.low %v17765_v57, %v17768_v62  ;;  %v14532_v30 = vcombine.high %v3735_v17, %v3743_v42  ;;  %v4078_v37 = vld [vmem:[%s17106_s5 + $0x1a40] sm:$0xff]  ;;  %v3783_v51 = vld [vmem:[%s17106_s5 + $0x1108] sm:$0xff] }
 0x461   : > { %v3227_v4 = vmul.f32 1.050701, %v3211_v38  ;;  %9704 = vmatpush1.bf16.msra.mxu1 %v14467_v59  ;;  %v14850_v5 = vcombine.high %v4054_v28, %v4062_v29  ;;  %v14531_v10 = vcombine.low %v3735_v17, %v3743_v42  ;;  %v14548_v39 = vcombine.high %v3751_v32, %v3759_v34  ;;  %v3775_v59 = vld [vmem:[%s17106_s5 + $0x10c8] sm:$0xff]  ;;  %v4086_v48 = vld [vmem:[%s17106_s5 + $0x1a80] sm:$0xff] }
 0x462   : > { %v17772_v6 = vpack.c.bf16 %v3226_v55, %v3218_v9  ;;  %9583 = vmatpush1.bf16.msra.mxu0 %v14785_v49  ;;  %9705 = vmatprep.subr.bf16.mxu1 %v14484_v1  ;;  %v14849_v41 = vcombine.low %v4054_v28, %v4062_v29  ;;  %v14866_v44 = vcombine.high %v4070_v36, %v4078_v37  ;;  %v4094_v49 = vld [vmem:[%s17106_s5 + $0x1ac0] sm:$0xff]  ;;  %v3791_v1 = vld [vmem:[%s17106_s5 + $0x1148] sm:$0xff] }
 0x463   : > { %v17776_v23 = vpack.c.bf16 %v3227_v4, %v3219_v2  ;;  %9595 = vmatprep.subr.bf16.mxu0 %v14802_v54  ;;  %v14547_v53 = vcombine.low %v3751_v32, %v3759_v34  ;;  %v14564_v60 = vcombine.high %v3767_v40, %v3775_v59  ;;  %v14865_v52 = vcombine.low %v4070_v36, %v4078_v37  ;;  %v4102_v54 = vld [vmem:[%s17106_s5 + $0x1b00] sm:$0xff]  ;;  %v3799_v38 = vld [vmem:[%s17106_s5 + $0x1188] sm:$0xff] }
 0x464   : > { %v14882_v7 = vcombine.high %v4086_v48, %v4094_v49  ;;  %v14563_v20 = vcombine.low %v3767_v40, %v3775_v59  ;;  %v4110_v9 = vld [vmem:[%s17106_s5 + $0x1b40] sm:$0xff]  ;;  %v14580_v55 = vcombine.high %v3783_v51, %v3791_v1  ;;  %v3807_v2 = vld [vmem:[%s17106_s5 + $0x11c8] sm:$0xff]  ;;  %v14881_v4 = vcombine.low %v4086_v48, %v4094_v49 }
 0x465   : > { %9584 = vmatprep.mubr.bf16.mxu0 %v17776_v23  ;;  %9706 = vmatpush1.bf16.msra.mxu1 %v14483_v47  ;;  %v14898_v47 = vcombine.high %v4102_v54, %v4110_v9  ;;  %v14579_v61 = vcombine.low %v3783_v51, %v3791_v1  ;;  %v14596_v26 = vcombine.high %v3799_v38, %v3807_v2  ;;  %v3815_v12 = vld [vmem:[%s17106_s5 + $0x1208] sm:$0xff]  ;;  %v4150_v29 = vld [vmem:[%s17106_s5 + $0x1c80] sm:$0xff] }
 0x466   : > { %9585 = vmatmul.mubr.bf16.vlgmr.msra.gmra.mrb[4].mxu0 %v17772_v6  ;;  %9707 = vmatprep.subr.bf16.mxu1 %v14500_v22  ;;  %v4126_v22 = vld [vmem:[%s17106_s5 + $0x1bc0] sm:$0xff]  ;;  %v14595_v14 = vcombine.low %v3799_v38, %v3807_v2  ;;  %v3831_v42 = vld [vmem:[%s17106_s5 + $0x1288] sm:$0xff] }
 0x467   : > { %9596 = vmatpush1.bf16.msra.mxu0 %v14801_v43  ;;  %v3823_v43 = vld [vmem:[%s17106_s5 + $0x1248] sm:$0xff]  ;;  %v4166_v37 = vld [vmem:[%s17106_s5 + $0x1d00] sm:$0xff] }
 0x468   : > { %9597 = vmatprep.subr.bf16.mxu0 %v14818_v3  ;;  %v14897_v3 = vcombine.low %v4102_v54, %v4110_v9  ;;  %v14612_v17 = vcombine.high %v3815_v12, %v3823_v43  ;;  %v14611_v28 = vcombine.low %v3815_v12, %v3823_v43  ;;  %v3847_v34 = vld [vmem:[%s17106_s5 + $0x1308] sm:$0xff]  ;;  %v4182_v49 = vld [vmem:[%s17106_s5 + $0x1d80] sm:$0xff] }
 0x469   : > { %9708 = vmatpush1.bf16.msra.mxu1 %v14499_v13  ;;  %v14914_v13 = vcombine.high %v4118_v63, %v4126_v22  ;;  %v3863_v59 = vld [vmem:[%s17106_s5 + $0x1388] sm:$0xff]  ;;  %v4198_v9 = vld [vmem:[%s17106_s5 + $0x1e00] sm:$0xff] }
 0x46a   : > { %9709 = vmatprep.subr.bf16.mxu1 %v14516_v16  ;;  %v4142_v16 = vld [vmem:[%s17106_s5 + $0x1c40] sm:$0xff]  ;;  %v3879_v1 = vld [vmem:[%s17106_s5 + $0x1408] sm:$0xff] }
 0x46b   : > { %9598 = vmatpush1.bf16.msra.mxu0 %v14817_v24  ;;  %v3839_v24 = vld [vmem:[%s17106_s5 + $0x12c8] sm:$0xff] }
 0x46c   : > { %9599 = vmatprep.subr.bf16.mxu0 %v14834_v25  ;;  %v14913_v25 = vcombine.low %v4118_v63, %v4126_v22  ;;  %v14628_v32 = vcombine.high %v3831_v42, %v3839_v24  ;;  %v14627_v36 = vcombine.low %v3831_v42, %v3839_v24  ;;  %v3895_v2 = vld [vmem:[%s17106_s5 + $0x1488] sm:$0xff]  ;;  %v4214_v22 = vld [vmem:[%s17106_s5 + $0x1e80] sm:$0xff] }
 0x46d   : > { %9710 = vmatpush1.bf16.msra.mxu1 %v14515_v27  ;;  %v14930_v27 = vcombine.high %v4134_v15, %v4142_v16  ;;  %v3911_v43 = vld [vmem:[%s17106_s5 + $0x1508] sm:$0xff] }
 0x46e   : > { %9711 = vmatprep.subr.bf16.mxu1 %v14532_v30  ;;  %v4158_v30 = vld [vmem:[%s17106_s5 + $0x1cc0] sm:$0xff]  ;;  %v3927_v24 = vld [vmem:[%s17106_s5 + $0x1588] sm:$0xff] }
 0x46f   : > { %9600 = vmatpush1.bf16.msra.mxu0 %v14833_v35  ;;  %v3855_v35 = vld [vmem:[%s17106_s5 + $0x1348] sm:$0xff] }
 0x470   : > { %9601 = vmatprep.subr.bf16.mxu0 %v14850_v5  ;;  %v14929_v5 = vcombine.low %v4134_v15, %v4142_v16  ;;  %v14644_v40 = vcombine.high %v3847_v34, %v3855_v35  ;;  %v14643_v48 = vcombine.low %v3847_v34, %v3855_v35  ;;  %v4230_v16 = vld [vmem:[%s17106_s5 + $0x1f00] sm:$0xff]  ;;  %v3943_v35 = vld [vmem:[%s17106_s5 + $0x1608] sm:$0xff] }
 0x471   : > { %9712 = vmatpush1.bf16.msra.mxu1 %v14531_v10  ;;  %v14946_v10 = vcombine.high %v4150_v29, %v4158_v30 }
 0x472   : > { %9724 = vmatprep.subr.bf16.mxu1 %v14548_v39  ;;  %v4174_v39 = vld [vmem:[%s17106_s5 + $0x1d40] sm:$0xff] }
 0x473   : > { %9602 = vmatpush1.bf16.msra.mxu0 %v14849_v41  ;;  %v3871_v41 = vld [vmem:[%s17106_s5 + $0x13c8] sm:$0xff] }
 0x474   : > { %9714 = vmatmul.mubr.bf16.vlgmr.msra.gmra.mrb[24].mxu1 %v17654_v45  ;;  %9603 = vmatprep.subr.bf16.mxu0 %v14866_v44  ;;  %v14945_v44 = vcombine.low %v4150_v29, %v4158_v30  ;;  %v14660_v51 = vcombine.high %v3863_v59, %v3871_v41  ;;  %v14659_v54 = vcombine.low %v3863_v59, %v3871_v41  ;;  %v4246_v30 = vld [vmem:[%s17106_s5 + $0x1f80] sm:$0xff]  ;;  %v3967_v59 = vld [vmem:[%s17106_s5 + $0x16c8] sm:$0xff] }
 0x475   : > { %9725 = vmatpush1.bf16.msra.mxu1 %v14547_v53  ;;  %9756 = vmatprep.mubr.bf16.mxu1 %v17776_v23  ;;  %v14962_v53 = vcombine.high %v4166_v37, %v4174_v39 }
 0x476   : > { %9726 = vmatprep.subr.bf16.mxu1 %v14564_v60  ;;  %v4190_v60 = vld [vmem:[%s17106_s5 + $0x1dc0] sm:$0xff] }
 0x477   : > { %9604 = vmatpush1.bf16.msra.mxu0 %v14865_v52  ;;  %v3887_v52 = vld [vmem:[%s17106_s5 + $0x1448] sm:$0xff] }
 0x478   : > { %9605 = vmatprep.subr.bf16.mxu0 %v14882_v7  ;;  %v14961_v7 = vcombine.low %v4166_v37, %v4174_v39  ;;  %v14676_v38 = vcombine.high %v3879_v1, %v3887_v52  ;;  %v14675_v63 = vcombine.low %v3879_v1, %v3887_v52  ;;  %v3991_v52 = vld [vmem:[%s17106_s5 + $0x1788] sm:$0xff] }
 0x479   : > { %9727 = vmatpush1.bf16.msra.mxu1 %v14563_v20  ;;  %v14978_v20 = vcombine.high %v4182_v49, %v4190_v60 }
 0x47a   : > { %9728 = vmatprep.subr.bf16.mxu1 %v14580_v55  ;;  %v4206_v55 = vld [vmem:[%s17106_s5 + $0x1e40] sm:$0xff] }
 0x47b   : > { %9606 = vmatpush1.bf16.msra.mxu0 %v14881_v4  ;;  %v3903_v4 = vld [vmem:[%s17106_s5 + $0x14c8] sm:$0xff] }
 0x47c   : > { %9607 = vmatprep.subr.bf16.mxu0 %v14898_v47  ;;  %v14977_v47 = vcombine.low %v4182_v49, %v4190_v60  ;;  %v14692_v12 = vcombine.high %v3895_v2, %v3903_v4  ;;  %v14691_v15 = vcombine.low %v3895_v2, %v3903_v4  ;;  %v3975_v49 = vld [vmem:[%s17106_s5 + $0x1708] sm:$0xff] }
 0x47d   : > { %9729 = vmatpush1.bf16.msra.mxu1 %v14579_v61  ;;  %v14994_v61 = vcombine.high %v4198_v9, %v4206_v55  ;;  %v3983_v60 = vld [vmem:[%s17106_s5 + $0x1748] sm:$0xff] }
 0x47e   : > { %9730 = vmatprep.subr.bf16.mxu1 %v14596_v26  ;;  %v4222_v26 = vld [vmem:[%s17106_s5 + $0x1ec0] sm:$0xff]  ;;  %v14772_v1 = vcombine.high %v3975_v49, %v3983_v60  ;;  %v4023_v4 = vld [vmem:[%s17106_s5 + $0x1888] sm:$0xff] }
 0x47f   : > { %9608 = vmatpush1.bf16.msra.mxu0 %v14897_v3  ;;  %v3919_v3 = vld [vmem:[%s17106_s5 + $0x1548] sm:$0xff] }
 0x480   : > { %9609 = vmatprep.subr.bf16.mxu0 %v14914_v13  ;;  %v14993_v13 = vcombine.low %v4198_v9, %v4206_v55  ;;  %v14708_v42 = vcombine.high %v3911_v43, %v3919_v3  ;;  %v14707_v29 = vcombine.low %v3911_v43, %v3919_v3  ;;  %v4007_v9 = vld [vmem:[%s17106_s5 + $0x1808] sm:$0xff] }
 0x481   : > { %9731 = vmatpush1.bf16.msra.mxu1 %v14595_v14  ;;  %v15010_v14 = vcombine.high %v4214_v22, %v4222_v26  ;;  %v4015_v55 = vld [vmem:[%s17106_s5 + $0x1848] sm:$0xff] }
 0x482   : > { %9732 = vmatprep.subr.bf16.mxu1 %v14612_v17  ;;  %v4238_v17 = vld [vmem:[%s17106_s5 + $0x1f40] sm:$0xff]  ;;  %v14804_v2 = vcombine.high %v4007_v9, %v4015_v55  ;;  %v4055_v3 = vld [vmem:[%s17106_s5 + $0x1988] sm:$0xff] }
 0x483   : > { %9610 = vmatpush1.bf16.msra.mxu0 %v14913_v25  ;;  %v3935_v25 = vld [vmem:[%s17106_s5 + $0x15c8] sm:$0xff] }
 0x484   : > { %9611 = vmatprep.subr.bf16.mxu0 %v14930_v27  ;;  %v15009_v27 = vcombine.low %v4214_v22, %v4222_v26  ;;  %v14724_v34 = vcombine.high %v3927_v24, %v3935_v25  ;;  %v14723_v37 = vcombine.low %v3927_v24, %v3935_v25  ;;  %v4039_v22 = vld [vmem:[%s17106_s5 + $0x1908] sm:$0xff] }
 0x485   : > { %9733 = vmatpush1.bf16.msra.mxu1 %v14611_v28  ;;  %v15026_v28 = vcombine.high %v4230_v16, %v4238_v17  ;;  %v4047_v26 = vld [vmem:[%s17106_s5 + $0x1948] sm:$0xff] }
 0x486   : > { %9734 = vmatprep.subr.bf16.mxu1 %v14628_v32  ;;  %v4254_v32 = vld [vmem:[%s17106_s5 + $0x1fc0] sm:$0xff]  ;;  %v14836_v43 = vcombine.high %v4039_v22, %v4047_v26  ;;  %v4087_v25 = vld [vmem:[%s17106_s5 + $0x1a88] sm:$0xff] }
 0x487   : > { %9612 = vmatpush1.bf16.msra.mxu0 %v14929_v5  ;;  %v3951_v5 = vld [vmem:[%s17106_s5 + $0x1648] sm:$0xff]  ;;  %v15041_v41 = vcombine.low %v4246_v30, %v4254_v32 }
 0x488   : > { %9613 = vmatprep.subr.bf16.mxu0 %v14946_v10  ;;  %v15025_v10 = vcombine.low %v4230_v16, %v4238_v17  ;;  %v14740_v39 = vcombine.high %v3943_v35, %v3951_v5  ;;  %v4071_v16 = vld [vmem:[%s17106_s5 + $0x1a08] sm:$0xff] }
 0x489   : > { %9735 = vmatpush1.bf16.msra.mxu1 %v14627_v36  ;;  %v15042_v36 = vcombine.high %v4246_v30, %v4254_v32  ;;  %v4079_v17 = vld [vmem:[%s17106_s5 + $0x1a48] sm:$0xff]  ;;  %v17865_v30 = vsub.s32 7, %v17271_v18 }
 0x48a   : > { %9736 = vmatprep.subr.bf16.mxu1 %v14644_v40  ;;  %v3959_v40 = vld [vmem:[%s17106_s5 + $0x1688] sm:$0xff]  ;;  %v14868_v24 = vcombine.high %v4071_v16, %v4079_v17 }
 0x48b   : > { %9614 = vmatpush1.bf16.msra.mxu0 %v14945_v44  ;;  %v14038_v44 = vcombine.high %v17765_v57, %v17768_v62 }
 0x48c   : > { %9615 = vmatprep.subr.bf16.mxu0 %v14962_v53  ;;  %v14739_v53 = vcombine.low %v3943_v35, %v3951_v5  ;;  %v4111_v35 = vld [vmem:[%s17106_s5 + $0x1b48] sm:$0xff] }
 0x48d   : > { %9737 = vmatpush1.bf16.msra.mxu1 %v14643_v48  ;;  %v14756_v48 = vcombine.high %v3959_v40, %v3967_v59 }
 0x48e   : > { %9738 = vmatprep.subr.bf16.mxu1 %v14660_v51  ;;  %v14755_v51 = vcombine.low %v3959_v40, %v3967_v59  ;;  %v4119_v40 = vld [vmem:[%s17106_s5 + $0x1b88] sm:$0xff] }
 0x48f   : > { %9616 = vmatpush1.bf16.msra.mxu0 %v14961_v7  ;;  %v3999_v7 = vld [vmem:[%s17106_s5 + $0x17c8] sm:$0xff] }
 0x490   : > { %9617 = vmatprep.subr.bf16.mxu0 %v14978_v20  ;;  %v14771_v20 = vcombine.low %v3975_v49, %v3983_v60 }
 0x491   : > { %9739 = vmatpush1.bf16.msra.mxu1 %v14659_v54  ;;  %v14788_v54 = vcombine.high %v3991_v52, %v3999_v7 }
 0x492   : > { %9740 = vmatprep.subr.bf16.mxu1 %v14676_v38  ;;  %v14787_v38 = vcombine.low %v3991_v52, %v3999_v7  ;;  %v4135_v7 = vld [vmem:[%s17106_s5 + $0x1c08] sm:$0xff] }
 0x493   : > { %9618 = vmatpush1.bf16.msra.mxu0 %v14977_v47  ;;  %v4031_v47 = vld [vmem:[%s17106_s5 + $0x18c8] sm:$0xff] }
 0x494   : > { %9619 = vmatprep.subr.bf16.mxu0 %v14994_v61  ;;  %v14803_v61 = vcombine.low %v4007_v9, %v4015_v55 }
 0x495   : > { %9741 = vmatpush1.bf16.msra.mxu1 %v14675_v63  ;;  %v14820_v63 = vcombine.high %v4023_v4, %v4031_v47 }
 0x496   : > { %9742 = vmatprep.subr.bf16.mxu1 %v14692_v12  ;;  %v14819_v12 = vcombine.low %v4023_v4, %v4031_v47  ;;  %v4159_v4 = vld [vmem:[%s17106_s5 + $0x1cc8] sm:$0xff] }
 0x497   : > { %9620 = vmatpush1.bf16.msra.mxu0 %v14993_v13  ;;  %v4063_v13 = vld [vmem:[%s17106_s5 + $0x19c8] sm:$0xff] }
 0x498   : > { %9621 = vmatprep.subr.bf16.mxu0 %v15010_v14  ;;  %v14835_v14 = vcombine.low %v4039_v22, %v4047_v26  ;;  %v4175_v22 = vld [vmem:[%s17106_s5 + $0x1d48] sm:$0xff] }
 0x499   : > { %9743 = vmatpush1.bf16.msra.mxu1 %v14691_v15  ;;  %v14852_v15 = vcombine.high %v4055_v3, %v4063_v13 }
 0x49a   : > { %9744 = vmatprep.subr.bf16.mxu1 %v14708_v42  ;;  %v14851_v42 = vcombine.low %v4055_v3, %v4063_v13 }
 0x49b   : > { %9622 = vmatpush1.bf16.msra.mxu0 %v15009_v27  ;;  %v4095_v27 = vld [vmem:[%s17106_s5 + $0x1ac8] sm:$0xff] }
 0x49c   : > { %9623 = vmatprep.subr.bf16.mxu0 %v15026_v28  ;;  %v17862_v28 = vsub.s32 6, %v17271_v18  ;;  %v14884_v32 = vcombine.high %v4087_v25, %v4095_v27  ;;  %v4127_v18 = vld [vmem:[%s17106_s5 + $0x1bc8] sm:$0xff] }
 0x49d   : > { %9745 = vmatpush1.bf16.msra.mxu1 %v14707_v29  ;;  %v14867_v29 = vcombine.low %v4071_v16, %v4079_v17  ;;  %v14915_v55 = vcombine.low %v4119_v40, %v4127_v18 }
 0x49e   : > { %9746 = vmatprep.subr.bf16.mxu1 %v14724_v34  ;;  %v4103_v34 = vld [vmem:[%s17106_s5 + $0x1b08] sm:$0xff]  ;;  %v1481_v5 = vrot.slane %v17706_v58, %v17862_v28 }
 0x49f   : > { %9624 = vmatpush1.bf16.msra.mxu0 %v15025_v10  ;;  %v1485_v10 = vrot.slane %v17706_v58, %v17865_v30  ;;  %v14916_v58 = vcombine.high %v4119_v40, %v4127_v18 }
 0x4a0   : > { %9625 = vmatprep.subr.bf16.mxu0 %v15042_v36  ;;  %v14883_v36 = vcombine.low %v4087_v25, %v4095_v27 }
 0x4a1   : > { %9747 = vmatpush1.bf16.msra.mxu1 %v14723_v37  ;;  %v14900_v37 = vcombine.high %v4103_v34, %v4111_v35 }
 0x4a2   : > { %9748 = vmatprep.subr.bf16.mxu1 %v14740_v39 }
 0x4a3   : > { %9626 = vmatpush1.bf16.msra.mxu0 %v15041_v41 }
 0x4a4   : > { %9810 = vmatprep.subr.bf16.mxu0 %v14038_v44 }
 0x4a5   : > { %9749 = vmatpush1.bf16.msra.mxu1 %v14739_v53 }
 0x4a6   : > { %9750 = vmatprep.subr.bf16.mxu1 %v14756_v48  ;;  %v14899_v48 = vcombine.low %v4103_v34, %v4111_v35 }
 0x4a9   : > { %9751 = vmatpush1.bf16.msra.mxu1 %v14755_v51 }
 0x4aa   : > { %9752 = vmatprep.subr.bf16.mxu1 %v14772_v1 }
 0x4ad   : > { %9753 = vmatpush1.bf16.msra.mxu1 %v14771_v20  ;;  %v4143_v20 = vld [vmem:[%s17106_s5 + $0x1c48] sm:$0xff] }
 0x4ae   : > { %9754 = vmatprep.subr.bf16.mxu1 %v14788_v54  ;;  %v14931_v47 = vcombine.low %v4135_v7, %v4143_v20 }
 0x4b1   : > { %9755 = vmatpush1.bf16.msra.mxu1 %v14787_v38  ;;  %v14932_v38 = vcombine.high %v4135_v7, %v4143_v20  ;;  %v4215_v7 = vld [vmem:[%s17106_s5 + $0x1e88] sm:$0xff] }
 0x4b2   : > { %9767 = vmatprep.subr.bf16.mxu1 %v14804_v2  ;;  %v4151_v2 = vld [vmem:[%s17106_s5 + $0x1c88] sm:$0xff] }
 0x4b3   : > { %v14947_v26 = vcombine.low %v4151_v2, %v4159_v4 }
 0x4b4   : > { %9757 = vmatmul.mubr.bf16.vlgmr.msra.gmra.mrb[24].mxu1 %v17772_v6 }
 0x4b5   : > { %9768 = vmatpush1.bf16.msra.mxu1 %v14803_v61  ;;  %v14948_v61 = vcombine.high %v4151_v2, %v4159_v4  ;;  %v4231_v2 = vld [vmem:[%s17106_s5 + $0x1f08] sm:$0xff] }
 0x4b6   : > { %9769 = vmatprep.subr.bf16.mxu1 %v14820_v63  ;;  %v4167_v63 = vld [vmem:[%s17106_s5 + $0x1d08] sm:$0xff] }
 0x4b7   : > { %v14963_v27 = vcombine.low %v4167_v63, %v4175_v22  ;;  %v4239_v4 = vld [vmem:[%s17106_s5 + $0x1f48] sm:$0xff] }
 0x4b8   : > { %v15027_v62 = vcombine.low %v4231_v2, %v4239_v4 }
 0x4b9   : > { %9770 = vmatpush1.bf16.msra.mxu1 %v14819_v12 }
 0x4ba   : > { %9771 = vmatprep.subr.bf16.mxu1 %v14836_v43  ;;  %v14964_v43 = vcombine.high %v4167_v63, %v4175_v22  ;;  %v15028_v22 = vcombine.high %v4231_v2, %v4239_v4  ;;  %v3305_v2 = vld [vmem:[%s17106_s5 + $0x218] sm:$0xff] }
 0x4bb   : > { %v3313_v4 = vld [vmem:[%s17106_s5 + $0x258] sm:$0xff] }
 0x4bd   : > { %9772 = vmatpush1.bf16.msra.mxu1 %v14835_v14  ;;  %v4183_v14 = vld [vmem:[%s17106_s5 + $0x1d88] sm:$0xff] }
 0x4be   : > { %9773 = vmatprep.subr.bf16.mxu1 %v14852_v15  ;;  %v4191_v15 = vld [vmem:[%s17106_s5 + $0x1dc8] sm:$0xff] }
 0x4bf   : > { %v14980_v34 = vcombine.high %v4183_v14, %v4191_v15  ;;  %v14979_v18 = vcombine.low %v4183_v14, %v4191_v15  ;;  %v3304_v14 = vld [vmem:[%s17106_s5 + $0x210] sm:$0xff] }
 0x4c0   : > { %v3312_v15 = vld [vmem:[%s17106_s5 + $0x250] sm:$0xff] }
 0x4c1   : > { %9774 = vmatpush1.bf16.msra.mxu1 %v14851_v42 }
 0x4c2   : > { %9775 = vmatprep.subr.bf16.mxu1 %v14868_v24 }
 0x4c5   : > { %9776 = vmatpush1.bf16.msra.mxu1 %v14867_v29 }
 0x4c6   : > { %9777 = vmatprep.subr.bf16.mxu1 %v14884_v32 }
 0x4c7   : > { %v3109_v39 = vpop.f32.mrb[20].mxu1 }
 0x4c8   : > { %v15376_v59 = vadd.f32 %v3109_v39, %v1481_v5  ;;  %v3111_v41 = vpop.f32.mrb[21].mxu1 }
 0x4c9   : > { %v15377_v44 = vadd.f32 %v3111_v41, %v1485_v10  ;;  %v3113_v53 = vpop.f32.mrb[22].mxu1  ;;  %9778 = vmatpush1.bf16.msra.mxu1 %v14883_v36  ;;  %v4207_v36 = vld [vmem:[%s17106_s5 + $0x1e48] sm:$0xff] }
 0x4ca   : > { %v3146_v49 = vmul.f32 1.442695, %v15376_v59  ;;  %v15378_v60 = vadd.f32 %v3113_v53, %v1481_v5  ;;  %v3115_v51 = vpop.f32.mrb[23].mxu1  ;;  %9779 = vmatprep.subr.bf16.mxu1 %v14900_v37  ;;  %vm3124_vm4 = vcmp.gt.f32.partialorder %v15376_v59, 0.0 }
 0x4cb   : > { %v3148_v1 = vmul.f32 1.442695, %v15377_v44  ;;  %v15379_v52 = vadd.f32 %v3115_v51, %v1485_v10  ;;  %vm3125_vm5 = vcmp.gt.f32.partialorder %v15377_v44, 0.0  ;;  %v4199_v10 = vld [vmem:[%s17106_s5 + $0x1e08] sm:$0xff] }
 0x4cc   : > { %16174 = vpow2.f32 %v3146_v49  ;;  %v3162_v54 = vmul.f32 1.442695, %v15378_v60  ;;  %vm3132_vm6 = vcmp.gt.f32.partialorder %v15378_v60, 0.0 }
 0x4cd   : > { %16176 = vpow2.f32 %v3148_v1  ;;  %v3164_v9 = vmul.f32 1.442695, %v15379_v52  ;;  %9780 = vmatpush1.bf16.msra.mxu1 %v14899_v48  ;;  %vm3133_vm7 = vcmp.gt.f32.partialorder %v15379_v52, 0.0 }
 0x4ce   : > { %16178 = vpow2.f32 %v3162_v54  ;;  %9781 = vmatprep.subr.bf16.mxu1 %v14916_v58  ;;  %v3256_v58 = vld [vmem:[%s17106_s5 + $0x90] sm:$0xff]  ;;  %v14995_v54 = vcombine.low %v4199_v10, %v4207_v36 }
 0x4cf   : > { %16180 = vpow2.f32 %v3164_v9 }
 0x4d1   : > { %9782 = vmatpush1.bf16.msra.mxu1 %v14915_v55 }
 0x4d2   : > { %9783 = vmatprep.subr.bf16.mxu1 %v14932_v38  ;;  %v3280_v38 = vld [vmem:[%s17106_s5 + $0x150] sm:$0xff] }
 0x4d5   : > { %9784 = vmatpush1.bf16.msra.mxu1 %v14931_v47 }
 0x4d6   : > { %v16175_v12 = vpop.eup %16174  ;;  %9785 = vmatprep.subr.bf16.mxu1 %v14948_v61 }
 0x4d7   : > { %v16177_v3 = vpop.eup %16176  ;;  %v14023_v13 = vadd.f32 -1.0, %v16175_v12  ;;  %v3296_v12 = vld [vmem:[%s17106_s5 + $0x1d0] sm:$0xff] }
 0x4d8   : > { %v16179_v16 = vpop.eup %16178  ;;  %v14024_v17 = vadd.f32 -1.0, %v16177_v3  ;;  %v4255_v3 = vld [vmem:[%s17106_s5 + $0x1fc8] sm:$0xff] }
 0x4d9   : > { %v16181_v42 = vpop.eup %16180  ;;  %v3188_v24 = vmul.f32 1.6732632, %v14023_v13  ;;  %v14031_v25 = vadd.f32 -1.0, %v16179_v16  ;;  %9786 = vmatpush1.bf16.msra.mxu1 %v14947_v26  ;;  %v3288_v26 = vld [vmem:[%s17106_s5 + $0x190] sm:$0xff]  ;;  %v3241_v16 = vld [vmem:[%s17106_s5 + $0x18] sm:$0xff] }
 0x4da   : > { %v3189_v29 = vmul.f32 1.6732632, %v14024_v17  ;;  %v14032_v32 = vadd.f32 -1.0, %v16181_v42  ;;  %9787 = vmatprep.subr.bf16.mxu1 %v14964_v43  ;;  %v4247_v43 = vld [vmem:[%s17106_s5 + $0x1f88] sm:$0xff]  ;;  %v3249_v17 = vld [vmem:[%s17106_s5 + $0x58] sm:$0xff]  ;;  %v14085_v42 = vcombine.low %v3288_v26, %v3296_v12 }
 0x4db   : > { %v3204_v35 = vsel %vm3124_vm4, %v15376_v59, %v3188_v24  ;;  %v3196_v5 = vmul.f32 1.6732632, %v14031_v25  ;;  %v14996_v59 = vcombine.high %v4199_v10, %v4207_v36  ;;  %v15044_v13 = vcombine.high %v4247_v43, %v4255_v3 }
 0x4dc   : > { %v3205_v37 = vsel %vm3125_vm5, %v15377_v44, %v3189_v29  ;;  %v3197_v39 = vmul.f32 1.6732632, %v14032_v32  ;;  %v3220_v41 = vmul.f32 1.050701, %v3204_v35  ;;  %v3264_v44 = vld [vmem:[%s17106_s5 + $0xd0] sm:$0xff]  ;;  %v15043_v24 = vcombine.low %v4247_v43, %v4255_v3  ;;  %v3265_v35 = vld [vmem:[%s17106_s5 + $0xd8] sm:$0xff] }
 0x4dd   : > { %v3212_v40 = vsel %vm3132_vm6, %v15378_v60, %v3196_v5  ;;  %9788 = vmatpush1.bf16.msra.mxu1 %v14963_v27  ;;  %v3221_v49 = vmul.f32 1.050701, %v3205_v37  ;;  %v4223_v60 = vld [vmem:[%s17106_s5 + $0x1ec8] sm:$0xff]  ;;  %v14054_v9 = vcombine.high %v3256_v58, %v3264_v44  ;;  %v14053_v47 = vcombine.low %v3256_v58, %v3264_v44  ;;  %v3320_v29 = vld [vmem:[%s17106_s5 + $0x290] sm:$0xff]  ;;  %v3289_v44 = vld [vmem:[%s17106_s5 + $0x198] sm:$0xff] }
 0x4de   : > { %v3228_v53 = vmul.f32 1.050701, %v3212_v40  ;;  %v3213_v48 = vsel %vm3133_vm7, %v15379_v52, %v3197_v39  ;;  %9789 = vmatprep.subr.bf16.mxu1 %v14980_v34  ;;  %v3272_v52 = vld [vmem:[%s17106_s5 + $0x110] sm:$0xff]  ;;  %v15012_v55 = vcombine.high %v4215_v7, %v4223_v60  ;;  %v15011_v61 = vcombine.low %v4215_v7, %v4223_v60  ;;  %v3257_v34 = vld [vmem:[%s17106_s5 + $0x98] sm:$0xff] }
 0x4df   : > { %v3229_v51 = vmul.f32 1.050701, %v3213_v48  ;;  %v14070_v63 = vcombine.high %v3272_v52, %v3280_v38  ;;  %v14069_v57 = vcombine.low %v3272_v52, %v3280_v38  ;;  %v14102_v25 = vcombine.high %v3304_v14, %v3312_v15  ;;  %v3328_v32 = vld [vmem:[%s17106_s5 + $0x2d0] sm:$0xff]  ;;  %v3297_v7 = vld [vmem:[%s17106_s5 + $0x1d8] sm:$0xff] }
 0x4e0   : > { %v17887_v1 = vpack.c.bf16 %v3228_v53, %v3220_v41  ;;  %v14040_v27 = vcombine.high %v3241_v16, %v3249_v17  ;;  %v14101_v5 = vcombine.low %v3304_v14, %v3312_v15  ;;  %v14039_v10 = vcombine.low %v3241_v16, %v3249_v17  ;;  %v3336_v37 = vld [vmem:[%s17106_s5 + $0x310] sm:$0xff]  ;;  %v3281_v41 = vld [vmem:[%s17106_s5 + $0x158] sm:$0xff] }
 0x4e1   : > { %v17891_v20 = vpack.c.bf16 %v3229_v51, %v3221_v49  ;;  %9790 = vmatpush1.bf16.msra.mxu1 %v14979_v18  ;;  %v14118_v36 = vcombine.high %v3320_v29, %v3328_v32  ;;  %v14056_v39 = vcombine.high %v3257_v34, %v3265_v35  ;;  %v3344_v40 = vld [vmem:[%s17106_s5 + $0x350] sm:$0xff]  ;;  %v3273_v18 = vld [vmem:[%s17106_s5 + $0x118] sm:$0xff]  ;;  %v14117_v53 = vcombine.low %v3320_v29, %v3328_v32 }
 0x4e2   : > { %9791 = vmatprep.subr.bf16.mxu1 %v14996_v59  ;;  %v14055_v48 = vcombine.low %v3257_v34, %v3265_v35  ;;  %v14134_v59 = vcombine.high %v3336_v37, %v3344_v40  ;;  %v14072_v49 = vcombine.high %v3273_v18, %v3281_v41  ;;  %v3352_v51 = vld [vmem:[%s17106_s5 + $0x390] sm:$0xff]  ;;  %v14133_v60 = vcombine.low %v3336_v37, %v3344_v40  ;;  %v3321_v43 = vld [vmem:[%s17106_s5 + $0x298] sm:$0xff] }
 0x4e3   : > { %9627 = vmatprep.mubr.bf16.mxu0 %v17891_v20  ;;  %9799 = vmatprep.mubr.bf16.mxu1 %v17891_v20  ;;  %v3360_v58 = vld [vmem:[%s17106_s5 + $0x3d0] sm:$0xff]  ;;  %v14088_v52 = vcombine.high %v3289_v44, %v3297_v7  ;;  %v3329_v3 = vld [vmem:[%s17106_s5 + $0x2d8] sm:$0xff] }
 0x4e4   : > { %9628 = vmatmul.mubr.bf16.vlgmr.msra.gmra.mrb[4].mxu0 %v17887_v1  ;;  %v3376_v38 = vld [vmem:[%s17106_s5 + $0x450] sm:$0xff]  ;;  %v3337_v16 = vld [vmem:[%s17106_s5 + $0x318] sm:$0xff] }
 0x4e5   : > { %9811 = vmatpush1.bf16.msra.mxu0 %v14037_v50  ;;  %9792 = vmatpush1.bf16.msra.mxu1 %v14995_v54  ;;  %v14086_v50 = vcombine.high %v3288_v26, %v3296_v12  ;;  %v14071_v54 = vcombine.low %v3273_v18, %v3281_v41  ;;  %v3384_v26 = vld [vmem:[%s17106_s5 + $0x490] sm:$0xff]  ;;  %v3345_v17 = vld [vmem:[%s17106_s5 + $0x358] sm:$0xff] }
 0x4e6   : > { %9842 = vmatprep.mubr.bf16.mxu0 %v17535_v11  ;;  %9812 = vmatprep.subr.bf16.mxu0 %v14054_v9  ;;  %v14150_v9 = vcombine.high %v3352_v51, %v3360_v58  ;;  %v3392_v12 = vld [vmem:[%s17106_s5 + $0x4d0] sm:$0xff]  ;;  %v3353_v34 = vld [vmem:[%s17106_s5 + $0x398] sm:$0xff] }
 0x4e7   : > { %9793 = vmatprep.subr.bf16.mxu1 %v15012_v55  ;;  %v3368_v55 = vld [vmem:[%s17106_s5 + $0x410] sm:$0xff]  ;;  %v3361_v35 = vld [vmem:[%s17106_s5 + $0x3d8] sm:$0xff] }
 0x4e8   : > { %v3400_v14 = vld [vmem:[%s17106_s5 + $0x510] sm:$0xff]  ;;  %v14152_v37 = vcombine.high %v3353_v34, %v3361_v35  ;;  %v3369_v18 = vld [vmem:[%s17106_s5 + $0x418] sm:$0xff] }
 0x4e9   : > { %9813 = vmatpush1.bf16.msra.mxu0 %v14053_v47  ;;  %9794 = vmatpush1.bf16.msra.mxu1 %v15011_v61  ;;  %v14149_v47 = vcombine.low %v3352_v51, %v3360_v58  ;;  %v14087_v61 = vcombine.low %v3289_v44, %v3297_v7  ;;  %v3408_v15 = vld [vmem:[%s17106_s5 + $0x550] sm:$0xff]  ;;  %v3377_v41 = vld [vmem:[%s17106_s5 + $0x458] sm:$0xff] }
 0x4ea   : > { %9814 = vmatprep.subr.bf16.mxu0 %v14070_v63  ;;  %9795 = vmatprep.subr.bf16.mxu1 %v15028_v22  ;;  %v14166_v63 = vcombine.high %v3368_v55, %v3376_v38  ;;  %v14104_v22 = vcombine.high %v3305_v2, %v3313_v4  ;;  %v3416_v29 = vld [vmem:[%s17106_s5 + $0x590] sm:$0xff]  ;;  %v3385_v44 = vld [vmem:[%s17106_s5 + $0x498] sm:$0xff] }
 0x4eb   : > { %v3424_v32 = vld [vmem:[%s17106_s5 + $0x5d0] sm:$0xff]  ;;  %v3393_v7 = vld [vmem:[%s17106_s5 + $0x4d8] sm:$0xff] }
 0x4ec   : > { %v3440_v40 = vld [vmem:[%s17106_s5 + $0x650] sm:$0xff] }
 0x4ed   : > { %9815 = vmatpush1.bf16.msra.mxu0 %v14069_v57  ;;  %9796 = vmatpush1.bf16.msra.mxu1 %v15027_v62  ;;  %v14165_v57 = vcombine.low %v3368_v55, %v3376_v38  ;;  %v14103_v62 = vcombine.low %v3305_v2, %v3313_v4  ;;  %v3448_v51 = vld [vmem:[%s17106_s5 + $0x690] sm:$0xff]  ;;  %v3401_v2 = vld [vmem:[%s17106_s5 + $0x518] sm:$0xff] }
 0x4ee   : > { %9816 = vmatprep.subr.bf16.mxu0 %v14086_v50  ;;  %9797 = vmatprep.subr.bf16.mxu1 %v15044_v13  ;;  %v14182_v50 = vcombine.high %v3384_v26, %v3392_v12  ;;  %v14120_v13 = vcombine.high %v3321_v43, %v3329_v3  ;;  %v3456_v58 = vld [vmem:[%s17106_s5 + $0x6d0] sm:$0xff]  ;;  %v3409_v4 = vld [vmem:[%s17106_s5 + $0x558] sm:$0xff] }
 0x4ef   : > { %v3464_v55 = vld [vmem:[%s17106_s5 + $0x710] sm:$0xff] }
 0x4f0   : > { %v3472_v38 = vld [vmem:[%s17106_s5 + $0x750] sm:$0xff] }
 0x4f1   : > { %9817 = vmatpush1.bf16.msra.mxu0 %v14085_v42  ;;  %9798 = vmatpush1.bf16.msra.mxu1 %v15043_v24  ;;  %v14181_v42 = vcombine.low %v3384_v26, %v3392_v12  ;;  %v14119_v24 = vcombine.low %v3321_v43, %v3329_v3  ;;  %v3480_v26 = vld [vmem:[%s17106_s5 + $0x790] sm:$0xff]  ;;  %v3417_v43 = vld [vmem:[%s17106_s5 + $0x598] sm:$0xff] }
 0x4f2   : > { %9818 = vmatprep.subr.bf16.mxu0 %v14102_v25  ;;  %9982 = vmatprep.subr.bf16.mxu1 %v14040_v27  ;;  %v14198_v25 = vcombine.high %v3400_v14, %v3408_v15  ;;  %v14136_v27 = vcombine.high %v3337_v16, %v3345_v17  ;;  %v3488_v12 = vld [vmem:[%s17106_s5 + $0x7d0] sm:$0xff]  ;;  %v3425_v3 = vld [vmem:[%s17106_s5 + $0x5d8] sm:$0xff] }
 0x4f4   : > { %9800 = vmatmul.mubr.bf16.vlgmr.msra.gmra.mrb[24].mxu1 %v17887_v1 }
 0x4f5   : > { %9819 = vmatpush1.bf16.msra.mxu0 %v14101_v5  ;;  %9983 = vmatpush1.bf16.msra.mxu1 %v14039_v10  ;;  %v14197_v5 = vcombine.low %v3400_v14, %v3408_v15  ;;  %v14135_v10 = vcombine.low %v3337_v16, %v3345_v17  ;;  %v3496_v14 = vld [vmem:[%s17106_s5 + $0x810] sm:$0xff]  ;;  %v3433_v16 = vld [vmem:[%s17106_s5 + $0x618] sm:$0xff] }
 0x4f6   : > { %10014 = vmatprep.mubr.bf16.mxu1 %v17535_v11  ;;  %9820 = vmatprep.subr.bf16.mxu0 %v14118_v36  ;;  %v14214_v36 = vcombine.high %v3416_v29, %v3424_v32  ;;  %v3504_v15 = vld [vmem:[%s17106_s5 + $0x850] sm:$0xff]  ;;  %v3441_v17 = vld [vmem:[%s17106_s5 + $0x658] sm:$0xff] }
 0x4f7   : > { %9984 = vmatprep.subr.bf16.mxu1 %v14056_v39  ;;  %v3432_v39 = vld [vmem:[%s17106_s5 + $0x610] sm:$0xff] }
 0x4f9   : > { %9821 = vmatpush1.bf16.msra.mxu0 %v14117_v53  ;;  %9985 = vmatpush1.bf16.msra.mxu1 %v14055_v48  ;;  %v14213_v53 = vcombine.low %v3416_v29, %v3424_v32  ;;  %v14151_v48 = vcombine.low %v3353_v34, %v3361_v35  ;;  %v3512_v29 = vld [vmem:[%s17106_s5 + $0x890] sm:$0xff]  ;;  %v3449_v34 = vld [vmem:[%s17106_s5 + $0x698] sm:$0xff] }
 0x4fa   : > { %9822 = vmatprep.subr.bf16.mxu0 %v14134_v59  ;;  %9986 = vmatprep.subr.bf16.mxu1 %v14072_v49  ;;  %v14230_v59 = vcombine.high %v3432_v39, %v3440_v40  ;;  %v14168_v49 = vcombine.high %v3369_v18, %v3377_v41  ;;  %v3520_v32 = vld [vmem:[%s17106_s5 + $0x8d0] sm:$0xff]  ;;  %v3457_v35 = vld [vmem:[%s17106_s5 + $0x6d8] sm:$0xff] }
 0x4fd   : > { %9823 = vmatpush1.bf16.msra.mxu0 %v14133_v60  ;;  %9987 = vmatpush1.bf16.msra.mxu1 %v14071_v54  ;;  %v14229_v60 = vcombine.low %v3432_v39, %v3440_v40  ;;  %v14167_v54 = vcombine.low %v3369_v18, %v3377_v41  ;;  %v3528_v39 = vld [vmem:[%s17106_s5 + $0x910] sm:$0xff]  ;;  %v3465_v18 = vld [vmem:[%s17106_s5 + $0x718] sm:$0xff] }
 0x4fe   : > { %9824 = vmatprep.subr.bf16.mxu0 %v14150_v9  ;;  %9988 = vmatprep.subr.bf16.mxu1 %v14088_v52  ;;  %v14246_v9 = vcombine.high %v3448_v51, %v3456_v58  ;;  %v14184_v52 = vcombine.high %v3385_v44, %v3393_v7  ;;  %v3536_v40 = vld [vmem:[%s17106_s5 + $0x950] sm:$0xff]  ;;  %v3473_v41 = vld [vmem:[%s17106_s5 + $0x758] sm:$0xff] }
 0x501   : > { %9825 = vmatpush1.bf16.msra.mxu0 %v14149_v47  ;;  %9989 = vmatpush1.bf16.msra.mxu1 %v14087_v61  ;;  %v14245_v47 = vcombine.low %v3448_v51, %v3456_v58  ;;  %v14183_v61 = vcombine.low %v3385_v44, %v3393_v7  ;;  %v3544_v51 = vld [vmem:[%s17106_s5 + $0x990] sm:$0xff]  ;;  %v3481_v44 = vld [vmem:[%s17106_s5 + $0x798] sm:$0xff] }
 0x502   : > { %9826 = vmatprep.subr.bf16.mxu0 %v14166_v63  ;;  %9990 = vmatprep.subr.bf16.mxu1 %v14104_v22  ;;  %v14262_v63 = vcombine.high %v3464_v55, %v3472_v38  ;;  %v14200_v22 = vcombine.high %v3401_v2, %v3409_v4  ;;  %v3552_v58 = vld [vmem:[%s17106_s5 + $0x9d0] sm:$0xff]  ;;  %v3489_v7 = vld [vmem:[%s17106_s5 + $0x7d8] sm:$0xff] }
 0x505   : > { %9827 = vmatpush1.bf16.msra.mxu0 %v14165_v57  ;;  %9991 = vmatpush1.bf16.msra.mxu1 %v14103_v62  ;;  %v14261_v57 = vcombine.low %v3464_v55, %v3472_v38  ;;  %v14199_v62 = vcombine.low %v3401_v2, %v3409_v4  ;;  %v3560_v55 = vld [vmem:[%s17106_s5 + $0xa10] sm:$0xff]  ;;  %v3497_v2 = vld [vmem:[%s17106_s5 + $0x818] sm:$0xff] }
 0x506   : > { %9828 = vmatprep.subr.bf16.mxu0 %v14182_v50  ;;  %9992 = vmatprep.subr.bf16.mxu1 %v14120_v13  ;;  %v14278_v50 = vcombine.high %v3480_v26, %v3488_v12  ;;  %v14216_v13 = vcombine.high %v3417_v43, %v3425_v3  ;;  %v3568_v38 = vld [vmem:[%s17106_s5 + $0xa50] sm:$0xff]  ;;  %v3505_v4 = vld [vmem:[%s17106_s5 + $0x858] sm:$0xff] }
 0x509   : > { %9829 = vmatpush1.bf16.msra.mxu0 %v14181_v42  ;;  %9993 = vmatpush1.bf16.msra.mxu1 %v14119_v24  ;;  %v14277_v42 = vcombine.low %v3480_v26, %v3488_v12  ;;  %v14215_v24 = vcombine.low %v3417_v43, %v3425_v3  ;;  %v3576_v26 = vld [vmem:[%s17106_s5 + $0xa90] sm:$0xff]  ;;  %v3513_v43 = vld [vmem:[%s17106_s5 + $0x898] sm:$0xff] }
 0x50a   : > { %9830 = vmatprep.subr.bf16.mxu0 %v14198_v25  ;;  %9994 = vmatprep.subr.bf16.mxu1 %v14136_v27  ;;  %v14294_v25 = vcombine.high %v3496_v14, %v3504_v15  ;;  %v14232_v27 = vcombine.high %v3433_v16, %v3441_v17  ;;  %v3584_v12 = vld [vmem:[%s17106_s5 + $0xad0] sm:$0xff]  ;;  %v3521_v3 = vld [vmem:[%s17106_s5 + $0x8d8] sm:$0xff] }
 0x50d   : > { %9831 = vmatpush1.bf16.msra.mxu0 %v14197_v5  ;;  %9995 = vmatpush1.bf16.msra.mxu1 %v14135_v10  ;;  %v14293_v5 = vcombine.low %v3496_v14, %v3504_v15  ;;  %v14231_v10 = vcombine.low %v3433_v16, %v3441_v17  ;;  %v3592_v14 = vld [vmem:[%s17106_s5 + $0xb10] sm:$0xff]  ;;  %v3529_v16 = vld [vmem:[%s17106_s5 + $0x918] sm:$0xff] }
 0x50e   : > { %9832 = vmatprep.subr.bf16.mxu0 %v14214_v36  ;;  %9996 = vmatprep.subr.bf16.mxu1 %v14152_v37  ;;  %v14310_v36 = vcombine.high %v3512_v29, %v3520_v32  ;;  %v14248_v37 = vcombine.high %v3449_v34, %v3457_v35  ;;  %v3600_v15 = vld [vmem:[%s17106_s5 + $0xb50] sm:$0xff]  ;;  %v3537_v17 = vld [vmem:[%s17106_s5 + $0x958] sm:$0xff] }
 0x511   : > { %9833 = vmatpush1.bf16.msra.mxu0 %v14213_v53  ;;  %9997 = vmatpush1.bf16.msra.mxu1 %v14151_v48  ;;  %v14309_v53 = vcombine.low %v3512_v29, %v3520_v32  ;;  %v14247_v48 = vcombine.low %v3449_v34, %v3457_v35  ;;  %v3608_v29 = vld [vmem:[%s17106_s5 + $0xb90] sm:$0xff]  ;;  %v3545_v34 = vld [vmem:[%s17106_s5 + $0x998] sm:$0xff] }
 0x512   : > { %9834 = vmatprep.subr.bf16.mxu0 %v14230_v59  ;;  %9998 = vmatprep.subr.bf16.mxu1 %v14168_v49  ;;  %v14326_v59 = vcombine.high %v3528_v39, %v3536_v40  ;;  %v14264_v49 = vcombine.high %v3465_v18, %v3473_v41  ;;  %v3616_v32 = vld [vmem:[%s17106_s5 + $0xbd0] sm:$0xff]  ;;  %v3553_v35 = vld [vmem:[%s17106_s5 + $0x9d8] sm:$0xff] }
 0x515   : > { %9835 = vmatpush1.bf16.msra.mxu0 %v14229_v60  ;;  %9999 = vmatpush1.bf16.msra.mxu1 %v14167_v54  ;;  %v14325_v60 = vcombine.low %v3528_v39, %v3536_v40  ;;  %v14263_v54 = vcombine.low %v3465_v18, %v3473_v41  ;;  %v3624_v39 = vld [vmem:[%s17106_s5 + $0xc10] sm:$0xff]  ;;  %v3561_v18 = vld [vmem:[%s17106_s5 + $0xa18] sm:$0xff] }
 0x516   : > { %9836 = vmatprep.subr.bf16.mxu0 %v14246_v9  ;;  %10000 = vmatprep.subr.bf16.mxu1 %v14184_v52  ;;  %v14342_v9 = vcombine.high %v3544_v51, %v3552_v58  ;;  %v14280_v52 = vcombine.high %v3481_v44, %v3489_v7  ;;  %v3632_v40 = vld [vmem:[%s17106_s5 + $0xc50] sm:$0xff]  ;;  %v3569_v41 = vld [vmem:[%s17106_s5 + $0xa58] sm:$0xff] }
 0x519   : > { %9837 = vmatpush1.bf16.msra.mxu0 %v14245_v47  ;;  %10001 = vmatpush1.bf16.msra.mxu1 %v14183_v61  ;;  %v14341_v47 = vcombine.low %v3544_v51, %v3552_v58  ;;  %v14279_v61 = vcombine.low %v3481_v44, %v3489_v7  ;;  %v3640_v51 = vld [vmem:[%s17106_s5 + $0xc90] sm:$0xff]  ;;  %v3577_v44 = vld [vmem:[%s17106_s5 + $0xa98] sm:$0xff] }
 0x51a   : > { %9838 = vmatprep.subr.bf16.mxu0 %v14262_v63  ;;  %10002 = vmatprep.subr.bf16.mxu1 %v14200_v22  ;;  %v14358_v63 = vcombine.high %v3560_v55, %v3568_v38  ;;  %v14296_v22 = vcombine.high %v3497_v2, %v3505_v4  ;;  %v3648_v58 = vld [vmem:[%s17106_s5 + $0xcd0] sm:$0xff]  ;;  %v3585_v7 = vld [vmem:[%s17106_s5 + $0xad8] sm:$0xff] }
 0x51d   : > { %9839 = vmatpush1.bf16.msra.mxu0 %v14261_v57  ;;  %10003 = vmatpush1.bf16.msra.mxu1 %v14199_v62  ;;  %v14357_v57 = vcombine.low %v3560_v55, %v3568_v38  ;;  %v14295_v62 = vcombine.low %v3497_v2, %v3505_v4  ;;  %v3656_v55 = vld [vmem:[%s17106_s5 + $0xd10] sm:$0xff]  ;;  %v3593_v2 = vld [vmem:[%s17106_s5 + $0xb18] sm:$0xff] }
 0x51e   : > { %9840 = vmatprep.subr.bf16.mxu0 %v14278_v50  ;;  %10004 = vmatprep.subr.bf16.mxu1 %v14216_v13  ;;  %v14374_v50 = vcombine.high %v3576_v26, %v3584_v12  ;;  %v14312_v13 = vcombine.high %v3513_v43, %v3521_v3  ;;  %v3664_v38 = vld [vmem:[%s17106_s5 + $0xd50] sm:$0xff]  ;;  %v3601_v4 = vld [vmem:[%s17106_s5 + $0xb58] sm:$0xff] }
 0x521   : > { %9841 = vmatpush1.bf16.msra.mxu0 %v14277_v42  ;;  %10005 = vmatpush1.bf16.msra.mxu1 %v14215_v24  ;;  %v14373_v42 = vcombine.low %v3576_v26, %v3584_v12  ;;  %v14311_v24 = vcombine.low %v3513_v43, %v3521_v3  ;;  %v3672_v26 = vld [vmem:[%s17106_s5 + $0xd90] sm:$0xff]  ;;  %v3609_v43 = vld [vmem:[%s17106_s5 + $0xb98] sm:$0xff] }
 0x522   : > { %9853 = vmatprep.subr.bf16.mxu0 %v14294_v25  ;;  %10006 = vmatprep.subr.bf16.mxu1 %v14232_v27  ;;  %v14390_v25 = vcombine.high %v3592_v14, %v3600_v15  ;;  %v14328_v27 = vcombine.high %v3529_v16, %v3537_v17  ;;  %v3680_v12 = vld [vmem:[%s17106_s5 + $0xdd0] sm:$0xff]  ;;  %v3617_v3 = vld [vmem:[%s17106_s5 + $0xbd8] sm:$0xff] }
 0x524   : > { %9843 = vmatmul.mubr.bf16.vlgmr.msra.gmra.mrb[8].mxu0 %v17533_v0 }
 0x525   : > { %9854 = vmatpush1.bf16.msra.mxu0 %v14293_v5  ;;  %9885 = vmatprep.mubr.bf16.mxu0 %v17656_v46  ;;  %v14389_v5 = vcombine.low %v3592_v14, %v3600_v15  ;;  %v3688_v14 = vld [vmem:[%s17106_s5 + $0xe10] sm:$0xff] }
 0x526   : > { %10007 = vmatpush1.bf16.msra.mxu1 %v14231_v10  ;;  %9855 = vmatprep.subr.bf16.mxu0 %v14310_v36  ;;  %v14327_v10 = vcombine.low %v3529_v16, %v3537_v17  ;;  %v14406_v36 = vcombine.high %v3608_v29, %v3616_v32  ;;  %v3696_v15 = vld [vmem:[%s17106_s5 + $0xe50] sm:$0xff]  ;;  %v3625_v16 = vld [vmem:[%s17106_s5 + $0xc18] sm:$0xff] }
 0x527   : > { %10008 = vmatprep.subr.bf16.mxu1 %v14248_v37  ;;  %v14344_v37 = vcombine.high %v3545_v34, %v3553_v35  ;;  %v3633_v17 = vld [vmem:[%s17106_s5 + $0xc58] sm:$0xff] }
 0x529   : > { %9856 = vmatpush1.bf16.msra.mxu0 %v14309_v53  ;;  %v14405_v53 = vcombine.low %v3608_v29, %v3616_v32  ;;  %v3704_v29 = vld [vmem:[%s17106_s5 + $0xe90] sm:$0xff] }
 0x52a   : > { %10009 = vmatpush1.bf16.msra.mxu1 %v14247_v48  ;;  %9857 = vmatprep.subr.bf16.mxu0 %v14326_v59  ;;  %v14343_v48 = vcombine.low %v3545_v34, %v3553_v35  ;;  %v14422_v59 = vcombine.high %v3624_v39, %v3632_v40  ;;  %v3712_v32 = vld [vmem:[%s17106_s5 + $0xed0] sm:$0xff]  ;;  %v3641_v34 = vld [vmem:[%s17106_s5 + $0xc98] sm:$0xff] }
 0x52b   : > { %10010 = vmatprep.subr.bf16.mxu1 %v14264_v49  ;;  %v14360_v49 = vcombine.high %v3561_v18, %v3569_v41  ;;  %v3649_v35 = vld [vmem:[%s17106_s5 + $0xcd8] sm:$0xff] }
 0x52d   : > { %9858 = vmatpush1.bf16.msra.mxu0 %v14325_v60  ;;  %v14421_v60 = vcombine.low %v3624_v39, %v3632_v40  ;;  %v3720_v39 = vld [vmem:[%s17106_s5 + $0xf10] sm:$0xff] }
 0x52e   : > { %10011 = vmatpush1.bf16.msra.mxu1 %v14263_v54  ;;  %9859 = vmatprep.subr.bf16.mxu0 %v14342_v9  ;;  %v14359_v54 = vcombine.low %v3561_v18, %v3569_v41  ;;  %v14438_v9 = vcombine.high %v3640_v51, %v3648_v58  ;;  %v3728_v40 = vld [vmem:[%s17106_s5 + $0xf50] sm:$0xff]  ;;  %v3657_v18 = vld [vmem:[%s17106_s5 + $0xd18] sm:$0xff] }
 0x52f   : > { %10012 = vmatprep.subr.bf16.mxu1 %v14280_v52  ;;  %v14376_v52 = vcombine.high %v3577_v44, %v3585_v7  ;;  %v3665_v41 = vld [vmem:[%s17106_s5 + $0xd58] sm:$0xff] }
 0x531   : > { %9860 = vmatpush1.bf16.msra.mxu0 %v14341_v47  ;;  %v14437_v47 = vcombine.low %v3640_v51, %v3648_v58  ;;  %v3736_v51 = vld [vmem:[%s17106_s5 + $0xf90] sm:$0xff] }
 0x532   : > { %10013 = vmatpush1.bf16.msra.mxu1 %v14279_v61  ;;  %9861 = vmatprep.subr.bf16.mxu0 %v14358_v63  ;;  %v14375_v61 = vcombine.low %v3577_v44, %v3585_v7  ;;  %v14454_v63 = vcombine.high %v3656_v55, %v3664_v38  ;;  %v3744_v58 = vld [vmem:[%s17106_s5 + $0xfd0] sm:$0xff]  ;;  %v3673_v44 = vld [vmem:[%s17106_s5 + $0xd98] sm:$0xff] }
 0x533   : > { %10025 = vmatprep.subr.bf16.mxu1 %v14296_v22  ;;  %v14392_v22 = vcombine.high %v3593_v2, %v3601_v4  ;;  %v3681_v7 = vld [vmem:[%s17106_s5 + $0xdd8] sm:$0xff] }
 0x535   : > { %9862 = vmatpush1.bf16.msra.mxu0 %v14357_v57  ;;  %10015 = vmatmul.mubr.bf16.vlgmr.msra.gmra.mrb[28].mxu1 %v17533_v0  ;;  %v14453_v57 = vcombine.low %v3656_v55, %v3664_v38  ;;  %v3752_v55 = vld [vmem:[%s17106_s5 + $0x1010] sm:$0xff] }
 0x536   : > { %10026 = vmatpush1.bf16.msra.mxu1 %v14295_v62  ;;  %10057 = vmatprep.mubr.bf16.mxu1 %v17656_v46  ;;  %v14391_v62 = vcombine.low %v3593_v2, %v3601_v4  ;;  %v3760_v38 = vld [vmem:[%s17106_s5 + $0x1050] sm:$0xff]  ;;  %v3689_v2 = vld [vmem:[%s17106_s5 + $0xe18] sm:$0xff] }
 0x537   : > { %9863 = vmatprep.subr.bf16.mxu0 %v14374_v50  ;;  %10027 = vmatprep.subr.bf16.mxu1 %v14312_v13  ;;  %v14470_v50 = vcombine.high %v3672_v26, %v3680_v12  ;;  %v14408_v13 = vcombine.high %v3609_v43, %v3617_v3  ;;  %v3697_v4 = vld [vmem:[%s17106_s5 + $0xe58] sm:$0xff] }
 0x539   : > { %9864 = vmatpush1.bf16.msra.mxu0 %v14373_v42  ;;  %v14469_v42 = vcombine.low %v3672_v26, %v3680_v12  ;;  %v3768_v26 = vld [vmem:[%s17106_s5 + $0x1090] sm:$0xff] }
 0x53a   : > { %10028 = vmatpush1.bf16.msra.mxu1 %v14311_v24  ;;  %9865 = vmatprep.subr.bf16.mxu0 %v14390_v25  ;;  %v14407_v24 = vcombine.low %v3609_v43, %v3617_v3  ;;  %v14486_v25 = vcombine.high %v3688_v14, %v3696_v15  ;;  %v3776_v12 = vld [vmem:[%s17106_s5 + $0x10d0] sm:$0xff]  ;;  %v3705_v43 = vld [vmem:[%s17106_s5 + $0xe98] sm:$0xff] }
 0x53b   : > { %10029 = vmatprep.subr.bf16.mxu1 %v14328_v27  ;;  %v14424_v27 = vcombine.high %v3625_v16, %v3633_v17  ;;  %v3713_v3 = vld [vmem:[%s17106_s5 + $0xed8] sm:$0xff] }
 0x53d   : > { %9866 = vmatpush1.bf16.msra.mxu0 %v14389_v5  ;;  %v14485_v5 = vcombine.low %v3688_v14, %v3696_v15  ;;  %v3784_v14 = vld [vmem:[%s17106_s5 + $0x1110] sm:$0xff] }
 0x53e   : > { %10030 = vmatpush1.bf16.msra.mxu1 %v14327_v10  ;;  %9867 = vmatprep.subr.bf16.mxu0 %v14406_v36  ;;  %v14423_v10 = vcombine.low %v3625_v16, %v3633_v17  ;;  %v14502_v36 = vcombine.high %v3704_v29, %v3712_v32  ;;  %v3792_v15 = vld [vmem:[%s17106_s5 + $0x1150] sm:$0xff]  ;;  %v3721_v16 = vld [vmem:[%s17106_s5 + $0xf18] sm:$0xff] }
 0x53f   : > { %10031 = vmatprep.subr.bf16.mxu1 %v14344_v37  ;;  %v14440_v37 = vcombine.high %v3641_v34, %v3649_v35  ;;  %v3729_v17 = vld [vmem:[%s17106_s5 + $0xf58] sm:$0xff] }
 0x541   : > { %9868 = vmatpush1.bf16.msra.mxu0 %v14405_v53  ;;  %v14501_v53 = vcombine.low %v3704_v29, %v3712_v32  ;;  %v3800_v29 = vld [vmem:[%s17106_s5 + $0x1190] sm:$0xff] }
 0x542   : > { %10032 = vmatpush1.bf16.msra.mxu1 %v14343_v48  ;;  %9869 = vmatprep.subr.bf16.mxu0 %v14422_v59  ;;  %v14439_v48 = vcombine.low %v3641_v34, %v3649_v35  ;;  %v14518_v59 = vcombine.high %v3720_v39, %v3728_v40  ;;  %v3808_v32 = vld [vmem:[%s17106_s5 + $0x11d0] sm:$0xff]  ;;  %v3737_v34 = vld [vmem:[%s17106_s5 + $0xf98] sm:$0xff] }
 0x543   : > { %10033 = vmatprep.subr.bf16.mxu1 %v14360_v49  ;;  %v14456_v49 = vcombine.high %v3657_v18, %v3665_v41  ;;  %v3745_v35 = vld [vmem:[%s17106_s5 + $0xfd8] sm:$0xff] }
 0x545   : > { %9870 = vmatpush1.bf16.msra.mxu0 %v14421_v60  ;;  %v14517_v60 = vcombine.low %v3720_v39, %v3728_v40  ;;  %v3816_v39 = vld [vmem:[%s17106_s5 + $0x1210] sm:$0xff] }
 0x546   : > { %10034 = vmatpush1.bf16.msra.mxu1 %v14359_v54  ;;  %9871 = vmatprep.subr.bf16.mxu0 %v14438_v9  ;;  %v14455_v54 = vcombine.low %v3657_v18, %v3665_v41  ;;  %v14534_v9 = vcombine.high %v3736_v51, %v3744_v58  ;;  %v3824_v40 = vld [vmem:[%s17106_s5 + $0x1250] sm:$0xff]  ;;  %v3753_v18 = vld [vmem:[%s17106_s5 + $0x1018] sm:$0xff] }
 0x547   : > { %10035 = vmatprep.subr.bf16.mxu1 %v14376_v52  ;;  %v14472_v52 = vcombine.high %v3673_v44, %v3681_v7  ;;  %v3761_v41 = vld [vmem:[%s17106_s5 + $0x1058] sm:$0xff] }
 0x549   : > { %9872 = vmatpush1.bf16.msra.mxu0 %v14437_v47  ;;  %v14533_v47 = vcombine.low %v3736_v51, %v3744_v58  ;;  %v3832_v51 = vld [vmem:[%s17106_s5 + $0x1290] sm:$0xff] }
 0x54a   : > { %10036 = vmatpush1.bf16.msra.mxu1 %v14375_v61  ;;  %9873 = vmatprep.subr.bf16.mxu0 %v14454_v63  ;;  %v14471_v61 = vcombine.low %v3673_v44, %v3681_v7  ;;  %v14550_v63 = vcombine.high %v3752_v55, %v3760_v38  ;;  %v3840_v58 = vld [vmem:[%s17106_s5 + $0x12d0] sm:$0xff]  ;;  %v3769_v44 = vld [vmem:[%s17106_s5 + $0x1098] sm:$0xff] }
 0x54b   : > { %10037 = vmatprep.subr.bf16.mxu1 %v14392_v22  ;;  %v14488_v22 = vcombine.high %v3689_v2, %v3697_v4  ;;  %v3777_v7 = vld [vmem:[%s17106_s5 + $0x10d8] sm:$0xff] }
 0x54d   : > { %9874 = vmatpush1.bf16.msra.mxu0 %v14453_v57  ;;  %v14549_v57 = vcombine.low %v3752_v55, %v3760_v38  ;;  %v3848_v55 = vld [vmem:[%s17106_s5 + $0x1310] sm:$0xff] }
 0x54e   : > { %10038 = vmatpush1.bf16.msra.mxu1 %v14391_v62  ;;  %9875 = vmatprep.subr.bf16.mxu0 %v14470_v50  ;;  %v14487_v62 = vcombine.low %v3689_v2, %v3697_v4  ;;  %v14566_v50 = vcombine.high %v3768_v26, %v3776_v12  ;;  %v3856_v38 = vld [vmem:[%s17106_s5 + $0x1350] sm:$0xff]  ;;  %v3785_v2 = vld [vmem:[%s17106_s5 + $0x1118] sm:$0xff] }
 0x54f   : > { %10039 = vmatprep.subr.bf16.mxu1 %v14408_v13  ;;  %v14504_v13 = vcombine.high %v3705_v43, %v3713_v3  ;;  %v3793_v4 = vld [vmem:[%s17106_s5 + $0x1158] sm:$0xff] }
 0x551   : > { %9876 = vmatpush1.bf16.msra.mxu0 %v14469_v42  ;;  %v14565_v42 = vcombine.low %v3768_v26, %v3776_v12  ;;  %v3864_v26 = vld [vmem:[%s17106_s5 + $0x1390] sm:$0xff] }
 0x552   : > { %10040 = vmatpush1.bf16.msra.mxu1 %v14407_v24  ;;  %9877 = vmatprep.subr.bf16.mxu0 %v14486_v25  ;;  %v14503_v24 = vcombine.low %v3705_v43, %v3713_v3  ;;  %v14582_v25 = vcombine.high %v3784_v14, %v3792_v15  ;;  %v3872_v12 = vld [vmem:[%s17106_s5 + $0x13d0] sm:$0xff]  ;;  %v3801_v43 = vld [vmem:[%s17106_s5 + $0x1198] sm:$0xff] }
 0x553   : > { %10041 = vmatprep.subr.bf16.mxu1 %v14424_v27  ;;  %v14520_v27 = vcombine.high %v3721_v16, %v3729_v17  ;;  %v3809_v3 = vld [vmem:[%s17106_s5 + $0x11d8] sm:$0xff] }
 0x555   : > { %9878 = vmatpush1.bf16.msra.mxu0 %v14485_v5  ;;  %v14581_v5 = vcombine.low %v3784_v14, %v3792_v15  ;;  %v3880_v14 = vld [vmem:[%s17106_s5 + $0x1410] sm:$0xff] }
 0x556   : > { %10042 = vmatpush1.bf16.msra.mxu1 %v14423_v10  ;;  %9879 = vmatprep.subr.bf16.mxu0 %v14502_v36  ;;  %v14519_v10 = vcombine.low %v3721_v16, %v3729_v17  ;;  %v14598_v36 = vcombine.high %v3800_v29, %v3808_v32  ;;  %v3888_v15 = vld [vmem:[%s17106_s5 + $0x1450] sm:$0xff]  ;;  %v3817_v16 = vld [vmem:[%s17106_s5 + $0x1218] sm:$0xff] }
 0x557   : > { %10043 = vmatprep.subr.bf16.mxu1 %v14440_v37  ;;  %v14536_v37 = vcombine.high %v3737_v34, %v3745_v35  ;;  %v3825_v17 = vld [vmem:[%s17106_s5 + $0x1258] sm:$0xff] }
 0x559   : > { %9880 = vmatpush1.bf16.msra.mxu0 %v14501_v53  ;;  %v14597_v53 = vcombine.low %v3800_v29, %v3808_v32  ;;  %v3896_v29 = vld [vmem:[%s17106_s5 + $0x1490] sm:$0xff] }
 0x55a   : > { %10044 = vmatpush1.bf16.msra.mxu1 %v14439_v48  ;;  %9881 = vmatprep.subr.bf16.mxu0 %v14518_v59  ;;  %v14535_v48 = vcombine.low %v3737_v34, %v3745_v35  ;;  %v14614_v59 = vcombine.high %v3816_v39, %v3824_v40  ;;  %v3904_v32 = vld [vmem:[%s17106_s5 + $0x14d0] sm:$0xff]  ;;  %v3833_v34 = vld [vmem:[%s17106_s5 + $0x1298] sm:$0xff] }
 0x55b   : > { %10045 = vmatprep.subr.bf16.mxu1 %v14456_v49  ;;  %v14552_v49 = vcombine.high %v3753_v18, %v3761_v41  ;;  %v3841_v35 = vld [vmem:[%s17106_s5 + $0x12d8] sm:$0xff] }
 0x55d   : > { %9882 = vmatpush1.bf16.msra.mxu0 %v14517_v60  ;;  %v14613_v60 = vcombine.low %v3816_v39, %v3824_v40  ;;  %v3912_v39 = vld [vmem:[%s17106_s5 + $0x1510] sm:$0xff] }
 0x55e   : > { %10046 = vmatpush1.bf16.msra.mxu1 %v14455_v54  ;;  %9883 = vmatprep.subr.bf16.mxu0 %v14534_v9  ;;  %v14551_v54 = vcombine.low %v3753_v18, %v3761_v41  ;;  %v14630_v9 = vcombine.high %v3832_v51, %v3840_v58  ;;  %v3920_v40 = vld [vmem:[%s17106_s5 + $0x1550] sm:$0xff]  ;;  %v3849_v18 = vld [vmem:[%s17106_s5 + $0x1318] sm:$0xff] }
 0x55f   : > { %10047 = vmatprep.subr.bf16.mxu1 %v14472_v52  ;;  %v14568_v52 = vcombine.high %v3769_v44, %v3777_v7  ;;  %v3857_v41 = vld [vmem:[%s17106_s5 + $0x1358] sm:$0xff] }
 0x561   : > { %9884 = vmatpush1.bf16.msra.mxu0 %v14533_v47  ;;  %v14629_v47 = vcombine.low %v3832_v51, %v3840_v58  ;;  %v3928_v51 = vld [vmem:[%s17106_s5 + $0x1590] sm:$0xff] }
 0x562   : > { %10048 = vmatpush1.bf16.msra.mxu1 %v14471_v61  ;;  %9896 = vmatprep.subr.bf16.mxu0 %v14550_v63  ;;  %v14567_v61 = vcombine.low %v3769_v44, %v3777_v7  ;;  %v14646_v63 = vcombine.high %v3848_v55, %v3856_v38  ;;  %v3936_v58 = vld [vmem:[%s17106_s5 + $0x15d0] sm:$0xff]  ;;  %v3865_v44 = vld [vmem:[%s17106_s5 + $0x1398] sm:$0xff] }
 0x563   : > { %10049 = vmatprep.subr.bf16.mxu1 %v14488_v22  ;;  %v14584_v22 = vcombine.high %v3785_v2, %v3793_v4  ;;  %v3873_v7 = vld [vmem:[%s17106_s5 + $0x13d8] sm:$0xff] }
 0x564   : > { %9886 = vmatmul.mubr.bf16.vlgmr.msra.gmra.mrb[8].mxu0 %v17654_v45 }
 0x565   : > { %9897 = vmatpush1.bf16.msra.mxu0 %v14549_v57  ;;  %9928 = vmatprep.mubr.bf16.mxu0 %v17776_v23  ;;  %v14645_v57 = vcombine.low %v3848_v55, %v3856_v38  ;;  %v3944_v55 = vld [vmem:[%s17106_s5 + $0x1610] sm:$0xff] }
 0x566   : > { %10050 = vmatpush1.bf16.msra.mxu1 %v14487_v62  ;;  %9898 = vmatprep.subr.bf16.mxu0 %v14566_v50  ;;  %v14583_v62 = vcombine.low %v3785_v2, %v3793_v4  ;;  %v14662_v50 = vcombine.high %v3864_v26, %v3872_v12  ;;  %v3952_v38 = vld [vmem:[%s17106_s5 + $0x1650] sm:$0xff]  ;;  %v3881_v2 = vld [vmem:[%s17106_s5 + $0x1418] sm:$0xff] }
 0x567   : > { %10051 = vmatprep.subr.bf16.mxu1 %v14504_v13  ;;  %v14600_v13 = vcombine.high %v3801_v43, %v3809_v3  ;;  %v3889_v4 = vld [vmem:[%s17106_s5 + $0x1458] sm:$0xff] }
 0x569   : > { %9899 = vmatpush1.bf16.msra.mxu0 %v14565_v42  ;;  %v14661_v42 = vcombine.low %v3864_v26, %v3872_v12  ;;  %v3960_v26 = vld [vmem:[%s17106_s5 + $0x1690] sm:$0xff] }
 0x56a   : > { %10052 = vmatpush1.bf16.msra.mxu1 %v14503_v24  ;;  %9900 = vmatprep.subr.bf16.mxu0 %v14582_v25  ;;  %v14599_v24 = vcombine.low %v3801_v43, %v3809_v3  ;;  %v14678_v25 = vcombine.high %v3880_v14, %v3888_v15  ;;  %v3968_v12 = vld [vmem:[%s17106_s5 + $0x16d0] sm:$0xff]  ;;  %v3897_v43 = vld [vmem:[%s17106_s5 + $0x1498] sm:$0xff] }
 0x56b   : > { %10053 = vmatprep.subr.bf16.mxu1 %v14520_v27  ;;  %v14616_v27 = vcombine.high %v3817_v16, %v3825_v17  ;;  %v3905_v3 = vld [vmem:[%s17106_s5 + $0x14d8] sm:$0xff] }
 0x56d   : > { %9901 = vmatpush1.bf16.msra.mxu0 %v14581_v5  ;;  %v14677_v5 = vcombine.low %v3880_v14, %v3888_v15  ;;  %v3976_v14 = vld [vmem:[%s17106_s5 + $0x1710] sm:$0xff] }
 0x56e   : > { %10054 = vmatpush1.bf16.msra.mxu1 %v14519_v10  ;;  %9902 = vmatprep.subr.bf16.mxu0 %v14598_v36  ;;  %v14615_v10 = vcombine.low %v3817_v16, %v3825_v17  ;;  %v14694_v36 = vcombine.high %v3896_v29, %v3904_v32  ;;  %v3984_v15 = vld [vmem:[%s17106_s5 + $0x1750] sm:$0xff]  ;;  %v3913_v16 = vld [vmem:[%s17106_s5 + $0x1518] sm:$0xff] }
 0x56f   : > { %10055 = vmatprep.subr.bf16.mxu1 %v14536_v37  ;;  %v14632_v37 = vcombine.high %v3833_v34, %v3841_v35  ;;  %v3921_v17 = vld [vmem:[%s17106_s5 + $0x1558] sm:$0xff] }
 0x571   : > { %9903 = vmatpush1.bf16.msra.mxu0 %v14597_v53  ;;  %v14693_v53 = vcombine.low %v3896_v29, %v3904_v32  ;;  %v3992_v29 = vld [vmem:[%s17106_s5 + $0x1790] sm:$0xff] }
 0x572   : > { %10056 = vmatpush1.bf16.msra.mxu1 %v14535_v48  ;;  %9904 = vmatprep.subr.bf16.mxu0 %v14614_v59  ;;  %v14631_v48 = vcombine.low %v3833_v34, %v3841_v35  ;;  %v14710_v59 = vcombine.high %v3912_v39, %v3920_v40  ;;  %v4000_v32 = vld [vmem:[%s17106_s5 + $0x17d0] sm:$0xff]  ;;  %v3929_v34 = vld [vmem:[%s17106_s5 + $0x1598] sm:$0xff] }
 0x573   : > { %10068 = vmatprep.subr.bf16.mxu1 %v14552_v49  ;;  %v14648_v49 = vcombine.high %v3849_v18, %v3857_v41  ;;  %v3937_v35 = vld [vmem:[%s17106_s5 + $0x15d8] sm:$0xff] }
 0x575   : > { %9905 = vmatpush1.bf16.msra.mxu0 %v14613_v60  ;;  %10058 = vmatmul.mubr.bf16.vlgmr.msra.gmra.mrb[28].mxu1 %v17654_v45  ;;  %v14709_v60 = vcombine.low %v3912_v39, %v3920_v40  ;;  %v4008_v39 = vld [vmem:[%s17106_s5 + $0x1810] sm:$0xff] }
 0x576   : > { %10069 = vmatpush1.bf16.msra.mxu1 %v14551_v54  ;;  %10100 = vmatprep.mubr.bf16.mxu1 %v17776_v23  ;;  %v14647_v54 = vcombine.low %v3849_v18, %v3857_v41  ;;  %v4016_v40 = vld [vmem:[%s17106_s5 + $0x1850] sm:$0xff]  ;;  %v3945_v18 = vld [vmem:[%s17106_s5 + $0x1618] sm:$0xff] }
 0x577   : > { %9906 = vmatprep.subr.bf16.mxu0 %v14630_v9  ;;  %10070 = vmatprep.subr.bf16.mxu1 %v14568_v52  ;;  %v14726_v9 = vcombine.high %v3928_v51, %v3936_v58  ;;  %v14664_v52 = vcombine.high %v3865_v44, %v3873_v7  ;;  %v3953_v41 = vld [vmem:[%s17106_s5 + $0x1658] sm:$0xff] }
 0x579   : > { %9907 = vmatpush1.bf16.msra.mxu0 %v14629_v47  ;;  %v14725_v47 = vcombine.low %v3928_v51, %v3936_v58  ;;  %v4024_v51 = vld [vmem:[%s17106_s5 + $0x1890] sm:$0xff] }
 0x57a   : > { %10071 = vmatpush1.bf16.msra.mxu1 %v14567_v61  ;;  %9908 = vmatprep.subr.bf16.mxu0 %v14646_v63  ;;  %v14663_v61 = vcombine.low %v3865_v44, %v3873_v7  ;;  %v14742_v63 = vcombine.high %v3944_v55, %v3952_v38  ;;  %v4032_v58 = vld [vmem:[%s17106_s5 + $0x18d0] sm:$0xff]  ;;  %v3961_v44 = vld [vmem:[%s17106_s5 + $0x1698] sm:$0xff] }
 0x57b   : > { %10072 = vmatprep.subr.bf16.mxu1 %v14584_v22  ;;  %v14680_v22 = vcombine.high %v3881_v2, %v3889_v4  ;;  %v3969_v7 = vld [vmem:[%s17106_s5 + $0x16d8] sm:$0xff] }
 0x57d   : > { %9909 = vmatpush1.bf16.msra.mxu0 %v14645_v57  ;;  %v14741_v57 = vcombine.low %v3944_v55, %v3952_v38  ;;  %v4040_v55 = vld [vmem:[%s17106_s5 + $0x1910] sm:$0xff] }
 0x57e   : > { %10073 = vmatpush1.bf16.msra.mxu1 %v14583_v62  ;;  %9910 = vmatprep.subr.bf16.mxu0 %v14662_v50  ;;  %v14679_v62 = vcombine.low %v3881_v2, %v3889_v4  ;;  %v14758_v50 = vcombine.high %v3960_v26, %v3968_v12  ;;  %v4048_v38 = vld [vmem:[%s17106_s5 + $0x1950] sm:$0xff]  ;;  %v3977_v2 = vld [vmem:[%s17106_s5 + $0x1718] sm:$0xff] }
 0x57f   : > { %10074 = vmatprep.subr.bf16.mxu1 %v14600_v13  ;;  %v14696_v13 = vcombine.high %v3897_v43, %v3905_v3  ;;  %v3985_v4 = vld [vmem:[%s17106_s5 + $0x1758] sm:$0xff] }
 0x581   : > { %9911 = vmatpush1.bf16.msra.mxu0 %v14661_v42  ;;  %v14757_v42 = vcombine.low %v3960_v26, %v3968_v12  ;;  %v4056_v26 = vld [vmem:[%s17106_s5 + $0x1990] sm:$0xff] }
 0x582   : > { %10075 = vmatpush1.bf16.msra.mxu1 %v14599_v24  ;;  %9912 = vmatprep.subr.bf16.mxu0 %v14678_v25  ;;  %v14695_v24 = vcombine.low %v3897_v43, %v3905_v3  ;;  %v14774_v25 = vcombine.high %v3976_v14, %v3984_v15  ;;  %v4064_v12 = vld [vmem:[%s17106_s5 + $0x19d0] sm:$0xff]  ;;  %v3993_v43 = vld [vmem:[%s17106_s5 + $0x1798] sm:$0xff] }
 0x583   : > { %10076 = vmatprep.subr.bf16.mxu1 %v14616_v27  ;;  %v14712_v27 = vcombine.high %v3913_v16, %v3921_v17  ;;  %v4001_v3 = vld [vmem:[%s17106_s5 + $0x17d8] sm:$0xff] }
 0x585   : > { %9913 = vmatpush1.bf16.msra.mxu0 %v14677_v5  ;;  %v14773_v5 = vcombine.low %v3976_v14, %v3984_v15  ;;  %v4072_v14 = vld [vmem:[%s17106_s5 + $0x1a10] sm:$0xff] }
 0x586   : > { %10077 = vmatpush1.bf16.msra.mxu1 %v14615_v10  ;;  %9914 = vmatprep.subr.bf16.mxu0 %v14694_v36  ;;  %v14711_v10 = vcombine.low %v3913_v16, %v3921_v17  ;;  %v14790_v36 = vcombine.high %v3992_v29, %v4000_v32  ;;  %v4080_v15 = vld [vmem:[%s17106_s5 + $0x1a50] sm:$0xff]  ;;  %v4009_v16 = vld [vmem:[%s17106_s5 + $0x1818] sm:$0xff] }
 0x587   : > { %10078 = vmatprep.subr.bf16.mxu1 %v14632_v37  ;;  %v14728_v37 = vcombine.high %v3929_v34, %v3937_v35  ;;  %v4017_v17 = vld [vmem:[%s17106_s5 + $0x1858] sm:$0xff] }
 0x589   : > { %9915 = vmatpush1.bf16.msra.mxu0 %v14693_v53  ;;  %v14789_v53 = vcombine.low %v3992_v29, %v4000_v32  ;;  %v4088_v29 = vld [vmem:[%s17106_s5 + $0x1a90] sm:$0xff] }
 0x58a   : > { %10079 = vmatpush1.bf16.msra.mxu1 %v14631_v48  ;;  %9916 = vmatprep.subr.bf16.mxu0 %v14710_v59  ;;  %v14727_v48 = vcombine.low %v3929_v34, %v3937_v35  ;;  %v14806_v59 = vcombine.high %v4008_v39, %v4016_v40  ;;  %v4096_v32 = vld [vmem:[%s17106_s5 + $0x1ad0] sm:$0xff]  ;;  %v4025_v34 = vld [vmem:[%s17106_s5 + $0x1898] sm:$0xff] }
 0x58b   : > { %10080 = vmatprep.subr.bf16.mxu1 %v14648_v49  ;;  %v14744_v49 = vcombine.high %v3945_v18, %v3953_v41  ;;  %v4033_v35 = vld [vmem:[%s17106_s5 + $0x18d8] sm:$0xff] }
 0x58d   : > { %9917 = vmatpush1.bf16.msra.mxu0 %v14709_v60  ;;  %v14805_v60 = vcombine.low %v4008_v39, %v4016_v40  ;;  %v14824_v39 = vcombine.high %v4025_v34, %v4033_v35  ;;  %v4104_v40 = vld [vmem:[%s17106_s5 + $0x1b10] sm:$0xff] }
 0x58e   : > { %10081 = vmatpush1.bf16.msra.mxu1 %v14647_v54  ;;  %9918 = vmatprep.subr.bf16.mxu0 %v14726_v9  ;;  %v14743_v54 = vcombine.low %v3945_v18, %v3953_v41  ;;  %v14822_v9 = vcombine.high %v4024_v51, %v4032_v58  ;;  %v4112_v18 = vld [vmem:[%s17106_s5 + $0x1b50] sm:$0xff] }
 0x58f   : > { %10082 = vmatprep.subr.bf16.mxu1 %v14664_v52  ;;  %v14760_v52 = vcombine.high %v3961_v44, %v3969_v7 }
 0x591   : > { %9919 = vmatpush1.bf16.msra.mxu0 %v14725_v47  ;;  %v14821_v47 = vcombine.low %v4024_v51, %v4032_v58  ;;  %v14823_v51 = vcombine.low %v4025_v34, %v4033_v35  ;;  %v14902_v58 = vcombine.high %v4104_v40, %v4112_v18  ;;  %v4097_v34 = vld [vmem:[%s17106_s5 + $0x1ad8] sm:$0xff] }
 0x592   : > { %10083 = vmatpush1.bf16.msra.mxu1 %v14663_v61  ;;  %9920 = vmatprep.subr.bf16.mxu0 %v14742_v63  ;;  %v14759_v61 = vcombine.low %v3961_v44, %v3969_v7  ;;  %v14838_v63 = vcombine.high %v4040_v55, %v4048_v38 }
 0x593   : > { %10084 = vmatprep.subr.bf16.mxu1 %v14680_v22  ;;  %v14776_v22 = vcombine.high %v3977_v2, %v3985_v4 }
 0x595   : > { %9921 = vmatpush1.bf16.msra.mxu0 %v14741_v57  ;;  %v14837_v57 = vcombine.low %v4040_v55, %v4048_v38  ;;  %v4057_v55 = vld [vmem:[%s17106_s5 + $0x1998] sm:$0xff] }
 0x596   : > { %10085 = vmatpush1.bf16.msra.mxu1 %v14679_v62  ;;  %9922 = vmatprep.subr.bf16.mxu0 %v14758_v50  ;;  %v14775_v62 = vcombine.low %v3977_v2, %v3985_v4  ;;  %v14854_v50 = vcombine.high %v4056_v26, %v4064_v12  ;;  %v4065_v38 = vld [vmem:[%s17106_s5 + $0x19d8] sm:$0xff] }
 0x597   : > { %10086 = vmatprep.subr.bf16.mxu1 %v14696_v13  ;;  %v14792_v13 = vcombine.high %v3993_v43, %v4001_v3 }
 0x599   : > { %9923 = vmatpush1.bf16.msra.mxu0 %v14757_v42  ;;  %v14853_v42 = vcombine.low %v4056_v26, %v4064_v12 }
 0x59a   : > { %10087 = vmatpush1.bf16.msra.mxu1 %v14695_v24  ;;  %9924 = vmatprep.subr.bf16.mxu0 %v14774_v25  ;;  %v14791_v24 = vcombine.low %v3993_v43, %v4001_v3  ;;  %v14870_v25 = vcombine.high %v4072_v14, %v4080_v15 }
 0x59b   : > { %10088 = vmatprep.subr.bf16.mxu1 %v14712_v27  ;;  %v14808_v27 = vcombine.high %v4009_v16, %v4017_v17 }
 0x59d   : > { %9925 = vmatpush1.bf16.msra.mxu0 %v14773_v5  ;;  %v14869_v5 = vcombine.low %v4072_v14, %v4080_v15  ;;  %v4073_v14 = vld [vmem:[%s17106_s5 + $0x1a18] sm:$0xff] }
 0x59e   : > { %10089 = vmatpush1.bf16.msra.mxu1 %v14711_v10  ;;  %9926 = vmatprep.subr.bf16.mxu0 %v14790_v36  ;;  %v18121_v10 = vld [vmem:[%s17113_s11] sm:$0xff]  ;;  %v14807_v36 = vcombine.low %v4009_v16, %v4017_v17  ;;  %v4081_v15 = vld [vmem:[%s17106_s5 + $0x1a58] sm:$0xff] }
 0x59f   : > { %10090 = vmatprep.subr.bf16.mxu1 %v14728_v37  ;;  %v14886_v37 = vcombine.high %v4088_v29, %v4096_v32  ;;  %v4269_v41 = vrot.slane %v18121_v10, %v17274_v19 }
 0x5a1   : > { %9927 = vmatpush1.bf16.msra.mxu0 %v14789_v53  ;;  %v4041_v53 = vld [vmem:[%s17106_s5 + $0x1918] sm:$0xff] }
 0x5a2   : > { %10091 = vmatpush1.bf16.msra.mxu1 %v14727_v48  ;;  %9939 = vmatprep.subr.bf16.mxu0 %v14806_v59  ;;  %v4049_v48 = vld [vmem:[%s17106_s5 + $0x1958] sm:$0xff]  ;;  %v14885_v59 = vcombine.low %v4088_v29, %v4096_v32  ;;  %v4160_v29 = vld [vmem:[%s17106_s5 + $0x1cd0] sm:$0xff] }
 0x5a3   : > { %10092 = vmatprep.subr.bf16.mxu1 %v14744_v49  ;;  %v4273_v49 = vrot.slane %v18121_v10, %v17280_v21  ;;  %v14840_v7 = vcombine.high %v4041_v53, %v4049_v48  ;;  %v14839_v26 = vcombine.low %v4041_v53, %v4049_v48  ;;  %v4089_v32 = vld [vmem:[%s17106_s5 + $0x1a98] sm:$0xff]  ;;  %v4277_v53 = vrot.slane %v18121_v10, %v17314_v31  ;;  %v18170_v48 = vld [vmem:[%s17106_s5 + $0x1d90] sm:$0xff] }
 0x5a4   : > { %9929 = vmatmul.mubr.bf16.vlgmr.msra.gmra.mrb[8].mxu0 %v17772_v6 }
 0x5a5   : > { %9940 = vmatpush1.bf16.msra.mxu0 %v14805_v60  ;;  %9971 = vmatprep.mubr.bf16.mxu0 %v17891_v20  ;;  %v4120_v60 = vld [vmem:[%s17106_s5 + $0x1b90] sm:$0xff] }
 0x5a6   : > { %10093 = vmatpush1.bf16.msra.mxu1 %v14743_v54  ;;  %9941 = vmatprep.subr.bf16.mxu0 %v14822_v9  ;;  %v4128_v54 = vld [vmem:[%s17106_s5 + $0x1bd0] sm:$0xff] }
 0x5a7   : > { %10094 = vmatprep.subr.bf16.mxu1 %v14760_v52  ;;  %v14918_v12 = vcombine.high %v4120_v60, %v4128_v54  ;;  %v14917_v17 = vcombine.low %v4120_v60, %v4128_v54 }
 0x5a9   : > { %9942 = vmatpush1.bf16.msra.mxu0 %v14821_v47  ;;  %v14901_v47 = vcombine.low %v4104_v40, %v4112_v18  ;;  %v4176_v40 = vld [vmem:[%s17106_s5 + $0x1d50] sm:$0xff]  ;;  %v18162_v18 = vld [vmem:[%s17106_s5 + $0x1b18] sm:$0xff] }
 0x5aa   : > { %10095 = vmatpush1.bf16.msra.mxu1 %v14759_v61  ;;  %9943 = vmatprep.subr.bf16.mxu0 %v14838_v63 }
 0x5ab   : > { %10096 = vmatprep.subr.bf16.mxu1 %v14776_v22 }
 0x5ad   : > { %9944 = vmatpush1.bf16.msra.mxu0 %v14837_v57  ;;  %v14856_v57 = vcombine.high %v4057_v55, %v4065_v38 }
 0x5ae   : > { %10097 = vmatpush1.bf16.msra.mxu1 %v14775_v62  ;;  %9945 = vmatprep.subr.bf16.mxu0 %v14854_v50  ;;  %v4136_v62 = vld [vmem:[%s17106_s5 + $0x1c10] sm:$0xff] }
 0x5af   : > { %10098 = vmatprep.subr.bf16.mxu1 %v14792_v13  ;;  %v4144_v50 = vld [vmem:[%s17106_s5 + $0x1c50] sm:$0xff] }
 0x5b0   : > { %v14933_v35 = vcombine.low %v4136_v62, %v4144_v50 }
 0x5b1   : > { %9946 = vmatpush1.bf16.msra.mxu0 %v14853_v42  ;;  %v14855_v42 = vcombine.low %v4057_v55, %v4065_v38  ;;  %v18188_v38 = vld [vmem:[%s17106_s5 + $0x1e10] sm:$0xff] }
 0x5b2   : > { %10099 = vmatpush1.bf16.msra.mxu1 %v14791_v24  ;;  %9947 = vmatprep.subr.bf16.mxu0 %v14870_v25  ;;  %v14934_v24 = vcombine.high %v4136_v62, %v4144_v50  ;;  %v14872_v25 = vcombine.high %v4073_v14, %v4081_v15 }
 0x5b3   : > { %10111 = vmatprep.subr.bf16.mxu1 %v14808_v27  ;;  %v4152_v27 = vld [vmem:[%s17106_s5 + $0x1c90] sm:$0xff] }
 0x5b5   : > { %9948 = vmatpush1.bf16.msra.mxu0 %v14869_v5  ;;  %10101 = vmatmul.mubr.bf16.vlgmr.msra.gmra.mrb[28].mxu1 %v17772_v6  ;;  %v14871_v5 = vcombine.low %v4073_v14, %v4081_v15 }
 0x5b6   : > { %10112 = vmatpush1.bf16.msra.mxu1 %v14807_v36  ;;  %10143 = vmatprep.mubr.bf16.mxu1 %v17891_v20  ;;  %v14950_v36 = vcombine.high %v4152_v27, %v4160_v29 }
 0x5b7   : > { %v9629_v44 = vpop.f32.mrb[4].mxu0  ;;  %9949 = vmatprep.subr.bf16.mxu0 %v14886_v37  ;;  %10113 = vmatprep.subr.bf16.mxu1 %v14824_v39  ;;  %v18158_v37 = vld [vmem:[%s17106_s5 + $0x1d10] sm:$0xff]  ;;  %v14888_v39 = vcombine.high %v4089_v32, %v4097_v34 }
 0x5b8   : > { %v18135_v9 = vadd.f32 %v9629_v44, %v4269_v41  ;;  %v9631_v52 = vpop.f32.mrb[5].mxu0  ;;  %v18178_v44 = vld [vmem:[%s17106_s5 + $0x1b98] sm:$0xff]  ;;  %v14965_v54 = vcombine.low %v18158_v37, %v4176_v40 }
 0x5b9   : > { %v18139_v2 = vadd.f32 %v9631_v52, %v4273_v49  ;;  %9950 = vmatpush1.bf16.msra.mxu0 %v14885_v59  ;;  %v9633_v4 = vpop.f32.mrb[6].mxu0  ;;  %v18173_v59 = vld [vmem:[%s17106_s5 + $0x1dd0] sm:$0xff]  ;;  %v14966_v52 = vcombine.high %v18158_v37, %v4176_v40  ;;  %v4137_v40 = vld [vmem:[%s17106_s5 + $0x1c18] sm:$0xff] }
 0x5ba   : > { %v10874_v61 = vmul.f32 1.442695, %v18135_v9  ;;  %v18142_v63 = vadd.f32 %v9633_v4, %v4269_v41  ;;  %10114 = vmatpush1.bf16.msra.mxu1 %v14823_v51  ;;  %v9635_v22 = vpop.f32.mrb[7].mxu0  ;;  %9951 = vmatprep.subr.bf16.mxu0 %v14902_v58  ;;  %v18165_v41 = vld [vmem:[%s17106_s5 + $0x1b58] sm:$0xff]  ;;  %v4281_v51 = vrot.slane %v18121_v10, %v17317_v33  ;;  %v14887_v58 = vcombine.low %v4089_v32, %v4097_v34  ;;  %v18191_v4 = vld [vmem:[%s17106_s5 + $0x1e50] sm:$0xff] }
 0x5bb   : > { %v10876_v43 = vmul.f32 1.442695, %v18139_v2  ;;  %v18145_v3 = vadd.f32 %v9635_v22, %v4273_v49  ;;  %10115 = vmatprep.subr.bf16.mxu1 %v14840_v7  ;;  %v14949_v49 = vcombine.low %v4152_v27, %v4160_v29  ;;  %v18181_v7 = vld [vmem:[%s17106_s5 + $0x1bd8] sm:$0xff]  ;;  %v14904_v55 = vcombine.high %v18162_v18, %v18165_v41 }
 0x5bc   : > { %16182 = vpow2.f32 %v10874_v61  ;;  %v10906_v13 = vmul.f32 1.442695, %v18142_v63  ;;  %v14903_v22 = vcombine.low %v18162_v18, %v18165_v41  ;;  %v14920_v14 = vcombine.high %v18178_v44, %v18181_v7  ;;  %v4145_v18 = vld [vmem:[%s17106_s5 + $0x1c58] sm:$0xff] }
 0x5bd   : > { %16184 = vpow2.f32 %v10876_v43  ;;  %v10908_v16 = vmul.f32 1.442695, %v18145_v3  ;;  %9952 = vmatpush1.bf16.msra.mxu0 %v14901_v47  ;;  %vm10842_vm8 = vcmp.gt.f32.partialorder %v18135_v9, 0.0  ;;  %vm10843_vm9 = vcmp.gt.f32.partialorder %v18139_v2, 0.0 }
 0x5be   : > { %16186 = vpow2.f32 %v10906_v13  ;;  %10116 = vmatpush1.bf16.msra.mxu1 %v14839_v26  ;;  %9953 = vmatprep.subr.bf16.mxu0 %v14918_v12  ;;  %v14981_v26 = vcombine.low %v18170_v48, %v18173_v59  ;;  %v14982_v12 = vcombine.high %v18170_v48, %v18173_v59  ;;  %v14919_v13 = vcombine.low %v18178_v44, %v18181_v7 }
 0x5bf   : > { %16188 = vpow2.f32 %v10908_v16  ;;  %10117 = vmatprep.subr.bf16.mxu1 %v14856_v57  ;;  %vm10858_vm10 = vcmp.gt.f32.partialorder %v18142_v63, 0.0  ;;  %vm10859_vm11 = vcmp.gt.f32.partialorder %v18145_v3, 0.0 }
 0x5c1   : > { %9954 = vmatpush1.bf16.msra.mxu0 %v14917_v17 }
 0x5c2   : > { %10118 = vmatpush1.bf16.msra.mxu1 %v14855_v42  ;;  %9955 = vmatprep.subr.bf16.mxu0 %v14934_v24 }
 0x5c3   : > { %10119 = vmatprep.subr.bf16.mxu1 %v14872_v25  ;;  %v14998_v25 = vcombine.high %v18188_v38, %v18191_v4 }
 0x5c5   : > { %9956 = vmatpush1.bf16.msra.mxu0 %v14933_v35 }
 0x5c6   : > { %v16183_v60 = vpop.eup %16182  ;;  %10120 = vmatpush1.bf16.msra.mxu1 %v14871_v5  ;;  %9957 = vmatprep.subr.bf16.mxu0 %v14950_v36 }
 0x5c7   : > { %v16185_v10 = vpop.eup %16184  ;;  %v15057_v47 = vadd.f32 -1.0, %v16183_v60  ;;  %v9801_v61 = vpop.f32.mrb[24].mxu1  ;;  %10121 = vmatprep.subr.bf16.mxu1 %v14888_v39  ;;  %v14936_v60 = vcombine.high %v4137_v40, %v4145_v18 }
 0x5c8   : > { %v16187_v43 = vpop.eup %16186  ;;  %v15058_v57 = vadd.f32 -1.0, %v16185_v10  ;;  %v18199_v62 = vadd.f32 %v9801_v61, %v4277_v53  ;;  %v9803_v50 = vpop.f32.mrb[25].mxu1  ;;  %v14997_v10 = vcombine.low %v18188_v38, %v18191_v4  ;;  %v14935_v61 = vcombine.low %v4137_v40, %v4145_v18  ;;  %v18262_v18 = vld [vmem:[%s17106_s5 + $0x20] sm:$0xff] }
 0x5c9   : > { %v16189_v15 = vpop.eup %16188  ;;  %v10970_v16 = vmul.f32 1.6732632, %v15057_v47  ;;  %v15073_v17 = vadd.f32 -1.0, %v16187_v43  ;;  %v18205_v42 = vadd.f32 %v9803_v50, %v4281_v51  ;;  %9958 = vmatpush1.bf16.msra.mxu0 %v14949_v49  ;;  %v9805_v24 = vpop.f32.mrb[26].mxu1  ;;  %v4240_v50 = vld [vmem:[%s17106_s5 + $0x1f50] sm:$0xff] }
 0x5ca   : > { %v10971_v27 = vmul.f32 1.6732632, %v15058_v57  ;;  %v15074_v29 = vadd.f32 -1.0, %v16189_v15  ;;  %v10878_v32 = vmul.f32 1.442695, %v18199_v62  ;;  %10122 = vmatpush1.bf16.msra.mxu1 %v14887_v58  ;;  %9959 = vmatprep.subr.bf16.mxu0 %v14966_v52  ;;  %v9807_v36 = vpop.f32.mrb[27].mxu1 }
 0x5cb   : > { %v11002_v34 = vsel %vm10842_vm8, %v18135_v9, %v10970_v16  ;;  %v10986_v35 = vmul.f32 1.6732632, %v15073_v17  ;;  %v10880_v5 = vmul.f32 1.442695, %v18205_v42  ;;  %10123 = vmatprep.subr.bf16.mxu1 %v14904_v55  ;;  %v18220_v9 = vadd.f32 %v9805_v24, %v4277_v53  ;;  %v4216_v58 = vld [vmem:[%s17106_s5 + $0x1e90] sm:$0xff]  ;;  %v4169_v15 = vld [vmem:[%s17106_s5 + $0x1d18] sm:$0xff] }
 0x5cc   : > { %v11003_v37 = vsel %vm10843_vm9, %v18139_v2, %v10971_v27  ;;  %v10987_v39 = vmul.f32 1.6732632, %v15074_v29  ;;  %16190 = vpow2.f32 %v10878_v32  ;;  %v18222_v48 = vmul.f32 1.050701, %v11002_v34  ;;  %v4232_v57 = vld [vmem:[%s17106_s5 + $0x1f10] sm:$0xff]  ;;  %v4177_v16 = vld [vmem:[%s17106_s5 + $0x1d58] sm:$0xff] }
 0x5cd   : > { %v11018_v41 = vsel %vm10858_vm10, %v18142_v63, %v10986_v35  ;;  %16192 = vpow2.f32 %v10880_v5  ;;  %9960 = vmatpush1.bf16.msra.mxu0 %v14965_v54  ;;  %v18227_v49 = vadd.f32 %v9807_v36, %v4281_v51  ;;  %v4224_v63 = vld [vmem:[%s17106_s5 + $0x1ed0] sm:$0xff]  ;;  %v18231_v44 = vmul.f32 1.050701, %v11003_v37  ;;  %v4161_v51 = vld [vmem:[%s17106_s5 + $0x1cd8] sm:$0xff] }
 0x5ce   : > { %v18224_v2 = vmul.f32 1.050701, %v11018_v41  ;;  %v11019_v59 = vsel %vm10859_vm11, %v18145_v3, %v10987_v39  ;;  %10124 = vmatpush1.bf16.msra.mxu1 %v14903_v22  ;;  %9961 = vmatprep.subr.bf16.mxu0 %v14982_v12  ;;  %v10910_v53 = vmul.f32 1.442695, %v18220_v9  ;;  %v4153_v3 = vld [vmem:[%s17106_s5 + $0x1c98] sm:$0xff]  ;;  %v15014_v22 = vcombine.high %v4216_v58, %v4224_v63  ;;  %v18253_v27 = vld [vmem:[%s17106_s5 + $0x1fd0] sm:$0xff] }
 0x5cf   : > { %v18233_v7 = vmul.f32 1.050701, %v11019_v59  ;;  %10125 = vmatprep.subr.bf16.mxu1 %v14920_v14  ;;  %v10912_v52 = vmul.f32 1.442695, %v18227_v49  ;;  %v14952_v43 = vcombine.high %v4153_v3, %v4161_v51  ;;  %v15013_v38 = vcombine.low %v4216_v58, %v4224_v63  ;;  %v18256_v5 = vld [vmem:[%s17106_s5 + $0x1d98] sm:$0xff]  ;;  %v18265_v41 = vld [vmem:[%s17106_s5 + $0x60] sm:$0xff] }
 0x5d0   : > { %v11066_v54 = vadd.f32 %v18224_v2, %v18222_v48  ;;  %16194 = vpow2.f32 %v10910_v53  ;;  %v14951_v17 = vcombine.low %v4153_v3, %v4161_v51  ;;  %v15030_v24 = vcombine.high %v4232_v57, %v4240_v50  ;;  %v18259_v36 = vld [vmem:[%s17106_s5 + $0x1dd8] sm:$0xff] }
 0x5d1   : > { %v11073_v55 = vadd.f32 %v18233_v7, %v18231_v44  ;;  %9962 = vmatpush1.bf16.msra.mxu0 %v14981_v26  ;;  %16196 = vpow2.f32 %v10912_v52  ;;  %v14968_v35 = vcombine.high %v4169_v15, %v4177_v16  ;;  %v15029_v40 = vcombine.low %v4232_v57, %v4240_v50 }
 0x5d2   : > { %v11067_v47 = vrot.slane %v11066_v54, 4  ;;  %10126 = vmatpush1.bf16.msra.mxu1 %v14919_v13  ;;  %9963 = vmatprep.subr.bf16.mxu0 %v14998_v25  ;;  %v18250_v25 = vld [vmem:[%s17106_s5 + $0x1f90] sm:$0xff]  ;;  %v14967_v58 = vcombine.low %v4169_v15, %v4177_v16  ;;  %v14983_v51 = vcombine.low %v18256_v5, %v18259_v36  ;;  %v14042_v57 = vcombine.high %v18262_v18, %v18265_v41 }
 0x5d3   : > { %v11074_v12 = vrot.slane %v11073_v55, 4  ;;  %10127 = vmatprep.subr.bf16.mxu1 %v14936_v60  ;;  %v15045_v63 = vcombine.low %v18250_v25, %v18253_v27  ;;  %v15046_v53 = vcombine.high %v18250_v25, %v18253_v27  ;;  %v18272_v60 = vld [vmem:[%s17106_s5 + $0x1e18] sm:$0xff]  ;;  %vm10844_vm12 = vcmp.gt.f32.partialorder %v18199_v62, 0.0 }
 0x5d4   : > { %v11068_v14 = vadd.f32 %v11067_v47, %v11066_v54  ;;  %v18275_v54 = vld [vmem:[%s17106_s5 + $0x1e58] sm:$0xff]  ;;  %v18285_v47 = vld [vmem:[%s17106_s5 + $0xe0] sm:$0xff]  ;;  %vm10845_vm13 = vcmp.gt.f32.partialorder %v18205_v42, 0.0  ;;  %vm10860_vm14 = vcmp.gt.f32.partialorder %v18220_v9, 0.0  ;;  %vm10861_vm15 = vcmp.gt.f32.partialorder %v18227_v49, 0.0 }
 0x5d5   : > { %v11075_v26 = vadd.f32 %v11074_v12, %v11073_v55  ;;  %9964 = vmatpush1.bf16.msra.mxu0 %v14997_v10  ;;  %v14984_v55 = vcombine.high %v18256_v5, %v18259_v36  ;;  %v18282_v10 = vld [vmem:[%s17106_s5 + $0xa0] sm:$0xff]  ;;  %v14999_v16 = vcombine.low %v18272_v60, %v18275_v54  ;;  %v4217_v5 = vld [vmem:[%s17106_s5 + $0x1e98] sm:$0xff] }
 0x5d6   : > { %v16191_v4 = vpop.eup %16190  ;;  %v11069_v13 = vrot.slane %v11068_v14, 2  ;;  %10128 = vmatpush1.bf16.msra.mxu1 %v14935_v61  ;;  %9965 = vmatprep.subr.bf16.mxu0 %v15014_v22  ;;  %v4225_v36 = vld [vmem:[%s17106_s5 + $0x1ed8] sm:$0xff] }
 0x5d7   : > { %v16193_v29 = vpop.eup %16192  ;;  %v11076_v32 = vrot.slane %v11075_v26, 2  ;;  %v15059_v34 = vadd.f32 -1.0, %v16191_v4  ;;  %10129 = vmatprep.subr.bf16.mxu1 %v14952_v43  ;;  %v14041_v43 = vcombine.low %v18262_v18, %v18265_v41  ;;  %v15016_v41 = vcombine.high %v4217_v5, %v4225_v36 }
 0x5d8   : > { %v11070_v37 = vadd.f32 %v11069_v13, %v11068_v14  ;;  %v15060_v39 = vadd.f32 -1.0, %v16193_v29  ;;  %v14058_v13 = vcombine.high %v18282_v10, %v18285_v47 }
 0x5d9   : > { %v11077_v59 = vadd.f32 %v11076_v32, %v11075_v26  ;;  %9966 = vmatpush1.bf16.msra.mxu0 %v15013_v38  ;;  %v10972_v3 = vmul.f32 1.6732632, %v15059_v34  ;;  %v15000_v26 = vcombine.high %v18272_v60, %v18275_v54  ;;  %v4233_v54 = vld [vmem:[%s17106_s5 + $0x1f18] sm:$0xff] }
 0x5da   : > { %v11071_v52 = vrot.slane %v11070_v37, 1  ;;  %10130 = vmatpush1.bf16.msra.mxu1 %v14951_v17  ;;  %9967 = vmatprep.subr.bf16.mxu0 %v15030_v24  ;;  %v16195_v61 = vpop.eup %16194  ;;  %v10973_v12 = vmul.f32 1.6732632, %v15060_v39 }
 0x5db   : > { %v11078_v22 = vrot.slane %v11077_v59, 1  ;;  %10131 = vmatprep.subr.bf16.mxu1 %v14968_v35  ;;  %v16197_v50 = vpop.eup %16196  ;;  %v15075_v15 = vadd.f32 -1.0, %v16195_v61  ;;  %v11004_v24 = vsel %vm10844_vm12, %v18199_v62, %v10972_v3 }
 0x5dc   : > { %v11072_v14 = vadd.f32 %v11071_v52, %v11070_v37  ;;  %v15076_v4 = vadd.f32 -1.0, %v16197_v50  ;;  %v11005_v29 = vsel %vm10845_vm13, %v18205_v42, %v10973_v12  ;;  %v18315_v42 = vmul.f32 1.050701, %v11004_v24  ;;  %v4241_v52 = vld [vmem:[%s17106_s5 + $0x1f58] sm:$0xff] }
 0x5dd   : > { %v11079_v38 = vadd.f32 %v11078_v22, %v11077_v59  ;;  %9968 = vmatpush1.bf16.msra.mxu0 %v15029_v40  ;;  %v10988_v25 = vmul.f32 1.6732632, %v15075_v15  ;;  %v18324_v40 = vmul.f32 1.050701, %v11005_v29  ;;  %v3274_v59 = vld [vmem:[%s17106_s5 + $0x120] sm:$0xff]  ;;  %v15015_v22 = vcombine.low %v4217_v5, %v4225_v36 }
 0x5de   : > { %v11178_v17 = vmul.f32 0.0625, %v11072_v14  ;;  %10132 = vmatpush1.bf16.msra.mxu1 %v14967_v58  ;;  %9969 = vmatprep.subr.bf16.mxu0 %v15046_v53  ;;  %v10989_v32 = vmul.f32 1.6732632, %v15076_v4  ;;  %v3282_v58 = vld [vmem:[%s17106_s5 + $0x160] sm:$0xff]  ;;  %v15032_v50 = vcombine.high %v4233_v54, %v4241_v52 }
 0x5df   : > { %v11179_v27 = vmul.f32 0.0625, %v11079_v38  ;;  %10133 = vmatprep.subr.bf16.mxu1 %v14984_v55  ;;  %v11020_v62 = vsel %vm10860_vm14, %v18220_v9, %v10988_v25  ;;  %v14074_v12 = vcombine.high %v3274_v59, %v3282_v58  ;;  %v3298_v14 = vld [vmem:[%s17106_s5 + $0x1e0] sm:$0xff]  ;;  %v15031_v25 = vcombine.low %v4233_v54, %v4241_v52 }
 0x5e0   : > { %v18303_v34 = vsub.f32 %v18222_v48, %v11178_v17  ;;  %v18306_v35 = vsub.f32 %v18224_v2, %v11178_v17  ;;  %v18317_v39 = vmul.f32 1.050701, %v11020_v62  ;;  %v11021_v48 = vsel %vm10861_vm15, %v18227_v49, %v10989_v32  ;;  %v3306_v62 = vld [vmem:[%s17106_s5 + $0x220] sm:$0xff] }
 0x5e1   : > { %v18313_v37 = vsub.f32 %v18233_v7, %v11179_v27  ;;  %9970 = vmatpush1.bf16.msra.mxu0 %v15045_v63  ;;  %v18326_v7 = vmul.f32 1.050701, %v11021_v48  ;;  %v18335_v63 = vsub.f32 %v18231_v44, %v11179_v27  ;;  %v14073_v17 = vcombine.low %v3274_v59, %v3282_v58  ;;  %v3314_v5 = vld [vmem:[%s17106_s5 + $0x260] sm:$0xff] }
 0x5e2   : > { %v11226_v2 = vmul.f32 %v18303_v34, %v18303_v34  ;;  %v11242_v9 = vmul.f32 %v18306_v35, %v18306_v35  ;;  %10134 = vmatpush1.bf16.msra.mxu1 %v14983_v51  ;;  %10154 = vmatprep.subr.bf16.mxu0 %v14042_v57  ;;  %v11080_v49 = vadd.f32 %v18317_v39, %v18315_v42 }
 0x5e3   : > { %v11243_v18 = vmul.f32 %v18313_v37, %v18313_v37  ;;  %10135 = vmatprep.subr.bf16.mxu1 %v15000_v26  ;;  %v11087_v60 = vadd.f32 %v18326_v7, %v18324_v40  ;;  %v14057_v51 = vcombine.low %v18282_v10, %v18285_v47  ;;  %v11227_v44 = vmul.f32 %v18335_v63, %v18335_v63  ;;  %v4249_v10 = vld [vmem:[%s17106_s5 + $0x1f98] sm:$0xff] }
 0x5e4   : > { %v11258_v53 = vadd.f32 %v11242_v9, %v11226_v2  ;;  %9972 = vmatmul.mubr.bf16.vlgmr.msra.gmra.mrb[8].mxu0 %v17887_v1  ;;  %v11081_v3 = vrot.slane %v11080_v49, 4  ;;  %v4257_v47 = vld [vmem:[%s17106_s5 + $0x1fd8] sm:$0xff]  ;;  %v3243_v9 = vld [vmem:[%s17106_s5 + $0x28] sm:$0xff]  ;;  %v14106_v54 = vcombine.high %v3306_v62, %v3314_v5 }
 0x5e5   : > { %10155 = vmatpush1.bf16.msra.mxu0 %v14041_v43  ;;  %10186 = vmatprep.mubr.bf16.mxu0 %v17535_v11  ;;  %v11088_v61 = vrot.slane %v11087_v60, 4  ;;  %v3290_v43 = vld [vmem:[%s17106_s5 + $0x1a0] sm:$0xff]  ;;  %v11265_v15 = vadd.f32 %v11243_v18, %v11227_v44  ;;  %v15048_v32 = vcombine.high %v4249_v10, %v4257_v47  ;;  %v3251_v18 = vld [vmem:[%s17106_s5 + $0x68] sm:$0xff] }
 0x5e6   : > { %v11259_v55 = vrot.slane %v11258_v53, 4  ;;  %10136 = vmatpush1.bf16.msra.mxu1 %v14999_v16  ;;  %10156 = vmatprep.subr.bf16.mxu0 %v14058_v13  ;;  %v11082_v57 = vadd.f32 %v11081_v3, %v11080_v49  ;;  %v14090_v27 = vcombine.high %v3290_v43, %v3298_v14  ;;  %v14044_v3 = vcombine.high %v3243_v9, %v3251_v18  ;;  %v3330_v44 = vld [vmem:[%s17106_s5 + $0x2e0] sm:$0xff] }
 0x5e7   : > { %10137 = vmatprep.subr.bf16.mxu1 %v15016_v41  ;;  %v11089_v38 = vadd.f32 %v11088_v61, %v11087_v60  ;;  %v11266_v16 = vrot.slane %v11265_v15, 4  ;;  %v14089_v41 = vcombine.low %v3290_v43, %v3298_v14  ;;  %v15047_v60 = vcombine.low %v4249_v10, %v4257_v47 }
 0x5e8   : > { %v11260_v26 = vadd.f32 %v11259_v55, %v11258_v53  ;;  %v11083_v4 = vrot.slane %v11082_v57, 2  ;;  %v14105_v43 = vcombine.low %v3306_v62, %v3314_v5 }
 0x5e9   : > { %10157 = vmatpush1.bf16.msra.mxu0 %v14057_v51  ;;  %v11090_v24 = vrot.slane %v11089_v38, 2  ;;  %v11267_v36 = vadd.f32 %v11266_v16, %v11265_v15  ;;  %v3322_v51 = vld [vmem:[%s17106_s5 + $0x2a0] sm:$0xff] }
 0x5ea   : > { %v11261_v13 = vrot.slane %v11260_v26, 2  ;;  %10138 = vmatpush1.bf16.msra.mxu1 %v15015_v22  ;;  %10158 = vmatprep.subr.bf16.mxu0 %v14074_v12  ;;  %v11084_v29 = vadd.f32 %v11083_v4, %v11082_v57  ;;  %v3259_v12 = vld [vmem:[%s17106_s5 + $0xa8] sm:$0xff]  ;;  %v14122_v10 = vcombine.high %v3322_v51, %v3330_v44 }
 0x5eb   : > { %10139 = vmatprep.subr.bf16.mxu1 %v15032_v50  ;;  %v11091_v2 = vadd.f32 %v11090_v24, %v11089_v38  ;;  %v11268_v59 = vrot.slane %v11267_v36, 2  ;;  %v3267_v57 = vld [vmem:[%s17106_s5 + $0xe8] sm:$0xff]  ;;  %v14043_v38 = vcombine.low %v3243_v9, %v3251_v18  ;;  %v3346_v24 = vld [vmem:[%s17106_s5 + $0x360] sm:$0xff] }
 0x5ec   : > { %v11262_v48 = vadd.f32 %v11261_v13, %v11260_v26  ;;  %v11085_v49 = vrot.slane %v11084_v29, 1  ;;  %v14060_v16 = vcombine.high %v3259_v12, %v3267_v57  ;;  %v3338_v13 = vld [vmem:[%s17106_s5 + $0x320] sm:$0xff] }
 0x5ed   : > { %10159 = vmatpush1.bf16.msra.mxu0 %v14073_v17  ;;  %v11092_v53 = vrot.slane %v11091_v2, 1  ;;  %v11269_v55 = vadd.f32 %v11268_v59, %v11267_v36  ;;  %v14121_v17 = vcombine.low %v3322_v51, %v3330_v44  ;;  %v3354_v18 = vld [vmem:[%s17106_s5 + $0x3a0] sm:$0xff]  ;;  %v3299_v59 = vld [vmem:[%s17106_s5 + $0x1e8] sm:$0xff] }
 0x5ee   : > { %v11263_v58 = vrot.slane %v11262_v48, 1  ;;  %10140 = vmatpush1.bf16.msra.mxu1 %v15031_v25  ;;  %10160 = vmatprep.subr.bf16.mxu0 %v14090_v27  ;;  %v11086_v52 = vadd.f32 %v11085_v49, %v11084_v29  ;;  %v3275_v29 = vld [vmem:[%s17106_s5 + $0x128] sm:$0xff]  ;;  %v3362_v49 = vld [vmem:[%s17106_s5 + $0x3e0] sm:$0xff] }
 0x5ef   : > { %10141 = vmatprep.subr.bf16.mxu1 %v15048_v32  ;;  %v11093_v22 = vadd.f32 %v11092_v53, %v11091_v2  ;;  %v11270_v14 = vrot.slane %v11269_v55, 1  ;;  %v3283_v32 = vld [vmem:[%s17106_s5 + $0x168] sm:$0xff] }
 0x5f0   : > { %v11264_v61 = vadd.f32 %v11263_v58, %v11262_v48  ;;  %v11180_v50 = vmul.f32 0.0625, %v11086_v52  ;;  %v14076_v9 = vcombine.high %v3275_v29, %v3283_v32  ;;  %v14075_v52 = vcombine.low %v3275_v29, %v3283_v32  ;;  %v3331_v29 = vld [vmem:[%s17106_s5 + $0x2e8] sm:$0xff] }
 0x5f1   : > { %10161 = vmatpush1.bf16.msra.mxu0 %v14089_v41  ;;  %v11181_v26 = vmul.f32 0.0625, %v11093_v22  ;;  %v11271_v62 = vadd.f32 %v11270_v14, %v11269_v55  ;;  %v3291_v41 = vld [vmem:[%s17106_s5 + $0x1a8] sm:$0xff]  ;;  %v3378_v22 = vld [vmem:[%s17106_s5 + $0x460] sm:$0xff]  ;;  %v14153_v14 = vcombine.low %v3354_v18, %v3362_v49 }
 0x5f2   : > { %v11370_v15 = vmul.f32 0.0625, %v11264_v61  ;;  %10142 = vmatpush1.bf16.msra.mxu1 %v15047_v60  ;;  %10162 = vmatprep.subr.bf16.mxu0 %v14106_v54  ;;  %v18360_v47 = vsub.f32 %v18315_v42, %v11180_v50  ;;  %v18363_v4 = vsub.f32 %v18317_v39, %v11180_v50  ;;  %v14137_v54 = vcombine.low %v3338_v13, %v3346_v24  ;;  %v3370_v61 = vld [vmem:[%s17106_s5 + $0x420] sm:$0xff] }
 0x5f3   : > { %10326 = vmatprep.subr.bf16.mxu1 %v14044_v3  ;;  %v18368_v27 = vsub.f32 %v18326_v7, %v11181_v26  ;;  %v18373_v5 = vsub.f32 %v18324_v40, %v11181_v26  ;;  %v14059_v7 = vcombine.low %v3259_v12, %v3267_v57  ;;  %v14138_v40 = vcombine.high %v3338_v13, %v3346_v24  ;;  %v3307_v12 = vld [vmem:[%s17106_s5 + $0x228] sm:$0xff]  ;;  %v3394_v13 = vld [vmem:[%s17106_s5 + $0x4e0] sm:$0xff] }
 0x5f4   : > { %v11386_v25 = vadd.f32 1e-05, %v11370_v15  ;;  %v11228_v42 = vmul.f32 %v18360_v47, %v18360_v47  ;;  %v11244_v39 = vmul.f32 %v18363_v4, %v18363_v4  ;;  %v11371_v48 = vmul.f32 0.0625, %v11271_v62  ;;  %v3315_v57 = vld [vmem:[%s17106_s5 + $0x268] sm:$0xff] }
 0x5f5   : > { %10144 = vmatmul.mubr.bf16.vlgmr.msra.gmra.mrb[28].mxu1 %v17887_v1  ;;  %10163 = vmatpush1.bf16.msra.mxu0 %v14105_v43  ;;  %v11245_v36 = vmul.f32 %v18368_v27, %v18368_v27  ;;  %v11229_v53 = vmul.f32 %v18373_v5, %v18373_v5  ;;  %v14154_v3 = vcombine.high %v3354_v18, %v3362_v49  ;;  %v3402_v18 = vld [vmem:[%s17106_s5 + $0x520] sm:$0xff] }
 0x5f6   : > { %16198 = vrsqrt.f32 %v11386_v25  ;;  %10327 = vmatpush1.bf16.msra.mxu1 %v14043_v38  ;;  %10358 = vmatprep.mubr.bf16.mxu1 %v17535_v11  ;;  %v11272_v2 = vadd.f32 %v11244_v39, %v11228_v42  ;;  %v11387_v58 = vadd.f32 1e-05, %v11371_v48  ;;  %v14092_v55 = vcombine.high %v3291_v41, %v3299_v59  ;;  %v3323_v25 = vld [vmem:[%s17106_s5 + $0x2a8] sm:$0xff]  ;;  %v3410_v49 = vld [vmem:[%s17106_s5 + $0x560] sm:$0xff] }
 0x5f7   : > { %10164 = vmatprep.subr.bf16.mxu0 %v14122_v10  ;;  %10328 = vmatprep.subr.bf16.mxu1 %v14060_v16  ;;  %v11279_v51 = vadd.f32 %v11245_v36, %v11229_v53  ;;  %v14091_v15 = vcombine.low %v3291_v41, %v3299_v59  ;;  %v14170_v26 = vcombine.high %v3370_v61, %v3378_v22  ;;  %v3386_v16 = vld [vmem:[%s17106_s5 + $0x4a0] sm:$0xff]  ;;  %v3339_v41 = vld [vmem:[%s17106_s5 + $0x328] sm:$0xff] }
 0x5f8   : > { %v11273_v60 = vrot.slane %v11272_v2, 4  ;;  %16200 = vrsqrt.f32 %v11387_v58  ;;  %v14169_v39 = vcombine.low %v3370_v61, %v3378_v22  ;;  %v14186_v36 = vcombine.high %v3386_v16, %v3394_v13  ;;  %v3347_v59 = vld [vmem:[%s17106_s5 + $0x368] sm:$0xff]  ;;  %v3418_v22 = vld [vmem:[%s17106_s5 + $0x5a0] sm:$0xff] }
 0x5f9   : > { %10165 = vmatpush1.bf16.msra.mxu0 %v14121_v17  ;;  %v11280_v50 = vrot.slane %v11279_v51, 4  ;;  %v14108_v17 = vcombine.high %v3307_v12, %v3315_v57  ;;  %v14140_v61 = vcombine.high %v3339_v41, %v3347_v59 }
 0x5fa   : > { %10329 = vmatpush1.bf16.msra.mxu1 %v14059_v7  ;;  %10166 = vmatprep.subr.bf16.mxu0 %v14138_v40  ;;  %v11274_v44 = vadd.f32 %v11273_v60, %v11272_v2  ;;  %v14107_v7 = vcombine.low %v3307_v12, %v3315_v57  ;;  %v3426_v12 = vld [vmem:[%s17106_s5 + $0x5e0] sm:$0xff]  ;;  %v3355_v57 = vld [vmem:[%s17106_s5 + $0x3a8] sm:$0xff] }
 0x5fb   : > { %10330 = vmatprep.subr.bf16.mxu1 %v14076_v9  ;;  %v11281_v38 = vadd.f32 %v11280_v50, %v11279_v51  ;;  %v14124_v9 = vcombine.high %v3323_v25, %v3331_v29  ;;  %v3363_v50 = vld [vmem:[%s17106_s5 + $0x3e8] sm:$0xff] }
 0x5fc   : > { %v11275_v43 = vrot.slane %v11274_v44, 2 }
 0x5fd   : > { %10167 = vmatpush1.bf16.msra.mxu0 %v14137_v54  ;;  %v11282_v32 = vrot.slane %v11281_v38, 2  ;;  %v14123_v54 = vcombine.low %v3323_v25, %v3331_v29  ;;  %v14155_v25 = vcombine.low %v3355_v57, %v3363_v50 }
 0x5fe   : > { %10331 = vmatpush1.bf16.msra.mxu1 %v14075_v52  ;;  %10168 = vmatprep.subr.bf16.mxu0 %v14154_v3  ;;  %v11276_v10 = vadd.f32 %v11275_v43, %v11274_v44  ;;  %v14202_v3 = vcombine.high %v3402_v18, %v3410_v49 }
 0x5ff   : > { %10332 = vmatprep.subr.bf16.mxu1 %v14092_v55  ;;  %v11283_v48 = vadd.f32 %v11282_v32, %v11281_v38  ;;  %v14156_v38 = vcombine.high %v3355_v57, %v3363_v50  ;;  %v3419_v50 = vld [vmem:[%s17106_s5 + $0x5a8] sm:$0xff] }
 0x600   : > { %v16199_v24 = vpop.eup %16198  ;;  %v11277_v42 = vrot.slane %v11276_v10, 1 }
 0x601   : > { %v18398_v62 = vmul.f32 %v16199_v24, %v18306_v35  ;;  %10169 = vmatpush1.bf16.msra.mxu0 %v14153_v14  ;;  %v18401_v40 = vmul.f32 %v16199_v24, %v18303_v34  ;;  %v11284_v53 = vrot.slane %v11283_v48, 1  ;;  %v14185_v34 = vcombine.low %v3386_v16, %v3394_v13  ;;  %v3371_v16 = vld [vmem:[%s17106_s5 + $0x428] sm:$0xff] }
 0x602   : > { %10333 = vmatpush1.bf16.msra.mxu1 %v14091_v15  ;;  %10170 = vmatprep.subr.bf16.mxu0 %v14170_v26  ;;  %v11278_v2 = vadd.f32 %v11277_v42, %v11276_v10  ;;  %v16201_v35 = vpop.eup %16200  ;;  %v14139_v14 = vcombine.low %v3339_v41, %v3347_v59  ;;  %v14218_v15 = vcombine.high %v3418_v22, %v3426_v12  ;;  %v3434_v10 = vld [vmem:[%s17106_s5 + $0x620] sm:$0xff]  ;;  %v3379_v13 = vld [vmem:[%s17106_s5 + $0x468] sm:$0xff] }
 0x603   : > { %10334 = vmatprep.subr.bf16.mxu1 %v14108_v17  ;;  %v18410_v52 = vmul.f32 %v16201_v35, %v18335_v63  ;;  %v18413_v51 = vmul.f32 %v16201_v35, %v18313_v37  ;;  %v11285_v44 = vadd.f32 %v11284_v53, %v11283_v48  ;;  %v14201_v37 = vcombine.low %v3402_v18, %v3410_v49  ;;  %v3442_v17 = vld [vmem:[%s17106_s5 + $0x660] sm:$0xff]  ;;  %v3403_v53 = vld [vmem:[%s17106_s5 + $0x528] sm:$0xff] }
 0x604   : > { %v11372_v60 = vmul.f32 0.0625, %v11278_v2  ;;  %v14217_v24 = vcombine.low %v3418_v22, %v3426_v12  ;;  %v14234_v29 = vcombine.high %v3434_v10, %v3442_v17  ;;  %v14172_v32 = vcombine.high %v3371_v16, %v3379_v13  ;;  %v3450_v42 = vld [vmem:[%s17106_s5 + $0x6a0] sm:$0xff] }
 0x605   : > { %10171 = vmatpush1.bf16.msra.mxu0 %v14169_v39  ;;  %v11451_v63 = vpack.c.bf16 %v18413_v51, %v18410_v52  ;;  %v11373_v43 = vmul.f32 0.0625, %v11285_v44  ;;  %v3458_v39 = vld [vmem:[%s17106_s5 + $0x6e0] sm:$0xff]  ;;  %v14233_v48 = vcombine.low %v3434_v10, %v3442_v17  ;;  %v14171_v2 = vcombine.low %v3371_v16, %v3379_v13  ;;  %v3435_v10 = vld [vmem:[%s17106_s5 + $0x628] sm:$0xff] }
 0x606   : > { %10335 = vmatpush1.bf16.msra.mxu1 %v14107_v7  ;;  %10172 = vmatprep.subr.bf16.mxu0 %v14186_v36  ;;  %v11388_v55 = vadd.f32 1e-05, %v11372_v60  ;;  %v3387_v7 = vld [vmem:[%s17106_s5 + $0x4a8] sm:$0xff]  ;;  %v3466_v35 = vld [vmem:[%s17106_s5 + $0x720] sm:$0xff] }
 0x607   : > { %10336 = vmatprep.subr.bf16.mxu1 %v14124_v9  ;;  %v11389_v26 = vadd.f32 1e-05, %v11373_v43  ;;  %v3395_v36 = vld [vmem:[%s17106_s5 + $0x4e8] sm:$0xff]  ;;  %v14250_v9 = vcombine.high %v3450_v42, %v3458_v39  ;;  %v3474_v41 = vld [vmem:[%s17106_s5 + $0x760] sm:$0xff] }
 0x608   : > { %16202 = vrsqrt.f32 %v11388_v55  ;;  %v14188_v49 = vcombine.high %v3387_v7, %v3395_v36  ;;  %v3411_v60 = vld [vmem:[%s17106_s5 + $0x568] sm:$0xff]  ;;  %v14187_v44 = vcombine.low %v3387_v7, %v3395_v36  ;;  %v14266_v55 = vcombine.high %v3466_v35, %v3474_v41  ;;  %v3482_v22 = vld [vmem:[%s17106_s5 + $0x7a0] sm:$0xff] }
 0x609   : > { %10173 = vmatpush1.bf16.msra.mxu0 %v14185_v34  ;;  %16204 = vrsqrt.f32 %v11389_v26  ;;  %v3490_v12 = vld [vmem:[%s17106_s5 + $0x7e0] sm:$0xff]  ;;  %v3427_v43 = vld [vmem:[%s17106_s5 + $0x5e8] sm:$0xff] }
 0x60a   : > { %10337 = vmatpush1.bf16.msra.mxu1 %v14123_v54  ;;  %10174 = vmatprep.subr.bf16.mxu0 %v14202_v3  ;;  %v14249_v54 = vcombine.low %v3450_v42, %v3458_v39  ;;  %v14282_v26 = vcombine.high %v3482_v22, %v3490_v12  ;;  %v3443_v17 = vld [vmem:[%s17106_s5 + $0x668] sm:$0xff]  ;;  %v14281_v16 = vcombine.low %v3482_v22, %v3490_v12 }
 0x60b   : > { %10338 = vmatprep.subr.bf16.mxu1 %v14140_v61  ;;  %v14219_v13 = vcombine.low %v3419_v50, %v3427_v43  ;;  %v3451_v42 = vld [vmem:[%s17106_s5 + $0x6a8] sm:$0xff]  ;;  %v14235_v36 = vcombine.low %v3435_v10, %v3443_v17 }
 0x60c   : > { %v3459_v39 = vld [vmem:[%s17106_s5 + $0x6e8] sm:$0xff] }
 0x60d   : > { %10175 = vmatpush1.bf16.msra.mxu0 %v14201_v37  ;;  %v14265_v37 = vcombine.low %v3466_v35, %v3474_v41  ;;  %v3475_v35 = vld [vmem:[%s17106_s5 + $0x768] sm:$0xff] }
 0x60e   : > { %10339 = vmatpush1.bf16.msra.mxu1 %v14139_v14  ;;  %10176 = vmatprep.subr.bf16.mxu0 %v14218_v15  ;;  %v14203_v15 = vcombine.low %v3403_v53, %v3411_v60  ;;  %v4259_v14 = vld [vmem:[%s17106_s5 + $0x1fe8] sm:$0xff] }
 0x60f   : > { %10340 = vmatprep.subr.bf16.mxu1 %v14156_v38  ;;  %v3498_v38 = vld [vmem:[%s17106_s5 + $0x820] sm:$0xff] }
 0x611   : > { %10177 = vmatpush1.bf16.msra.mxu0 %v14217_v24 }
 0x612   : > { %10341 = vmatpush1.bf16.msra.mxu1 %v14155_v25  ;;  %10178 = vmatprep.subr.bf16.mxu0 %v14234_v29  ;;  %v16203_v18 = vpop.eup %16202  ;;  %v14236_v25 = vcombine.high %v3435_v10, %v3443_v17  ;;  %v3514_v29 = vld [vmem:[%s17106_s5 + $0x8a0] sm:$0xff] }
 0x613   : > { %10342 = vmatprep.subr.bf16.mxu1 %v14172_v32  ;;  %v18432_v59 = vmul.f32 %v16203_v18, %v18363_v4  ;;  %v18437_v34 = vmul.f32 %v16203_v18, %v18360_v47  ;;  %v16205_v3 = vpop.eup %16204  ;;  %v14204_v4 = vcombine.high %v3403_v53, %v3411_v60  ;;  %v3522_v32 = vld [vmem:[%s17106_s5 + $0x8e0] sm:$0xff]  ;;  %v14251_v53 = vcombine.low %v3451_v42, %v3459_v39 }
 0x614   : > { %v18444_v47 = vmul.f32 %v16205_v3, %v18373_v5  ;;  %v18447_v57 = vmul.f32 %v16205_v3, %v18368_v27  ;;  %v14220_v5 = vcombine.high %v3419_v50, %v3427_v43  ;;  %v3506_v27 = vld [vmem:[%s17106_s5 + $0x860] sm:$0xff]  ;;  %v14313_v41 = vcombine.low %v3514_v29, %v3522_v32 }
 0x615   : > { %10179 = vmatpush1.bf16.msra.mxu0 %v14233_v48  ;;  %v14298_v24 = vcombine.high %v3498_v38, %v3506_v27  ;;  %v14297_v7 = vcombine.low %v3498_v38, %v3506_v27  ;;  %v14314_v48 = vcombine.high %v3514_v29, %v3522_v32  ;;  %v3538_v18 = vld [vmem:[%s17106_s5 + $0x960] sm:$0xff] }
 0x616   : > { %10343 = vmatpush1.bf16.msra.mxu1 %v14171_v2  ;;  %10180 = vmatprep.subr.bf16.mxu0 %v14250_v9  ;;  %v14252_v2 = vcombine.high %v3451_v42, %v3459_v39  ;;  %v3530_v9 = vld [vmem:[%s17106_s5 + $0x920] sm:$0xff] }
 0x617   : > { %10344 = vmatprep.subr.bf16.mxu1 %v14188_v49  ;;  %v3467_v49 = vld [vmem:[%s17106_s5 + $0x728] sm:$0xff]  ;;  %v14330_v60 = vcombine.high %v3530_v9, %v3538_v18  ;;  %v3546_v3 = vld [vmem:[%s17106_s5 + $0x9a0] sm:$0xff]  ;;  %v14329_v22 = vcombine.low %v3530_v9, %v3538_v18 }
 0x618   : > { %v14267_v12 = vcombine.low %v3467_v49, %v3475_v35 }
 0x619   : > { %10181 = vmatpush1.bf16.msra.mxu0 %v14249_v54  ;;  %v14268_v54 = vcombine.high %v3467_v49, %v3475_v35 }
 0x61a   : > { %10345 = vmatpush1.bf16.msra.mxu1 %v14187_v44  ;;  %10182 = vmatprep.subr.bf16.mxu0 %v14266_v55  ;;  %v3554_v44 = vld [vmem:[%s17106_s5 + $0x9e0] sm:$0xff]  ;;  %v3483_v55 = vld [vmem:[%s17106_s5 + $0x7a8] sm:$0xff] }
 0x61b   : > { %10346 = vmatprep.subr.bf16.mxu1 %v14204_v4  ;;  %v3491_v4 = vld [vmem:[%s17106_s5 + $0x7e8] sm:$0xff]  ;;  %v14346_v50 = vcombine.high %v3546_v3, %v3554_v44  ;;  %v14345_v38 = vcombine.low %v3546_v3, %v3554_v44 }
 0x61c   : > { %v14284_v43 = vcombine.high %v3483_v55, %v3491_v4  ;;  %v14283_v27 = vcombine.low %v3483_v55, %v3491_v4 }
 0x61d   : > { %10183 = vmatpush1.bf16.msra.mxu0 %v14265_v37  ;;  %v3562_v37 = vld [vmem:[%s17106_s5 + $0xa20] sm:$0xff] }
 0x61e   : > { %10347 = vmatpush1.bf16.msra.mxu1 %v14203_v15  ;;  %10184 = vmatprep.subr.bf16.mxu0 %v14282_v26  ;;  %v3570_v15 = vld [vmem:[%s17106_s5 + $0xa60] sm:$0xff]  ;;  %v3499_v26 = vld [vmem:[%s17106_s5 + $0x828] sm:$0xff] }
 0x61f   : > { %10348 = vmatprep.subr.bf16.mxu1 %v14220_v5  ;;  %v3507_v5 = vld [vmem:[%s17106_s5 + $0x868] sm:$0xff]  ;;  %v14362_v10 = vcombine.high %v3562_v37, %v3570_v15  ;;  %v14361_v29 = vcombine.low %v3562_v37, %v3570_v15 }
 0x620   : > { %v14300_v17 = vcombine.high %v3499_v26, %v3507_v5  ;;  %v14299_v32 = vcombine.low %v3499_v26, %v3507_v5 }
 0x621   : > { %10185 = vmatpush1.bf16.msra.mxu0 %v14281_v16  ;;  %v3578_v16 = vld [vmem:[%s17106_s5 + $0xaa0] sm:$0xff] }
 0x622   : > { %10349 = vmatpush1.bf16.msra.mxu1 %v14219_v13  ;;  %10197 = vmatprep.subr.bf16.mxu0 %v14298_v24  ;;  %v3586_v13 = vld [vmem:[%s17106_s5 + $0xae0] sm:$0xff]  ;;  %v3515_v24 = vld [vmem:[%s17106_s5 + $0x8a8] sm:$0xff] }
 0x623   : > { %10350 = vmatprep.subr.bf16.mxu1 %v14236_v25  ;;  %v3523_v25 = vld [vmem:[%s17106_s5 + $0x8e8] sm:$0xff]  ;;  %v14378_v42 = vcombine.high %v3578_v16, %v3586_v13  ;;  %v14377_v9 = vcombine.low %v3578_v16, %v3586_v13 }
 0x624   : > { %10187 = vmatmul.mubr.bf16.vlgmr.msra.gmra.mrb[12].mxu0 %v17533_v0  ;;  %v14316_v39 = vcombine.high %v3515_v24, %v3523_v25  ;;  %v14315_v18 = vcombine.low %v3515_v24, %v3523_v25 }
 0x625   : > { %10198 = vmatpush1.bf16.msra.mxu0 %v14297_v7  ;;  %10229 = vmatprep.mubr.bf16.mxu0 %v17656_v46  ;;  %v3594_v7 = vld [vmem:[%s17106_s5 + $0xb20] sm:$0xff] }
 0x626   : > { %10351 = vmatpush1.bf16.msra.mxu1 %v14235_v36  ;;  %10199 = vmatprep.subr.bf16.mxu0 %v14314_v48  ;;  %v3602_v36 = vld [vmem:[%s17106_s5 + $0xb60] sm:$0xff]  ;;  %v3531_v48 = vld [vmem:[%s17106_s5 + $0x928] sm:$0xff] }
 0x627   : > { %10352 = vmatprep.subr.bf16.mxu1 %v14252_v2  ;;  %v3539_v2 = vld [vmem:[%s17106_s5 + $0x968] sm:$0xff]  ;;  %v14394_v49 = vcombine.high %v3594_v7, %v3602_v36  ;;  %v14393_v3 = vcombine.low %v3594_v7, %v3602_v36 }
 0x628   : > { %v14332_v35 = vcombine.high %v3531_v48, %v3539_v2  ;;  %v14331_v44 = vcombine.low %v3531_v48, %v3539_v2 }
 0x629   : > { %10200 = vmatpush1.bf16.msra.mxu0 %v14313_v41  ;;  %v3610_v41 = vld [vmem:[%s17106_s5 + $0xba0] sm:$0xff] }
 0x62a   : > { %10353 = vmatpush1.bf16.msra.mxu1 %v14251_v53  ;;  %10201 = vmatprep.subr.bf16.mxu0 %v14330_v60  ;;  %v3618_v53 = vld [vmem:[%s17106_s5 + $0xbe0] sm:$0xff]  ;;  %v3547_v60 = vld [vmem:[%s17106_s5 + $0x9a8] sm:$0xff] }
 0x62b   : > { %10354 = vmatprep.subr.bf16.mxu1 %v14268_v54  ;;  %v3555_v54 = vld [vmem:[%s17106_s5 + $0x9e8] sm:$0xff]  ;;  %v14410_v55 = vcombine.high %v3610_v41, %v3618_v53  ;;  %v14409_v37 = vcombine.low %v3610_v41, %v3618_v53 }
 0x62c   : > { %v14348_v4 = vcombine.high %v3547_v60, %v3555_v54  ;;  %v14347_v15 = vcombine.low %v3547_v60, %v3555_v54 }
 0x62d   : > { %10202 = vmatpush1.bf16.msra.mxu0 %v14329_v22  ;;  %v3626_v22 = vld [vmem:[%s17106_s5 + $0xc20] sm:$0xff] }
 0x62e   : > { %10355 = vmatpush1.bf16.msra.mxu1 %v14267_v12  ;;  %10203 = vmatprep.subr.bf16.mxu0 %v14346_v50  ;;  %v3634_v12 = vld [vmem:[%s17106_s5 + $0xc60] sm:$0xff]  ;;  %v3563_v50 = vld [vmem:[%s17106_s5 + $0xa28] sm:$0xff] }
 0x62f   : > { %10356 = vmatprep.subr.bf16.mxu1 %v14284_v43  ;;  %v3571_v43 = vld [vmem:[%s17106_s5 + $0xa68] sm:$0xff]  ;;  %v14426_v26 = vcombine.high %v3626_v22, %v3634_v12  ;;  %v14425_v16 = vcombine.low %v3626_v22, %v3634_v12 }
 0x630   : > { %v14364_v5 = vcombine.high %v3563_v50, %v3571_v43  ;;  %v14363_v13 = vcombine.low %v3563_v50, %v3571_v43 }
 0x631   : > { %10204 = vmatpush1.bf16.msra.mxu0 %v14345_v38  ;;  %v3642_v38 = vld [vmem:[%s17106_s5 + $0xca0] sm:$0xff] }
 0x632   : > { %10357 = vmatpush1.bf16.msra.mxu1 %v14283_v27  ;;  %10205 = vmatprep.subr.bf16.mxu0 %v14362_v10  ;;  %v3650_v27 = vld [vmem:[%s17106_s5 + $0xce0] sm:$0xff]  ;;  %v3579_v10 = vld [vmem:[%s17106_s5 + $0xaa8] sm:$0xff] }
 0x633   : > { %10369 = vmatprep.subr.bf16.mxu1 %v14300_v17  ;;  %v3587_v17 = vld [vmem:[%s17106_s5 + $0xae8] sm:$0xff]  ;;  %v14442_v24 = vcombine.high %v3642_v38, %v3650_v27  ;;  %v14441_v7 = vcombine.low %v3642_v38, %v3650_v27 }
 0x634   : > { %v14380_v25 = vcombine.high %v3579_v10, %v3587_v17  ;;  %v14379_v36 = vcombine.low %v3579_v10, %v3587_v17 }
 0x635   : > { %10206 = vmatpush1.bf16.msra.mxu0 %v14361_v29  ;;  %10359 = vmatmul.mubr.bf16.vlgmr.msra.gmra.mrb[32].mxu1 %v17533_v0  ;;  %v3658_v29 = vld [vmem:[%s17106_s5 + $0xd20] sm:$0xff] }
 0x636   : > { %10370 = vmatpush1.bf16.msra.mxu1 %v14299_v32  ;;  %10401 = vmatprep.mubr.bf16.mxu1 %v17656_v46  ;;  %v3666_v32 = vld [vmem:[%s17106_s5 + $0xd60] sm:$0xff] }
 0x637   : > { %10207 = vmatprep.subr.bf16.mxu0 %v14378_v42  ;;  %10371 = vmatprep.subr.bf16.mxu1 %v14316_v39  ;;  %v3595_v42 = vld [vmem:[%s17106_s5 + $0xb28] sm:$0xff]  ;;  %v14458_v48 = vcombine.high %v3658_v29, %v3666_v32  ;;  %v14457_v41 = vcombine.low %v3658_v29, %v3666_v32 }
 0x638   : > { %v3603_v39 = vld [vmem:[%s17106_s5 + $0xb68] sm:$0xff] }
 0x639   : > { %10208 = vmatpush1.bf16.msra.mxu0 %v14377_v9  ;;  %v14396_v2 = vcombine.high %v3595_v42, %v3603_v39  ;;  %v3674_v9 = vld [vmem:[%s17106_s5 + $0xda0] sm:$0xff]  ;;  %v14395_v53 = vcombine.low %v3595_v42, %v3603_v39 }
 0x63a   : > { %10372 = vmatpush1.bf16.msra.mxu1 %v14315_v18  ;;  %10209 = vmatprep.subr.bf16.mxu0 %v14394_v49  ;;  %v3682_v18 = vld [vmem:[%s17106_s5 + $0xde0] sm:$0xff]  ;;  %v3611_v49 = vld [vmem:[%s17106_s5 + $0xba8] sm:$0xff] }
 0x63b   : > { %10373 = vmatprep.subr.bf16.mxu1 %v14332_v35  ;;  %v3619_v35 = vld [vmem:[%s17106_s5 + $0xbe8] sm:$0xff]  ;;  %v14474_v60 = vcombine.high %v3674_v9, %v3682_v18  ;;  %v14473_v22 = vcombine.low %v3674_v9, %v3682_v18 }
 0x63c   : > { %v14412_v54 = vcombine.high %v3611_v49, %v3619_v35  ;;  %v14411_v12 = vcombine.low %v3611_v49, %v3619_v35 }
 0x63d   : > { %10210 = vmatpush1.bf16.msra.mxu0 %v14393_v3  ;;  %v3690_v3 = vld [vmem:[%s17106_s5 + $0xe20] sm:$0xff] }
 0x63e   : > { %10374 = vmatpush1.bf16.msra.mxu1 %v14331_v44  ;;  %10211 = vmatprep.subr.bf16.mxu0 %v14410_v55  ;;  %v3698_v44 = vld [vmem:[%s17106_s5 + $0xe60] sm:$0xff]  ;;  %v3627_v55 = vld [vmem:[%s17106_s5 + $0xc28] sm:$0xff] }
 0x63f   : > { %10375 = vmatprep.subr.bf16.mxu1 %v14348_v4  ;;  %v3635_v4 = vld [vmem:[%s17106_s5 + $0xc68] sm:$0xff]  ;;  %v14490_v50 = vcombine.high %v3690_v3, %v3698_v44  ;;  %v14489_v38 = vcombine.low %v3690_v3, %v3698_v44 }
 0x640   : > { %v14428_v43 = vcombine.high %v3627_v55, %v3635_v4  ;;  %v14427_v27 = vcombine.low %v3627_v55, %v3635_v4 }
 0x641   : > { %10212 = vmatpush1.bf16.msra.mxu0 %v14409_v37  ;;  %v3706_v37 = vld [vmem:[%s17106_s5 + $0xea0] sm:$0xff] }
 0x642   : > { %10376 = vmatpush1.bf16.msra.mxu1 %v14347_v15  ;;  %10213 = vmatprep.subr.bf16.mxu0 %v14426_v26  ;;  %v3714_v15 = vld [vmem:[%s17106_s5 + $0xee0] sm:$0xff]  ;;  %v3643_v26 = vld [vmem:[%s17106_s5 + $0xca8] sm:$0xff] }
 0x643   : > { %10377 = vmatprep.subr.bf16.mxu1 %v14364_v5  ;;  %v3651_v5 = vld [vmem:[%s17106_s5 + $0xce8] sm:$0xff]  ;;  %v14506_v10 = vcombine.high %v3706_v37, %v3714_v15  ;;  %v14505_v29 = vcombine.low %v3706_v37, %v3714_v15 }
 0x644   : > { %v14444_v17 = vcombine.high %v3643_v26, %v3651_v5  ;;  %v14443_v32 = vcombine.low %v3643_v26, %v3651_v5 }
 0x645   : > { %10214 = vmatpush1.bf16.msra.mxu0 %v14425_v16  ;;  %v3722_v16 = vld [vmem:[%s17106_s5 + $0xf20] sm:$0xff] }
 0x646   : > { %10378 = vmatpush1.bf16.msra.mxu1 %v14363_v13  ;;  %10215 = vmatprep.subr.bf16.mxu0 %v14442_v24  ;;  %v3730_v13 = vld [vmem:[%s17106_s5 + $0xf60] sm:$0xff]  ;;  %v3659_v24 = vld [vmem:[%s17106_s5 + $0xd28] sm:$0xff] }
 0x647   : > { %10379 = vmatprep.subr.bf16.mxu1 %v14380_v25  ;;  %v3667_v25 = vld [vmem:[%s17106_s5 + $0xd68] sm:$0xff]  ;;  %v14522_v42 = vcombine.high %v3722_v16, %v3730_v13  ;;  %v14521_v9 = vcombine.low %v3722_v16, %v3730_v13 }
 0x648   : > { %v14460_v39 = vcombine.high %v3659_v24, %v3667_v25  ;;  %v14459_v18 = vcombine.low %v3659_v24, %v3667_v25 }
 0x649   : > { %10216 = vmatpush1.bf16.msra.mxu0 %v14441_v7  ;;  %v3738_v7 = vld [vmem:[%s17106_s5 + $0xfa0] sm:$0xff] }
 0x64a   : > { %10380 = vmatpush1.bf16.msra.mxu1 %v14379_v36  ;;  %10217 = vmatprep.subr.bf16.mxu0 %v14458_v48  ;;  %v3746_v36 = vld [vmem:[%s17106_s5 + $0xfe0] sm:$0xff]  ;;  %v3675_v48 = vld [vmem:[%s17106_s5 + $0xda8] sm:$0xff] }
 0x64b   : > { %10381 = vmatprep.subr.bf16.mxu1 %v14396_v2  ;;  %v3683_v2 = vld [vmem:[%s17106_s5 + $0xde8] sm:$0xff]  ;;  %v14538_v49 = vcombine.high %v3738_v7, %v3746_v36  ;;  %v14537_v3 = vcombine.low %v3738_v7, %v3746_v36 }
 0x64c   : > { %v14476_v35 = vcombine.high %v3675_v48, %v3683_v2  ;;  %v14475_v44 = vcombine.low %v3675_v48, %v3683_v2 }
 0x64d   : > { %10218 = vmatpush1.bf16.msra.mxu0 %v14457_v41  ;;  %v3754_v41 = vld [vmem:[%s17106_s5 + $0x1020] sm:$0xff] }
 0x64e   : > { %10382 = vmatpush1.bf16.msra.mxu1 %v14395_v53  ;;  %10219 = vmatprep.subr.bf16.mxu0 %v14474_v60  ;;  %v3762_v53 = vld [vmem:[%s17106_s5 + $0x1060] sm:$0xff]  ;;  %v3691_v60 = vld [vmem:[%s17106_s5 + $0xe28] sm:$0xff] }
 0x64f   : > { %10383 = vmatprep.subr.bf16.mxu1 %v14412_v54  ;;  %v3699_v54 = vld [vmem:[%s17106_s5 + $0xe68] sm:$0xff]  ;;  %v14554_v55 = vcombine.high %v3754_v41, %v3762_v53  ;;  %v14553_v37 = vcombine.low %v3754_v41, %v3762_v53 }
 0x650   : > { %v14492_v4 = vcombine.high %v3691_v60, %v3699_v54  ;;  %v14491_v15 = vcombine.low %v3691_v60, %v3699_v54 }
 0x651   : > { %10220 = vmatpush1.bf16.msra.mxu0 %v14473_v22  ;;  %v3770_v22 = vld [vmem:[%s17106_s5 + $0x10a0] sm:$0xff] }
 0x652   : > { %10384 = vmatpush1.bf16.msra.mxu1 %v14411_v12  ;;  %10221 = vmatprep.subr.bf16.mxu0 %v14490_v50  ;;  %v3778_v12 = vld [vmem:[%s17106_s5 + $0x10e0] sm:$0xff]  ;;  %v3707_v50 = vld [vmem:[%s17106_s5 + $0xea8] sm:$0xff] }
 0x653   : > { %10385 = vmatprep.subr.bf16.mxu1 %v14428_v43  ;;  %v3715_v43 = vld [vmem:[%s17106_s5 + $0xee8] sm:$0xff]  ;;  %v14570_v26 = vcombine.high %v3770_v22, %v3778_v12  ;;  %v14569_v16 = vcombine.low %v3770_v22, %v3778_v12 }
 0x654   : > { %v14508_v5 = vcombine.high %v3707_v50, %v3715_v43  ;;  %v14507_v13 = vcombine.low %v3707_v50, %v3715_v43 }
 0x655   : > { %10222 = vmatpush1.bf16.msra.mxu0 %v14489_v38  ;;  %v3786_v38 = vld [vmem:[%s17106_s5 + $0x1120] sm:$0xff] }
 0x656   : > { %10386 = vmatpush1.bf16.msra.mxu1 %v14427_v27  ;;  %10223 = vmatprep.subr.bf16.mxu0 %v14506_v10  ;;  %v3794_v27 = vld [vmem:[%s17106_s5 + $0x1160] sm:$0xff]  ;;  %v3723_v10 = vld [vmem:[%s17106_s5 + $0xf28] sm:$0xff] }
 0x657   : > { %10387 = vmatprep.subr.bf16.mxu1 %v14444_v17  ;;  %v3731_v17 = vld [vmem:[%s17106_s5 + $0xf68] sm:$0xff]  ;;  %v14586_v24 = vcombine.high %v3786_v38, %v3794_v27  ;;  %v14585_v7 = vcombine.low %v3786_v38, %v3794_v27 }
 0x658   : > { %v14524_v25 = vcombine.high %v3723_v10, %v3731_v17  ;;  %v14523_v36 = vcombine.low %v3723_v10, %v3731_v17 }
 0x659   : > { %10224 = vmatpush1.bf16.msra.mxu0 %v14505_v29  ;;  %v3802_v29 = vld [vmem:[%s17106_s5 + $0x11a0] sm:$0xff] }
 0x65a   : > { %10388 = vmatpush1.bf16.msra.mxu1 %v14443_v32  ;;  %10225 = vmatprep.subr.bf16.mxu0 %v14522_v42  ;;  %v3810_v32 = vld [vmem:[%s17106_s5 + $0x11e0] sm:$0xff]  ;;  %v3739_v42 = vld [vmem:[%s17106_s5 + $0xfa8] sm:$0xff] }
 0x65b   : > { %10389 = vmatprep.subr.bf16.mxu1 %v14460_v39  ;;  %v3747_v39 = vld [vmem:[%s17106_s5 + $0xfe8] sm:$0xff]  ;;  %v14602_v48 = vcombine.high %v3802_v29, %v3810_v32  ;;  %v14601_v41 = vcombine.low %v3802_v29, %v3810_v32 }
 0x65c   : > { %v14540_v2 = vcombine.high %v3739_v42, %v3747_v39  ;;  %v14539_v53 = vcombine.low %v3739_v42, %v3747_v39 }
 0x65d   : > { %10226 = vmatpush1.bf16.msra.mxu0 %v14521_v9  ;;  %v3818_v9 = vld [vmem:[%s17106_s5 + $0x1220] sm:$0xff] }
 0x65e   : > { %10390 = vmatpush1.bf16.msra.mxu1 %v14459_v18  ;;  %10227 = vmatprep.subr.bf16.mxu0 %v14538_v49  ;;  %v3826_v18 = vld [vmem:[%s17106_s5 + $0x1260] sm:$0xff]  ;;  %v3755_v49 = vld [vmem:[%s17106_s5 + $0x1028] sm:$0xff] }
 0x65f   : > { %10391 = vmatprep.subr.bf16.mxu1 %v14476_v35  ;;  %v3763_v35 = vld [vmem:[%s17106_s5 + $0x1068] sm:$0xff]  ;;  %v14618_v60 = vcombine.high %v3818_v9, %v3826_v18  ;;  %v14617_v22 = vcombine.low %v3818_v9, %v3826_v18 }
 0x660   : > { %v14556_v54 = vcombine.high %v3755_v49, %v3763_v35  ;;  %v14555_v12 = vcombine.low %v3755_v49, %v3763_v35 }
 0x661   : > { %10228 = vmatpush1.bf16.msra.mxu0 %v14537_v3  ;;  %v3834_v3 = vld [vmem:[%s17106_s5 + $0x12a0] sm:$0xff] }
 0x662   : > { %10392 = vmatpush1.bf16.msra.mxu1 %v14475_v44  ;;  %10240 = vmatprep.subr.bf16.mxu0 %v14554_v55  ;;  %v3842_v44 = vld [vmem:[%s17106_s5 + $0x12e0] sm:$0xff]  ;;  %v3771_v55 = vld [vmem:[%s17106_s5 + $0x10a8] sm:$0xff] }
 0x663   : > { %10393 = vmatprep.subr.bf16.mxu1 %v14492_v4  ;;  %v3779_v4 = vld [vmem:[%s17106_s5 + $0x10e8] sm:$0xff]  ;;  %v14634_v50 = vcombine.high %v3834_v3, %v3842_v44  ;;  %v14633_v38 = vcombine.low %v3834_v3, %v3842_v44 }
 0x664   : > { %10230 = vmatmul.mubr.bf16.vlgmr.msra.gmra.mrb[12].mxu0 %v17654_v45  ;;  %v14572_v43 = vcombine.high %v3771_v55, %v3779_v4  ;;  %v14571_v27 = vcombine.low %v3771_v55, %v3779_v4 }
 0x665   : > { %10241 = vmatpush1.bf16.msra.mxu0 %v14553_v37  ;;  %10272 = vmatprep.mubr.bf16.mxu0 %v17776_v23  ;;  %v3850_v37 = vld [vmem:[%s17106_s5 + $0x1320] sm:$0xff] }
 0x666   : > { %10394 = vmatpush1.bf16.msra.mxu1 %v14491_v15  ;;  %10242 = vmatprep.subr.bf16.mxu0 %v14570_v26  ;;  %v3858_v15 = vld [vmem:[%s17106_s5 + $0x1360] sm:$0xff]  ;;  %v3787_v26 = vld [vmem:[%s17106_s5 + $0x1128] sm:$0xff] }
 0x667   : > { %10395 = vmatprep.subr.bf16.mxu1 %v14508_v5  ;;  %v3795_v5 = vld [vmem:[%s17106_s5 + $0x1168] sm:$0xff]  ;;  %v14650_v10 = vcombine.high %v3850_v37, %v3858_v15  ;;  %v14649_v29 = vcombine.low %v3850_v37, %v3858_v15 }
 0x668   : > { %v14588_v17 = vcombine.high %v3787_v26, %v3795_v5  ;;  %v14587_v32 = vcombine.low %v3787_v26, %v3795_v5 }
 0x669   : > { %10243 = vmatpush1.bf16.msra.mxu0 %v14569_v16  ;;  %v3866_v16 = vld [vmem:[%s17106_s5 + $0x13a0] sm:$0xff] }
 0x66a   : > { %10396 = vmatpush1.bf16.msra.mxu1 %v14507_v13  ;;  %10244 = vmatprep.subr.bf16.mxu0 %v14586_v24  ;;  %v3874_v13 = vld [vmem:[%s17106_s5 + $0x13e0] sm:$0xff]  ;;  %v3803_v24 = vld [vmem:[%s17106_s5 + $0x11a8] sm:$0xff] }
 0x66b   : > { %10397 = vmatprep.subr.bf16.mxu1 %v14524_v25  ;;  %v3811_v25 = vld [vmem:[%s17106_s5 + $0x11e8] sm:$0xff]  ;;  %v14666_v42 = vcombine.high %v3866_v16, %v3874_v13  ;;  %v14665_v9 = vcombine.low %v3866_v16, %v3874_v13 }
 0x66c   : > { %v14604_v39 = vcombine.high %v3803_v24, %v3811_v25  ;;  %v14603_v18 = vcombine.low %v3803_v24, %v3811_v25 }
 0x66d   : > { %10245 = vmatpush1.bf16.msra.mxu0 %v14585_v7  ;;  %v3882_v7 = vld [vmem:[%s17106_s5 + $0x1420] sm:$0xff] }
 0x66e   : > { %10398 = vmatpush1.bf16.msra.mxu1 %v14523_v36  ;;  %10246 = vmatprep.subr.bf16.mxu0 %v14602_v48  ;;  %v3890_v36 = vld [vmem:[%s17106_s5 + $0x1460] sm:$0xff]  ;;  %v3819_v48 = vld [vmem:[%s17106_s5 + $0x1228] sm:$0xff] }
 0x66f   : > { %10399 = vmatprep.subr.bf16.mxu1 %v14540_v2  ;;  %v3827_v2 = vld [vmem:[%s17106_s5 + $0x1268] sm:$0xff]  ;;  %v14682_v49 = vcombine.high %v3882_v7, %v3890_v36  ;;  %v14681_v3 = vcombine.low %v3882_v7, %v3890_v36 }
 0x670   : > { %v14620_v35 = vcombine.high %v3819_v48, %v3827_v2  ;;  %v14619_v44 = vcombine.low %v3819_v48, %v3827_v2 }
 0x671   : > { %10247 = vmatpush1.bf16.msra.mxu0 %v14601_v41  ;;  %v3898_v41 = vld [vmem:[%s17106_s5 + $0x14a0] sm:$0xff] }
 0x672   : > { %10400 = vmatpush1.bf16.msra.mxu1 %v14539_v53  ;;  %10248 = vmatprep.subr.bf16.mxu0 %v14618_v60  ;;  %v3906_v53 = vld [vmem:[%s17106_s5 + $0x14e0] sm:$0xff]  ;;  %v3835_v60 = vld [vmem:[%s17106_s5 + $0x12a8] sm:$0xff] }
 0x673   : > { %10412 = vmatprep.subr.bf16.mxu1 %v14556_v54  ;;  %v3843_v54 = vld [vmem:[%s17106_s5 + $0x12e8] sm:$0xff]  ;;  %v14698_v55 = vcombine.high %v3898_v41, %v3906_v53  ;;  %v14697_v37 = vcombine.low %v3898_v41, %v3906_v53 }
 0x674   : > { %v14636_v4 = vcombine.high %v3835_v60, %v3843_v54  ;;  %v14635_v15 = vcombine.low %v3835_v60, %v3843_v54 }
 0x675   : > { %10249 = vmatpush1.bf16.msra.mxu0 %v14617_v22  ;;  %10402 = vmatmul.mubr.bf16.vlgmr.msra.gmra.mrb[32].mxu1 %v17654_v45  ;;  %v3914_v22 = vld [vmem:[%s17106_s5 + $0x1520] sm:$0xff] }
 0x676   : > { %10413 = vmatpush1.bf16.msra.mxu1 %v14555_v12  ;;  %10444 = vmatprep.mubr.bf16.mxu1 %v17776_v23  ;;  %v3922_v12 = vld [vmem:[%s17106_s5 + $0x1560] sm:$0xff] }
 0x677   : > { %10250 = vmatprep.subr.bf16.mxu0 %v14634_v50  ;;  %10414 = vmatprep.subr.bf16.mxu1 %v14572_v43  ;;  %v3851_v50 = vld [vmem:[%s17106_s5 + $0x1328] sm:$0xff]  ;;  %v14714_v26 = vcombine.high %v3914_v22, %v3922_v12  ;;  %v14713_v16 = vcombine.low %v3914_v22, %v3922_v12 }
 0x678   : > { %v3859_v43 = vld [vmem:[%s17106_s5 + $0x1368] sm:$0xff] }
 0x679   : > { %10251 = vmatpush1.bf16.msra.mxu0 %v14633_v38  ;;  %v14652_v5 = vcombine.high %v3851_v50, %v3859_v43  ;;  %v3930_v38 = vld [vmem:[%s17106_s5 + $0x15a0] sm:$0xff]  ;;  %v14651_v13 = vcombine.low %v3851_v50, %v3859_v43 }
 0x67a   : > { %10415 = vmatpush1.bf16.msra.mxu1 %v14571_v27  ;;  %10252 = vmatprep.subr.bf16.mxu0 %v14650_v10  ;;  %v3938_v27 = vld [vmem:[%s17106_s5 + $0x15e0] sm:$0xff]  ;;  %v3867_v10 = vld [vmem:[%s17106_s5 + $0x13a8] sm:$0xff] }
 0x67b   : > { %10416 = vmatprep.subr.bf16.mxu1 %v14588_v17  ;;  %v3875_v17 = vld [vmem:[%s17106_s5 + $0x13e8] sm:$0xff]  ;;  %v14730_v24 = vcombine.high %v3930_v38, %v3938_v27  ;;  %v14729_v7 = vcombine.low %v3930_v38, %v3938_v27 }
 0x67c   : > { %v14668_v25 = vcombine.high %v3867_v10, %v3875_v17  ;;  %v14667_v36 = vcombine.low %v3867_v10, %v3875_v17 }
 0x67d   : > { %10253 = vmatpush1.bf16.msra.mxu0 %v14649_v29  ;;  %v3946_v29 = vld [vmem:[%s17106_s5 + $0x1620] sm:$0xff] }
 0x67e   : > { %10417 = vmatpush1.bf16.msra.mxu1 %v14587_v32  ;;  %10254 = vmatprep.subr.bf16.mxu0 %v14666_v42  ;;  %v3954_v32 = vld [vmem:[%s17106_s5 + $0x1660] sm:$0xff]  ;;  %v3883_v42 = vld [vmem:[%s17106_s5 + $0x1428] sm:$0xff] }
 0x67f   : > { %10418 = vmatprep.subr.bf16.mxu1 %v14604_v39  ;;  %v3891_v39 = vld [vmem:[%s17106_s5 + $0x1468] sm:$0xff]  ;;  %v14746_v48 = vcombine.high %v3946_v29, %v3954_v32  ;;  %v14745_v41 = vcombine.low %v3946_v29, %v3954_v32 }
 0x680   : > { %v14684_v2 = vcombine.high %v3883_v42, %v3891_v39  ;;  %v14683_v53 = vcombine.low %v3883_v42, %v3891_v39 }
 0x681   : > { %10255 = vmatpush1.bf16.msra.mxu0 %v14665_v9  ;;  %v3962_v9 = vld [vmem:[%s17106_s5 + $0x16a0] sm:$0xff] }
 0x682   : > { %10419 = vmatpush1.bf16.msra.mxu1 %v14603_v18  ;;  %10256 = vmatprep.subr.bf16.mxu0 %v14682_v49  ;;  %v3970_v18 = vld [vmem:[%s17106_s5 + $0x16e0] sm:$0xff]  ;;  %v3899_v49 = vld [vmem:[%s17106_s5 + $0x14a8] sm:$0xff] }
 0x683   : > { %10420 = vmatprep.subr.bf16.mxu1 %v14620_v35  ;;  %v3907_v35 = vld [vmem:[%s17106_s5 + $0x14e8] sm:$0xff]  ;;  %v14762_v60 = vcombine.high %v3962_v9, %v3970_v18  ;;  %v14761_v22 = vcombine.low %v3962_v9, %v3970_v18 }
 0x684   : > { %v14700_v54 = vcombine.high %v3899_v49, %v3907_v35  ;;  %v14699_v12 = vcombine.low %v3899_v49, %v3907_v35 }
 0x685   : > { %10257 = vmatpush1.bf16.msra.mxu0 %v14681_v3  ;;  %v3978_v3 = vld [vmem:[%s17106_s5 + $0x1720] sm:$0xff] }
 0x686   : > { %10421 = vmatpush1.bf16.msra.mxu1 %v14619_v44  ;;  %10258 = vmatprep.subr.bf16.mxu0 %v14698_v55  ;;  %v3986_v44 = vld [vmem:[%s17106_s5 + $0x1760] sm:$0xff]  ;;  %v3915_v55 = vld [vmem:[%s17106_s5 + $0x1528] sm:$0xff] }
 0x687   : > { %10422 = vmatprep.subr.bf16.mxu1 %v14636_v4  ;;  %v3923_v4 = vld [vmem:[%s17106_s5 + $0x1568] sm:$0xff]  ;;  %v14778_v50 = vcombine.high %v3978_v3, %v3986_v44  ;;  %v14777_v38 = vcombine.low %v3978_v3, %v3986_v44 }
 0x688   : > { %v14716_v43 = vcombine.high %v3915_v55, %v3923_v4  ;;  %v14715_v27 = vcombine.low %v3915_v55, %v3923_v4 }
 0x689   : > { %10259 = vmatpush1.bf16.msra.mxu0 %v14697_v37  ;;  %v3994_v37 = vld [vmem:[%s17106_s5 + $0x17a0] sm:$0xff] }
 0x68a   : > { %10423 = vmatpush1.bf16.msra.mxu1 %v14635_v15  ;;  %10260 = vmatprep.subr.bf16.mxu0 %v14714_v26  ;;  %v4002_v15 = vld [vmem:[%s17106_s5 + $0x17e0] sm:$0xff]  ;;  %v3931_v26 = vld [vmem:[%s17106_s5 + $0x15a8] sm:$0xff] }
 0x68b   : > { %10424 = vmatprep.subr.bf16.mxu1 %v14652_v5  ;;  %v3939_v5 = vld [vmem:[%s17106_s5 + $0x15e8] sm:$0xff]  ;;  %v14794_v10 = vcombine.high %v3994_v37, %v4002_v15  ;;  %v14793_v29 = vcombine.low %v3994_v37, %v4002_v15 }
 0x68c   : > { %v14732_v17 = vcombine.high %v3931_v26, %v3939_v5  ;;  %v14731_v32 = vcombine.low %v3931_v26, %v3939_v5 }
 0x68d   : > { %10261 = vmatpush1.bf16.msra.mxu0 %v14713_v16  ;;  %v4010_v16 = vld [vmem:[%s17106_s5 + $0x1820] sm:$0xff] }
 0x68e   : > { %10425 = vmatpush1.bf16.msra.mxu1 %v14651_v13  ;;  %10262 = vmatprep.subr.bf16.mxu0 %v14730_v24  ;;  %v4018_v13 = vld [vmem:[%s17106_s5 + $0x1860] sm:$0xff]  ;;  %v3947_v24 = vld [vmem:[%s17106_s5 + $0x1628] sm:$0xff] }
 0x68f   : > { %10426 = vmatprep.subr.bf16.mxu1 %v14668_v25  ;;  %v3955_v25 = vld [vmem:[%s17106_s5 + $0x1668] sm:$0xff]  ;;  %v14810_v42 = vcombine.high %v4010_v16, %v4018_v13  ;;  %v14809_v9 = vcombine.low %v4010_v16, %v4018_v13 }
 0x690   : > { %v14748_v39 = vcombine.high %v3947_v24, %v3955_v25  ;;  %v14747_v18 = vcombine.low %v3947_v24, %v3955_v25 }
 0x691   : > { %10263 = vmatpush1.bf16.msra.mxu0 %v14729_v7  ;;  %v4026_v7 = vld [vmem:[%s17106_s5 + $0x18a0] sm:$0xff] }
 0x692   : > { %10427 = vmatpush1.bf16.msra.mxu1 %v14667_v36  ;;  %10264 = vmatprep.subr.bf16.mxu0 %v14746_v48  ;;  %v4034_v36 = vld [vmem:[%s17106_s5 + $0x18e0] sm:$0xff]  ;;  %v3963_v48 = vld [vmem:[%s17106_s5 + $0x16a8] sm:$0xff] }
 0x693   : > { %10428 = vmatprep.subr.bf16.mxu1 %v14684_v2  ;;  %v3971_v2 = vld [vmem:[%s17106_s5 + $0x16e8] sm:$0xff]  ;;  %v14826_v49 = vcombine.high %v4026_v7, %v4034_v36  ;;  %v14825_v3 = vcombine.low %v4026_v7, %v4034_v36 }
 0x694   : > { %v14764_v35 = vcombine.high %v3963_v48, %v3971_v2  ;;  %v14763_v44 = vcombine.low %v3963_v48, %v3971_v2 }
 0x695   : > { %10265 = vmatpush1.bf16.msra.mxu0 %v14745_v41  ;;  %v4042_v41 = vld [vmem:[%s17106_s5 + $0x1920] sm:$0xff] }
 0x696   : > { %10429 = vmatpush1.bf16.msra.mxu1 %v14683_v53  ;;  %10266 = vmatprep.subr.bf16.mxu0 %v14762_v60  ;;  %v4050_v53 = vld [vmem:[%s17106_s5 + $0x1960] sm:$0xff]  ;;  %v3979_v60 = vld [vmem:[%s17106_s5 + $0x1728] sm:$0xff] }
 0x697   : > { %10430 = vmatprep.subr.bf16.mxu1 %v14700_v54  ;;  %v3987_v54 = vld [vmem:[%s17106_s5 + $0x1768] sm:$0xff]  ;;  %v14842_v55 = vcombine.high %v4042_v41, %v4050_v53  ;;  %v14841_v37 = vcombine.low %v4042_v41, %v4050_v53 }
 0x698   : > { %v14780_v4 = vcombine.high %v3979_v60, %v3987_v54  ;;  %v14779_v15 = vcombine.low %v3979_v60, %v3987_v54  ;;  %v4043_v41 = vld [vmem:[%s17106_s5 + $0x1928] sm:$0xff] }
 0x699   : > { %10267 = vmatpush1.bf16.msra.mxu0 %v14761_v22  ;;  %v4058_v22 = vld [vmem:[%s17106_s5 + $0x19a0] sm:$0xff]  ;;  %v4051_v53 = vld [vmem:[%s17106_s5 + $0x1968] sm:$0xff] }
 0x69a   : > { %10431 = vmatpush1.bf16.msra.mxu1 %v14699_v12  ;;  %10268 = vmatprep.subr.bf16.mxu0 %v14778_v50  ;;  %v4066_v12 = vld [vmem:[%s17106_s5 + $0x19e0] sm:$0xff]  ;;  %v3995_v50 = vld [vmem:[%s17106_s5 + $0x17a8] sm:$0xff] }
 0x69b   : > { %10432 = vmatprep.subr.bf16.mxu1 %v14716_v43  ;;  %v4003_v43 = vld [vmem:[%s17106_s5 + $0x17e8] sm:$0xff]  ;;  %v14858_v26 = vcombine.high %v4058_v22, %v4066_v12  ;;  %v14857_v16 = vcombine.low %v4058_v22, %v4066_v12  ;;  %v4122_v22 = vld [vmem:[%s17106_s5 + $0x1ba0] sm:$0xff] }
 0x69c   : > { %v14796_v5 = vcombine.high %v3995_v50, %v4003_v43  ;;  %v14795_v13 = vcombine.low %v3995_v50, %v4003_v43  ;;  %v4130_v12 = vld [vmem:[%s17106_s5 + $0x1be0] sm:$0xff] }
 0x69d   : > { %10269 = vmatpush1.bf16.msra.mxu0 %v14777_v38  ;;  %v4074_v38 = vld [vmem:[%s17106_s5 + $0x1a20] sm:$0xff] }
 0x69e   : > { %10433 = vmatpush1.bf16.msra.mxu1 %v14715_v27  ;;  %10270 = vmatprep.subr.bf16.mxu0 %v14794_v10  ;;  %v4082_v27 = vld [vmem:[%s17106_s5 + $0x1a60] sm:$0xff]  ;;  %v4011_v10 = vld [vmem:[%s17106_s5 + $0x1828] sm:$0xff] }
 0x69f   : > { %10434 = vmatprep.subr.bf16.mxu1 %v14732_v17  ;;  %v4019_v17 = vld [vmem:[%s17106_s5 + $0x1868] sm:$0xff]  ;;  %v14874_v24 = vcombine.high %v4074_v38, %v4082_v27  ;;  %v14873_v7 = vcombine.low %v4074_v38, %v4082_v27 }
 0x6a0   : > { %v14812_v25 = vcombine.high %v4011_v10, %v4019_v17  ;;  %v14811_v36 = vcombine.low %v4011_v10, %v4019_v17 }
 0x6a1   : > { %10271 = vmatpush1.bf16.msra.mxu0 %v14793_v29  ;;  %v4090_v29 = vld [vmem:[%s17106_s5 + $0x1aa0] sm:$0xff] }
 0x6a2   : > { %10435 = vmatpush1.bf16.msra.mxu1 %v14731_v32  ;;  %10283 = vmatprep.subr.bf16.mxu0 %v14810_v42  ;;  %v4098_v32 = vld [vmem:[%s17106_s5 + $0x1ae0] sm:$0xff]  ;;  %v4027_v42 = vld [vmem:[%s17106_s5 + $0x18a8] sm:$0xff] }
 0x6a3   : > { %10436 = vmatprep.subr.bf16.mxu1 %v14748_v39  ;;  %v4035_v39 = vld [vmem:[%s17106_s5 + $0x18e8] sm:$0xff]  ;;  %v14890_v48 = vcombine.high %v4090_v29, %v4098_v32  ;;  %v14889_v54 = vcombine.low %v4090_v29, %v4098_v32  ;;  %v4138_v32 = vld [vmem:[%s17106_s5 + $0x1c20] sm:$0xff] }
 0x6a4   : > { %10273 = vmatmul.mubr.bf16.vlgmr.msra.gmra.mrb[12].mxu0 %v17772_v6  ;;  %v14828_v2 = vcombine.high %v4027_v42, %v4035_v39 }
 0x6a5   : > { %10284 = vmatpush1.bf16.msra.mxu0 %v14809_v9  ;;  %10315 = vmatprep.mubr.bf16.mxu0 %v17891_v20  ;;  %v4106_v9 = vld [vmem:[%s17106_s5 + $0x1b20] sm:$0xff] }
 0x6a6   : > { %10437 = vmatpush1.bf16.msra.mxu1 %v14747_v18  ;;  %10285 = vmatprep.subr.bf16.mxu0 %v14826_v49  ;;  %v4114_v18 = vld [vmem:[%s17106_s5 + $0x1b60] sm:$0xff] }
 0x6a7   : > { %10438 = vmatprep.subr.bf16.mxu1 %v14764_v35  ;;  %v18618_v49 = vld [vmem:[%s17113_s11] sm:$0xff]  ;;  %v14905_v38 = vcombine.low %v4106_v9, %v4114_v18 }
 0x6a8   : > { %v4285_v35 = vrot.slane %v18618_v49, %v17696_v56  ;;  %v4289_v60 = vrot.slane %v18618_v49, %v17701_v8 }
 0x6a9   : > { %10286 = vmatpush1.bf16.msra.mxu0 %v14825_v3  ;;  %v14827_v3 = vcombine.low %v4027_v42, %v4035_v39  ;;  %v4146_v42 = vld [vmem:[%s17106_s5 + $0x1c60] sm:$0xff] }
 0x6aa   : > { %10439 = vmatpush1.bf16.msra.mxu1 %v14763_v44  ;;  %10287 = vmatprep.subr.bf16.mxu0 %v14842_v55  ;;  %v14906_v44 = vcombine.high %v4106_v9, %v4114_v18  ;;  %v14938_v18 = vcombine.high %v4138_v32, %v4146_v42 }
 0x6ab   : > { %10440 = vmatprep.subr.bf16.mxu1 %v14780_v4  ;;  %v14844_v4 = vcombine.high %v4043_v41, %v4051_v53 }
 0x6ad   : > { %10288 = vmatpush1.bf16.msra.mxu0 %v14841_v37  ;;  %v4059_v37 = vld [vmem:[%s17106_s5 + $0x19a8] sm:$0xff] }
 0x6ae   : > { %10441 = vmatpush1.bf16.msra.mxu1 %v14779_v15  ;;  %10289 = vmatprep.subr.bf16.mxu0 %v14858_v26  ;;  %v4067_v15 = vld [vmem:[%s17106_s5 + $0x19e8] sm:$0xff] }
 0x6af   : > { %10442 = vmatprep.subr.bf16.mxu1 %v14796_v5  ;;  %v14860_v29 = vcombine.high %v4059_v37, %v4067_v15  ;;  %v14859_v9 = vcombine.low %v4059_v37, %v4067_v15  ;;  %v18658_v37 = vld [vmem:[%s17106_s5 + $0x1b68] sm:$0xff]  ;;  %v18661_v15 = vld [vmem:[%s17106_s5 + $0x1da0] sm:$0xff] }
 0x6b1   : > { %10290 = vmatpush1.bf16.msra.mxu0 %v14857_v16  ;;  %v14843_v16 = vcombine.low %v4043_v41, %v4051_v53  ;;  %v4154_v41 = vld [vmem:[%s17106_s5 + $0x1ca0] sm:$0xff] }
 0x6b2   : > { %10443 = vmatpush1.bf16.msra.mxu1 %v14795_v13  ;;  %10291 = vmatprep.subr.bf16.mxu0 %v14874_v24  ;;  %v14922_v13 = vcombine.high %v4122_v22, %v4130_v12  ;;  %v4162_v53 = vld [vmem:[%s17106_s5 + $0x1ce0] sm:$0xff] }
 0x6b3   : > { %10455 = vmatprep.subr.bf16.mxu1 %v14812_v25 }
 0x6b5   : > { %10292 = vmatpush1.bf16.msra.mxu0 %v14873_v7  ;;  %10445 = vmatmul.mubr.bf16.vlgmr.msra.gmra.mrb[32].mxu1 %v17772_v6  ;;  %v4075_v7 = vld [vmem:[%s17106_s5 + $0x1a28] sm:$0xff] }
 0x6b6   : > { %10456 = vmatpush1.bf16.msra.mxu1 %v14811_v36  ;;  %10487 = vmatprep.mubr.bf16.mxu1 %v17891_v20  ;;  %v4083_v36 = vld [vmem:[%s17106_s5 + $0x1a68] sm:$0xff] }
 0x6b7   : > { %v9973_v55 = vpop.f32.mrb[8].mxu0  ;;  %10293 = vmatprep.subr.bf16.mxu0 %v14890_v48  ;;  %10457 = vmatprep.subr.bf16.mxu1 %v14828_v2  ;;  %v14921_v2 = vcombine.low %v4122_v22, %v4130_v12  ;;  %v4170_v22 = vld [vmem:[%s17106_s5 + $0x1d20] sm:$0xff] }
 0x6b8   : > { %v18630_v50 = vadd.f32 %v9973_v55, %v4285_v35  ;;  %v9975_v43 = vpop.f32.mrb[9].mxu0  ;;  %v14954_v55 = vcombine.high %v4154_v41, %v4162_v53  ;;  %v4178_v12 = vld [vmem:[%s17106_s5 + $0x1d60] sm:$0xff] }
 0x6b9   : > { %v18634_v26 = vadd.f32 %v9975_v43, %v4289_v60  ;;  %v9977_v5 = vpop.f32.mrb[10].mxu0  ;;  %10294 = vmatpush1.bf16.msra.mxu0 %v14889_v54  ;;  %v4099_v54 = vld [vmem:[%s17106_s5 + $0x1ae8] sm:$0xff] }
 0x6ba   : > { %v10882_v27 = vmul.f32 1.442695, %v18630_v50  ;;  %v18637_v10 = vadd.f32 %v9977_v5, %v4285_v35  ;;  %v9979_v17 = vpop.f32.mrb[11].mxu0  ;;  %10458 = vmatpush1.bf16.msra.mxu1 %v14827_v3  ;;  %10295 = vmatprep.subr.bf16.mxu0 %v14906_v44  ;;  %v14876_v35 = vcombine.high %v4075_v7, %v4083_v36  ;;  %v14937_v3 = vcombine.low %v4138_v32, %v4146_v42  ;;  %v18655_v43 = vld [vmem:[%s17106_s5 + $0x1b28] sm:$0xff]  ;;  %v18664_v5 = vld [vmem:[%s17106_s5 + $0x1de0] sm:$0xff] }
 0x6bb   : > { %v10884_v24 = vmul.f32 1.442695, %v18634_v26  ;;  %v18640_v25 = vadd.f32 %v9979_v17, %v4289_v60  ;;  %10459 = vmatprep.subr.bf16.mxu1 %v14844_v4  ;;  %v4091_v60 = vld [vmem:[%s17106_s5 + $0x1aa8] sm:$0xff]  ;;  %v14875_v44 = vcombine.low %v4075_v7, %v4083_v36  ;;  %v4297_v17 = vrot.slane %v18618_v49, %v17865_v30  ;;  %v18680_v7 = vld [vmem:[%s17106_s5 + $0x1e60] sm:$0xff] }
 0x6bc   : > { %16206 = vpow2.f32 %v10882_v27  ;;  %v10914_v39 = vmul.f32 1.442695, %v18637_v10  ;;  %v14892_v4 = vcombine.high %v4091_v60, %v4099_v54  ;;  %v14953_v27 = vcombine.low %v4154_v41, %v4162_v53 }
 0x6bd   : > { %16208 = vpow2.f32 %v10884_v24  ;;  %v10916_v48 = vmul.f32 1.442695, %v18640_v25  ;;  %10296 = vmatpush1.bf16.msra.mxu0 %v14905_v38  ;;  %v4293_v38 = vrot.slane %v18618_v49, %v17862_v28  ;;  %v14969_v32 = vcombine.low %v4170_v22, %v4178_v12 }
 0x6be   : > { %16210 = vpow2.f32 %v10914_v39  ;;  %10460 = vmatpush1.bf16.msra.mxu1 %v14843_v16  ;;  %10297 = vmatprep.subr.bf16.mxu0 %v14922_v13  ;;  %v18671_v16 = vld [vmem:[%s17106_s5 + $0x1ba8] sm:$0xff]  ;;  %v14970_v42 = vcombine.high %v4170_v22, %v4178_v12  ;;  %v18677_v39 = vld [vmem:[%s17106_s5 + $0x1e20] sm:$0xff]  ;;  %v14907_v49 = vcombine.low %v18655_v43, %v18658_v37  ;;  %v14985_v53 = vcombine.low %v18661_v15, %v18664_v5 }
 0x6bf   : > { %16212 = vpow2.f32 %v10916_v48  ;;  %10461 = vmatprep.subr.bf16.mxu1 %v14860_v29  ;;  %v18674_v13 = vld [vmem:[%s17106_s5 + $0x1be8] sm:$0xff]  ;;  %v14891_v29 = vcombine.low %v4091_v60, %v4099_v54  ;;  %v15002_v12 = vcombine.high %v18677_v39, %v18680_v7  ;;  %vm10846_vm0 = vcmp.gt.f32.partialorder %v18630_v50, 0.0 }
 0x6c0   : > { %v14923_v60 = vcombine.low %v18671_v16, %v18674_v13  ;;  %v14924_v54 = vcombine.high %v18671_v16, %v18674_v13  ;;  %vm10847_vm1 = vcmp.gt.f32.partialorder %v18634_v26, 0.0  ;;  %vm10862_vm2 = vcmp.gt.f32.partialorder %v18637_v10, 0.0 }
 0x6c1   : > { %10298 = vmatpush1.bf16.msra.mxu0 %v14921_v2  ;;  %v14908_v2 = vcombine.high %v18655_v43, %v18658_v37  ;;  %vm10863_vm3 = vcmp.gt.f32.partialorder %v18640_v25, 0.0 }
 0x6c2   : > { %10462 = vmatpush1.bf16.msra.mxu1 %v14859_v9  ;;  %10299 = vmatprep.subr.bf16.mxu0 %v14938_v18  ;;  %v14986_v9 = vcombine.high %v18661_v15, %v18664_v5 }
 0x6c3   : > { %10463 = vmatprep.subr.bf16.mxu1 %v14876_v35 }
 0x6c5   : > { %10300 = vmatpush1.bf16.msra.mxu0 %v14937_v3 }
 0x6c6   : > { %v16207_v24 = vpop.eup %16206  ;;  %10464 = vmatpush1.bf16.msra.mxu1 %v14875_v44  ;;  %10301 = vmatprep.subr.bf16.mxu0 %v14954_v55 }
 0x6c7   : > { %v16209_v36 = vpop.eup %16208  ;;  %v15061_v48 = vadd.f32 -1.0, %v16207_v24  ;;  %10465 = vmatprep.subr.bf16.mxu1 %v14892_v4 }
 0x6c8   : > { %v16211_v18 = vpop.eup %16210  ;;  %v15062_v35 = vadd.f32 -1.0, %v16209_v36  ;;  %v10145_v41 = vpop.f32.mrb[28].mxu1 }
 0x6c9   : > { %v16213_v3 = vpop.eup %16212  ;;  %v10974_v44 = vmul.f32 1.6732632, %v15061_v48  ;;  %v15077_v55 = vadd.f32 -1.0, %v16211_v18  ;;  %v18694_v4 = vadd.f32 %v10145_v41, %v4293_v38  ;;  %v10147_v22 = vpop.f32.mrb[29].mxu1  ;;  %10302 = vmatpush1.bf16.msra.mxu0 %v14953_v27  ;;  %v4139_v18 = vld [vmem:[%s17106_s5 + $0x1c28] sm:$0xff] }
 0x6ca   : > { %v10975_v43 = vmul.f32 1.6732632, %v15062_v35  ;;  %v15078_v37 = vadd.f32 -1.0, %v16213_v3  ;;  %v18699_v15 = vadd.f32 %v10147_v22, %v4297_v17  ;;  %v10149_v5 = vpop.f32.mrb[30].mxu1  ;;  %10466 = vmatpush1.bf16.msra.mxu1 %v14891_v29  ;;  %10303 = vmatprep.subr.bf16.mxu0 %v14970_v42  ;;  %v4147_v35 = vld [vmem:[%s17106_s5 + $0x1c68] sm:$0xff]  ;;  %v4226_v22 = vld [vmem:[%s17106_s5 + $0x1ee0] sm:$0xff] }
 0x6cb   : > { %v11006_v16 = vsel %vm10846_vm0, %v18630_v50, %v10974_v44  ;;  %v10990_v13 = vmul.f32 1.6732632, %v15077_v55  ;;  %v10886_v27 = vmul.f32 1.442695, %v18694_v4  ;;  %v10151_v24 = vpop.f32.mrb[31].mxu1  ;;  %10467 = vmatprep.subr.bf16.mxu1 %v14908_v2  ;;  %v18716_v41 = vadd.f32 %v10149_v5, %v4293_v38  ;;  %v4155_v38 = vld [vmem:[%s17106_s5 + $0x1ca8] sm:$0xff] }
 0x6cc   : > { %v11007_v36 = vsel %vm10847_vm1, %v18634_v26, %v10975_v43  ;;  %v10991_v48 = vmul.f32 1.6732632, %v15078_v37  ;;  %v18709_v29 = vmul.f32 1.050701, %v11006_v16  ;;  %v10888_v42 = vmul.f32 1.442695, %v18699_v15 }
 0x6cd   : > { %v11022_v50 = vsel %vm10862_vm2, %v18637_v10, %v10990_v13  ;;  %16214 = vpow2.f32 %v10886_v27  ;;  %10304 = vmatpush1.bf16.msra.mxu0 %v14969_v32  ;;  %v18718_v3 = vadd.f32 %v10151_v24, %v4297_v17  ;;  %v18720_v44 = vmul.f32 1.050701, %v11007_v36  ;;  %v4218_v32 = vld [vmem:[%s17106_s5 + $0x1ea0] sm:$0xff]  ;;  %v4163_v17 = vld [vmem:[%s17106_s5 + $0x1ce8] sm:$0xff] }
 0x6ce   : > { %v18713_v2 = vmul.f32 1.050701, %v11022_v50  ;;  %v11023_v26 = vsel %vm10863_vm3, %v18640_v25, %v10991_v48  ;;  %10468 = vmatpush1.bf16.msra.mxu1 %v14907_v49  ;;  %10305 = vmatprep.subr.bf16.mxu0 %v14986_v9  ;;  %16216 = vpow2.f32 %v10888_v42  ;;  %v14940_v55 = vcombine.high %v4139_v18, %v4147_v35  ;;  %v4234_v24 = vld [vmem:[%s17106_s5 + $0x1f20] sm:$0xff]  ;;  %v4179_v50 = vld [vmem:[%s17106_s5 + $0x1d68] sm:$0xff] }
 0x6cf   : > { %v18722_v10 = vmul.f32 1.050701, %v11023_v26  ;;  %10469 = vmatprep.subr.bf16.mxu1 %v14924_v54  ;;  %v10918_v25 = vmul.f32 1.442695, %v18716_v41  ;;  %v10920_v9 = vmul.f32 1.442695, %v18718_v3  ;;  %v15001_v54 = vcombine.low %v18677_v39, %v18680_v7 }
 0x6d0   : > { %v11094_v43 = vadd.f32 %v18713_v2, %v18709_v29  ;;  %v14939_v5 = vcombine.low %v4139_v18, %v4147_v35  ;;  %v15018_v16 = vcombine.high %v4218_v32, %v4226_v22  ;;  %v14956_v27 = vcombine.high %v4155_v38, %v4163_v17  ;;  %v4242_v36 = vld [vmem:[%s17106_s5 + $0x1f60] sm:$0xff] }
 0x6d1   : > { %v11101_v49 = vadd.f32 %v18722_v10, %v18720_v44  ;;  %10306 = vmatpush1.bf16.msra.mxu0 %v14985_v53  ;;  %16218 = vpow2.f32 %v10918_v25  ;;  %v4171_v53 = vld [vmem:[%s17106_s5 + $0x1d28] sm:$0xff]  ;;  %v15017_v7 = vcombine.low %v4218_v32, %v4226_v22  ;;  %v15034_v18 = vcombine.high %v4234_v24, %v4242_v36  ;;  %v18741_v35 = vld [vmem:[%s17106_s5 + $0x1fa0] sm:$0xff] }
 0x6d2   : > { %v11095_v37 = vrot.slane %v11094_v43, 4  ;;  %10470 = vmatpush1.bf16.msra.mxu1 %v14923_v60  ;;  %10307 = vmatprep.subr.bf16.mxu0 %v15002_v12  ;;  %16220 = vpow2.f32 %v10920_v9  ;;  %v14955_v12 = vcombine.low %v4155_v38, %v4163_v17  ;;  %v18744_v42 = vld [vmem:[%s17106_s5 + $0x1fe0] sm:$0xff]  ;;  %v18747_v25 = vld [vmem:[%s17106_s5 + $0x1da8] sm:$0xff]  ;;  %v15033_v9 = vcombine.low %v4234_v24, %v4242_v36  ;;  %v18756_v38 = vld [vmem:[%s17106_s5 + $0x70] sm:$0xff] }
 0x6d3   : > { %v11102_v13 = vrot.slane %v11101_v49, 4  ;;  %10471 = vmatprep.subr.bf16.mxu1 %v14940_v55  ;;  %v18750_v32 = vld [vmem:[%s17106_s5 + $0x1de8] sm:$0xff]  ;;  %vm10848_vm4 = vcmp.gt.f32.partialorder %v18694_v4, 0.0  ;;  %vm10849_vm5 = vcmp.gt.f32.partialorder %v18699_v15, 0.0  ;;  %vm10864_vm6 = vcmp.gt.f32.partialorder %v18716_v41, 0.0 }
 0x6d4   : > { %v11096_v48 = vadd.f32 %v11095_v37, %v11094_v43  ;;  %v14972_v43 = vcombine.high %v4171_v53, %v4179_v50  ;;  %vm10865_vm7 = vcmp.gt.f32.partialorder %v18718_v3, 0.0 }
 0x6d5   : > { %v11103_v39 = vadd.f32 %v11102_v13, %v11101_v49  ;;  %10308 = vmatpush1.bf16.msra.mxu0 %v15001_v54  ;;  %v18753_v54 = vld [vmem:[%s17106_s5 + $0x30] sm:$0xff]  ;;  %v15050_v13 = vcombine.high %v18741_v35, %v18744_v42 }
 0x6d6   : > { %v11097_v60 = vrot.slane %v11096_v48, 2  ;;  %10472 = vmatpush1.bf16.msra.mxu1 %v14939_v5  ;;  %10309 = vmatprep.subr.bf16.mxu0 %v15018_v16  ;;  %v14971_v5 = vcombine.low %v4171_v53, %v4179_v50  ;;  %v15049_v16 = vcombine.low %v18741_v35, %v18744_v42  ;;  %v18774_v53 = vld [vmem:[%s17106_s5 + $0xf0] sm:$0xff]  ;;  %v14987_v35 = vcombine.low %v18747_v25, %v18750_v32 }
 0x6d7   : > { %v16215_v26 = vpop.eup %16214  ;;  %v11104_v55 = vrot.slane %v11103_v39, 2  ;;  %10473 = vmatprep.subr.bf16.mxu1 %v14956_v27  ;;  %v18763_v27 = vld [vmem:[%s17106_s5 + $0x1e28] sm:$0xff]  ;;  %v14045_v42 = vcombine.low %v18753_v54, %v18756_v38 }
 0x6d8   : > { %v11098_v22 = vadd.f32 %v11097_v60, %v11096_v48  ;;  %v15063_v49 = vadd.f32 -1.0, %v16215_v26  ;;  %v16217_v17 = vpop.eup %16216  ;;  %v18766_v48 = vld [vmem:[%s17106_s5 + $0x1e68] sm:$0xff]  ;;  %v14046_v26 = vcombine.high %v18753_v54, %v18756_v38 }
 0x6d9   : > { %v11105_v37 = vadd.f32 %v11104_v55, %v11103_v39  ;;  %10310 = vmatpush1.bf16.msra.mxu0 %v15017_v7  ;;  %v15064_v60 = vadd.f32 -1.0, %v16217_v17  ;;  %v14988_v39 = vcombine.high %v18747_v25, %v18750_v32  ;;  %v18771_v7 = vld [vmem:[%s17106_s5 + $0xb0] sm:$0xff]  ;;  %v15004_v17 = vcombine.high %v18763_v27, %v18766_v48 }
 0x6da   : > { %v11099_v24 = vrot.slane %v11098_v22, 1  ;;  %v10976_v36 = vmul.f32 1.6732632, %v15063_v49  ;;  %10474 = vmatpush1.bf16.msra.mxu1 %v14955_v12  ;;  %10311 = vmatprep.subr.bf16.mxu0 %v15034_v18  ;;  %v15003_v49 = vcombine.low %v18763_v27, %v18766_v48  ;;  %v14062_v32 = vcombine.high %v18771_v7, %v18774_v53 }
 0x6db   : > { %v11106_v50 = vrot.slane %v11105_v37, 1  ;;  %10475 = vmatprep.subr.bf16.mxu1 %v14972_v43  ;;  %v16219_v12 = vpop.eup %16218  ;;  %v10977_v55 = vmul.f32 1.6732632, %v15064_v60 }
 0x6dc   : > { %v11100_v18 = vadd.f32 %v11099_v24, %v11098_v22  ;;  %v16221_v61 = vpop.eup %16220  ;;  %v15079_v25 = vadd.f32 -1.0, %v16219_v12  ;;  %v11008_v22 = vsel %vm10848_vm4, %v18694_v4, %v10976_v36  ;;  %v4219_v36 = vld [vmem:[%s17106_s5 + $0x1ea8] sm:$0xff]  ;;  %v3276_v12 = vld [vmem:[%s17106_s5 + $0x130] sm:$0xff] }
 0x6dd   : > { %v11107_v43 = vadd.f32 %v11106_v50, %v11105_v37  ;;  %10312 = vmatpush1.bf16.msra.mxu0 %v15033_v9  ;;  %v15080_v38 = vadd.f32 -1.0, %v16221_v61  ;;  %v11009_v4 = vsel %vm10849_vm5, %v18699_v15, %v10977_v55  ;;  %v4227_v61 = vld [vmem:[%s17106_s5 + $0x1ee8] sm:$0xff] }
 0x6de   : > { %v11182_v54 = vmul.f32 0.0625, %v11100_v18  ;;  %10476 = vmatpush1.bf16.msra.mxu1 %v14971_v5  ;;  %10313 = vmatprep.subr.bf16.mxu0 %v15050_v13  ;;  %v10992_v37 = vmul.f32 1.6732632, %v15079_v25  ;;  %v18805_v13 = vmul.f32 1.050701, %v11008_v22  ;;  %v15020_v50 = vcombine.high %v4219_v36, %v4227_v61  ;;  %v3284_v18 = vld [vmem:[%s17106_s5 + $0x170] sm:$0xff] }
 0x6df   : > { %v11183_v27 = vmul.f32 0.0625, %v11107_v43  ;;  %10477 = vmatprep.subr.bf16.mxu1 %v14988_v39  ;;  %v10993_v24 = vmul.f32 1.6732632, %v15080_v38  ;;  %v15019_v38 = vcombine.low %v4219_v36, %v4227_v61 }
 0x6e0   : > { %v18794_v9 = vsub.f32 %v18709_v29, %v11182_v54  ;;  %v18797_v48 = vsub.f32 %v18713_v2, %v11182_v54  ;;  %v11024_v60 = vsel %vm10864_vm6, %v18716_v41, %v10992_v37 }
 0x6e1   : > { %v18803_v5 = vsub.f32 %v18722_v10, %v11183_v27  ;;  %10314 = vmatpush1.bf16.msra.mxu0 %v15049_v16  ;;  %v18809_v29 = vsub.f32 %v18720_v44, %v11183_v27  ;;  %v18815_v10 = vmul.f32 1.050701, %v11024_v60  ;;  %v11025_v39 = vsel %vm10865_vm7, %v18718_v3, %v10993_v24  ;;  %v4235_v3 = vld [vmem:[%s17106_s5 + $0x1f28] sm:$0xff]  ;;  %v3292_v24 = vld [vmem:[%s17106_s5 + $0x1b0] sm:$0xff] }
 0x6e2   : > { %v11230_v2 = vmul.f32 %v18794_v9, %v18794_v9  ;;  %v11246_v15 = vmul.f32 %v18797_v48, %v18797_v48  ;;  %10478 = vmatpush1.bf16.msra.mxu1 %v14987_v35  ;;  %10498 = vmatprep.subr.bf16.mxu0 %v14046_v26  ;;  %v18822_v44 = vmul.f32 1.050701, %v11009_v4  ;;  %v18824_v16 = vmul.f32 1.050701, %v11025_v39  ;;  %v4243_v35 = vld [vmem:[%s17106_s5 + $0x1f68] sm:$0xff]  ;;  %v3300_v60 = vld [vmem:[%s17106_s5 + $0x1f0] sm:$0xff] }
 0x6e3   : > { %v11247_v41 = vmul.f32 %v18803_v5, %v18803_v5  ;;  %10479 = vmatprep.subr.bf16.mxu1 %v15004_v17  ;;  %v11108_v43 = vadd.f32 %v18815_v10, %v18805_v13  ;;  %v11231_v26 = vmul.f32 %v18809_v29, %v18809_v29  ;;  %v14061_v17 = vcombine.low %v18771_v7, %v18774_v53  ;;  %v4251_v39 = vld [vmem:[%s17106_s5 + $0x1fa8] sm:$0xff] }
 0x6e4   : > { %v11286_v55 = vadd.f32 %v11246_v15, %v11230_v2  ;;  %10316 = vmatmul.mubr.bf16.vlgmr.msra.gmra.mrb[12].mxu0 %v17887_v1  ;;  %v11115_v25 = vadd.f32 %v18824_v16, %v18822_v44  ;;  %v14078_v27 = vcombine.high %v3276_v12, %v3284_v18  ;;  %v15036_v4 = vcombine.high %v4235_v3, %v4243_v35 }
 0x6e5   : > { %10499 = vmatpush1.bf16.msra.mxu0 %v14045_v42  ;;  %10530 = vmatprep.mubr.bf16.mxu0 %v17535_v11  ;;  %v11109_v22 = vrot.slane %v11108_v43, 4  ;;  %v11293_v2 = vadd.f32 %v11247_v41, %v11231_v26  ;;  %v14077_v53 = vcombine.low %v3276_v12, %v3284_v18  ;;  %v15035_v61 = vcombine.low %v4235_v3, %v4243_v35  ;;  %v3253_v12 = vld [vmem:[%s17106_s5 + $0x78] sm:$0xff] }
 0x6e6   : > { %v11287_v54 = vrot.slane %v11286_v55, 4  ;;  %10480 = vmatpush1.bf16.msra.mxu1 %v15003_v49  ;;  %10500 = vmatprep.subr.bf16.mxu0 %v14062_v32  ;;  %v11116_v37 = vrot.slane %v11115_v25, 4  ;;  %v15052_v41 = vcombine.high %v4251_v39, %v4259_v14 }
 0x6e7   : > { %10481 = vmatprep.subr.bf16.mxu1 %v15020_v50  ;;  %v11110_v15 = vadd.f32 %v11109_v22, %v11108_v43  ;;  %v11294_v49 = vrot.slane %v11293_v2, 4  ;;  %v14094_v50 = vcombine.high %v3292_v24, %v3300_v60  ;;  %v3316_v43 = vld [vmem:[%s17106_s5 + $0x270] sm:$0xff] }
 0x6e8   : > { %v11288_v42 = vadd.f32 %v11287_v54, %v11286_v55  ;;  %v11117_v7 = vadd.f32 %v11116_v37, %v11115_v25  ;;  %v3308_v55 = vld [vmem:[%s17106_s5 + $0x230] sm:$0xff]  ;;  %v3245_v25 = vld [vmem:[%s17106_s5 + $0x38] sm:$0xff] }
 0x6e9   : > { %10501 = vmatpush1.bf16.msra.mxu0 %v14061_v17  ;;  %v11111_v36 = vrot.slane %v11110_v15, 2  ;;  %v11295_v26 = vadd.f32 %v11294_v49, %v11293_v2  ;;  %v14093_v17 = vcombine.low %v3292_v24, %v3300_v60  ;;  %v14110_v37 = vcombine.high %v3308_v55, %v3316_v43  ;;  %v3269_v24 = vld [vmem:[%s17106_s5 + $0xf8] sm:$0xff] }
 0x6ea   : > { %v11289_v32 = vrot.slane %v11288_v42, 2  ;;  %10482 = vmatpush1.bf16.msra.mxu1 %v15019_v38  ;;  %10502 = vmatprep.subr.bf16.mxu0 %v14078_v27  ;;  %v11118_v58 = vrot.slane %v11117_v7, 2  ;;  %v15051_v27 = vcombine.low %v4251_v39, %v4259_v14  ;;  %v14048_v2 = vcombine.high %v3245_v25, %v3253_v12 }
 0x6eb   : > { %10483 = vmatprep.subr.bf16.mxu1 %v15036_v4  ;;  %v11112_v22 = vadd.f32 %v11111_v36, %v11110_v15  ;;  %v11296_v38 = vrot.slane %v11295_v26, 2  ;;  %v14047_v39 = vcombine.low %v3245_v25, %v3253_v12 }
 0x6ec   : > { %v11290_v54 = vadd.f32 %v11289_v32, %v11288_v42  ;;  %v11119_v18 = vadd.f32 %v11118_v58, %v11117_v7  ;;  %v3324_v42 = vld [vmem:[%s17106_s5 + $0x2b0] sm:$0xff]  ;;  %v3261_v7 = vld [vmem:[%s17106_s5 + $0xb8] sm:$0xff] }
 0x6ed   : > { %10503 = vmatpush1.bf16.msra.mxu0 %v14077_v53  ;;  %v11113_v35 = vrot.slane %v11112_v22, 1  ;;  %v11297_v15 = vadd.f32 %v11296_v38, %v11295_v26  ;;  %v3332_v58 = vld [vmem:[%s17106_s5 + $0x2f0] sm:$0xff]  ;;  %v14109_v53 = vcombine.low %v3308_v55, %v3316_v43  ;;  %v14064_v26 = vcombine.high %v3261_v7, %v3269_v24 }
 0x6ee   : > { %v11291_v3 = vrot.slane %v11290_v54, 1  ;;  %10484 = vmatpush1.bf16.msra.mxu1 %v15035_v61  ;;  %10504 = vmatprep.subr.bf16.mxu0 %v14094_v50  ;;  %v11120_v4 = vrot.slane %v11119_v18, 1  ;;  %v14125_v43 = vcombine.low %v3324_v42, %v3332_v58  ;;  %v14063_v25 = vcombine.low %v3261_v7, %v3269_v24 }
 0x6ef   : > { %10485 = vmatprep.subr.bf16.mxu1 %v15052_v41  ;;  %v11114_v32 = vadd.f32 %v11113_v35, %v11112_v22  ;;  %v11298_v36 = vrot.slane %v11297_v15, 1  ;;  %v14126_v41 = vcombine.high %v3324_v42, %v3332_v58  ;;  %v3348_v22 = vld [vmem:[%s17106_s5 + $0x370] sm:$0xff]  ;;  %v3285_v35 = vld [vmem:[%s17106_s5 + $0x178] sm:$0xff] }
 0x6f0   : > { %v11292_v49 = vadd.f32 %v11291_v3, %v11290_v54  ;;  %v11121_v60 = vadd.f32 %v11120_v4, %v11119_v18  ;;  %v3340_v54 = vld [vmem:[%s17106_s5 + $0x330] sm:$0xff]  ;;  %v3301_v58 = vld [vmem:[%s17106_s5 + $0x1f8] sm:$0xff] }
 0x6f1   : > { %10505 = vmatpush1.bf16.msra.mxu0 %v14093_v17  ;;  %v11184_v14 = vmul.f32 0.0625, %v11114_v32  ;;  %v11299_v38 = vadd.f32 %v11298_v36, %v11297_v15  ;;  %v3277_v17 = vld [vmem:[%s17106_s5 + $0x138] sm:$0xff]  ;;  %v3364_v42 = vld [vmem:[%s17106_s5 + $0x3f0] sm:$0xff] }
 0x6f2   : > { %v11374_v61 = vmul.f32 0.0625, %v11292_v49  ;;  %10486 = vmatpush1.bf16.msra.mxu1 %v15051_v27  ;;  %10506 = vmatprep.subr.bf16.mxu0 %v14110_v37  ;;  %v11185_v50 = vmul.f32 0.0625, %v11121_v60  ;;  %v14142_v37 = vcombine.high %v3340_v54, %v3348_v22  ;;  %v3293_v32 = vld [vmem:[%s17106_s5 + $0x1b8] sm:$0xff]  ;;  %v14079_v60 = vcombine.low %v3277_v17, %v3285_v35 }
 0x6f3   : > { %10670 = vmatprep.subr.bf16.mxu1 %v14048_v2  ;;  %v18855_v18 = vsub.f32 %v18805_v13, %v11184_v14  ;;  %v18858_v55 = vsub.f32 %v18815_v10, %v11184_v14  ;;  %v11375_v12 = vmul.f32 0.0625, %v11299_v38  ;;  %v14080_v2 = vcombine.high %v3277_v17, %v3285_v35  ;;  %v3372_v14 = vld [vmem:[%s17106_s5 + $0x430] sm:$0xff] }
 0x6f4   : > { %v11390_v3 = vadd.f32 1e-05, %v11374_v61  ;;  %v18863_v27 = vsub.f32 %v18824_v16, %v11185_v50  ;;  %v18867_v13 = vsub.f32 %v18822_v44, %v11185_v50  ;;  %v3356_v44 = vld [vmem:[%s17106_s5 + $0x3b0] sm:$0xff]  ;;  %v14096_v61 = vcombine.high %v3293_v32, %v3301_v58 }
 0x6f5   : > { %10488 = vmatmul.mubr.bf16.vlgmr.msra.gmra.mrb[32].mxu1 %v17887_v1  ;;  %10507 = vmatpush1.bf16.msra.mxu0 %v14109_v53  ;;  %v11232_v10 = vmul.f32 %v18855_v18, %v18855_v18  ;;  %v11248_v16 = vmul.f32 %v18858_v55, %v18858_v55  ;;  %v11391_v15 = vadd.f32 1e-05, %v11375_v12  ;;  %v14158_v53 = vcombine.high %v3356_v44, %v3364_v42  ;;  %v3396_v12 = vld [vmem:[%s17106_s5 + $0x4f0] sm:$0xff] }
 0x6f6   : > { %16222 = vrsqrt.f32 %v11390_v3  ;;  %10671 = vmatpush1.bf16.msra.mxu1 %v14047_v39  ;;  %10702 = vmatprep.mubr.bf16.mxu1 %v17535_v11  ;;  %v11249_v4 = vmul.f32 %v18863_v27, %v18863_v27  ;;  %v11233_v7 = vmul.f32 %v18867_v13, %v18867_v13  ;;  %v14141_v11 = vcombine.low %v3340_v54, %v3348_v22  ;;  %v3380_v39 = vld [vmem:[%s17106_s5 + $0x470] sm:$0xff] }
 0x6f7   : > { %10508 = vmatprep.subr.bf16.mxu0 %v14126_v41  ;;  %10672 = vmatprep.subr.bf16.mxu1 %v14064_v26  ;;  %v11300_v49 = vadd.f32 %v11248_v16, %v11232_v10  ;;  %16224 = vrsqrt.f32 %v11391_v15  ;;  %v3309_v41 = vld [vmem:[%s17106_s5 + $0x238] sm:$0xff]  ;;  %v14157_v54 = vcombine.low %v3356_v44, %v3364_v42  ;;  %v14095_v3 = vcombine.low %v3293_v32, %v3301_v58 }
 0x6f8   : > { %v11307_v36 = vadd.f32 %v11249_v4, %v11233_v7  ;;  %v3317_v26 = vld [vmem:[%s17106_s5 + $0x278] sm:$0xff]  ;;  %v14173_v44 = vcombine.low %v3372_v14, %v3380_v39 }
 0x6f9   : > { %10509 = vmatpush1.bf16.msra.mxu0 %v14125_v43  ;;  %v11301_v24 = vrot.slane %v11300_v49, 4  ;;  %v14174_v43 = vcombine.high %v3372_v14, %v3380_v39  ;;  %v14112_v35 = vcombine.high %v3309_v41, %v3317_v26  ;;  %v3333_v4 = vld [vmem:[%s17106_s5 + $0x2f8] sm:$0xff]  ;;  %v14111_v32 = vcombine.low %v3309_v41, %v3317_v26 }
 0x6fa   : > { %10673 = vmatpush1.bf16.msra.mxu1 %v14063_v25  ;;  %10510 = vmatprep.subr.bf16.mxu0 %v14142_v37  ;;  %v11308_v38 = vrot.slane %v11307_v36, 4  ;;  %v3388_v25 = vld [vmem:[%s17106_s5 + $0x4b0] sm:$0xff]  ;;  %v3325_v37 = vld [vmem:[%s17106_s5 + $0x2b8] sm:$0xff] }
 0x6fb   : > { %10674 = vmatprep.subr.bf16.mxu1 %v14080_v2  ;;  %v11302_v50 = vadd.f32 %v11301_v24, %v11300_v49  ;;  %v14190_v58 = vcombine.high %v3388_v25, %v3396_v12  ;;  %v14128_v24 = vcombine.high %v3325_v37, %v3333_v4  ;;  %v14189_v41 = vcombine.low %v3388_v25, %v3396_v12  ;;  %v3365_v25 = vld [vmem:[%s17106_s5 + $0x3f8] sm:$0xff] }
 0x6fc   : > { %v11309_v17 = vadd.f32 %v11308_v38, %v11307_v36  ;;  %v14127_v38 = vcombine.low %v3325_v37, %v3333_v4 }
 0x6fd   : > { %10511 = vmatpush1.bf16.msra.mxu0 %v14141_v11  ;;  %v11303_v22 = vrot.slane %v11302_v50, 2 }
 0x6fe   : > { %10675 = vmatpush1.bf16.msra.mxu1 %v14079_v60  ;;  %10512 = vmatprep.subr.bf16.mxu0 %v14158_v53  ;;  %v11310_v2 = vrot.slane %v11309_v17, 2  ;;  %v3404_v60 = vld [vmem:[%s17106_s5 + $0x530] sm:$0xff] }
 0x6ff   : > { %10676 = vmatprep.subr.bf16.mxu1 %v14096_v61  ;;  %v11304_v16 = vadd.f32 %v11303_v22, %v11302_v50  ;;  %v3412_v53 = vld [vmem:[%s17106_s5 + $0x570] sm:$0xff]  ;;  %v3341_v61 = vld [vmem:[%s17106_s5 + $0x338] sm:$0xff] }
 0x700   : > { %v16223_v10 = vpop.eup %16222  ;;  %v11311_v7 = vadd.f32 %v11310_v2, %v11309_v17  ;;  %v14205_v12 = vcombine.low %v3404_v60, %v3412_v53  ;;  %v3436_v2 = vld [vmem:[%s17106_s5 + $0x630] sm:$0xff] }
 0x701   : > { %v18891_v15 = vmul.f32 %v16223_v10, %v18797_v48  ;;  %10513 = vmatpush1.bf16.msra.mxu0 %v14157_v54  ;;  %v18894_v42 = vmul.f32 %v16223_v10, %v18794_v9  ;;  %v11305_v49 = vrot.slane %v11304_v16, 1  ;;  %v16225_v11 = vpop.eup %16224  ;;  %v3349_v9 = vld [vmem:[%s17106_s5 + $0x378] sm:$0xff]  ;;  %v14206_v54 = vcombine.high %v3404_v60, %v3412_v53  ;;  %v3452_v53 = vld [vmem:[%s17106_s5 + $0x6b0] sm:$0xff] }
 0x702   : > { %10677 = vmatpush1.bf16.msra.mxu1 %v14095_v3  ;;  %10514 = vmatprep.subr.bf16.mxu0 %v14174_v43  ;;  %v18903_v14 = vmul.f32 %v16225_v11, %v18809_v29  ;;  %v18906_v39 = vmul.f32 %v16225_v11, %v18803_v5  ;;  %v11312_v50 = vrot.slane %v11311_v7, 1  ;;  %v14144_v3 = vcombine.high %v3341_v61, %v3349_v9  ;;  %v3420_v29 = vld [vmem:[%s17106_s5 + $0x5b0] sm:$0xff] }
 0x703   : > { %10678 = vmatprep.subr.bf16.mxu1 %v14112_v35  ;;  %v11454_v48 = vpack.c.bf16 %v18891_v15, %v18894_v42  ;;  %v11306_v36 = vadd.f32 %v11305_v49, %v11304_v16  ;;  %v3428_v43 = vld [vmem:[%s17106_s5 + $0x5f0] sm:$0xff]  ;;  %v3357_v35 = vld [vmem:[%s17106_s5 + $0x3b8] sm:$0xff]  ;;  %v14143_v16 = vcombine.low %v3341_v61, %v3349_v9  ;;  %v15908_v42 = vld [vmem:[%s17115_s24 + $0x344] ss:$8 sps:$4 sm:$0xff]  }
 0x704   : > { %v11455_v22 = vpack.c.bf16 %v18906_v39, %v18903_v14  ;;  %v11313_v5 = vadd.f32 %v11312_v50, %v11311_v7  ;;  %v14222_v37 = vcombine.high %v3420_v29, %v3428_v43  ;;  %v14160_v4 = vcombine.high %v3357_v35, %v3365_v25  ;;  %v3389_v61 = vld [vmem:[%s17106_s5 + $0x4b8] sm:$0xff]  ;;  %v15858_v14 = vld [vmem:[%s17115_s24 + $0x240] ss:$8 sps:$4 sm:$0xff]  }
 0x705   : > { %10515 = vmatpush1.bf16.msra.mxu0 %v14173_v44  ;;  %v11376_v26 = vmul.f32 0.0625, %v11306_v36  ;;  %v3444_v44 = vld [vmem:[%s17106_s5 + $0x670] sm:$0xff]  ;;  %v14221_v7 = vcombine.low %v3420_v29, %v3428_v43  ;;  %v14159_v11 = vcombine.low %v3357_v35, %v3365_v25  ;;  %v3397_v9 = vld [vmem:[%s17106_s5 + $0x4f8] sm:$0xff] }
 0x706   : > { %10679 = vmatpush1.bf16.msra.mxu1 %v14111_v32  ;;  %10516 = vmatprep.subr.bf16.mxu0 %v14190_v58  ;;  %v11377_v10 = vmul.f32 0.0625, %v11313_v5  ;;  %v3373_v32 = vld [vmem:[%s17106_s5 + $0x438] sm:$0xff]  ;;  %v3460_v36 = vld [vmem:[%s17106_s5 + $0x6f0] sm:$0xff]  ;;  %v14237_v50 = vcombine.low %v3436_v2, %v3444_v44 }
 0x707   : > { %10680 = vmatprep.subr.bf16.mxu1 %v14128_v24  ;;  %v11392_v17 = vadd.f32 1e-05, %v11376_v26  ;;  %v3381_v58 = vld [vmem:[%s17106_s5 + $0x478] sm:$0xff]  ;;  %v14238_v24 = vcombine.high %v3436_v2, %v3444_v44  ;;  %v14254_v26 = vcombine.high %v3452_v53, %v3460_v36  ;;  %v14253_v35 = vcombine.low %v3452_v53, %v3460_v36  ;;  %v3492_v2 = vld [vmem:[%s17106_s5 + $0x7f0] sm:$0xff] }
 0x708   : > { %v11393_v49 = vadd.f32 1e-05, %v11377_v10  ;;  %v14176_v60 = vcombine.high %v3373_v32, %v3381_v58  ;;  %v3405_v43 = vld [vmem:[%s17106_s5 + $0x538] sm:$0xff]  ;;  %v3508_v53 = vld [vmem:[%s17106_s5 + $0x870] sm:$0xff] }
 0x709   : > { %10517 = vmatpush1.bf16.msra.mxu0 %v14189_v41  ;;  %16226 = vrsqrt.f32 %v11392_v17  ;;  %v14175_v41 = vcombine.low %v3373_v32, %v3381_v58  ;;  %v3413_v5 = vld [vmem:[%s17106_s5 + $0x578] sm:$0xff] }
 0x70a   : > { %10681 = vmatpush1.bf16.msra.mxu1 %v14127_v38  ;;  %10518 = vmatprep.subr.bf16.mxu0 %v14206_v54  ;;  %16228 = vrsqrt.f32 %v11393_v49  ;;  %v14192_v38 = vcombine.high %v3389_v61, %v3397_v9  ;;  %v3468_v54 = vld [vmem:[%s17106_s5 + $0x730] sm:$0xff]  ;;  %v3421_v44 = vld [vmem:[%s17106_s5 + $0x5b8] sm:$0xff] }
 0x70b   : > { %10682 = vmatprep.subr.bf16.mxu1 %v14144_v3  ;;  %v3476_v3 = vld [vmem:[%s17106_s5 + $0x770] sm:$0xff]  ;;  %v3429_v49 = vld [vmem:[%s17106_s5 + $0x5f8] sm:$0xff] }
 0x70c   : > { %v14270_v10 = vcombine.high %v3468_v54, %v3476_v3  ;;  %v14269_v58 = vcombine.low %v3468_v54, %v3476_v3  ;;  %v3437_v36 = vld [vmem:[%s17106_s5 + $0x638] sm:$0xff] }
 0x70d   : > { %10519 = vmatpush1.bf16.msra.mxu0 %v14205_v12  ;;  %v14191_v12 = vcombine.low %v3389_v61, %v3397_v9  ;;  %v14223_v9 = vcombine.low %v3421_v44, %v3429_v49  ;;  %v3453_v54 = vld [vmem:[%s17106_s5 + $0x6b8] sm:$0xff] }
 0x70e   : > { %10683 = vmatpush1.bf16.msra.mxu1 %v14143_v16  ;;  %10520 = vmatprep.subr.bf16.mxu0 %v14222_v37  ;;  %v14208_v37 = vcombine.high %v3405_v43, %v3413_v5  ;;  %v3461_v3 = vld [vmem:[%s17106_s5 + $0x6f8] sm:$0xff] }
 0x70f   : > { %10684 = vmatprep.subr.bf16.mxu1 %v14160_v4  ;;  %v3484_v4 = vld [vmem:[%s17106_s5 + $0x7b0] sm:$0xff] }
 0x710   : > { %v14285_v61 = vcombine.low %v3484_v4, %v3492_v2  ;;  %v15863_v39 = vld [vmem:[%s17115_s24 + $0x254] ss:$8 sps:$4 sm:$0xff]   ;;  %v15903_v15 = vld [vmem:[%s17115_s24 + $0x330] ss:$8 sps:$4 sm:$0xff]  }
 0x711   : > { %10521 = vmatpush1.bf16.msra.mxu0 %v14221_v7  ;;  %v14207_v7 = vcombine.low %v3405_v43, %v3413_v5 }
 0x712   : > { %10685 = vmatpush1.bf16.msra.mxu1 %v14159_v11  ;;  %10522 = vmatprep.subr.bf16.mxu0 %v14238_v24  ;;  %v14286_v11 = vcombine.high %v3484_v4, %v3492_v2  ;;  %v14255_v2 = vcombine.low %v3453_v54, %v3461_v3 }
 0x713   : > { %10686 = vmatprep.subr.bf16.mxu1 %v14176_v60  ;;  %v16227_v29 = vpop.eup %16226  ;;  %v14224_v60 = vcombine.high %v3421_v44, %v3429_v49 }
 0x714   : > { %v18927_v17 = vmul.f32 %v16227_v29, %v18858_v55  ;;  %v18930_v25 = vmul.f32 %v16227_v29, %v18855_v18  ;;  %v16229_v16 = vpop.eup %16228 }
 0x715   : > { %10523 = vmatpush1.bf16.msra.mxu0 %v14237_v50  ;;  %v18939_v18 = vmul.f32 %v16229_v16, %v18867_v13  ;;  %v18942_v32 = vmul.f32 %v16229_v16, %v18863_v27  ;;  %v3500_v13 = vld [vmem:[%s17106_s5 + $0x830] sm:$0xff]  ;;  %v3445_v27 = vld [vmem:[%s17106_s5 + $0x678] sm:$0xff] }
 0x716   : > { %10687 = vmatpush1.bf16.msra.mxu1 %v14175_v41  ;;  %10524 = vmatprep.subr.bf16.mxu0 %v14254_v26  ;;  %v14302_v50 = vcombine.high %v3500_v13, %v3508_v53  ;;  %v14240_v41 = vcombine.high %v3437_v36, %v3445_v27  ;;  %v3516_v26 = vld [vmem:[%s17106_s5 + $0x8b0] sm:$0xff]  ;;  %v14301_v29 = vcombine.low %v3500_v13, %v3508_v53  ;;  %v3469_v16 = vld [vmem:[%s17106_s5 + $0x738] sm:$0xff] }
 0x717   : > { %10688 = vmatprep.subr.bf16.mxu1 %v14192_v38  ;;  %v11457_v24 = vpack.c.bf16 %v18942_v32, %v18939_v18  ;;  %v3524_v38 = vld [vmem:[%s17106_s5 + $0x8f0] sm:$0xff]  ;;  %v14239_v43 = vcombine.low %v3437_v36, %v3445_v27  ;;  %v16292_v32 = vld [vmem:[%s17113_s11 + $0x8] sm:$0xff] }
 0x718   : > { %v14318_v5 = vcombine.high %v3516_v26, %v3524_v38  ;;  %v14317_v4 = vcombine.low %v3516_v26, %v3524_v38  ;;  %v15911_v18 = vld [vmem:[%s17115_s24 + $0x354] ss:$8 sps:$4 sm:$0xff]  }
 0x719   : > { %10525 = vmatpush1.bf16.msra.mxu0 %v14253_v35  ;;  %v14256_v35 = vcombine.high %v3453_v54, %v3461_v3 }
 0x71a   : > { %10689 = vmatpush1.bf16.msra.mxu1 %v14191_v12  ;;  %10526 = vmatprep.subr.bf16.mxu0 %v14270_v10  ;;  %v3532_v12 = vld [vmem:[%s17106_s5 + $0x930] sm:$0xff] }
 0x71b   : > { %10690 = vmatprep.subr.bf16.mxu1 %v14208_v37  ;;  %v3540_v10 = vld [vmem:[%s17106_s5 + $0x970] sm:$0xff]  ;;  %v3477_v37 = vld [vmem:[%s17106_s5 + $0x778] sm:$0xff] }
 0x71c   : > { %v14334_v44 = vcombine.high %v3532_v12, %v3540_v10  ;;  %v14272_v49 = vcombine.high %v3469_v16, %v3477_v37  ;;  %v14333_v13 = vcombine.low %v3532_v12, %v3540_v10  ;;  %v14271_v53 = vcombine.low %v3469_v16, %v3477_v37 }
 0x71d   : > { %10527 = vmatpush1.bf16.msra.mxu0 %v14269_v58  ;;  %v3548_v58 = vld [vmem:[%s17106_s5 + $0x9b0] sm:$0xff] }
 0x71e   : > { %10691 = vmatpush1.bf16.msra.mxu1 %v14207_v7  ;;  %10528 = vmatprep.subr.bf16.mxu0 %v14286_v11  ;;  %v3556_v7 = vld [vmem:[%s17106_s5 + $0x9f0] sm:$0xff]  ;;  %v3485_v11 = vld [vmem:[%s17106_s5 + $0x7b8] sm:$0xff] }
 0x71f   : > { %10692 = vmatprep.subr.bf16.mxu1 %v14224_v60  ;;  %v3493_v60 = vld [vmem:[%s17106_s5 + $0x7f8] sm:$0xff]  ;;  %v14350_v36 = vcombine.high %v3548_v58, %v3556_v7  ;;  %v14349_v26 = vcombine.low %v3548_v58, %v3556_v7 }
 0x720   : > { %v14288_v27 = vcombine.high %v3485_v11, %v3493_v60  ;;  %v14287_v38 = vcombine.low %v3485_v11, %v3493_v60 }
 0x721   : > { %10529 = vmatpush1.bf16.msra.mxu0 %v14285_v61  ;;  %v3564_v61 = vld [vmem:[%s17106_s5 + $0xa30] sm:$0xff] }
 0x722   : > { %10693 = vmatpush1.bf16.msra.mxu1 %v14223_v9  ;;  %10541 = vmatprep.subr.bf16.mxu0 %v14302_v50  ;;  %v3572_v9 = vld [vmem:[%s17106_s5 + $0xa70] sm:$0xff]  ;;  %v3501_v50 = vld [vmem:[%s17106_s5 + $0x838] sm:$0xff] }
 0x723   : > { %10694 = vmatprep.subr.bf16.mxu1 %v14240_v41  ;;  %v3509_v41 = vld [vmem:[%s17106_s5 + $0x878] sm:$0xff]  ;;  %v14366_v54 = vcombine.high %v3564_v61, %v3572_v9  ;;  %v14365_v12 = vcombine.low %v3564_v61, %v3572_v9 }
 0x724   : > { %10531 = vmatmul.mubr.bf16.vlgmr.msra.gmra.mrb[16].mxu0 %v17533_v0  ;;  %v14304_v3 = vcombine.high %v3501_v50, %v3509_v41  ;;  %v14303_v10 = vcombine.low %v3501_v50, %v3509_v41  ;;  %v3628_v50 = vld [vmem:[%s17106_s5 + $0xc30] sm:$0xff] }
 0x725   : > { %10542 = vmatpush1.bf16.msra.mxu0 %v14301_v29  ;;  %10573 = vmatprep.mubr.bf16.mxu0 %v17656_v46  ;;  %v3580_v29 = vld [vmem:[%s17106_s5 + $0xab0] sm:$0xff] }
 0x726   : > { %10695 = vmatpush1.bf16.msra.mxu1 %v14239_v43  ;;  %10543 = vmatprep.subr.bf16.mxu0 %v14318_v5  ;;  %v3588_v43 = vld [vmem:[%s17106_s5 + $0xaf0] sm:$0xff]  ;;  %v3517_v5 = vld [vmem:[%s17106_s5 + $0x8b8] sm:$0xff] }
 0x727   : > { %10696 = vmatprep.subr.bf16.mxu1 %v14256_v35  ;;  %v3525_v35 = vld [vmem:[%s17106_s5 + $0x8f8] sm:$0xff]  ;;  %v14382_v16 = vcombine.high %v3580_v29, %v3588_v43  ;;  %v14381_v58 = vcombine.low %v3580_v29, %v3588_v43  ;;  %v3636_v41 = vld [vmem:[%s17106_s5 + $0xc70] sm:$0xff] }
 0x728   : > { %v14320_v37 = vcombine.high %v3517_v5, %v3525_v35  ;;  %v14319_v7 = vcombine.low %v3517_v5, %v3525_v35  ;;  %v14430_v29 = vcombine.high %v3628_v50, %v3636_v41  ;;  %v3644_v5 = vld [vmem:[%s17106_s5 + $0xcb0] sm:$0xff] }
 0x729   : > { %10544 = vmatpush1.bf16.msra.mxu0 %v14317_v4  ;;  %v3596_v4 = vld [vmem:[%s17106_s5 + $0xb30] sm:$0xff] }
 0x72a   : > { %10697 = vmatpush1.bf16.msra.mxu1 %v14255_v2  ;;  %10545 = vmatprep.subr.bf16.mxu0 %v14334_v44  ;;  %v3604_v2 = vld [vmem:[%s17106_s5 + $0xb70] sm:$0xff]  ;;  %v3533_v44 = vld [vmem:[%s17106_s5 + $0x938] sm:$0xff] }
 0x72b   : > { %10698 = vmatprep.subr.bf16.mxu1 %v14272_v49  ;;  %v3541_v49 = vld [vmem:[%s17106_s5 + $0x978] sm:$0xff]  ;;  %v14398_v11 = vcombine.high %v3596_v4, %v3604_v2  ;;  %v14397_v61 = vcombine.low %v3596_v4, %v3604_v2  ;;  %v3652_v35 = vld [vmem:[%s17106_s5 + $0xcf0] sm:$0xff] }
 0x72c   : > { %v14336_v60 = vcombine.high %v3533_v44, %v3541_v49  ;;  %v14446_v4 = vcombine.high %v3644_v5, %v3652_v35 }
 0x72d   : > { %10546 = vmatpush1.bf16.msra.mxu0 %v14333_v13  ;;  %v3612_v13 = vld [vmem:[%s17106_s5 + $0xbb0] sm:$0xff] }
 0x72e   : > { %10699 = vmatpush1.bf16.msra.mxu1 %v14271_v53  ;;  %10547 = vmatprep.subr.bf16.mxu0 %v14350_v36  ;;  %v3620_v53 = vld [vmem:[%s17106_s5 + $0xbf0] sm:$0xff]  ;;  %v3549_v36 = vld [vmem:[%s17106_s5 + $0x9b8] sm:$0xff] }
 0x72f   : > { %10700 = vmatprep.subr.bf16.mxu1 %v14288_v27  ;;  %v3557_v27 = vld [vmem:[%s17106_s5 + $0x9f8] sm:$0xff] }
 0x730   : > { %v14352_v9 = vcombine.high %v3549_v36, %v3557_v27 }
 0x731   : > { %10548 = vmatpush1.bf16.msra.mxu0 %v14349_v26  ;;  %v3565_v26 = vld [vmem:[%s17106_s5 + $0xa38] sm:$0xff] }
 0x732   : > { %10701 = vmatpush1.bf16.msra.mxu1 %v14287_v38  ;;  %10549 = vmatprep.subr.bf16.mxu0 %v14366_v54  ;;  %v3573_v38 = vld [vmem:[%s17106_s5 + $0xa78] sm:$0xff]  ;;  %v14413_v54 = vcombine.low %v3612_v13, %v3620_v53 }
 0x733   : > { %10713 = vmatprep.subr.bf16.mxu1 %v14304_v3  ;;  %v14351_v3 = vcombine.low %v3549_v36, %v3557_v27  ;;  %v14368_v43 = vcombine.high %v3565_v26, %v3573_v38  ;;  %v3676_v36 = vld [vmem:[%s17106_s5 + $0xdb0] sm:$0xff] }
 0x734   : > { %v3684_v27 = vld [vmem:[%s17106_s5 + $0xdf0] sm:$0xff] }
 0x735   : > { %10550 = vmatpush1.bf16.msra.mxu0 %v14365_v12  ;;  %10703 = vmatmul.mubr.bf16.vlgmr.msra.gmra.mrb[36].mxu1 %v17533_v0  ;;  %v14335_v0 = vcombine.low %v3533_v44, %v3541_v49  ;;  %v3581_v12 = vld [vmem:[%s17106_s5 + $0xab8] sm:$0xff]  ;;  %v3660_v44 = vld [vmem:[%s17106_s5 + $0xd30] sm:$0xff] }
 0x736   : > { %10714 = vmatpush1.bf16.msra.mxu1 %v14303_v10  ;;  %10745 = vmatprep.mubr.bf16.mxu1 %v17656_v46  ;;  %v14414_v46 = vcombine.high %v3612_v13, %v3620_v53  ;;  %v3589_v10 = vld [vmem:[%s17106_s5 + $0xaf8] sm:$0xff]  ;;  %v3668_v49 = vld [vmem:[%s17106_s5 + $0xd70] sm:$0xff] }
 0x737   : > { %10551 = vmatprep.subr.bf16.mxu0 %v14382_v16  ;;  %10715 = vmatprep.subr.bf16.mxu1 %v14320_v37  ;;  %v14429_v16 = vcombine.low %v3628_v50, %v3636_v41  ;;  %v14367_v37 = vcombine.low %v3565_v26, %v3573_v38  ;;  %v14384_v2 = vcombine.high %v3581_v12, %v3589_v10  ;;  %v3692_v26 = vld [vmem:[%s17106_s5 + $0xe30] sm:$0xff] }
 0x738   : > { %v14462_v13 = vcombine.high %v3660_v44, %v3668_v49  ;;  %v14478_v50 = vcombine.high %v3676_v36, %v3684_v27  ;;  %v3700_v38 = vld [vmem:[%s17106_s5 + $0xe70] sm:$0xff] }
 0x739   : > { %10552 = vmatpush1.bf16.msra.mxu0 %v14381_v58  ;;  %v3597_v58 = vld [vmem:[%s17106_s5 + $0xb38] sm:$0xff] }
 0x73a   : > { %10716 = vmatpush1.bf16.msra.mxu1 %v14319_v7  ;;  %10553 = vmatprep.subr.bf16.mxu0 %v14398_v11  ;;  %v3605_v7 = vld [vmem:[%s17106_s5 + $0xb78] sm:$0xff]  ;;  %v14445_v11 = vcombine.low %v3644_v5, %v3652_v35  ;;  %v14494_v5 = vcombine.high %v3692_v26, %v3700_v38 }
 0x73b   : > { %10717 = vmatprep.subr.bf16.mxu1 %v14336_v60  ;;  %v14383_v60 = vcombine.low %v3581_v12, %v3589_v10  ;;  %v14400_v53 = vcombine.high %v3597_v58, %v3605_v7  ;;  %v3708_v12 = vld [vmem:[%s17106_s5 + $0xeb0] sm:$0xff] }
 0x73c   : > { %v3716_v10 = vld [vmem:[%s17106_s5 + $0xef0] sm:$0xff] }
 0x73d   : > { %10554 = vmatpush1.bf16.msra.mxu0 %v14397_v61  ;;  %v3613_v61 = vld [vmem:[%s17106_s5 + $0xbb8] sm:$0xff] }
 0x73e   : > { %10718 = vmatpush1.bf16.msra.mxu1 %v14335_v0  ;;  %10555 = vmatprep.subr.bf16.mxu0 %v14414_v46  ;;  %v3621_v0 = vld [vmem:[%s17106_s5 + $0xbf8] sm:$0xff]  ;;  %v14461_v46 = vcombine.low %v3660_v44, %v3668_v49  ;;  %v14510_v44 = vcombine.high %v3708_v12, %v3716_v10 }
 0x73f   : > { %10719 = vmatprep.subr.bf16.mxu1 %v14352_v9  ;;  %v14399_v9 = vcombine.low %v3597_v58, %v3605_v7  ;;  %v14416_v41 = vcombine.high %v3613_v61, %v3621_v0  ;;  %v3724_v58 = vld [vmem:[%s17106_s5 + $0xf30] sm:$0xff] }
 0x740   : > { %v3732_v7 = vld [vmem:[%s17106_s5 + $0xf70] sm:$0xff] }
 0x741   : > { %10556 = vmatpush1.bf16.msra.mxu0 %v14413_v54  ;;  %v3629_v54 = vld [vmem:[%s17106_s5 + $0xc38] sm:$0xff] }
 0x742   : > { %10720 = vmatpush1.bf16.msra.mxu1 %v14351_v3  ;;  %10557 = vmatprep.subr.bf16.mxu0 %v14430_v29  ;;  %v3637_v3 = vld [vmem:[%s17106_s5 + $0xc78] sm:$0xff]  ;;  %v14477_v29 = vcombine.low %v3676_v36, %v3684_v27  ;;  %v14526_v36 = vcombine.high %v3724_v58, %v3732_v7 }
 0x743   : > { %10721 = vmatprep.subr.bf16.mxu1 %v14368_v43  ;;  %v14415_v43 = vcombine.low %v3613_v61, %v3621_v0  ;;  %v14432_v35 = vcombine.high %v3629_v54, %v3637_v3  ;;  %v3740_v61 = vld [vmem:[%s17106_s5 + $0xfb0] sm:$0xff] }
 0x744   : > { %v3748_v0 = vld [vmem:[%s17106_s5 + $0xff0] sm:$0xff] }
 0x745   : > { %10558 = vmatpush1.bf16.msra.mxu0 %v14429_v16  ;;  %v3645_v16 = vld [vmem:[%s17106_s5 + $0xcb8] sm:$0xff] }
 0x746   : > { %10722 = vmatpush1.bf16.msra.mxu1 %v14367_v37  ;;  %10559 = vmatprep.subr.bf16.mxu0 %v14446_v4  ;;  %v3653_v37 = vld [vmem:[%s17106_s5 + $0xcf8] sm:$0xff]  ;;  %v14493_v4 = vcombine.low %v3692_v26, %v3700_v38  ;;  %v14542_v26 = vcombine.high %v3740_v61, %v3748_v0 }
 0x747   : > { %10723 = vmatprep.subr.bf16.mxu1 %v14384_v2  ;;  %v14431_v2 = vcombine.low %v3629_v54, %v3637_v3  ;;  %v14448_v49 = vcombine.high %v3645_v16, %v3653_v37  ;;  %v3756_v54 = vld [vmem:[%s17106_s5 + $0x1030] sm:$0xff] }
 0x748   : > { %v3764_v3 = vld [vmem:[%s17106_s5 + $0x1070] sm:$0xff] }
 0x749   : > { %10560 = vmatpush1.bf16.msra.mxu0 %v14445_v11  ;;  %v3661_v11 = vld [vmem:[%s17106_s5 + $0xd38] sm:$0xff] }
 0x74a   : > { %10724 = vmatpush1.bf16.msra.mxu1 %v14383_v60  ;;  %10561 = vmatprep.subr.bf16.mxu0 %v14462_v13  ;;  %v3669_v60 = vld [vmem:[%s17106_s5 + $0xd78] sm:$0xff]  ;;  %v14509_v13 = vcombine.low %v3708_v12, %v3716_v10  ;;  %v14558_v12 = vcombine.high %v3756_v54, %v3764_v3 }
 0x74b   : > { %10725 = vmatprep.subr.bf16.mxu1 %v14400_v53  ;;  %v14447_v53 = vcombine.low %v3645_v16, %v3653_v37  ;;  %v14464_v27 = vcombine.high %v3661_v11, %v3669_v60  ;;  %v3772_v16 = vld [vmem:[%s17106_s5 + $0x10b0] sm:$0xff] }
 0x74c   : > { %v3780_v37 = vld [vmem:[%s17106_s5 + $0x10f0] sm:$0xff] }
 0x74d   : > { %10562 = vmatpush1.bf16.msra.mxu0 %v14461_v46  ;;  %v3677_v46 = vld [vmem:[%s17106_s5 + $0xdb8] sm:$0xff] }
 0x74e   : > { %10726 = vmatpush1.bf16.msra.mxu1 %v14399_v9  ;;  %10563 = vmatprep.subr.bf16.mxu0 %v14478_v50  ;;  %v3685_v9 = vld [vmem:[%s17106_s5 + $0xdf8] sm:$0xff]  ;;  %v14525_v50 = vcombine.low %v3724_v58, %v3732_v7  ;;  %v14574_v58 = vcombine.high %v3772_v16, %v3780_v37 }
 0x74f   : > { %10727 = vmatprep.subr.bf16.mxu1 %v14416_v41  ;;  %v14463_v41 = vcombine.low %v3661_v11, %v3669_v60  ;;  %v14480_v38 = vcombine.high %v3677_v46, %v3685_v9  ;;  %v3788_v11 = vld [vmem:[%s17106_s5 + $0x1130] sm:$0xff] }
 0x750   : > { %v3796_v60 = vld [vmem:[%s17106_s5 + $0x1170] sm:$0xff] }
 0x751   : > { %10564 = vmatpush1.bf16.msra.mxu0 %v14477_v29  ;;  %v3693_v29 = vld [vmem:[%s17106_s5 + $0xe38] sm:$0xff] }
 0x752   : > { %10728 = vmatpush1.bf16.msra.mxu1 %v14415_v43  ;;  %10565 = vmatprep.subr.bf16.mxu0 %v14494_v5  ;;  %v3701_v43 = vld [vmem:[%s17106_s5 + $0xe78] sm:$0xff]  ;;  %v14541_v5 = vcombine.low %v3740_v61, %v3748_v0  ;;  %v14590_v61 = vcombine.high %v3788_v11, %v3796_v60 }
 0x753   : > { %10729 = vmatprep.subr.bf16.mxu1 %v14432_v35  ;;  %v14479_v35 = vcombine.low %v3677_v46, %v3685_v9  ;;  %v14496_v10 = vcombine.high %v3693_v29, %v3701_v43  ;;  %v3804_v46 = vld [vmem:[%s17106_s5 + $0x11b0] sm:$0xff] }
 0x754   : > { %v3812_v9 = vld [vmem:[%s17106_s5 + $0x11f0] sm:$0xff] }
 0x755   : > { %10566 = vmatpush1.bf16.msra.mxu0 %v14493_v4  ;;  %v3709_v4 = vld [vmem:[%s17106_s5 + $0xeb8] sm:$0xff] }
 0x756   : > { %10730 = vmatpush1.bf16.msra.mxu1 %v14431_v2  ;;  %10567 = vmatprep.subr.bf16.mxu0 %v14510_v44  ;;  %v3717_v2 = vld [vmem:[%s17106_s5 + $0xef8] sm:$0xff]  ;;  %v14557_v44 = vcombine.low %v3756_v54, %v3764_v3  ;;  %v14606_v54 = vcombine.high %v3804_v46, %v3812_v9 }
 0x757   : > { %10731 = vmatprep.subr.bf16.mxu1 %v14448_v49  ;;  %v14495_v49 = vcombine.low %v3693_v29, %v3701_v43  ;;  %v14512_v7 = vcombine.high %v3709_v4, %v3717_v2  ;;  %v3820_v29 = vld [vmem:[%s17106_s5 + $0x1230] sm:$0xff] }
 0x758   : > { %v3828_v43 = vld [vmem:[%s17106_s5 + $0x1270] sm:$0xff] }
 0x759   : > { %10568 = vmatpush1.bf16.msra.mxu0 %v14509_v13  ;;  %v3725_v13 = vld [vmem:[%s17106_s5 + $0xf38] sm:$0xff] }
 0x75a   : > { %10732 = vmatpush1.bf16.msra.mxu1 %v14447_v53  ;;  %10569 = vmatprep.subr.bf16.mxu0 %v14526_v36  ;;  %v3733_v53 = vld [vmem:[%s17106_s5 + $0xf78] sm:$0xff]  ;;  %v14573_v36 = vcombine.low %v3772_v16, %v3780_v37  ;;  %v14622_v16 = vcombine.high %v3820_v29, %v3828_v43 }
 0x75b   : > { %10733 = vmatprep.subr.bf16.mxu1 %v14464_v27  ;;  %v14511_v27 = vcombine.low %v3709_v4, %v3717_v2  ;;  %v14528_v0 = vcombine.high %v3725_v13, %v3733_v53  ;;  %v3836_v4 = vld [vmem:[%s17106_s5 + $0x12b0] sm:$0xff] }
 0x75c   : > { %v3844_v2 = vld [vmem:[%s17106_s5 + $0x12f0] sm:$0xff] }
 0x75d   : > { %10570 = vmatpush1.bf16.msra.mxu0 %v14525_v50  ;;  %v3741_v50 = vld [vmem:[%s17106_s5 + $0xfb8] sm:$0xff] }
 0x75e   : > { %10734 = vmatpush1.bf16.msra.mxu1 %v14463_v41  ;;  %10571 = vmatprep.subr.bf16.mxu0 %v14542_v26  ;;  %v3749_v41 = vld [vmem:[%s17106_s5 + $0xff8] sm:$0xff]  ;;  %v14589_v26 = vcombine.low %v3788_v11, %v3796_v60  ;;  %v14638_v11 = vcombine.high %v3836_v4, %v3844_v2 }
 0x75f   : > { %10735 = vmatprep.subr.bf16.mxu1 %v14480_v38  ;;  %v14527_v38 = vcombine.low %v3725_v13, %v3733_v53  ;;  %v14544_v3 = vcombine.high %v3741_v50, %v3749_v41  ;;  %v3852_v13 = vld [vmem:[%s17106_s5 + $0x1330] sm:$0xff] }
 0x760   : > { %v3860_v53 = vld [vmem:[%s17106_s5 + $0x1370] sm:$0xff] }
 0x761   : > { %10572 = vmatpush1.bf16.msra.mxu0 %v14541_v5  ;;  %v3757_v5 = vld [vmem:[%s17106_s5 + $0x1038] sm:$0xff] }
 0x762   : > { %10736 = vmatpush1.bf16.msra.mxu1 %v14479_v35  ;;  %10584 = vmatprep.subr.bf16.mxu0 %v14558_v12  ;;  %v3765_v35 = vld [vmem:[%s17106_s5 + $0x1078] sm:$0xff]  ;;  %v14605_v12 = vcombine.low %v3804_v46, %v3812_v9  ;;  %v14654_v46 = vcombine.high %v3852_v13, %v3860_v53 }
 0x763   : > { %10737 = vmatprep.subr.bf16.mxu1 %v14496_v10  ;;  %v14543_v10 = vcombine.low %v3741_v50, %v3749_v41  ;;  %v14560_v37 = vcombine.high %v3757_v5, %v3765_v35  ;;  %v3868_v50 = vld [vmem:[%s17106_s5 + $0x13b0] sm:$0xff] }
 0x764   : > { %10574 = vmatmul.mubr.bf16.vlgmr.msra.gmra.mrb[16].mxu0 %v17654_v45  ;;  %v3876_v41 = vld [vmem:[%s17106_s5 + $0x13f0] sm:$0xff] }
 0x765   : > { %10585 = vmatpush1.bf16.msra.mxu0 %v14557_v44  ;;  %10616 = vmatprep.mubr.bf16.mxu0 %v17776_v23  ;;  %v3773_v44 = vld [vmem:[%s17106_s5 + $0x10b8] sm:$0xff] }
 0x766   : > { %10738 = vmatpush1.bf16.msra.mxu1 %v14495_v49  ;;  %10586 = vmatprep.subr.bf16.mxu0 %v14574_v58  ;;  %v3781_v49 = vld [vmem:[%s17106_s5 + $0x10f8] sm:$0xff]  ;;  %v14621_v58 = vcombine.low %v3820_v29, %v3828_v43  ;;  %v3884_v29 = vld [vmem:[%s17106_s5 + $0x1430] sm:$0xff] }
 0x767   : > { %10739 = vmatprep.subr.bf16.mxu1 %v14512_v7  ;;  %v14559_v7 = vcombine.low %v3757_v5, %v3765_v35  ;;  %v14576_v60 = vcombine.high %v3773_v44, %v3781_v49  ;;  %v3892_v43 = vld [vmem:[%s17106_s5 + $0x1470] sm:$0xff]  ;;  %v3821_v5 = vld [vmem:[%s17106_s5 + $0x1238] sm:$0xff] }
 0x768   : > { %v3829_v35 = vld [vmem:[%s17106_s5 + $0x1278] sm:$0xff] }
 0x769   : > { %10587 = vmatpush1.bf16.msra.mxu0 %v14573_v36  ;;  %v3789_v36 = vld [vmem:[%s17106_s5 + $0x1138] sm:$0xff] }
 0x76a   : > { %10740 = vmatpush1.bf16.msra.mxu1 %v14511_v27  ;;  %10588 = vmatprep.subr.bf16.mxu0 %v14590_v61  ;;  %v3797_v27 = vld [vmem:[%s17106_s5 + $0x1178] sm:$0xff]  ;;  %v14637_v61 = vcombine.low %v3836_v4, %v3844_v2  ;;  %v3900_v4 = vld [vmem:[%s17106_s5 + $0x14b0] sm:$0xff] }
 0x76b   : > { %10741 = vmatprep.subr.bf16.mxu1 %v14528_v0  ;;  %v14575_v0 = vcombine.low %v3773_v44, %v3781_v49  ;;  %v14592_v9 = vcombine.high %v3789_v36, %v3797_v27  ;;  %v3908_v2 = vld [vmem:[%s17106_s5 + $0x14f0] sm:$0xff]  ;;  %v3837_v44 = vld [vmem:[%s17106_s5 + $0x12b8] sm:$0xff] }
 0x76c   : > { %v3845_v49 = vld [vmem:[%s17106_s5 + $0x12f8] sm:$0xff] }
 0x76d   : > { %10589 = vmatpush1.bf16.msra.mxu0 %v14589_v26  ;;  %v3805_v26 = vld [vmem:[%s17106_s5 + $0x11b8] sm:$0xff] }
 0x76e   : > { %10742 = vmatpush1.bf16.msra.mxu1 %v14527_v38  ;;  %10590 = vmatprep.subr.bf16.mxu0 %v14606_v54  ;;  %v3813_v38 = vld [vmem:[%s17106_s5 + $0x11f8] sm:$0xff]  ;;  %v14653_v54 = vcombine.low %v3852_v13, %v3860_v53  ;;  %v3916_v13 = vld [vmem:[%s17106_s5 + $0x1530] sm:$0xff] }
 0x76f   : > { %10743 = vmatprep.subr.bf16.mxu1 %v14544_v3  ;;  %v14608_v3 = vcombine.high %v3805_v26, %v3813_v38  ;;  %v3924_v53 = vld [vmem:[%s17106_s5 + $0x1570] sm:$0xff] }
 0x771   : > { %10591 = vmatpush1.bf16.msra.mxu0 %v14605_v12  ;;  %v14669_v12 = vcombine.low %v3868_v50, %v3876_v41 }
 0x772   : > { %10744 = vmatpush1.bf16.msra.mxu1 %v14543_v10  ;;  %10592 = vmatprep.subr.bf16.mxu0 %v14622_v16  ;;  %v14607_v10 = vcombine.low %v3805_v26, %v3813_v38  ;;  %v14686_v16 = vcombine.high %v3884_v29, %v3892_v43  ;;  %v3869_v26 = vld [vmem:[%s17106_s5 + $0x13b8] sm:$0xff] }
 0x773   : > { %10756 = vmatprep.subr.bf16.mxu1 %v14560_v37  ;;  %v14624_v37 = vcombine.high %v3821_v5, %v3829_v35  ;;  %v3877_v38 = vld [vmem:[%s17106_s5 + $0x13f8] sm:$0xff] }
 0x775   : > { %10593 = vmatpush1.bf16.msra.mxu0 %v14621_v58  ;;  %10746 = vmatmul.mubr.bf16.vlgmr.msra.gmra.mrb[36].mxu1 %v17654_v45  ;;  %v14591_v45 = vcombine.low %v3789_v36, %v3797_v27  ;;  %v14685_v58 = vcombine.low %v3884_v29, %v3892_v43  ;;  %v3853_v36 = vld [vmem:[%s17106_s5 + $0x1338] sm:$0xff]  ;;  %v3948_v29 = vld [vmem:[%s17106_s5 + $0x1630] sm:$0xff] }
 0x776   : > { %10757 = vmatpush1.bf16.msra.mxu1 %v14559_v7  ;;  %10788 = vmatprep.mubr.bf16.mxu1 %v17776_v23  ;;  %v14670_v23 = vcombine.high %v3868_v50, %v3876_v41  ;;  %v14623_v7 = vcombine.low %v3821_v5, %v3829_v35  ;;  %v3861_v27 = vld [vmem:[%s17106_s5 + $0x1378] sm:$0xff]  ;;  %v3932_v50 = vld [vmem:[%s17106_s5 + $0x15b0] sm:$0xff] }
 0x777   : > { %10594 = vmatprep.subr.bf16.mxu0 %v14638_v11  ;;  %10758 = vmatprep.subr.bf16.mxu1 %v14576_v60  ;;  %v14702_v11 = vcombine.high %v3900_v4, %v3908_v2  ;;  %v14640_v60 = vcombine.high %v3837_v44, %v3845_v49  ;;  %v3940_v41 = vld [vmem:[%s17106_s5 + $0x15f0] sm:$0xff]  ;;  %v3885_v5 = vld [vmem:[%s17106_s5 + $0x1438] sm:$0xff] }
 0x778   : > { %v3956_v43 = vld [vmem:[%s17106_s5 + $0x1670] sm:$0xff]  ;;  %v3893_v35 = vld [vmem:[%s17106_s5 + $0x1478] sm:$0xff] }
 0x779   : > { %10595 = vmatpush1.bf16.msra.mxu0 %v14637_v61  ;;  %v14701_v61 = vcombine.low %v3900_v4, %v3908_v2  ;;  %v3964_v4 = vld [vmem:[%s17106_s5 + $0x16b0] sm:$0xff] }
 0x77a   : > { %10759 = vmatpush1.bf16.msra.mxu1 %v14575_v0  ;;  %10596 = vmatprep.subr.bf16.mxu0 %v14654_v46  ;;  %v14639_v0 = vcombine.low %v3837_v44, %v3845_v49  ;;  %v14718_v46 = vcombine.high %v3916_v13, %v3924_v53  ;;  %v3972_v2 = vld [vmem:[%s17106_s5 + $0x16f0] sm:$0xff]  ;;  %v3901_v44 = vld [vmem:[%s17106_s5 + $0x14b8] sm:$0xff] }
 0x77b   : > { %10760 = vmatprep.subr.bf16.mxu1 %v14592_v9  ;;  %v14656_v9 = vcombine.high %v3853_v36, %v3861_v27  ;;  %v3909_v49 = vld [vmem:[%s17106_s5 + $0x14f8] sm:$0xff] }
 0x77d   : > { %10597 = vmatpush1.bf16.msra.mxu0 %v14653_v54  ;;  %v14717_v54 = vcombine.low %v3916_v13, %v3924_v53  ;;  %v3980_v13 = vld [vmem:[%s17106_s5 + $0x1730] sm:$0xff] }
 0x77e   : > { %10761 = vmatpush1.bf16.msra.mxu1 %v14591_v45  ;;  %10598 = vmatprep.subr.bf16.mxu0 %v14670_v23  ;;  %v14655_v45 = vcombine.low %v3853_v36, %v3861_v27  ;;  %v14734_v23 = vcombine.high %v3932_v50, %v3940_v41  ;;  %v3988_v53 = vld [vmem:[%s17106_s5 + $0x1770] sm:$0xff]  ;;  %v3917_v36 = vld [vmem:[%s17106_s5 + $0x1538] sm:$0xff] }
 0x77f   : > { %10762 = vmatprep.subr.bf16.mxu1 %v14608_v3  ;;  %v14672_v3 = vcombine.high %v3869_v26, %v3877_v38  ;;  %v3925_v27 = vld [vmem:[%s17106_s5 + $0x1578] sm:$0xff] }
 0x781   : > { %10599 = vmatpush1.bf16.msra.mxu0 %v14669_v12  ;;  %v14733_v12 = vcombine.low %v3932_v50, %v3940_v41  ;;  %v3996_v50 = vld [vmem:[%s17106_s5 + $0x17b0] sm:$0xff] }
 0x782   : > { %10763 = vmatpush1.bf16.msra.mxu1 %v14607_v10  ;;  %10600 = vmatprep.subr.bf16.mxu0 %v14686_v16  ;;  %v14671_v10 = vcombine.low %v3869_v26, %v3877_v38  ;;  %v14750_v16 = vcombine.high %v3948_v29, %v3956_v43  ;;  %v4004_v41 = vld [vmem:[%s17106_s5 + $0x17f0] sm:$0xff]  ;;  %v3933_v26 = vld [vmem:[%s17106_s5 + $0x15b8] sm:$0xff] }
 0x783   : > { %10764 = vmatprep.subr.bf16.mxu1 %v14624_v37  ;;  %v14688_v37 = vcombine.high %v3885_v5, %v3893_v35  ;;  %v3941_v38 = vld [vmem:[%s17106_s5 + $0x15f8] sm:$0xff] }
 0x785   : > { %10601 = vmatpush1.bf16.msra.mxu0 %v14685_v58  ;;  %v14749_v58 = vcombine.low %v3948_v29, %v3956_v43  ;;  %v4012_v29 = vld [vmem:[%s17106_s5 + $0x1830] sm:$0xff] }
 0x786   : > { %10765 = vmatpush1.bf16.msra.mxu1 %v14623_v7  ;;  %10602 = vmatprep.subr.bf16.mxu0 %v14702_v11  ;;  %v14687_v7 = vcombine.low %v3885_v5, %v3893_v35  ;;  %v14766_v11 = vcombine.high %v3964_v4, %v3972_v2  ;;  %v4020_v43 = vld [vmem:[%s17106_s5 + $0x1870] sm:$0xff]  ;;  %v3949_v5 = vld [vmem:[%s17106_s5 + $0x1638] sm:$0xff] }
 0x787   : > { %10766 = vmatprep.subr.bf16.mxu1 %v14640_v60  ;;  %v14704_v60 = vcombine.high %v3901_v44, %v3909_v49  ;;  %v3957_v35 = vld [vmem:[%s17106_s5 + $0x1678] sm:$0xff] }
 0x789   : > { %10603 = vmatpush1.bf16.msra.mxu0 %v14701_v61  ;;  %v14765_v61 = vcombine.low %v3964_v4, %v3972_v2  ;;  %v4028_v4 = vld [vmem:[%s17106_s5 + $0x18b0] sm:$0xff] }
 0x78a   : > { %10767 = vmatpush1.bf16.msra.mxu1 %v14639_v0  ;;  %10604 = vmatprep.subr.bf16.mxu0 %v14718_v46  ;;  %v14703_v0 = vcombine.low %v3901_v44, %v3909_v49  ;;  %v14782_v46 = vcombine.high %v3980_v13, %v3988_v53  ;;  %v4036_v2 = vld [vmem:[%s17106_s5 + $0x18f0] sm:$0xff]  ;;  %v3965_v44 = vld [vmem:[%s17106_s5 + $0x16b8] sm:$0xff] }
 0x78b   : > { %10768 = vmatprep.subr.bf16.mxu1 %v14656_v9  ;;  %v14720_v9 = vcombine.high %v3917_v36, %v3925_v27  ;;  %v3973_v49 = vld [vmem:[%s17106_s5 + $0x16f8] sm:$0xff] }
 0x78d   : > { %10605 = vmatpush1.bf16.msra.mxu0 %v14717_v54  ;;  %v14781_v54 = vcombine.low %v3980_v13, %v3988_v53  ;;  %v4044_v13 = vld [vmem:[%s17106_s5 + $0x1930] sm:$0xff] }
 0x78e   : > { %10769 = vmatpush1.bf16.msra.mxu1 %v14655_v45  ;;  %10606 = vmatprep.subr.bf16.mxu0 %v14734_v23  ;;  %v14719_v45 = vcombine.low %v3917_v36, %v3925_v27  ;;  %v14798_v23 = vcombine.high %v3996_v50, %v4004_v41  ;;  %v4052_v53 = vld [vmem:[%s17106_s5 + $0x1970] sm:$0xff]  ;;  %v3981_v36 = vld [vmem:[%s17106_s5 + $0x1738] sm:$0xff] }
 0x78f   : > { %10770 = vmatprep.subr.bf16.mxu1 %v14672_v3  ;;  %v14736_v3 = vcombine.high %v3933_v26, %v3941_v38  ;;  %v3989_v27 = vld [vmem:[%s17106_s5 + $0x1778] sm:$0xff] }
 0x791   : > { %10607 = vmatpush1.bf16.msra.mxu0 %v14733_v12  ;;  %v14797_v12 = vcombine.low %v3996_v50, %v4004_v41  ;;  %v4060_v50 = vld [vmem:[%s17106_s5 + $0x19b0] sm:$0xff] }
 0x792   : > { %10771 = vmatpush1.bf16.msra.mxu1 %v14671_v10  ;;  %10608 = vmatprep.subr.bf16.mxu0 %v14750_v16  ;;  %v14735_v10 = vcombine.low %v3933_v26, %v3941_v38  ;;  %v14814_v16 = vcombine.high %v4012_v29, %v4020_v43  ;;  %v4068_v41 = vld [vmem:[%s17106_s5 + $0x19f0] sm:$0xff]  ;;  %v3997_v26 = vld [vmem:[%s17106_s5 + $0x17b8] sm:$0xff] }
 0x793   : > { %10772 = vmatprep.subr.bf16.mxu1 %v14688_v37  ;;  %v14752_v37 = vcombine.high %v3949_v5, %v3957_v35  ;;  %v4005_v38 = vld [vmem:[%s17106_s5 + $0x17f8] sm:$0xff] }
 0x795   : > { %10609 = vmatpush1.bf16.msra.mxu0 %v14749_v58  ;;  %v14813_v58 = vcombine.low %v4012_v29, %v4020_v43  ;;  %v4076_v29 = vld [vmem:[%s17106_s5 + $0x1a30] sm:$0xff] }
 0x796   : > { %10773 = vmatpush1.bf16.msra.mxu1 %v14687_v7  ;;  %10610 = vmatprep.subr.bf16.mxu0 %v14766_v11  ;;  %v14751_v7 = vcombine.low %v3949_v5, %v3957_v35  ;;  %v14830_v11 = vcombine.high %v4028_v4, %v4036_v2  ;;  %v4084_v43 = vld [vmem:[%s17106_s5 + $0x1a70] sm:$0xff]  ;;  %v4013_v5 = vld [vmem:[%s17106_s5 + $0x1838] sm:$0xff] }
 0x797   : > { %10774 = vmatprep.subr.bf16.mxu1 %v14704_v60  ;;  %v14768_v60 = vcombine.high %v3965_v44, %v3973_v49  ;;  %v4021_v35 = vld [vmem:[%s17106_s5 + $0x1878] sm:$0xff] }
 0x799   : > { %10611 = vmatpush1.bf16.msra.mxu0 %v14765_v61  ;;  %v14829_v61 = vcombine.low %v4028_v4, %v4036_v2  ;;  %v4092_v4 = vld [vmem:[%s17106_s5 + $0x1ab0] sm:$0xff] }
 0x79a   : > { %10775 = vmatpush1.bf16.msra.mxu1 %v14703_v0  ;;  %10612 = vmatprep.subr.bf16.mxu0 %v14782_v46  ;;  %v14767_v0 = vcombine.low %v3965_v44, %v3973_v49  ;;  %v14846_v46 = vcombine.high %v4044_v13, %v4052_v53  ;;  %v4100_v2 = vld [vmem:[%s17106_s5 + $0x1af0] sm:$0xff]  ;;  %v4029_v44 = vld [vmem:[%s17106_s5 + $0x18b8] sm:$0xff] }
 0x79b   : > { %10776 = vmatprep.subr.bf16.mxu1 %v14720_v9  ;;  %v14784_v9 = vcombine.high %v3981_v36, %v3989_v27  ;;  %v4037_v49 = vld [vmem:[%s17106_s5 + $0x18f8] sm:$0xff] }
 0x79d   : > { %10613 = vmatpush1.bf16.msra.mxu0 %v14781_v54  ;;  %v14845_v54 = vcombine.low %v4044_v13, %v4052_v53  ;;  %v14832_v13 = vcombine.high %v4029_v44, %v4037_v49  ;;  %v4108_v53 = vld [vmem:[%s17106_s5 + $0x1b30] sm:$0xff] }
 0x79e   : > { %10777 = vmatpush1.bf16.msra.mxu1 %v14719_v45  ;;  %10614 = vmatprep.subr.bf16.mxu0 %v14798_v23  ;;  %v14783_v45 = vcombine.low %v3981_v36, %v3989_v27  ;;  %v14862_v23 = vcombine.high %v4060_v50, %v4068_v41  ;;  %v4116_v36 = vld [vmem:[%s17106_s5 + $0x1b70] sm:$0xff] }
 0x79f   : > { %10778 = vmatprep.subr.bf16.mxu1 %v14736_v3  ;;  %v14800_v3 = vcombine.high %v3997_v26, %v4005_v38 }
 0x7a1   : > { %10615 = vmatpush1.bf16.msra.mxu0 %v14797_v12  ;;  %v14861_v12 = vcombine.low %v4060_v50, %v4068_v41  ;;  %v14831_v50 = vcombine.low %v4029_v44, %v4037_v49  ;;  %v14910_v41 = vcombine.high %v4108_v53, %v4116_v36  ;;  %v4140_v49 = vld [vmem:[%s17106_s5 + $0x1c30] sm:$0xff] }
 0x7a2   : > { %10779 = vmatpush1.bf16.msra.mxu1 %v14735_v10  ;;  %10627 = vmatprep.subr.bf16.mxu0 %v14814_v16  ;;  %v14799_v10 = vcombine.low %v3997_v26, %v4005_v38  ;;  %v14878_v16 = vcombine.high %v4076_v29, %v4084_v43 }
 0x7a3   : > { %10780 = vmatprep.subr.bf16.mxu1 %v14752_v37  ;;  %v14816_v37 = vcombine.high %v4013_v5, %v4021_v35 }
 0x7a4   : > { %10617 = vmatmul.mubr.bf16.vlgmr.msra.gmra.mrb[16].mxu0 %v17772_v6 }
 0x7a5   : > { %10628 = vmatpush1.bf16.msra.mxu0 %v14813_v58  ;;  %10659 = vmatprep.mubr.bf16.mxu0 %v17891_v20  ;;  %v14877_v58 = vcombine.low %v4076_v29, %v4084_v43  ;;  %v4069_v29 = vld [vmem:[%s17106_s5 + $0x19f8] sm:$0xff] }
 0x7a6   : > { %10781 = vmatpush1.bf16.msra.mxu1 %v14751_v7  ;;  %10629 = vmatprep.subr.bf16.mxu0 %v14830_v11  ;;  %v19109_v7 = vld [vmem:[%s17113_s11 + $0x8] sm:$0xff]  ;;  %v14815_v11 = vcombine.low %v4013_v5, %v4021_v35 }
 0x7a7   : > { %10782 = vmatprep.subr.bf16.mxu1 %v14768_v60  ;;  %v14894_v60 = vcombine.high %v4092_v4, %v4100_v2  ;;  %v4301_v27 = vrot.slane %v19109_v7, %v17274_v19 }
 0x7a9   : > { %10630 = vmatpush1.bf16.msra.mxu0 %v14829_v61  ;;  %v4045_v61 = vld [vmem:[%s17106_s5 + $0x1938] sm:$0xff] }
 0x7aa   : > { %10783 = vmatpush1.bf16.msra.mxu1 %v14767_v0  ;;  %10631 = vmatprep.subr.bf16.mxu0 %v14846_v46  ;;  %v4053_v0 = vld [vmem:[%s17106_s5 + $0x1978] sm:$0xff]  ;;  %v4305_v46 = vrot.slane %v19109_v7, %v17280_v21 }
 0x7ab   : > { %10784 = vmatprep.subr.bf16.mxu1 %v14784_v9  ;;  %v14893_v9 = vcombine.low %v4092_v4, %v4100_v2  ;;  %v14848_v38 = vcombine.high %v4045_v61, %v4053_v0 }
 0x7ad   : > { %10632 = vmatpush1.bf16.msra.mxu0 %v14845_v54  ;;  %v4124_v54 = vld [vmem:[%s17106_s5 + $0x1bb0] sm:$0xff] }
 0x7ae   : > { %10785 = vmatpush1.bf16.msra.mxu1 %v14783_v45  ;;  %10633 = vmatprep.subr.bf16.mxu0 %v14862_v23  ;;  %v4132_v45 = vld [vmem:[%s17106_s5 + $0x1bf0] sm:$0xff] }
 0x7af   : > { %10786 = vmatprep.subr.bf16.mxu1 %v14800_v3 }
 0x7b1   : > { %10634 = vmatpush1.bf16.msra.mxu0 %v14861_v12 }
 0x7b2   : > { %10787 = vmatpush1.bf16.msra.mxu1 %v14799_v10  ;;  %10635 = vmatprep.subr.bf16.mxu0 %v14878_v16  ;;  %v14847_v16 = vcombine.low %v4045_v61, %v4053_v0 }
 0x7b3   : > { %10799 = vmatprep.subr.bf16.mxu1 %v14816_v37  ;;  %v14926_v37 = vcombine.high %v4124_v54, %v4132_v45 }
 0x7b5   : > { %10636 = vmatpush1.bf16.msra.mxu0 %v14877_v58  ;;  %10789 = vmatmul.mubr.bf16.vlgmr.msra.gmra.mrb[36].mxu1 %v17772_v6  ;;  %v4061_v6 = vld [vmem:[%s17106_s5 + $0x19b8] sm:$0xff]  ;;  %v4148_v58 = vld [vmem:[%s17106_s5 + $0x1c70] sm:$0xff] }
 0x7b6   : > { %10800 = vmatpush1.bf16.msra.mxu1 %v14815_v11  ;;  %10831 = vmatprep.mubr.bf16.mxu1 %v17891_v20  ;;  %v14909_v20 = vcombine.low %v4108_v53, %v4116_v36  ;;  %v14864_v44 = vcombine.high %v4061_v6, %v4069_v29  ;;  %v14925_v36 = vcombine.low %v4124_v54, %v4132_v45 }
 0x7b7   : > { %v10317_v26 = vpop.f32.mrb[12].mxu0  ;;  %10637 = vmatprep.subr.bf16.mxu0 %v14894_v60  ;;  %10801 = vmatprep.subr.bf16.mxu1 %v14832_v13  ;;  %v4077_v60 = vld [vmem:[%s17106_s5 + $0x1a38] sm:$0xff]  ;;  %v14942_v61 = vcombine.high %v4140_v49, %v4148_v58 }
 0x7b8   : > { %v19123_v23 = vadd.f32 %v10317_v26, %v4301_v27  ;;  %v10319_v3 = vpop.f32.mrb[13].mxu0  ;;  %v4085_v13 = vld [vmem:[%s17106_s5 + $0x1a78] sm:$0xff]  ;;  %v14941_v26 = vcombine.low %v4140_v49, %v4148_v58 }
 0x7b9   : > { %v19127_v43 = vadd.f32 %v10319_v3, %v4305_v46  ;;  %v10321_v5 = vpop.f32.mrb[14].mxu0  ;;  %10638 = vmatpush1.bf16.msra.mxu0 %v14893_v9  ;;  %v14880_v0 = vcombine.high %v4077_v60, %v4085_v13  ;;  %v4164_v9 = vld [vmem:[%s17106_s5 + $0x1cf0] sm:$0xff] }
 0x7ba   : > { %v10890_v35 = vmul.f32 1.442695, %v19123_v23  ;;  %v19130_v12 = vadd.f32 %v10321_v5, %v4301_v27  ;;  %v10323_v10 = vpop.f32.mrb[15].mxu0  ;;  %10802 = vmatpush1.bf16.msra.mxu1 %v14831_v50  ;;  %10639 = vmatprep.subr.bf16.mxu0 %v14910_v41  ;;  %v14863_v27 = vcombine.low %v4061_v6, %v4069_v29  ;;  %v4093_v50 = vld [vmem:[%s17106_s5 + $0x1ab8] sm:$0xff]  ;;  %v4172_v3 = vld [vmem:[%s17106_s5 + $0x1d30] sm:$0xff]  ;;  %vm10850_vm8 = vcmp.gt.f32.partialorder %v19123_v23, 0.0 }
 0x7bb   : > { %v10892_v4 = vmul.f32 1.442695, %v19127_v43  ;;  %v19133_v2 = vadd.f32 %v10323_v10, %v4305_v46  ;;  %10803 = vmatprep.subr.bf16.mxu1 %v14848_v38  ;;  %v4156_v46 = vld [vmem:[%s17106_s5 + $0x1cb0] sm:$0xff]  ;;  %v4101_v41 = vld [vmem:[%s17106_s5 + $0x1af8] sm:$0xff]  ;;  %v14879_v38 = vcombine.low %v4077_v60, %v4085_v13  ;;  %v4309_v10 = vrot.slane %v19109_v7, %v17314_v31 }
 0x7bc   : > { %16230 = vpow2.f32 %v10890_v35  ;;  %v10922_v11 = vmul.f32 1.442695, %v19130_v12  ;;  %v14958_v54 = vcombine.high %v4156_v46, %v4164_v9  ;;  %v14896_v45 = vcombine.high %v4093_v50, %v4101_v41  ;;  %v4180_v6 = vld [vmem:[%s17106_s5 + $0x1d70] sm:$0xff]  ;;  %v19148_v29 = vld [vmem:[%s17106_s5 + $0x1b38] sm:$0xff] }
 0x7bd   : > { %16232 = vpow2.f32 %v10892_v4  ;;  %v10924_v53 = vmul.f32 1.442695, %v19133_v2  ;;  %10640 = vmatpush1.bf16.msra.mxu0 %v14909_v20  ;;  %v19151_v5 = vld [vmem:[%s17106_s5 + $0x1b78] sm:$0xff]  ;;  %v19154_v20 = vld [vmem:[%s17106_s5 + $0x1db0] sm:$0xff]  ;;  %v14895_v58 = vcombine.low %v4093_v50, %v4101_v41  ;;  %v14974_v60 = vcombine.high %v4172_v3, %v4180_v6 }
 0x7be   : > { %16234 = vpow2.f32 %v10922_v11  ;;  %10804 = vmatpush1.bf16.msra.mxu1 %v14847_v16  ;;  %10641 = vmatprep.subr.bf16.mxu0 %v14926_v37  ;;  %v19157_v35 = vld [vmem:[%s17106_s5 + $0x1df0] sm:$0xff]  ;;  %v14957_v16 = vcombine.low %v4156_v46, %v4164_v9  ;;  %v4313_v37 = vrot.slane %v19109_v7, %v17317_v33  ;;  %v19164_v4 = vld [vmem:[%s17106_s5 + $0x1bb8] sm:$0xff]  ;;  %v14973_v11 = vcombine.low %v4172_v3, %v4180_v6 }
 0x7bf   : > { %16236 = vpow2.f32 %v10924_v53  ;;  %10805 = vmatprep.subr.bf16.mxu1 %v14864_v44  ;;  %v19167_v44 = vld [vmem:[%s17106_s5 + $0x1bf8] sm:$0xff]  ;;  %v19170_v13 = vld [vmem:[%s17106_s5 + $0x1e30] sm:$0xff]  ;;  %v14911_v33 = vcombine.low %v19148_v29, %v19151_v5  ;;  %v14912_v7 = vcombine.high %v19148_v29, %v19151_v5  ;;  %v14989_v9 = vcombine.low %v19154_v20, %v19157_v35 }
 0x7c0   : > { %v19173_v53 = vld [vmem:[%s17106_s5 + $0x1e70] sm:$0xff]  ;;  %v14927_v50 = vcombine.low %v19164_v4, %v19167_v44  ;;  %v14928_v41 = vcombine.high %v19164_v4, %v19167_v44  ;;  %vm10851_vm9 = vcmp.gt.f32.partialorder %v19127_v43, 0.0  ;;  %vm10866_vm10 = vcmp.gt.f32.partialorder %v19130_v12, 0.0 }
 0x7c1   : > { %10642 = vmatpush1.bf16.msra.mxu0 %v14925_v36  ;;  %v15006_v6 = vcombine.high %v19170_v13, %v19173_v53  ;;  %vm10867_vm11 = vcmp.gt.f32.partialorder %v19133_v2, 0.0 }
 0x7c2   : > { %10806 = vmatpush1.bf16.msra.mxu1 %v14863_v27  ;;  %10643 = vmatprep.subr.bf16.mxu0 %v14942_v61  ;;  %v14990_v27 = vcombine.high %v19154_v20, %v19157_v35 }
 0x7c3   : > { %10807 = vmatprep.subr.bf16.mxu1 %v14880_v0 }
 0x7c5   : > { %10644 = vmatpush1.bf16.msra.mxu0 %v14941_v26 }
 0x7c6   : > { %v16231_v49 = vpop.eup %16230  ;;  %10808 = vmatpush1.bf16.msra.mxu1 %v14879_v38  ;;  %10645 = vmatprep.subr.bf16.mxu0 %v14958_v54 }
 0x7c7   : > { %v16233_v36 = vpop.eup %16232  ;;  %v15065_v31 = vadd.f32 -1.0, %v16231_v49  ;;  %10809 = vmatprep.subr.bf16.mxu1 %v14896_v45 }
 0x7c8   : > { %v16235_v61 = vpop.eup %16234  ;;  %v15066_v0 = vadd.f32 -1.0, %v16233_v36  ;;  %v10489_v46 = vpop.f32.mrb[32].mxu1 }
 0x7c9   : > { %v16237_v26 = vpop.eup %16236  ;;  %v10978_v38 = vmul.f32 1.6732632, %v15065_v31  ;;  %v15081_v54 = vadd.f32 -1.0, %v16235_v61  ;;  %v19187_v45 = vadd.f32 %v10489_v46, %v4309_v10  ;;  %v10491_v3 = vpop.f32.mrb[33].mxu1  ;;  %10646 = vmatpush1.bf16.msra.mxu0 %v14957_v16  ;;  %v4141_v61 = vld [vmem:[%s17106_s5 + $0x1c38] sm:$0xff] }
 0x7ca   : > { %v10979_v29 = vmul.f32 1.6732632, %v15066_v0  ;;  %v15082_v5 = vadd.f32 -1.0, %v16237_v26  ;;  %v19192_v20 = vadd.f32 %v10491_v3, %v4313_v37  ;;  %v10493_v35 = vpop.f32.mrb[34].mxu1  ;;  %10810 = vmatpush1.bf16.msra.mxu1 %v14895_v58  ;;  %10647 = vmatprep.subr.bf16.mxu0 %v14974_v60  ;;  %v4149_v0 = vld [vmem:[%s17106_s5 + $0x1c78] sm:$0xff]  ;;  %v4228_v3 = vld [vmem:[%s17106_s5 + $0x1ef0] sm:$0xff] }
 0x7cb   : > { %v11010_v4 = vsel %vm10850_vm8, %v19123_v23, %v10978_v38  ;;  %v10994_v44 = vmul.f32 1.6732632, %v15081_v54  ;;  %v10894_v16 = vmul.f32 1.442695, %v19187_v45  ;;  %v10495_v49 = vpop.f32.mrb[35].mxu1  ;;  %10811 = vmatprep.subr.bf16.mxu1 %v14912_v7  ;;  %v19209_v46 = vadd.f32 %v10493_v35, %v4309_v10  ;;  %v4157_v10 = vld [vmem:[%s17106_s5 + $0x1cb8] sm:$0xff] }
 0x7cc   : > { %v11011_v36 = vsel %vm10851_vm9, %v19127_v43, %v10979_v29  ;;  %v10995_v31 = vmul.f32 1.6732632, %v15082_v5  ;;  %v19202_v58 = vmul.f32 1.050701, %v11010_v4  ;;  %v10896_v60 = vmul.f32 1.442695, %v19192_v20 }
 0x7cd   : > { %v11026_v23 = vsel %vm10866_vm10, %v19130_v12, %v10994_v44  ;;  %16238 = vpow2.f32 %v10894_v16  ;;  %10648 = vmatpush1.bf16.msra.mxu0 %v14973_v11  ;;  %v19211_v26 = vadd.f32 %v10495_v49, %v4313_v37  ;;  %v19213_v38 = vmul.f32 1.050701, %v11011_v36  ;;  %v4220_v11 = vld [vmem:[%s17106_s5 + $0x1eb0] sm:$0xff]  ;;  %v4165_v37 = vld [vmem:[%s17106_s5 + $0x1cf8] sm:$0xff] }
 0x7ce   : > { %v19206_v7 = vmul.f32 1.050701, %v11026_v23  ;;  %v11027_v43 = vsel %vm10867_vm11, %v19133_v2, %v10995_v31  ;;  %10812 = vmatpush1.bf16.msra.mxu1 %v14911_v33  ;;  %10649 = vmatprep.subr.bf16.mxu0 %v14990_v27  ;;  %16240 = vpow2.f32 %v10896_v60  ;;  %v14944_v54 = vcombine.high %v4141_v61, %v4149_v0  ;;  %v4236_v49 = vld [vmem:[%s17106_s5 + $0x1f30] sm:$0xff]  ;;  %v4181_v23 = vld [vmem:[%s17106_s5 + $0x1d78] sm:$0xff] }
 0x7cf   : > { %v19215_v12 = vmul.f32 1.050701, %v11027_v43  ;;  %10813 = vmatprep.subr.bf16.mxu1 %v14928_v41  ;;  %v10926_v2 = vmul.f32 1.442695, %v19209_v46  ;;  %v10928_v27 = vmul.f32 1.442695, %v19211_v26  ;;  %v15005_v41 = vcombine.low %v19170_v13, %v19173_v53 }
 0x7d0   : > { %v11122_v29 = vadd.f32 %v19206_v7, %v19202_v58  ;;  %v14943_v35 = vcombine.low %v4141_v61, %v4149_v0  ;;  %v15022_v4 = vcombine.high %v4220_v11, %v4228_v3  ;;  %v14960_v16 = vcombine.high %v4157_v10, %v4165_v37  ;;  %v4244_v36 = vld [vmem:[%s17106_s5 + $0x1f70] sm:$0xff] }
 0x7d1   : > { %v11129_v33 = vadd.f32 %v19215_v12, %v19213_v38  ;;  %10650 = vmatpush1.bf16.msra.mxu0 %v14989_v9  ;;  %16242 = vpow2.f32 %v10926_v2  ;;  %v4173_v9 = vld [vmem:[%s17106_s5 + $0x1d38] sm:$0xff]  ;;  %v15021_v13 = vcombine.low %v4220_v11, %v4228_v3  ;;  %vm10852_vm12 = vcmp.gt.f32.partialorder %v19187_v45, 0.0 }
 0x7d2   : > { %v11123_v5 = vrot.slane %v11122_v29, 4  ;;  %10814 = vmatpush1.bf16.msra.mxu1 %v14927_v50  ;;  %10651 = vmatprep.subr.bf16.mxu0 %v15006_v6  ;;  %16244 = vpow2.f32 %v10928_v27  ;;  %v14959_v50 = vcombine.low %v4157_v10, %v4165_v37  ;;  %v15038_v6 = vcombine.high %v4236_v49, %v4244_v36  ;;  %v19238_v37 = vld [vmem:[%s17106_s5 + $0x1e38] sm:$0xff] }
 0x7d3   : > { %v11130_v44 = vrot.slane %v11129_v33, 4  ;;  %10815 = vmatprep.subr.bf16.mxu1 %v14944_v54  ;;  %v14976_v43 = vcombine.high %v4173_v9, %v4181_v23  ;;  %v4252_v54 = vld [vmem:[%s17106_s5 + $0x1fb0] sm:$0xff]  ;;  %v14975_v10 = vcombine.low %v4173_v9, %v4181_v23  ;;  %vm10853_vm13 = vcmp.gt.f32.partialorder %v19192_v20, 0.0 }
 0x7d4   : > { %v11124_v31 = vadd.f32 %v11123_v5, %v11122_v29  ;;  %v4260_v29 = vld [vmem:[%s17106_s5 + $0x1ff0] sm:$0xff]  ;;  %v15037_v5 = vcombine.low %v4236_v49, %v4244_v36  ;;  %vm10868_vm14 = vcmp.gt.f32.partialorder %v19209_v46, 0.0  ;;  %vm10869_vm15 = vcmp.gt.f32.partialorder %v19211_v26, 0.0 }
 0x7d5   : > { %v11131_v60 = vadd.f32 %v11130_v44, %v11129_v33  ;;  %10652 = vmatpush1.bf16.msra.mxu0 %v15005_v41  ;;  %v4189_v33 = vld [vmem:[%s17106_s5 + $0x1db8] sm:$0xff] }
 0x7d6   : > { %v11125_v53 = vrot.slane %v11124_v31, 2  ;;  %10816 = vmatpush1.bf16.msra.mxu1 %v14943_v35  ;;  %10653 = vmatprep.subr.bf16.mxu0 %v15022_v4  ;;  %v4197_v41 = vld [vmem:[%s17106_s5 + $0x1df8] sm:$0xff] }
 0x7d7   : > { %v16239_v61 = vpop.eup %16238  ;;  %v11132_v0 = vrot.slane %v11131_v60, 2  ;;  %10817 = vmatprep.subr.bf16.mxu1 %v14960_v16  ;;  %v19241_v35 = vld [vmem:[%s17106_s5 + $0x1e78] sm:$0xff]  ;;  %v14992_v49 = vcombine.high %v4189_v33, %v4197_v41 }
 0x7d8   : > { %v11126_v2 = vadd.f32 %v11125_v53, %v11124_v31  ;;  %v15067_v27 = vadd.f32 -1.0, %v16239_v61  ;;  %v16241_v11 = vpop.eup %16240  ;;  %v15054_v31 = vcombine.high %v4252_v54, %v4260_v29  ;;  %v19244_v53 = vld [vmem:[%s17106_s5 + $0x1eb8] sm:$0xff] }
 0x7d9   : > { %v11133_v3 = vadd.f32 %v11132_v0, %v11131_v60  ;;  %10654 = vmatpush1.bf16.msra.mxu0 %v15021_v13  ;;  %v15068_v16 = vadd.f32 -1.0, %v16241_v11  ;;  %v19247_v61 = vld [vmem:[%s17106_s5 + $0x1ef8] sm:$0xff]  ;;  %v15053_v60 = vcombine.low %v4252_v54, %v4260_v29  ;;  %v14991_v13 = vcombine.low %v4189_v33, %v4197_v41  ;;  %v15752_v33 = vld [vmem:[%s17115_s24 + $0x4] ss:$8 sps:$4 sm:$0xff]  }
 0x7da   : > { %v11127_v4 = vrot.slane %v11126_v2, 1  ;;  %v10980_v44 = vmul.f32 1.6732632, %v15067_v27  ;;  %10818 = vmatpush1.bf16.msra.mxu1 %v14959_v50  ;;  %10655 = vmatprep.subr.bf16.mxu0 %v15038_v6  ;;  %v15007_v0 = vcombine.low %v19238_v37, %v19241_v35  ;;  %v15008_v50 = vcombine.high %v19238_v37, %v19241_v35 }
 0x7db   : > { %v11134_v55 = vrot.slane %v11133_v3, 1  ;;  %10819 = vmatprep.subr.bf16.mxu1 %v14976_v43  ;;  %v16243_v36 = vpop.eup %16242  ;;  %v10981_v23 = vmul.f32 1.6732632, %v15068_v16  ;;  %v15024_v43 = vcombine.high %v19244_v53, %v19247_v61 }
 0x7dc   : > { %v11128_v9 = vadd.f32 %v11127_v4, %v11126_v2  ;;  %v16245_v6 = vpop.eup %16244  ;;  %v15083_v11 = vadd.f32 -1.0, %v16243_v36  ;;  %v11012_v29 = vsel %vm10852_vm12, %v19187_v45, %v10980_v44  ;;  %v15750_v44 = vld [vmem:[%s17115_s24] ss:$8 sps:$4 sm:$0xff]  }
 0x7dd   : > { %v11135_v27 = vadd.f32 %v11134_v55, %v11133_v3  ;;  %10656 = vmatpush1.bf16.msra.mxu0 %v15037_v5  ;;  %v15084_v2 = vadd.f32 -1.0, %v16245_v6  ;;  %v11013_v5 = vsel %vm10853_vm13, %v19192_v20, %v10981_v23  ;;  %v19271_v35 = vmul.f32 1.050701, %v11012_v29  ;;  %v15758_v29 = vld [vmem:[%s17115_s24 + $0x24] ss:$8 sps:$4 sm:$0xff]  }
 0x7de   : > { %v11186_v54 = vmul.f32 0.0625, %v11128_v9  ;;  %10820 = vmatpush1.bf16.msra.mxu1 %v14975_v10  ;;  %10657 = vmatprep.subr.bf16.mxu0 %v15054_v31  ;;  %v10996_v55 = vmul.f32 1.6732632, %v15083_v11  ;;  %v19288_v31 = vmul.f32 1.050701, %v11013_v5  ;;  %v4245_v9 = vld [vmem:[%s17106_s5 + $0x1f78] sm:$0xff] }
 0x7df   : > { %v11187_v41 = vmul.f32 0.0625, %v11135_v27  ;;  %10821 = vmatprep.subr.bf16.mxu1 %v14992_v49  ;;  %v10997_v10 = vmul.f32 1.6732632, %v15084_v2 }
 0x7e0   : > { %v19262_v3 = vsub.f32 %v19202_v58, %v11186_v54  ;;  %v19265_v45 = vsub.f32 %v19206_v7, %v11186_v54  ;;  %v11028_v4 = vsel %vm10868_vm14, %v19209_v46, %v10996_v55  ;;  %v15755_v46 = vld [vmem:[%s17115_s24 + $0x14] ss:$8 sps:$4 sm:$0xff]   ;;  %v15023_v54 = vcombine.low %v19244_v53, %v19247_v61 }
 0x7e1   : > { %v19269_v37 = vsub.f32 %v19215_v12, %v11187_v41  ;;  %10658 = vmatpush1.bf16.msra.mxu0 %v15053_v60  ;;  %v19276_v16 = vsub.f32 %v19213_v38, %v11187_v41  ;;  %v19282_v7 = vmul.f32 1.050701, %v11028_v4  ;;  %v11029_v12 = vsel %vm10869_vm15, %v19211_v26, %v10997_v10  ;;  %v4261_v55 = vld [vmem:[%s17106_s5 + $0x1ff8] sm:$0xff]  ;;  %v15756_v10 = vld [vmem:[%s17115_s24 + $0x20] ss:$8 sps:$4 sm:$0xff]  }
 0x7e2   : > { %v11234_v58 = vmul.f32 %v19262_v3, %v19262_v3  ;;  %v11250_v20 = vmul.f32 %v19265_v45, %v19265_v45  ;;  %10822 = vmatpush1.bf16.msra.mxu1 %v14991_v13  ;;  %13014 = vmatprep.subr.bf16.mxu0 %v15752_v33  ;;  %v19290_v60 = vmul.f32 1.050701, %v11029_v12  ;;  %v4237_v13 = vld [vmem:[%s17106_s5 + $0x1f38] sm:$0xff] }
 0x7e3   : > { %v11251_v38 = vmul.f32 %v19269_v37, %v19269_v37  ;;  %10823 = vmatprep.subr.bf16.mxu1 %v15008_v50  ;;  %v11235_v49 = vmul.f32 %v19276_v16, %v19276_v16  ;;  %v11136_v26 = vadd.f32 %v19282_v7, %v19271_v35  ;;  %v15753_v50 = vld [vmem:[%s17115_s24 + $0x10] ss:$8 sps:$4 sm:$0xff]   ;;  %v15040_v33 = vcombine.high %v4237_v13, %v4245_v9  ;;  %v15761_v61 = vld [vmem:[%s17115_s24 + $0x34] ss:$8 sps:$4 sm:$0xff]  }
 0x7e4   : > { %v11314_v36 = vadd.f32 %v11250_v20, %v11234_v58  ;;  %10660 = vmatmul.mubr.bf16.vlgmr.msra.gmra.mrb[16].mxu0 %v17887_v1  ;;  %v11143_v23 = vadd.f32 %v19290_v60, %v19288_v31  ;;  %v15039_v53 = vcombine.low %v4237_v13, %v4245_v9  ;;  %v15764_v13 = vld [vmem:[%s17115_s24 + $0x44] ss:$8 sps:$4 sm:$0xff]  }
 0x7e5   : > { %13015 = vmatpush1.bf16.msra.mxu0 %v15750_v44  ;;  %13046 = vmatprep.mubr.bf16.mxu0 %v11451_v63  ;;  %v11321_v6 = vadd.f32 %v11251_v38, %v11235_v49  ;;  %v11137_v11 = vrot.slane %v11136_v26, 4  ;;  %v4253_v63 = vld [vmem:[%s17106_s5 + $0x1fb8] sm:$0xff] }
 0x7e6   : > { %v11315_v27 = vrot.slane %v11314_v36, 4  ;;  %10824 = vmatpush1.bf16.msra.mxu1 %v15007_v0  ;;  %13016 = vmatprep.subr.bf16.mxu0 %v15755_v46  ;;  %v11144_v2 = vrot.slane %v11143_v23, 4  ;;  %v15056_v58 = vcombine.high %v4253_v63, %v4261_v55  ;;  %v15759_v49 = vld [vmem:[%s17115_s24 + $0x30] ss:$8 sps:$4 sm:$0xff]  }
 0x7e7   : > { %10825 = vmatprep.subr.bf16.mxu1 %v15024_v43  ;;  %v11322_v41 = vrot.slane %v11321_v6, 4  ;;  %v11138_v51 = vadd.f32 %v11137_v11, %v11136_v26 }
 0x7e8   : > { %v11316_v52 = vadd.f32 %v11315_v27, %v11314_v36  ;;  %v11145_v5 = vadd.f32 %v11144_v2, %v11143_v23 }
 0x7e9   : > { %13017 = vmatpush1.bf16.msra.mxu0 %v15753_v50  ;;  %v11323_v4 = vadd.f32 %v11322_v41, %v11321_v6  ;;  %v11139_v44 = vrot.slane %v11138_v51, 2  ;;  %v15055_v50 = vcombine.low %v4253_v63, %v4261_v55 }
 0x7ea   : > { %v11317_v0 = vrot.slane %v11316_v52, 2  ;;  %10826 = vmatpush1.bf16.msra.mxu1 %v15023_v54  ;;  %13018 = vmatprep.subr.bf16.mxu0 %v15758_v29  ;;  %v11146_v43 = vrot.slane %v11145_v5, 2  ;;  %v15762_v29 = vld [vmem:[%s17115_s24 + $0x40] ss:$8 sps:$4 sm:$0xff]  }
 0x7eb   : > { %10827 = vmatprep.subr.bf16.mxu1 %v15040_v33  ;;  %v11324_v20 = vrot.slane %v11323_v4, 2  ;;  %v11140_v46 = vadd.f32 %v11139_v44, %v11138_v51 }
 0x7ec   : > { %v11318_v12 = vadd.f32 %v11317_v0, %v11316_v52  ;;  %v11147_v38 = vadd.f32 %v11146_v43, %v11145_v5  ;;  %v15767_v52 = vld [vmem:[%s17115_s24 + $0x54] ss:$8 sps:$4 sm:$0xff]   ;;  %v15765_v0 = vld [vmem:[%s17115_s24 + $0x50] ss:$8 sps:$4 sm:$0xff]   ;;  %v15768_v43 = vld [vmem:[%s17115_s24 + $0x60] ss:$8 sps:$4 sm:$0xff]  }
 0x7ed   : > { %13019 = vmatpush1.bf16.msra.mxu0 %v15756_v10  ;;  %v11325_v36 = vadd.f32 %v11324_v20, %v11323_v4  ;;  %v11141_v23 = vrot.slane %v11140_v46, 1 }
 0x7ee   : > { %v11319_v26 = vrot.slane %v11318_v12, 1  ;;  %10828 = vmatpush1.bf16.msra.mxu1 %v15039_v53  ;;  %13020 = vmatprep.subr.bf16.mxu0 %v15761_v61  ;;  %v11148_v9 = vrot.slane %v11147_v38, 1 }
 0x7ef   : > { %10829 = vmatprep.subr.bf16.mxu1 %v15056_v58  ;;  %v11326_v6 = vrot.slane %v11325_v36, 1  ;;  %v11142_v11 = vadd.f32 %v11141_v23, %v11140_v46  ;;  %v15776_v23 = vld [vmem:[%s17115_s24 + $0x84] ss:$8 sps:$4 sm:$0xff]  }
 0x7f0   : > { %v11320_v27 = vadd.f32 %v11319_v26, %v11318_v12  ;;  %v11149_v54 = vadd.f32 %v11148_v9, %v11147_v38  ;;  %v15773_v12 = vld [vmem:[%s17115_s24 + $0x74] ss:$8 sps:$4 sm:$0xff]  }
 0x7f1   : > { %13021 = vmatpush1.bf16.msra.mxu0 %v15759_v49  ;;  %v11327_v2 = vadd.f32 %v11326_v6, %v11325_v36  ;;  %v11188_v41 = vmul.f32 0.0625, %v11142_v11  ;;  %v15771_v49 = vld [vmem:[%s17115_s24 + $0x70] ss:$8 sps:$4 sm:$0xff]   ;;  %v15774_v11 = vld [vmem:[%s17115_s24 + $0x80] ss:$8 sps:$4 sm:$0xff]  }
 0x7f2   : > { %v11378_v33 = vmul.f32 0.0625, %v11320_v27  ;;  %10830 = vmatpush1.bf16.msra.mxu1 %v15055_v50  ;;  %13022 = vmatprep.subr.bf16.mxu0 %v15764_v13  ;;  %v11189_v51 = vmul.f32 0.0625, %v11149_v54 }
 0x7f3   : > { %v11379_v5 = vmul.f32 0.0625, %v11327_v2  ;;  %v19317_v55 = vsub.f32 %v19271_v35, %v11188_v41  ;;  %v19320_v10 = vsub.f32 %v19282_v7, %v11188_v41 }
 0x7f4   : > { %v11394_v63 = vadd.f32 1e-05, %v11378_v33  ;;  %v19323_v4 = vsub.f32 %v19290_v60, %v11189_v51  ;;  %v19328_v53 = vsub.f32 %v19288_v31, %v11189_v51  ;;  %v15770_v60 = vld [vmem:[%s17115_s24 + $0x64] ss:$8 sps:$4 sm:$0xff]   ;;  %v15779_v33 = vld [vmem:[%s17115_s24 + $0x94] ss:$8 sps:$4 sm:$0xff]  }
 0x7f5   : > { %10832 = vmatmul.mubr.bf16.vlgmr.msra.gmra.mrb[36].mxu1 %v17887_v1  ;;  %13023 = vmatpush1.bf16.msra.mxu0 %v15762_v29  ;;  %v11395_v44 = vadd.f32 1e-05, %v11379_v5  ;;  %v11236_v35 = vmul.f32 %v19317_v55, %v19317_v55  ;;  %v11252_v7 = vmul.f32 %v19320_v10, %v19320_v10 }
 0x7f6   : > { %16246 = vrsqrt.f32 %v11394_v63  ;;  %13024 = vmatprep.subr.bf16.mxu0 %v15767_v52  ;;  %v11253_v1 = vmul.f32 %v19323_v4, %v19323_v4  ;;  %v11237_v61 = vmul.f32 %v19328_v53, %v19328_v53  ;;  %v15777_v63 = vld [vmem:[%s17115_s24 + $0x90] ss:$8 sps:$4 sm:$0xff]  }
 0x7f7   : > { %16248 = vrsqrt.f32 %v11395_v44  ;;  %v11328_v31 = vadd.f32 %v11252_v7, %v11236_v35  ;;  %v15780_v7 = vld [vmem:[%s17115_s24 + $0xa0] ss:$8 sps:$4 sm:$0xff]  }
 0x7f8   : > { %v11335_v58 = vadd.f32 %v11253_v1, %v11237_v61  ;;  %v15785_v1 = vld [vmem:[%s17115_s24 + $0xb4] ss:$8 sps:$4 sm:$0xff]   ;;  %v15783_v61 = vld [vmem:[%s17115_s24 + $0xb0] ss:$8 sps:$4 sm:$0xff]  }
 0x7f9   : > { %13025 = vmatpush1.bf16.msra.mxu0 %v15765_v0  ;;  %v11329_v20 = vrot.slane %v11328_v31, 4 }
 0x7fa   : > { %13026 = vmatprep.subr.bf16.mxu0 %v15770_v60  ;;  %v11336_v46 = vrot.slane %v11335_v58, 4 }
 0x7fb   : > { %v11330_v38 = vadd.f32 %v11329_v20, %v11328_v31  ;;  %v15788_v31 = vld [vmem:[%s17115_s24 + $0xc4] ss:$8 sps:$4 sm:$0xff]  }
 0x7fc   : > { %v11337_v36 = vadd.f32 %v11336_v46, %v11335_v58  ;;  %v15791_v58 = vld [vmem:[%s17115_s24 + $0xd4] ss:$8 sps:$4 sm:$0xff]  }
 0x7fd   : > { %13027 = vmatpush1.bf16.msra.mxu0 %v15768_v43  ;;  %v11331_v26 = vrot.slane %v11330_v38, 2  ;;  %v15786_v43 = vld [vmem:[%s17115_s24 + $0xc0] ss:$8 sps:$4 sm:$0xff]  }
 0x7fe   : > { %13028 = vmatprep.subr.bf16.mxu0 %v15773_v12  ;;  %v11338_v50 = vrot.slane %v11337_v36, 2 }
 0x7ff   : > { %v11332_v9 = vadd.f32 %v11331_v26, %v11330_v38  ;;  %v15789_v38 = vld [vmem:[%s17115_s24 + $0xd0] ss:$8 sps:$4 sm:$0xff]  }
 0x800   : > { %v16247_v13 = vpop.eup %16246  ;;  %v11339_v29 = vadd.f32 %v11338_v50, %v11337_v36  ;;  %v15794_v36 = vld [vmem:[%s17115_s24 + $0xe4] ss:$8 sps:$4 sm:$0xff]  }
 0x801   : > { %v16249_v6 = vpop.eup %16248  ;;  %v19344_v27 = vmul.f32 %v16247_v13, %v19265_v45  ;;  %13029 = vmatpush1.bf16.msra.mxu0 %v15771_v49  ;;  %v19348_v54 = vmul.f32 %v16247_v13, %v19262_v3  ;;  %v11333_v2 = vrot.slane %v11332_v9, 1  ;;  %v15797_v13 = vld [vmem:[%s17115_s24 + $0xf4] ss:$8 sps:$4 sm:$0xff]  }
 0x802   : > { %13030 = vmatprep.subr.bf16.mxu0 %v15776_v23  ;;  %v19352_v41 = vmul.f32 %v16249_v6, %v19276_v16  ;;  %v19355_v52 = vmul.f32 %v16249_v6, %v19269_v37  ;;  %v11340_v51 = vrot.slane %v11339_v29, 1  ;;  %v15782_v16 = vld [vmem:[%s17115_s24 + $0xa4] ss:$8 sps:$4 sm:$0xff]   ;;  %v15803_v6 = vld [vmem:[%s17115_s24 + $0x114] ss:$8 sps:$4 sm:$0xff]  }
 0x803   : > { %v11458_v45 = vpack.c.bf16 %v19344_v27, %v19348_v54  ;;  %v11334_v5 = vadd.f32 %v11333_v2, %v11332_v9  ;;  %v15795_v9 = vld [vmem:[%s17115_s24 + $0xf0] ss:$8 sps:$4 sm:$0xff]   ;;  %v16004_v54 = vld [vmem:[%s17115_s24 + $0x544] ss:$8 sps:$4 sm:$0xff]  }
 0x804   : > { %v11459_v3 = vpack.c.bf16 %v19355_v52, %v19352_v41  ;;  %v11341_v0 = vadd.f32 %v11340_v51, %v11339_v29  ;;  %v19891_v29 = vpack.c.bf16 %v18447_v57, %v18444_v47  ;;  %v15801_v2 = vld [vmem:[%s17115_s24 + $0x110] ss:$8 sps:$4 sm:$0xff]   ;;  %v15804_v51 = vld [vmem:[%s17115_s24 + $0x120] ss:$8 sps:$4 sm:$0xff]   ;;  %v15815_v57 = vld [vmem:[%s17115_s24 + $0x154] ss:$8 sps:$4 sm:$0xff]  }
 0x805   : > { %13031 = vmatpush1.bf16.msra.mxu0 %v15774_v11  ;;  %v11380_v44 = vmul.f32 0.0625, %v11334_v5  ;;  %v19890_v11 = vpack.c.bf16 %v18398_v62, %v18401_v40  ;;  %v15809_v5 = vld [vmem:[%s17115_s24 + $0x134] ss:$8 sps:$4 sm:$0xff]   ;;  %v15807_v62 = vld [vmem:[%s17115_s24 + $0x130] ss:$8 sps:$4 sm:$0xff]  }
 0x806   : > { %13032 = vmatprep.subr.bf16.mxu0 %v15779_v33  ;;  %v11381_v37 = vmul.f32 0.0625, %v11341_v0  ;;  %v15806_v33 = vld [vmem:[%s17115_s24 + $0x124] ss:$8 sps:$4 sm:$0xff]   ;;  %v15810_v47 = vld [vmem:[%s17115_s24 + $0x140] ss:$8 sps:$4 sm:$0xff]  }
 0x807   : > { %v11396_v35 = vadd.f32 1e-05, %v11380_v44  ;;  %v15812_v40 = vld [vmem:[%s17115_s24 + $0x144] ss:$8 sps:$4 sm:$0xff]   ;;  %v15816_v44 = vld [vmem:[%s17115_s24 + $0x160] ss:$8 sps:$4 sm:$0xff]  }
 0x808   : > { %v11397_v60 = vadd.f32 1e-05, %v11381_v37  ;;  %v15818_v0 = vld [vmem:[%s17115_s24 + $0x164] ss:$8 sps:$4 sm:$0xff]   ;;  %v15819_v37 = vld [vmem:[%s17115_s24 + $0x170] ss:$8 sps:$4 sm:$0xff]  }
 0x809   : > { %13033 = vmatpush1.bf16.msra.mxu0 %v15777_v63  ;;  %16250 = vrsqrt.f32 %v11396_v35  ;;  %v15813_v63 = vld [vmem:[%s17115_s24 + $0x150] ss:$8 sps:$4 sm:$0xff]   ;;  %v15824_v35 = vld [vmem:[%s17115_s24 + $0x184] ss:$8 sps:$4 sm:$0xff]   ;;  %v15953_v52 = vld [vmem:[%s17115_s24 + $0x434] ss:$8 sps:$4 sm:$0xff]  }
 0x80a   : > { %13034 = vmatprep.subr.bf16.mxu0 %v15782_v16  ;;  %16252 = vrsqrt.f32 %v11397_v60  ;;  %v15821_v16 = vld [vmem:[%s17115_s24 + $0x174] ss:$8 sps:$4 sm:$0xff]   ;;  %v15999_v27 = vld [vmem:[%s17115_s24 + $0x530] ss:$8 sps:$4 sm:$0xff]  }
 0x80b   : > { %v15827_v60 = vld [vmem:[%s17115_s24 + $0x194] ss:$8 sps:$4 sm:$0xff]  }
 0x80d   : > { %13035 = vmatpush1.bf16.msra.mxu0 %v15780_v7  ;;  %v15822_v7 = vld [vmem:[%s17115_s24 + $0x180] ss:$8 sps:$4 sm:$0xff]  }
 0x80e   : > { %13036 = vmatprep.subr.bf16.mxu0 %v15785_v1  ;;  %v15825_v1 = vld [vmem:[%s17115_s24 + $0x190] ss:$8 sps:$4 sm:$0xff]  }
 0x811   : > { %13037 = vmatpush1.bf16.msra.mxu0 %v15783_v61  ;;  %v15830_v61 = vld [vmem:[%s17115_s24 + $0x1a4] ss:$8 sps:$4 sm:$0xff]  }
 0x812   : > { %13038 = vmatprep.subr.bf16.mxu0 %v15788_v31  ;;  %v15828_v31 = vld [vmem:[%s17115_s24 + $0x1a0] ss:$8 sps:$4 sm:$0xff]  }
 0x813   : > { %v16251_v20 = vpop.eup %16250 }
 0x814   : > { %v16253_v12 = vpop.eup %16252  ;;  %v19370_v46 = vmul.f32 %v16251_v20, %v19320_v10  ;;  %v19374_v49 = vmul.f32 %v16251_v20, %v19317_v55  ;;  %v15792_v55 = vld [vmem:[%s17115_s24 + $0xe0] ss:$8 sps:$4 sm:$0xff]   ;;  %v15836_v20 = vld [vmem:[%s17115_s24 + $0x1c4] ss:$8 sps:$4 sm:$0xff]  }
 0x815   : > { %13039 = vmatpush1.bf16.msra.mxu0 %v15786_v43  ;;  %v19378_v26 = vmul.f32 %v16253_v12, %v19328_v53  ;;  %v19381_v23 = vmul.f32 %v16253_v12, %v19323_v4  ;;  %v15800_v53 = vld [vmem:[%s17115_s24 + $0x104] ss:$8 sps:$4 sm:$0xff]   ;;  %v15798_v4 = vld [vmem:[%s17115_s24 + $0x100] ss:$8 sps:$4 sm:$0xff]   ;;  %v15833_v43 = vld [vmem:[%s17115_s24 + $0x1b4] ss:$8 sps:$4 sm:$0xff]  }
 0x816   : > { %13040 = vmatprep.subr.bf16.mxu0 %v15791_v58  ;;  %v11460_v10 = vpack.c.bf16 %v19370_v46, %v19374_v49  ;;  %v15831_v58 = vld [vmem:[%s17115_s24 + $0x1b0] ss:$8 sps:$4 sm:$0xff]   ;;  %v15834_v12 = vld [vmem:[%s17115_s24 + $0x1c0] ss:$8 sps:$4 sm:$0xff]   ;;  %v16052_v49 = vld [vmem:[%s17115_s24 + $0x644] ss:$8 sps:$4 sm:$0xff]  }
 0x817   : > { %v11461_v50 = vpack.c.bf16 %v19381_v23, %v19378_v26  ;;  %v16007_v26 = vld [vmem:[%s17115_s24 + $0x554] ss:$8 sps:$4 sm:$0xff]   ;;  %v16005_v23 = vld [vmem:[%s17115_s24 + $0x550] ss:$8 sps:$4 sm:$0xff]  }
 0x818   : > { %v16047_v46 = vld [vmem:[%s17115_s24 + $0x630] ss:$8 sps:$4 sm:$0xff]  }
 0x819   : > { %13041 = vmatpush1.bf16.msra.mxu0 %v15789_v38  ;;  %v15839_v38 = vld [vmem:[%s17115_s24 + $0x1d4] ss:$8 sps:$4 sm:$0xff]  }
 0x81a   : > { %13042 = vmatprep.subr.bf16.mxu0 %v15794_v36  ;;  %v15837_v36 = vld [vmem:[%s17115_s24 + $0x1d0] ss:$8 sps:$4 sm:$0xff]  }
 0x81d   : > { %13043 = vmatpush1.bf16.msra.mxu0 %v15792_v55  ;;  %v15842_v55 = vld [vmem:[%s17115_s24 + $0x1e4] ss:$8 sps:$4 sm:$0xff]  }
 0x81e   : > { %13044 = vmatprep.subr.bf16.mxu0 %v15797_v13  ;;  %v15840_v13 = vld [vmem:[%s17115_s24 + $0x1e0] ss:$8 sps:$4 sm:$0xff]  }
 0x821   : > { %13045 = vmatpush1.bf16.msra.mxu0 %v15795_v9  ;;  %v15845_v9 = vld [vmem:[%s17115_s24 + $0x1f4] ss:$8 sps:$4 sm:$0xff]  }
 0x822   : > { %13057 = vmatprep.subr.bf16.mxu0 %v15800_v53  ;;  %v15843_v53 = vld [vmem:[%s17115_s24 + $0x1f0] ss:$8 sps:$4 sm:$0xff]  }
 0x824   : > { %13047 = vmatmul.mubr.bf16.vlgmr.msra.gmra.mrb[20].mxu0 %v19890_v11  ;;  %v15851_v11 = vld [vmem:[%s17115_s24 + $0x214] ss:$8 sps:$4 sm:$0xff]  }
 0x825   : > { %13058 = vmatpush1.bf16.msra.mxu0 %v15798_v4  ;;  %13089 = vmatprep.mubr.bf16.mxu0 %v19891_v29  ;;  %v15848_v4 = vld [vmem:[%s17115_s24 + $0x204] ss:$8 sps:$4 sm:$0xff]   ;;  %v19892_v29 = vpack.c.bf16 %v18432_v59, %v18437_v34  ;;  %v15855_v59 = vld [vmem:[%s17115_s24 + $0x230] ss:$8 sps:$4 sm:$0xff]  }
 0x826   : > { %13059 = vmatprep.subr.bf16.mxu0 %v15803_v6  ;;  %v15846_v6 = vld [vmem:[%s17115_s24 + $0x200] ss:$8 sps:$4 sm:$0xff]   ;;  %v15860_v34 = vld [vmem:[%s17115_s24 + $0x244] ss:$8 sps:$4 sm:$0xff]  }
 0x829   : > { %13060 = vmatpush1.bf16.msra.mxu0 %v15801_v2  ;;  %v15849_v2 = vld [vmem:[%s17115_s24 + $0x210] ss:$8 sps:$4 sm:$0xff]  }
 0x82a   : > { %13061 = vmatprep.subr.bf16.mxu0 %v15806_v33  ;;  %v15854_v33 = vld [vmem:[%s17115_s24 + $0x224] ss:$8 sps:$4 sm:$0xff]  }
 0x82d   : > { %13062 = vmatpush1.bf16.msra.mxu0 %v15804_v51  ;;  %v15852_v51 = vld [vmem:[%s17115_s24 + $0x220] ss:$8 sps:$4 sm:$0xff]  }
 0x82e   : > { %13063 = vmatprep.subr.bf16.mxu0 %v15809_v5  ;;  %v15857_v5 = vld [vmem:[%s17115_s24 + $0x234] ss:$8 sps:$4 sm:$0xff]  }
 0x831   : > { %13064 = vmatpush1.bf16.msra.mxu0 %v15807_v62  ;;  %v15866_v62 = vld [vmem:[%s17115_s24 + $0x264] ss:$8 sps:$4 sm:$0xff]  }
 0x832   : > { %13065 = vmatprep.subr.bf16.mxu0 %v15812_v40  ;;  %v15864_v40 = vld [vmem:[%s17115_s24 + $0x260] ss:$8 sps:$4 sm:$0xff]  }
 0x835   : > { %13066 = vmatpush1.bf16.msra.mxu0 %v15810_v47  ;;  %v15869_v47 = vld [vmem:[%s17115_s24 + $0x274] ss:$8 sps:$4 sm:$0xff]  }
 0x836   : > { %13067 = vmatprep.subr.bf16.mxu0 %v15815_v57  ;;  %v15867_v57 = vld [vmem:[%s17115_s24 + $0x270] ss:$8 sps:$4 sm:$0xff]  }
 0x839   : > { %13068 = vmatpush1.bf16.msra.mxu0 %v15813_v63  ;;  %v15872_v63 = vld [vmem:[%s17115_s24 + $0x284] ss:$8 sps:$4 sm:$0xff]  }
 0x83a   : > { %13069 = vmatprep.subr.bf16.mxu0 %v15818_v0  ;;  %v15870_v0 = vld [vmem:[%s17115_s24 + $0x280] ss:$8 sps:$4 sm:$0xff]  }
 0x83d   : > { %13070 = vmatpush1.bf16.msra.mxu0 %v15816_v44  ;;  %v15875_v44 = vld [vmem:[%s17115_s24 + $0x294] ss:$8 sps:$4 sm:$0xff]  }
 0x83e   : > { %13071 = vmatprep.subr.bf16.mxu0 %v15821_v16  ;;  %v15873_v16 = vld [vmem:[%s17115_s24 + $0x290] ss:$8 sps:$4 sm:$0xff]  }
 0x841   : > { %13072 = vmatpush1.bf16.msra.mxu0 %v15819_v37  ;;  %v15878_v37 = vld [vmem:[%s17115_s24 + $0x2a4] ss:$8 sps:$4 sm:$0xff]  }
 0x842   : > { %13073 = vmatprep.subr.bf16.mxu0 %v15824_v35  ;;  %v15876_v35 = vld [vmem:[%s17115_s24 + $0x2a0] ss:$8 sps:$4 sm:$0xff]  }
 0x845   : > { %13074 = vmatpush1.bf16.msra.mxu0 %v15822_v7  ;;  %v15881_v7 = vld [vmem:[%s17115_s24 + $0x2b4] ss:$8 sps:$4 sm:$0xff]  }
 0x846   : > { %13075 = vmatprep.subr.bf16.mxu0 %v15827_v60  ;;  %v15879_v60 = vld [vmem:[%s17115_s24 + $0x2b0] ss:$8 sps:$4 sm:$0xff]  }
 0x849   : > { %13076 = vmatpush1.bf16.msra.mxu0 %v15825_v1  ;;  %v15884_v1 = vld [vmem:[%s17115_s24 + $0x2c4] ss:$8 sps:$4 sm:$0xff]  }
 0x84a   : > { %13077 = vmatprep.subr.bf16.mxu0 %v15830_v61  ;;  %v15882_v61 = vld [vmem:[%s17115_s24 + $0x2c0] ss:$8 sps:$4 sm:$0xff]  }
 0x84d   : > { %13078 = vmatpush1.bf16.msra.mxu0 %v15828_v31  ;;  %v15887_v31 = vld [vmem:[%s17115_s24 + $0x2d4] ss:$8 sps:$4 sm:$0xff]  }
 0x84e   : > { %13079 = vmatprep.subr.bf16.mxu0 %v15833_v43  ;;  %v15885_v43 = vld [vmem:[%s17115_s24 + $0x2d0] ss:$8 sps:$4 sm:$0xff]  }
 0x851   : > { %13080 = vmatpush1.bf16.msra.mxu0 %v15831_v58  ;;  %v15890_v58 = vld [vmem:[%s17115_s24 + $0x2e4] ss:$8 sps:$4 sm:$0xff]  }
 0x852   : > { %13081 = vmatprep.subr.bf16.mxu0 %v15836_v20  ;;  %v15888_v20 = vld [vmem:[%s17115_s24 + $0x2e0] ss:$8 sps:$4 sm:$0xff]  }
 0x855   : > { %13082 = vmatpush1.bf16.msra.mxu0 %v15834_v12  ;;  %v15893_v12 = vld [vmem:[%s17115_s24 + $0x2f4] ss:$8 sps:$4 sm:$0xff]  }
 0x856   : > { %13083 = vmatprep.subr.bf16.mxu0 %v15839_v38  ;;  %v15891_v38 = vld [vmem:[%s17115_s24 + $0x2f0] ss:$8 sps:$4 sm:$0xff]  }
 0x859   : > { %13084 = vmatpush1.bf16.msra.mxu0 %v15837_v36  ;;  %v15896_v36 = vld [vmem:[%s17115_s24 + $0x304] ss:$8 sps:$4 sm:$0xff]  }
 0x85a   : > { %13085 = vmatprep.subr.bf16.mxu0 %v15842_v55  ;;  %v15894_v55 = vld [vmem:[%s17115_s24 + $0x300] ss:$8 sps:$4 sm:$0xff]  }
 0x85d   : > { %13086 = vmatpush1.bf16.msra.mxu0 %v15840_v13  ;;  %v15899_v13 = vld [vmem:[%s17115_s24 + $0x314] ss:$8 sps:$4 sm:$0xff]  }
 0x85e   : > { %13087 = vmatprep.subr.bf16.mxu0 %v15845_v9  ;;  %v15897_v9 = vld [vmem:[%s17115_s24 + $0x310] ss:$8 sps:$4 sm:$0xff]  }
 0x861   : > { %13088 = vmatpush1.bf16.msra.mxu0 %v15843_v53  ;;  %v15902_v53 = vld [vmem:[%s17115_s24 + $0x324] ss:$8 sps:$4 sm:$0xff]  }
 0x862   : > { %13100 = vmatprep.subr.bf16.mxu0 %v15848_v4  ;;  %v15900_v4 = vld [vmem:[%s17115_s24 + $0x320] ss:$8 sps:$4 sm:$0xff]  }
 0x864   : > { %13090 = vmatmul.mubr.bf16.vlgmr.msra.gmra.mrb[20].mxu0 %v19892_v29  ;;  %v15909_v29 = vld [vmem:[%s17115_s24 + $0x350] ss:$8 sps:$4 sm:$0xff]  }
 0x865   : > { %13101 = vmatpush1.bf16.msra.mxu0 %v15846_v6  ;;  %13132 = vmatprep.mubr.bf16.mxu0 %v11455_v22  ;;  %v15861_v22 = vld [vmem:[%s17115_s24 + $0x250] ss:$8 sps:$4 sm:$0xff]   ;;  %v15905_v6 = vld [vmem:[%s17115_s24 + $0x334] ss:$8 sps:$4 sm:$0xff]  }
 0x866   : > { %13102 = vmatprep.subr.bf16.mxu0 %v15851_v11  ;;  %v4321_v11 = vrot.slane %v16292_v32, %v17701_v8 }
 0x869   : > { %13103 = vmatpush1.bf16.msra.mxu0 %v15849_v2  ;;  %v15914_v2 = vld [vmem:[%s17115_s24 + $0x364] ss:$8 sps:$4 sm:$0xff]  }
 0x86a   : > { %13104 = vmatprep.subr.bf16.mxu0 %v15854_v33 }
 0x86d   : > { %13105 = vmatpush1.bf16.msra.mxu0 %v15852_v51 }
 0x86e   : > { %13106 = vmatprep.subr.bf16.mxu0 %v15857_v5 }
 0x871   : > { %13107 = vmatpush1.bf16.msra.mxu0 %v15855_v59 }
 0x872   : > { %13108 = vmatprep.subr.bf16.mxu0 %v15860_v34 }
 0x875   : > { %13109 = vmatpush1.bf16.msra.mxu0 %v15858_v14  ;;  %v15912_v14 = vld [vmem:[%s17115_s24 + $0x360] ss:$8 sps:$4 sm:$0xff]  }
 0x876   : > { %13110 = vmatprep.subr.bf16.mxu0 %v15863_v39 }
 0x879   : > { %13111 = vmatpush1.bf16.msra.mxu0 %v15861_v22 }
 0x87a   : > { %13112 = vmatprep.subr.bf16.mxu0 %v15866_v62 }
 0x87d   : > { %13113 = vmatpush1.bf16.msra.mxu0 %v15864_v40 }
 0x87e   : > { %13114 = vmatprep.subr.bf16.mxu0 %v15869_v47 }
 0x881   : > { %13115 = vmatpush1.bf16.msra.mxu0 %v15867_v57 }
 0x882   : > { %13116 = vmatprep.subr.bf16.mxu0 %v15872_v63  ;;  %v15915_v63 = vld [vmem:[%s17115_s24 + $0x370] ss:$8 sps:$4 sm:$0xff]  }
 0x885   : > { %13117 = vmatpush1.bf16.msra.mxu0 %v15870_v0  ;;  %v15920_v0 = vld [vmem:[%s17115_s24 + $0x384] ss:$8 sps:$4 sm:$0xff]  }
 0x886   : > { %13118 = vmatprep.subr.bf16.mxu0 %v15875_v44  ;;  %v15918_v44 = vld [vmem:[%s17115_s24 + $0x380] ss:$8 sps:$4 sm:$0xff]  }
 0x889   : > { %13119 = vmatpush1.bf16.msra.mxu0 %v15873_v16  ;;  %v15923_v16 = vld [vmem:[%s17115_s24 + $0x394] ss:$8 sps:$4 sm:$0xff]  }
 0x88a   : > { %13120 = vmatprep.subr.bf16.mxu0 %v15878_v37  ;;  %v4325_v37 = vrot.slane %v16292_v32, %v17862_v28  ;;  %v15929_v28 = vld [vmem:[%s17115_s24 + $0x3b4] ss:$8 sps:$4 sm:$0xff]  }
 0x88d   : > { %13121 = vmatpush1.bf16.msra.mxu0 %v15876_v35  ;;  %v15921_v35 = vld [vmem:[%s17115_s24 + $0x390] ss:$8 sps:$4 sm:$0xff]  }
 0x88e   : > { %13122 = vmatprep.subr.bf16.mxu0 %v15881_v7 }
 0x891   : > { %13123 = vmatpush1.bf16.msra.mxu0 %v15879_v60  ;;  %v4329_v60 = vrot.slane %v16292_v32, %v17865_v30 }
 0x892   : > { %13124 = vmatprep.subr.bf16.mxu0 %v15884_v1  ;;  %v15926_v1 = vld [vmem:[%s17115_s24 + $0x3a4] ss:$8 sps:$4 sm:$0xff]  }
 0x895   : > { %13125 = vmatpush1.bf16.msra.mxu0 %v15882_v61 }
 0x896   : > { %13126 = vmatprep.subr.bf16.mxu0 %v15887_v31 }
 0x899   : > { %13127 = vmatpush1.bf16.msra.mxu0 %v15885_v43 }
 0x89a   : > { %13128 = vmatprep.subr.bf16.mxu0 %v15890_v58 }
 0x89d   : > { %13129 = vmatpush1.bf16.msra.mxu0 %v15888_v20 }
 0x89e   : > { %13130 = vmatprep.subr.bf16.mxu0 %v15893_v12  ;;  %v15924_v12 = vld [vmem:[%s17115_s24 + $0x3a0] ss:$8 sps:$4 sm:$0xff]  }
 0x8a1   : > { %13131 = vmatpush1.bf16.msra.mxu0 %v15891_v38 }
 0x8a2   : > { %13143 = vmatprep.subr.bf16.mxu0 %v15896_v36 }
 0x8a4   : > { %13133 = vmatmul.mubr.bf16.vlgmr.msra.gmra.mrb[20].mxu0 %v11454_v48  ;;  %v15906_v48 = vld [vmem:[%s17115_s24 + $0x340] ss:$8 sps:$4 sm:$0xff]  }
 0x8a5   : > { %13144 = vmatpush1.bf16.msra.mxu0 %v15894_v55  ;;  %13175 = vmatprep.mubr.bf16.mxu0 %v11457_v24  ;;  %v4317_v24 = vrot.slane %v16292_v32, %v17696_v56  ;;  %v15917_v56 = vld [vmem:[%s17115_s24 + $0x374] ss:$8 sps:$4 sm:$0xff]  }
 0x8a6   : > { %13145 = vmatprep.subr.bf16.mxu0 %v15899_v13 }
 0x8a9   : > { %13146 = vmatpush1.bf16.msra.mxu0 %v15897_v9 }
 0x8aa   : > { %13147 = vmatprep.subr.bf16.mxu0 %v15902_v53 }
 0x8ad   : > { %13148 = vmatpush1.bf16.msra.mxu0 %v15900_v4 }
 0x8ae   : > { %13149 = vmatprep.subr.bf16.mxu0 %v15905_v6 }
 0x8b1   : > { %13150 = vmatpush1.bf16.msra.mxu0 %v15903_v15 }
 0x8b2   : > { %13151 = vmatprep.subr.bf16.mxu0 %v15908_v42 }
 0x8b5   : > { %13152 = vmatpush1.bf16.msra.mxu0 %v15906_v48 }
 0x8b6   : > { %13153 = vmatprep.subr.bf16.mxu0 %v15911_v18 }
 0x8b7   : > { %v10661_v33 = vpop.f32.mrb[16].mxu0 }
 0x8b8   : > { %v15404_v51 = vadd.f32 %v10661_v33, %v4317_v24  ;;  %v10663_v5 = vpop.f32.mrb[17].mxu0  ;;  %v15927_v33 = vld [vmem:[%s17115_s24 + $0x3b0] ss:$8 sps:$4 sm:$0xff]  }
 0x8b9   : > { %v15405_v59 = vadd.f32 %v10663_v5, %v4321_v11  ;;  %v10665_v34 = vpop.f32.mrb[18].mxu0  ;;  %13154 = vmatpush1.bf16.msra.mxu0 %v15909_v29 }
 0x8ba   : > { %v10898_v39 = vmul.f32 1.442695, %v15404_v51  ;;  %v15406_v22 = vadd.f32 %v10665_v34, %v4317_v24  ;;  %v10667_v62 = vpop.f32.mrb[19].mxu0  ;;  %13155 = vmatprep.subr.bf16.mxu0 %v15914_v2  ;;  %vm10854_vm0 = vcmp.gt.f32.partialorder %v15404_v51, 0.0 }
 0x8bb   : > { %v10900_v8 = vmul.f32 1.442695, %v15405_v59  ;;  %v15407_v40 = vadd.f32 %v10667_v62, %v4321_v11  ;;  %vm10855_vm1 = vcmp.gt.f32.partialorder %v15405_v59, 0.0 }
 0x8bc   : > { %16254 = vpow2.f32 %v10898_v39  ;;  %v10930_v47 = vmul.f32 1.442695, %v15406_v22  ;;  %vm10870_vm2 = vcmp.gt.f32.partialorder %v15406_v22, 0.0 }
 0x8bd   : > { %16256 = vpow2.f32 %v10900_v8  ;;  %v10932_v57 = vmul.f32 1.442695, %v15407_v40  ;;  %13156 = vmatpush1.bf16.msra.mxu0 %v15912_v14  ;;  %vm10871_vm3 = vcmp.gt.f32.partialorder %v15407_v40, 0.0 }
 0x8be   : > { %16258 = vpow2.f32 %v10930_v47  ;;  %13157 = vmatprep.subr.bf16.mxu0 %v15917_v56  ;;  %v15930_v47 = vld [vmem:[%s17115_s24 + $0x3c0] ss:$8 sps:$4 sm:$0xff]  }
 0x8bf   : > { %16260 = vpow2.f32 %v10932_v57 }
 0x8c1   : > { %13158 = vmatpush1.bf16.msra.mxu0 %v15915_v63  ;;  %v15935_v63 = vld [vmem:[%s17115_s24 + $0x3d4] ss:$8 sps:$4 sm:$0xff]  }
 0x8c2   : > { %13159 = vmatprep.subr.bf16.mxu0 %v15920_v0 }
 0x8c5   : > { %13160 = vmatpush1.bf16.msra.mxu0 %v15918_v44 }
 0x8c6   : > { %v16255_v7 = vpop.eup %16254  ;;  %13161 = vmatprep.subr.bf16.mxu0 %v15923_v16 }
 0x8c7   : > { %v16257_v61 = vpop.eup %16256  ;;  %v15069_v31 = vadd.f32 -1.0, %v16255_v7  ;;  %v15938_v7 = vld [vmem:[%s17115_s24 + $0x3e4] ss:$8 sps:$4 sm:$0xff]  }
 0x8c8   : > { %v16259_v43 = vpop.eup %16258  ;;  %v15070_v58 = vadd.f32 -1.0, %v16257_v61  ;;  %v10833_v20 = vpop.f32.mrb[36].mxu1 }
 0x8c9   : > { %v16261_v38 = vpop.eup %16260  ;;  %v10982_v36 = vmul.f32 1.6732632, %v15069_v31  ;;  %v15085_v55 = vadd.f32 -1.0, %v16259_v43  ;;  %v19499_v13 = vadd.f32 %v10833_v20, %v4325_v37  ;;  %v10835_v9 = vpop.f32.mrb[37].mxu1  ;;  %13162 = vmatpush1.bf16.msra.mxu0 %v15921_v35  ;;  %v15936_v20 = vld [vmem:[%s17115_s24 + $0x3e0] ss:$8 sps:$4 sm:$0xff]  }
 0x8ca   : > { %v10983_v53 = vmul.f32 1.6732632, %v15070_v58  ;;  %v15086_v4 = vadd.f32 -1.0, %v16261_v38  ;;  %v19502_v6 = vadd.f32 %v10835_v9, %v4329_v60  ;;  %v10837_v30 = vpop.f32.mrb[38].mxu1  ;;  %13163 = vmatprep.subr.bf16.mxu0 %v15926_v1 }
 0x8cb   : > { %v11014_v15 = vsel %vm10854_vm0, %v15404_v51, %v10982_v36  ;;  %v10998_v42 = vmul.f32 1.6732632, %v15085_v55  ;;  %v10902_v48 = vmul.f32 1.442695, %v19499_v13  ;;  %v10839_v18 = vpop.f32.mrb[39].mxu1  ;;  %v19509_v34 = vadd.f32 %v10837_v30, %v4325_v37 }
 0x8cc   : > { %v11015_v32 = vsel %vm10855_vm1, %v15405_v59, %v10983_v53  ;;  %v10999_v24 = vmul.f32 1.6732632, %v15086_v4  ;;  %v19505_v11 = vmul.f32 1.050701, %v11014_v15  ;;  %v10904_v2 = vmul.f32 1.442695, %v19502_v6 }
 0x8cd   : > { %v11030_v29 = vsel %vm10870_vm2, %v15406_v22, %v10998_v42  ;;  %16262 = vpow2.f32 %v10902_v48  ;;  %13164 = vmatpush1.bf16.msra.mxu0 %v15924_v12  ;;  %v19511_v14 = vadd.f32 %v10839_v18, %v4329_v60  ;;  %v15932_v59 = vld [vmem:[%s17115_s24 + $0x3c4] ss:$8 sps:$4 sm:$0xff]   ;;  %v19514_v39 = vmul.f32 1.050701, %v11015_v32  ;;  %v15933_v37 = vld [vmem:[%s17115_s24 + $0x3d0] ss:$8 sps:$4 sm:$0xff]  }
 0x8ce   : > { %v11062_v51 = vmul.f32 1.050701, %v11030_v29  ;;  %v11031_v5 = vsel %vm10871_vm3, %v15407_v40, %v10999_v24  ;;  %13165 = vmatprep.subr.bf16.mxu0 %v15929_v28  ;;  %16264 = vpow2.f32 %v10904_v2  ;;  %v10934_v56 = vmul.f32 1.442695, %v19509_v34  ;;  %v15941_v55 = vld [vmem:[%s17115_s24 + $0x3f4] ss:$8 sps:$4 sm:$0xff]  }
 0x8cf   : > { %v11063_v62 = vmul.f32 1.050701, %v11031_v5  ;;  %v10936_v40 = vmul.f32 1.442695, %v19511_v14  ;;  %vm10856_vm4 = vcmp.gt.f32.partialorder %v19499_v13, 0.0  ;;  %vm10857_vm5 = vcmp.gt.f32.partialorder %v19502_v6, 0.0 }
 0x8d0   : > { %v11150_v22 = vadd.f32 %v11062_v51, %v19505_v11  ;;  %16266 = vpow2.f32 %v10934_v56  ;;  %v15939_v48 = vld [vmem:[%s17115_s24 + $0x3f0] ss:$8 sps:$4 sm:$0xff]   ;;  %v15944_v29 = vld [vmem:[%s17115_s24 + $0x404] ss:$8 sps:$4 sm:$0xff]   ;;  %vm10872_vm6 = vcmp.gt.f32.partialorder %v19509_v34, 0.0  ;;  %vm10873_vm7 = vcmp.gt.f32.partialorder %v19511_v14, 0.0 }
 0x8d1   : > { %v11157_v8 = vadd.f32 %v11063_v62, %v19514_v39  ;;  %13166 = vmatpush1.bf16.msra.mxu0 %v15927_v33  ;;  %16268 = vpow2.f32 %v10936_v40 }
 0x8d2   : > { %v11151_v57 = vrot.slane %v11150_v22, 4  ;;  %13167 = vmatprep.subr.bf16.mxu0 %v15932_v59 }
 0x8d3   : > { %v11158_v0 = vrot.slane %v11157_v8, 4 }
 0x8d4   : > { %v11152_v44 = vadd.f32 %v11151_v57, %v11150_v22 }
 0x8d5   : > { %v11159_v16 = vadd.f32 %v11158_v0, %v11157_v8  ;;  %13168 = vmatpush1.bf16.msra.mxu0 %v15930_v47  ;;  %v15942_v47 = vld [vmem:[%s17115_s24 + $0x400] ss:$8 sps:$4 sm:$0xff]  }
 0x8d6   : > { %v11153_v35 = vrot.slane %v11152_v44, 2  ;;  %13169 = vmatprep.subr.bf16.mxu0 %v15935_v63  ;;  %v15947_v63 = vld [vmem:[%s17115_s24 + $0x414] ss:$8 sps:$4 sm:$0xff]  }
 0x8d7   : > { %v16263_v60 = vpop.eup %16262  ;;  %v11160_v1 = vrot.slane %v11159_v16, 2 }
 0x8d8   : > { %v11154_v61 = vadd.f32 %v11153_v35, %v11152_v44  ;;  %v15071_v31 = vadd.f32 -1.0, %v16263_v60  ;;  %v16265_v43 = vpop.eup %16264  ;;  %v19893_v35 = vpack.c.bf16 %v18927_v17, %v18930_v25 }
 0x8d9   : > { %v11161_v58 = vadd.f32 %v11160_v1, %v11159_v16  ;;  %13170 = vmatpush1.bf16.msra.mxu0 %v15933_v37  ;;  %v15072_v36 = vadd.f32 -1.0, %v16265_v43 }
 0x8da   : > { %v11155_v12 = vrot.slane %v11154_v61, 1  ;;  %v10984_v38 = vmul.f32 1.6732632, %v15071_v31  ;;  %13171 = vmatprep.subr.bf16.mxu0 %v15938_v7  ;;  %v16267_v28 = vpop.eup %16266  ;;  %v15945_v7 = vld [vmem:[%s17115_s24 + $0x410] ss:$8 sps:$4 sm:$0xff]  }
 0x8db   : > { %v11162_v9 = vrot.slane %v11161_v58, 1  ;;  %v10985_v4 = vmul.f32 1.6732632, %v15072_v36  ;;  %v16269_v30 = vpop.eup %16268  ;;  %v15087_v42 = vadd.f32 -1.0, %v16267_v28  ;;  %v15950_v31 = vld [vmem:[%s17115_s24 + $0x424] ss:$8 sps:$4 sm:$0xff]  }
 0x8dc   : > { %v11156_v53 = vadd.f32 %v11155_v12, %v11154_v61  ;;  %v11016_v32 = vsel %vm10856_vm4, %v19499_v13, %v10984_v38  ;;  %v15088_v24 = vadd.f32 -1.0, %v16269_v30  ;;  %v15948_v12 = vld [vmem:[%s17115_s24 + $0x420] ss:$8 sps:$4 sm:$0xff]  }
 0x8dd   : > { %v11163_v15 = vadd.f32 %v11162_v9, %v11161_v58  ;;  %13172 = vmatpush1.bf16.msra.mxu0 %v15936_v20  ;;  %v11000_v33 = vmul.f32 1.6732632, %v15087_v42  ;;  %v11017_v13 = vsel %vm10857_vm5, %v19502_v6, %v10985_v4  ;;  %v19541_v8 = vmul.f32 1.050701, %v11016_v32  ;;  %v15951_v4 = vld [vmem:[%s17115_s24 + $0x430] ss:$8 sps:$4 sm:$0xff]  }
 0x8de   : > { %v11190_v18 = vmul.f32 0.0625, %v11156_v53  ;;  %13173 = vmatprep.subr.bf16.mxu0 %v15941_v55  ;;  %v11001_v22 = vmul.f32 1.6732632, %v15088_v24  ;;  %v11049_v0 = vmul.f32 1.050701, %v11017_v13 }
 0x8df   : > { %v11191_v2 = vmul.f32 0.0625, %v11163_v15  ;;  %v11032_v40 = vsel %vm10872_vm6, %v19509_v34, %v11000_v33  ;;  %v15954_v33 = vld [vmem:[%s17115_s24 + $0x440] ss:$8 sps:$4 sm:$0xff]  }
 0x8e0   : > { %v19534_v5 = vsub.f32 %v19505_v11, %v11190_v18  ;;  %v19536_v59 = vsub.f32 %v11062_v51, %v11190_v18  ;;  %v11064_v6 = vmul.f32 1.050701, %v11032_v40 }
 0x8e1   : > { %v19539_v56 = vsub.f32 %v11063_v62, %v11191_v2  ;;  %13174 = vmatpush1.bf16.msra.mxu0 %v15939_v48  ;;  %v19546_v57 = vsub.f32 %v19514_v39, %v11191_v2  ;;  %v11033_v62 = vsel %vm10873_vm7, %v19511_v14, %v11001_v22  ;;  %v15956_v48 = vld [vmem:[%s17115_s24 + $0x444] ss:$8 sps:$4 sm:$0xff]  }
 0x8e2   : > { %v11238_v11 = vmul.f32 %v19534_v5, %v19534_v5  ;;  %v11254_v51 = vmul.f32 %v19536_v59, %v19536_v59  ;;  %13186 = vmatprep.subr.bf16.mxu0 %v15944_v29  ;;  %v11065_v44 = vmul.f32 1.050701, %v11033_v62  ;;  %v11164_v37 = vadd.f32 %v11064_v6, %v19541_v8 }
 0x8e3   : > { %v11255_v34 = vmul.f32 %v19539_v56, %v19539_v56  ;;  %v11239_v39 = vmul.f32 %v19546_v57, %v19546_v57 }
 0x8e4   : > { %v11342_v16 = vadd.f32 %v11254_v51, %v11238_v11  ;;  %13176 = vmatmul.mubr.bf16.vlgmr.msra.gmra.mrb[20].mxu0 %v19893_v35  ;;  %v11171_v14 = vadd.f32 %v11065_v44, %v11049_v0  ;;  %v11165_v61 = vrot.slane %v11164_v37, 4 }
 0x8e5   : > { %13187 = vmatpush1.bf16.msra.mxu0 %v15942_v47  ;;  %13218 = vmatprep.mubr.bf16.mxu0 %v11459_v3  ;;  %v11349_v60 = vadd.f32 %v11255_v34, %v11239_v39  ;;  %v15959_v47 = vld [vmem:[%s17115_s24 + $0x454] ss:$8 sps:$4 sm:$0xff]  }
 0x8e6   : > { %v11343_v1 = vrot.slane %v11342_v16, 4  ;;  %13188 = vmatprep.subr.bf16.mxu0 %v15947_v63  ;;  %v11172_v43 = vrot.slane %v11171_v14, 4  ;;  %v11166_v17 = vadd.f32 %v11165_v61, %v11164_v37 }
 0x8e7   : > { %v11350_v58 = vrot.slane %v11349_v60, 4 }
 0x8e8   : > { %v11344_v20 = vadd.f32 %v11343_v1, %v11342_v16  ;;  %v11173_v25 = vadd.f32 %v11172_v43, %v11171_v14  ;;  %v11167_v41 = vrot.slane %v11166_v17, 2  ;;  %v15957_v16 = vld [vmem:[%s17115_s24 + $0x450] ss:$8 sps:$4 sm:$0xff]  }
 0x8e9   : > { %13189 = vmatpush1.bf16.msra.mxu0 %v15945_v7  ;;  %v11351_v38 = vadd.f32 %v11350_v58, %v11349_v60  ;;  %v15960_v60 = vld [vmem:[%s17115_s24 + $0x460] ss:$8 sps:$4 sm:$0xff]  }
 0x8ea   : > { %v11345_v36 = vrot.slane %v11344_v20, 2  ;;  %13190 = vmatprep.subr.bf16.mxu0 %v15950_v31  ;;  %v11174_v3 = vrot.slane %v11173_v25, 2  ;;  %v11168_v28 = vadd.f32 %v11167_v41, %v11166_v17  ;;  %v15965_v31 = vld [vmem:[%s17115_s24 + $0x474] ss:$8 sps:$4 sm:$0xff]  }
 0x8eb   : > { %v11352_v55 = vrot.slane %v11351_v38, 2 }
 0x8ec   : > { %v11346_v9 = vadd.f32 %v11345_v36, %v11344_v20  ;;  %v11175_v53 = vadd.f32 %v11174_v3, %v11173_v25  ;;  %v11169_v42 = vrot.slane %v11168_v28, 1  ;;  %v15963_v20 = vld [vmem:[%s17115_s24 + $0x470] ss:$8 sps:$4 sm:$0xff]  }
 0x8ed   : > { %13191 = vmatpush1.bf16.msra.mxu0 %v15948_v12  ;;  %v11353_v30 = vadd.f32 %v11352_v55, %v11351_v38  ;;  %v15968_v12 = vld [vmem:[%s17115_s24 + $0x484] ss:$8 sps:$4 sm:$0xff]   ;;  %v15966_v55 = vld [vmem:[%s17115_s24 + $0x480] ss:$8 sps:$4 sm:$0xff]  }
 0x8ee   : > { %v11347_v15 = vrot.slane %v11346_v9, 1  ;;  %13192 = vmatprep.subr.bf16.mxu0 %v15953_v52  ;;  %v11176_v18 = vrot.slane %v11175_v53, 1  ;;  %v11170_v29 = vadd.f32 %v11169_v42, %v11168_v28 }
 0x8ef   : > { %v11354_v32 = vrot.slane %v11353_v30, 1 }
 0x8f0   : > { %v11348_v24 = vadd.f32 %v11347_v15, %v11346_v9  ;;  %v11177_v2 = vadd.f32 %v11176_v18, %v11175_v53  ;;  %v11192_v40 = vmul.f32 0.0625, %v11170_v29  ;;  %v15969_v18 = vld [vmem:[%s17115_s24 + $0x490] ss:$8 sps:$4 sm:$0xff]  }
 0x8f1   : > { %13193 = vmatpush1.bf16.msra.mxu0 %v15951_v4  ;;  %v11355_v13 = vadd.f32 %v11354_v32, %v11353_v30  ;;  %v15971_v4 = vld [vmem:[%s17115_s24 + $0x494] ss:$8 sps:$4 sm:$0xff]  }
 0x8f2   : > { %v11382_v22 = vmul.f32 0.0625, %v11348_v24  ;;  %13194 = vmatprep.subr.bf16.mxu0 %v15956_v48  ;;  %v11193_v11 = vmul.f32 0.0625, %v11177_v2  ;;  %v19574_v63 = vsub.f32 %v19541_v8, %v11192_v40  ;;  %v19576_v34 = vsub.f32 %v11064_v6, %v11192_v40  ;;  %v15962_v8 = vld [vmem:[%s17115_s24 + $0x464] ss:$8 sps:$4 sm:$0xff]   ;;  %v15972_v2 = vld [vmem:[%s17115_s24 + $0x4a0] ss:$8 sps:$4 sm:$0xff]  }
 0x8f3   : > { %v11383_v51 = vmul.f32 0.0625, %v11355_v13  ;;  %v15977_v13 = vld [vmem:[%s17115_s24 + $0x4b4] ss:$8 sps:$4 sm:$0xff]   ;;  %v15980_v40 = vld [vmem:[%s17115_s24 + $0x4c4] ss:$8 sps:$4 sm:$0xff]  }
 0x8f4   : > { %v11398_v62 = vadd.f32 1e-05, %v11382_v22  ;;  %v19578_v39 = vsub.f32 %v11065_v44, %v11193_v11  ;;  %v19581_v35 = vsub.f32 %v11049_v0, %v11193_v11  ;;  %v11240_v14 = vmul.f32 %v19574_v63, %v19574_v63  ;;  %v15975_v22 = vld [vmem:[%s17115_s24 + $0x4b0] ss:$8 sps:$4 sm:$0xff]   ;;  %v15983_v11 = vld [vmem:[%s17115_s24 + $0x4d4] ss:$8 sps:$4 sm:$0xff]  }
 0x8f5   : > { %13195 = vmatpush1.bf16.msra.mxu0 %v15954_v33  ;;  %v11399_v37 = vadd.f32 1e-05, %v11383_v51  ;;  %v11256_v7 = vmul.f32 %v19576_v34, %v19576_v34 }
 0x8f6   : > { %16270 = vrsqrt.f32 %v11398_v62  ;;  %13196 = vmatprep.subr.bf16.mxu0 %v15959_v47  ;;  %v11257_v6 = vmul.f32 %v19578_v39, %v19578_v39  ;;  %v11241_v44 = vmul.f32 %v19581_v35, %v19581_v35  ;;  %v15978_v47 = vld [vmem:[%s17115_s24 + $0x4c0] ss:$8 sps:$4 sm:$0xff]  }
 0x8f7   : > { %16272 = vrsqrt.f32 %v11399_v37  ;;  %v11356_v0 = vadd.f32 %v11256_v7, %v11240_v14  ;;  %v15981_v37 = vld [vmem:[%s17115_s24 + $0x4d0] ss:$8 sps:$4 sm:$0xff]   ;;  %v15986_v7 = vld [vmem:[%s17115_s24 + $0x4e4] ss:$8 sps:$4 sm:$0xff]  }
 0x8f8   : > { %v11363_v1 = vadd.f32 %v11257_v6, %v11241_v44 }
 0x8f9   : > { %13197 = vmatpush1.bf16.msra.mxu0 %v15957_v16  ;;  %v11357_v61 = vrot.slane %v11356_v0, 4 }
 0x8fa   : > { %13198 = vmatprep.subr.bf16.mxu0 %v15962_v8  ;;  %v11364_v43 = vrot.slane %v11363_v1, 4 }
 0x8fb   : > { %v11358_v58 = vadd.f32 %v11357_v61, %v11356_v0  ;;  %v15989_v0 = vld [vmem:[%s17115_s24 + $0x4f4] ss:$8 sps:$4 sm:$0xff]   ;;  %v15993_v61 = vld [vmem:[%s17115_s24 + $0x510] ss:$8 sps:$4 sm:$0xff]  }
 0x8fc   : > { %v11365_v17 = vadd.f32 %v11364_v43, %v11363_v1  ;;  %v15995_v1 = vld [vmem:[%s17115_s24 + $0x514] ss:$8 sps:$4 sm:$0xff]   ;;  %v15996_v43 = vld [vmem:[%s17115_s24 + $0x520] ss:$8 sps:$4 sm:$0xff]  }
 0x8fd   : > { %13199 = vmatpush1.bf16.msra.mxu0 %v15960_v60  ;;  %v11359_v25 = vrot.slane %v11358_v58, 2  ;;  %v15987_v60 = vld [vmem:[%s17115_s24 + $0x4f0] ss:$8 sps:$4 sm:$0xff]  }
 0x8fe   : > { %13200 = vmatprep.subr.bf16.mxu0 %v15965_v31  ;;  %v11366_v38 = vrot.slane %v11365_v17, 2  ;;  %v15998_v31 = vld [vmem:[%s17115_s24 + $0x524] ss:$8 sps:$4 sm:$0xff]  }
 0x8ff   : > { %v11360_v41 = vadd.f32 %v11359_v25, %v11358_v58  ;;  %v16001_v58 = vld [vmem:[%s17115_s24 + $0x534] ss:$8 sps:$4 sm:$0xff]   ;;  %v16011_v25 = vld [vmem:[%s17115_s24 + $0x570] ss:$8 sps:$4 sm:$0xff]  }
 0x900   : > { %v16271_v36 = vpop.eup %16270  ;;  %v11367_v28 = vadd.f32 %v11366_v38, %v11365_v17  ;;  %v16013_v17 = vld [vmem:[%s17115_s24 + $0x574] ss:$8 sps:$4 sm:$0xff]   ;;  %v16014_v38 = vld [vmem:[%s17115_s24 + $0x580] ss:$8 sps:$4 sm:$0xff]  }
 0x901   : > { %v16273_v52 = vpop.eup %16272  ;;  %v19597_v3 = vmul.f32 %v16271_v36, %v19536_v59  ;;  %13201 = vmatpush1.bf16.msra.mxu0 %v15963_v20  ;;  %v19601_v9 = vmul.f32 %v16271_v36, %v19534_v5  ;;  %v11361_v53 = vrot.slane %v11360_v41, 1  ;;  %v16008_v20 = vld [vmem:[%s17115_s24 + $0x560] ss:$8 sps:$4 sm:$0xff]   ;;  %v16019_v36 = vld [vmem:[%s17115_s24 + $0x594] ss:$8 sps:$4 sm:$0xff]  }
 0x902   : > { %13202 = vmatprep.subr.bf16.mxu0 %v15968_v12  ;;  %v19605_v30 = vmul.f32 %v16273_v52, %v19546_v57  ;;  %v19608_v15 = vmul.f32 %v16273_v52, %v19539_v56  ;;  %v11368_v42 = vrot.slane %v11367_v28, 1  ;;  %v15974_v57 = vld [vmem:[%s17115_s24 + $0x4a4] ss:$8 sps:$4 sm:$0xff]  }
 0x903   : > { %v11462_v59 = vpack.c.bf16 %v19597_v3, %v19601_v9  ;;  %v11362_v48 = vadd.f32 %v11361_v53, %v11360_v41  ;;  %v16016_v12 = vld [vmem:[%s17115_s24 + $0x584] ss:$8 sps:$4 sm:$0xff]   ;;  %v16017_v41 = vld [vmem:[%s17115_s24 + $0x590] ss:$8 sps:$4 sm:$0xff]  }
 0x904   : > { %v11463_v5 = vpack.c.bf16 %v19608_v15, %v19605_v30  ;;  %v11369_v32 = vadd.f32 %v11368_v42, %v11367_v28  ;;  %v16022_v52 = vld [vmem:[%s17115_s24 + $0x5a4] ss:$8 sps:$4 sm:$0xff]   ;;  %v16025_v28 = vld [vmem:[%s17115_s24 + $0x5b4] ss:$8 sps:$4 sm:$0xff]   ;;  %v16023_v53 = vld [vmem:[%s17115_s24 + $0x5b0] ss:$8 sps:$4 sm:$0xff]  }
 0x905   : > { %13203 = vmatpush1.bf16.msra.mxu0 %v15966_v55  ;;  %v11384_v24 = vmul.f32 0.0625, %v11362_v48  ;;  %v16020_v55 = vld [vmem:[%s17115_s24 + $0x5a0] ss:$8 sps:$4 sm:$0xff]   ;;  %v16031_v48 = vld [vmem:[%s17115_s24 + $0x5d4] ss:$8 sps:$4 sm:$0xff]  }
 0x906   : > { %13204 = vmatprep.subr.bf16.mxu0 %v15971_v4  ;;  %v11385_v56 = vmul.f32 0.0625, %v11369_v32  ;;  %v16028_v4 = vld [vmem:[%s17115_s24 + $0x5c4] ss:$8 sps:$4 sm:$0xff]   ;;  %v16026_v42 = vld [vmem:[%s17115_s24 + $0x5c0] ss:$8 sps:$4 sm:$0xff]  }
 0x907   : > { %v11400_v29 = vadd.f32 1e-05, %v11384_v24  ;;  %v16034_v32 = vld [vmem:[%s17115_s24 + $0x5e4] ss:$8 sps:$4 sm:$0xff]   ;;  %v16032_v24 = vld [vmem:[%s17115_s24 + $0x5e0] ss:$8 sps:$4 sm:$0xff]  }
 0x908   : > { %v11401_v33 = vadd.f32 1e-05, %v11385_v56  ;;  %v16035_v56 = vld [vmem:[%s17115_s24 + $0x5f0] ss:$8 sps:$4 sm:$0xff]   ;;  %v16055_v30 = vld [vmem:[%s17115_s24 + $0x654] ss:$8 sps:$4 sm:$0xff]  }
 0x909   : > { %13205 = vmatpush1.bf16.msra.mxu0 %v15969_v18  ;;  %16274 = vrsqrt.f32 %v11400_v29  ;;  %v16029_v18 = vld [vmem:[%s17115_s24 + $0x5d0] ss:$8 sps:$4 sm:$0xff]   ;;  %v16040_v29 = vld [vmem:[%s17115_s24 + $0x604] ss:$8 sps:$4 sm:$0xff]  }
 0x90a   : > { %13206 = vmatprep.subr.bf16.mxu0 %v15974_v57  ;;  %16276 = vrsqrt.f32 %v11401_v33  ;;  %v16037_v57 = vld [vmem:[%s17115_s24 + $0x5f4] ss:$8 sps:$4 sm:$0xff]   ;;  %v16053_v15 = vld [vmem:[%s17115_s24 + $0x650] ss:$8 sps:$4 sm:$0xff]   ;;  %v16100_v9 = vld [vmem:[%s17115_s24 + $0x744] ss:$8 sps:$4 sm:$0xff]  }
 0x90b   : > { %v16043_v33 = vld [vmem:[%s17115_s24 + $0x614] ss:$8 sps:$4 sm:$0xff]   ;;  %v16095_v3 = vld [vmem:[%s17115_s24 + $0x730] ss:$8 sps:$4 sm:$0xff]  }
 0x90d   : > { %13207 = vmatpush1.bf16.msra.mxu0 %v15972_v2  ;;  %v16038_v2 = vld [vmem:[%s17115_s24 + $0x600] ss:$8 sps:$4 sm:$0xff]  }
 0x90e   : > { %13208 = vmatprep.subr.bf16.mxu0 %v15977_v13  ;;  %v16041_v13 = vld [vmem:[%s17115_s24 + $0x610] ss:$8 sps:$4 sm:$0xff]  }
 0x911   : > { %13209 = vmatpush1.bf16.msra.mxu0 %v15975_v22  ;;  %v16046_v22 = vld [vmem:[%s17115_s24 + $0x624] ss:$8 sps:$4 sm:$0xff]  }
 0x912   : > { %13210 = vmatprep.subr.bf16.mxu0 %v15980_v40  ;;  %v16044_v40 = vld [vmem:[%s17115_s24 + $0x620] ss:$8 sps:$4 sm:$0xff]  }
 0x913   : > { %v16275_v51 = vpop.eup %16274 }
 0x914   : > { %v16277_v62 = vpop.eup %16276  ;;  %v19623_v16 = vmul.f32 %v16275_v51, %v19576_v34  ;;  %v19627_v14 = vmul.f32 %v16275_v51, %v19574_v63  ;;  %v15984_v63 = vld [vmem:[%s17115_s24 + $0x4e0] ss:$8 sps:$4 sm:$0xff]   ;;  %v16061_v51 = vld [vmem:[%s17115_s24 + $0x674] ss:$8 sps:$4 sm:$0xff]  }
 0x915   : > { %13211 = vmatpush1.bf16.msra.mxu0 %v15978_v47  ;;  %v19631_v8 = vmul.f32 %v16277_v62, %v19581_v35  ;;  %v19634_v6 = vmul.f32 %v16277_v62, %v19578_v39  ;;  %v15992_v35 = vld [vmem:[%s17115_s24 + $0x504] ss:$8 sps:$4 sm:$0xff]   ;;  %v15990_v39 = vld [vmem:[%s17115_s24 + $0x500] ss:$8 sps:$4 sm:$0xff]   ;;  %v16049_v47 = vld [vmem:[%s17115_s24 + $0x634] ss:$8 sps:$4 sm:$0xff]  }
 0x916   : > { %13212 = vmatprep.subr.bf16.mxu0 %v15983_v11  ;;  %v11464_v34 = vpack.c.bf16 %v19623_v16, %v19627_v14  ;;  %v16056_v11 = vld [vmem:[%s17115_s24 + $0x660] ss:$8 sps:$4 sm:$0xff]   ;;  %v16059_v62 = vld [vmem:[%s17115_s24 + $0x670] ss:$8 sps:$4 sm:$0xff]  }
 0x917   : > { %v11465_v44 = vpack.c.bf16 %v19634_v6, %v19631_v8  ;;  %v16103_v8 = vld [vmem:[%s17115_s24 + $0x754] ss:$8 sps:$4 sm:$0xff]   ;;  %v16101_v6 = vld [vmem:[%s17115_s24 + $0x750] ss:$8 sps:$4 sm:$0xff]  }
 0x919   : > { %13213 = vmatpush1.bf16.msra.mxu0 %v15981_v37  ;;  %v16064_v37 = vld [vmem:[%s17115_s24 + $0x684] ss:$8 sps:$4 sm:$0xff]  }
 0x91a   : > { %13214 = vmatprep.subr.bf16.mxu0 %v15986_v7  ;;  %v16062_v7 = vld [vmem:[%s17115_s24 + $0x680] ss:$8 sps:$4 sm:$0xff]  }
 0x91d   : > { %13215 = vmatpush1.bf16.msra.mxu0 %v15984_v63  ;;  %v16067_v63 = vld [vmem:[%s17115_s24 + $0x694] ss:$8 sps:$4 sm:$0xff]  }
 0x91e   : > { %13216 = vmatprep.subr.bf16.mxu0 %v15989_v0  ;;  %v16065_v0 = vld [vmem:[%s17115_s24 + $0x690] ss:$8 sps:$4 sm:$0xff]  }
 0x921   : > { %13217 = vmatpush1.bf16.msra.mxu0 %v15987_v60  ;;  %v16070_v60 = vld [vmem:[%s17115_s24 + $0x6a4] ss:$8 sps:$4 sm:$0xff]  }
 0x922   : > { %13229 = vmatprep.subr.bf16.mxu0 %v15992_v35  ;;  %v16068_v35 = vld [vmem:[%s17115_s24 + $0x6a0] ss:$8 sps:$4 sm:$0xff]  }
 0x924   : > { %13219 = vmatmul.mubr.bf16.vlgmr.msra.gmra.mrb[20].mxu0 %v11458_v45  ;;  %v16002_v45 = vld [vmem:[%s17115_s24 + $0x540] ss:$8 sps:$4 sm:$0xff]  }
 0x925   : > { %13230 = vmatpush1.bf16.msra.mxu0 %v15990_v39  ;;  %13261 = vmatprep.mubr.bf16.mxu0 %v11461_v50  ;;  %v16010_v50 = vld [vmem:[%s17115_s24 + $0x564] ss:$8 sps:$4 sm:$0xff]   ;;  %v16073_v39 = vld [vmem:[%s17115_s24 + $0x6b4] ss:$8 sps:$4 sm:$0xff]  }
 0x926   : > { %13231 = vmatprep.subr.bf16.mxu0 %v15995_v1  ;;  %v16071_v1 = vld [vmem:[%s17115_s24 + $0x6b0] ss:$8 sps:$4 sm:$0xff]  }
 0x929   : > { %13232 = vmatpush1.bf16.msra.mxu0 %v15993_v61  ;;  %v16076_v61 = vld [vmem:[%s17115_s24 + $0x6c4] ss:$8 sps:$4 sm:$0xff]  }
 0x92a   : > { %13233 = vmatprep.subr.bf16.mxu0 %v15998_v31  ;;  %v16074_v31 = vld [vmem:[%s17115_s24 + $0x6c0] ss:$8 sps:$4 sm:$0xff]  }
 0x92d   : > { %13234 = vmatpush1.bf16.msra.mxu0 %v15996_v43  ;;  %v16079_v43 = vld [vmem:[%s17115_s24 + $0x6d4] ss:$8 sps:$4 sm:$0xff]  }
 0x92e   : > { %13235 = vmatprep.subr.bf16.mxu0 %v16001_v58  ;;  %v16077_v58 = vld [vmem:[%s17115_s24 + $0x6d0] ss:$8 sps:$4 sm:$0xff]  }
 0x931   : > { %13236 = vmatpush1.bf16.msra.mxu0 %v15999_v27  ;;  %v16082_v27 = vld [vmem:[%s17115_s24 + $0x6e4] ss:$8 sps:$4 sm:$0xff]  }
 0x932   : > { %13237 = vmatprep.subr.bf16.mxu0 %v16004_v54  ;;  %v16080_v54 = vld [vmem:[%s17115_s24 + $0x6e0] ss:$8 sps:$4 sm:$0xff]  }
 0x935   : > { %13238 = vmatpush1.bf16.msra.mxu0 %v16002_v45  ;;  %v16085_v45 = vld [vmem:[%s17115_s24 + $0x6f4] ss:$8 sps:$4 sm:$0xff]  }
 0x936   : > { %13239 = vmatprep.subr.bf16.mxu0 %v16007_v26  ;;  %v16083_v26 = vld [vmem:[%s17115_s24 + $0x6f0] ss:$8 sps:$4 sm:$0xff]  }
 0x939   : > { %13240 = vmatpush1.bf16.msra.mxu0 %v16005_v23  ;;  %v16088_v23 = vld [vmem:[%s17115_s24 + $0x704] ss:$8 sps:$4 sm:$0xff]  }
 0x93a   : > { %13241 = vmatprep.subr.bf16.mxu0 %v16010_v50  ;;  %v16086_v50 = vld [vmem:[%s17115_s24 + $0x700] ss:$8 sps:$4 sm:$0xff]  }
 0x93d   : > { %13242 = vmatpush1.bf16.msra.mxu0 %v16008_v20  ;;  %v16091_v20 = vld [vmem:[%s17115_s24 + $0x714] ss:$8 sps:$4 sm:$0xff]  }
 0x93e   : > { %13243 = vmatprep.subr.bf16.mxu0 %v16013_v17  ;;  %v16089_v17 = vld [vmem:[%s17115_s24 + $0x710] ss:$8 sps:$4 sm:$0xff]  }
 0x941   : > { %13244 = vmatpush1.bf16.msra.mxu0 %v16011_v25  ;;  %v16094_v25 = vld [vmem:[%s17115_s24 + $0x724] ss:$8 sps:$4 sm:$0xff]  }
 0x942   : > { %13245 = vmatprep.subr.bf16.mxu0 %v16016_v12  ;;  %v16092_v12 = vld [vmem:[%s17115_s24 + $0x720] ss:$8 sps:$4 sm:$0xff]  }
 0x945   : > { %13246 = vmatpush1.bf16.msra.mxu0 %v16014_v38  ;;  %v16097_v38 = vld [vmem:[%s17115_s24 + $0x734] ss:$8 sps:$4 sm:$0xff]  }
 0x946   : > { %13247 = vmatprep.subr.bf16.mxu0 %v16019_v36  ;;  %v16104_v36 = vld [vmem:[%s17115_s24 + $0x760] ss:$8 sps:$4 sm:$0xff]  }
 0x949   : > { %13248 = vmatpush1.bf16.msra.mxu0 %v16017_v41  ;;  %v16109_v41 = vld [vmem:[%s17115_s24 + $0x774] ss:$8 sps:$4 sm:$0xff]  }
 0x94a   : > { %13249 = vmatprep.subr.bf16.mxu0 %v16022_v52  ;;  %v16107_v52 = vld [vmem:[%s17115_s24 + $0x770] ss:$8 sps:$4 sm:$0xff]  }
 0x94d   : > { %13250 = vmatpush1.bf16.msra.mxu0 %v16020_v55  ;;  %v16112_v55 = vld [vmem:[%s17115_s24 + $0x784] ss:$8 sps:$4 sm:$0xff]  }
 0x94e   : > { %13251 = vmatprep.subr.bf16.mxu0 %v16025_v28  ;;  %v16110_v28 = vld [vmem:[%s17115_s24 + $0x780] ss:$8 sps:$4 sm:$0xff]  }
 0x951   : > { %13252 = vmatpush1.bf16.msra.mxu0 %v16023_v53  ;;  %v16115_v53 = vld [vmem:[%s17115_s24 + $0x794] ss:$8 sps:$4 sm:$0xff]  }
 0x952   : > { %13253 = vmatprep.subr.bf16.mxu0 %v16028_v4  ;;  %v16113_v4 = vld [vmem:[%s17115_s24 + $0x790] ss:$8 sps:$4 sm:$0xff]  }
 0x955   : > { %13254 = vmatpush1.bf16.msra.mxu0 %v16026_v42  ;;  %v16118_v42 = vld [vmem:[%s17115_s24 + $0x7a4] ss:$8 sps:$4 sm:$0xff]  }
 0x956   : > { %13255 = vmatprep.subr.bf16.mxu0 %v16031_v48  ;;  %v16116_v48 = vld [vmem:[%s17115_s24 + $0x7a0] ss:$8 sps:$4 sm:$0xff]  }
 0x959   : > { %13256 = vmatpush1.bf16.msra.mxu0 %v16029_v18  ;;  %v16121_v18 = vld [vmem:[%s17115_s24 + $0x7b4] ss:$8 sps:$4 sm:$0xff]  }
 0x95a   : > { %13257 = vmatprep.subr.bf16.mxu0 %v16034_v32  ;;  %v16119_v32 = vld [vmem:[%s17115_s24 + $0x7b0] ss:$8 sps:$4 sm:$0xff]  }
 0x95d   : > { %13258 = vmatpush1.bf16.msra.mxu0 %v16032_v24  ;;  %v16124_v24 = vld [vmem:[%s17115_s24 + $0x7c4] ss:$8 sps:$4 sm:$0xff]  }
 0x95e   : > { %13259 = vmatprep.subr.bf16.mxu0 %v16037_v57  ;;  %v16122_v57 = vld [vmem:[%s17115_s24 + $0x7c0] ss:$8 sps:$4 sm:$0xff]  }
 0x961   : > { %13260 = vmatpush1.bf16.msra.mxu0 %v16035_v56  ;;  %v16127_v56 = vld [vmem:[%s17115_s24 + $0x7d4] ss:$8 sps:$4 sm:$0xff]  }
 0x962   : > { %13272 = vmatprep.subr.bf16.mxu0 %v16040_v29  ;;  %v16125_v29 = vld [vmem:[%s17115_s24 + $0x7d0] ss:$8 sps:$4 sm:$0xff]  }
 0x964   : > { %13262 = vmatmul.mubr.bf16.vlgmr.msra.gmra.mrb[20].mxu0 %v11460_v10  ;;  %v16050_v10 = vld [vmem:[%s17115_s24 + $0x640] ss:$8 sps:$4 sm:$0xff]  }
 0x965   : > { %13273 = vmatpush1.bf16.msra.mxu0 %v16038_v2  ;;  %13304 = vmatprep.mubr.bf16.mxu0 %v11463_v5  ;;  %v16058_v5 = vld [vmem:[%s17115_s24 + $0x664] ss:$8 sps:$4 sm:$0xff]  }
 0x966   : > { %13274 = vmatprep.subr.bf16.mxu0 %v16043_v33  ;;  %v16130_v2 = vld [vmem:[%s17115_s24 + $0x7e4] ss:$8 sps:$4 sm:$0xff]   ;;  %v16128_v33 = vld [vmem:[%s17115_s24 + $0x7e0] ss:$8 sps:$4 sm:$0xff]  }
 0x969   : > { %13275 = vmatpush1.bf16.msra.mxu0 %v16041_v13  ;;  %v16133_v13 = vld [vmem:[%s17115_s24 + $0x7f4] ss:$8 sps:$4 sm:$0xff]  }
 0x96a   : > { %13276 = vmatprep.subr.bf16.mxu0 %v16046_v22  ;;  %v16131_v22 = vld [vmem:[%s17115_s24 + $0x7f0] ss:$8 sps:$4 sm:$0xff]  }
 0x96d   : > { %13277 = vmatpush1.bf16.msra.mxu0 %v16044_v40  ;;  %v11722_v40 = vld [vmem:[%s17123_s21] sm:$0x3] }
 0x96e   : > { %13278 = vmatprep.subr.bf16.mxu0 %v16049_v47  ;;  %v11727_v47 = vrot.slane %v11722_v40, %v17274_v19 }
 0x971   : > { %13279 = vmatpush1.bf16.msra.mxu0 %v16047_v46  ;;  %v11731_v46 = vrot.slane %v11722_v40, %v17280_v21 }
 0x972   : > { %13280 = vmatprep.subr.bf16.mxu0 %v16052_v49 }
 0x975   : > { %13281 = vmatpush1.bf16.msra.mxu0 %v16050_v10 }
 0x976   : > { %13282 = vmatprep.subr.bf16.mxu0 %v16055_v30 }
 0x979   : > { %13283 = vmatpush1.bf16.msra.mxu0 %v16053_v15 }
 0x97a   : > { %13284 = vmatprep.subr.bf16.mxu0 %v16058_v5 }
 0x97d   : > { %13285 = vmatpush1.bf16.msra.mxu0 %v16056_v11 }
 0x97e   : > { %13286 = vmatprep.subr.bf16.mxu0 %v16061_v51 }
 0x981   : > { %13287 = vmatpush1.bf16.msra.mxu0 %v16059_v62 }
 0x982   : > { %13288 = vmatprep.subr.bf16.mxu0 %v16064_v37 }
 0x985   : > { %13289 = vmatpush1.bf16.msra.mxu0 %v16062_v7 }
 0x986   : > { %13290 = vmatprep.subr.bf16.mxu0 %v16067_v63 }
 0x989   : > { %13291 = vmatpush1.bf16.msra.mxu0 %v16065_v0 }
 0x98a   : > { %13292 = vmatprep.subr.bf16.mxu0 %v16070_v60 }
 0x98d   : > { %13293 = vmatpush1.bf16.msra.mxu0 %v16068_v35 }
 0x98e   : > { %13294 = vmatprep.subr.bf16.mxu0 %v16073_v39 }
 0x991   : > { %13295 = vmatpush1.bf16.msra.mxu0 %v16071_v1 }
 0x992   : > { %13296 = vmatprep.subr.bf16.mxu0 %v16076_v61 }
 0x995   : > { %13297 = vmatpush1.bf16.msra.mxu0 %v16074_v31 }
 0x996   : > { %13298 = vmatprep.subr.bf16.mxu0 %v16079_v43 }
 0x999   : > { %13299 = vmatpush1.bf16.msra.mxu0 %v16077_v58 }
 0x99a   : > { %13300 = vmatprep.subr.bf16.mxu0 %v16082_v27 }
 0x99d   : > { %13301 = vmatpush1.bf16.msra.mxu0 %v16080_v54 }
 0x99e   : > { %13302 = vmatprep.subr.bf16.mxu0 %v16085_v45 }
 0x9a1   : > { %13303 = vmatpush1.bf16.msra.mxu0 %v16083_v26 }
 0x9a2   : > { %13315 = vmatprep.subr.bf16.mxu0 %v16088_v23 }
 0x9a4   : > { %13305 = vmatmul.mubr.bf16.vlgmr.msra.gmra.mrb[20].mxu0 %v11462_v59  ;;  %v16098_v59 = vld [vmem:[%s17115_s24 + $0x740] ss:$8 sps:$4 sm:$0xff]  }
 0x9a5   : > { %13316 = vmatpush1.bf16.msra.mxu0 %v16086_v50  ;;  %13347 = vmatprep.mubr.bf16.mxu0 %v11465_v44  ;;  %v16106_v44 = vld [vmem:[%s17115_s24 + $0x764] ss:$8 sps:$4 sm:$0xff]  }
 0x9a6   : > { %13317 = vmatprep.subr.bf16.mxu0 %v16091_v20 }
 0x9a9   : > { %13318 = vmatpush1.bf16.msra.mxu0 %v16089_v17 }
 0x9aa   : > { %13319 = vmatprep.subr.bf16.mxu0 %v16094_v25 }
 0x9ad   : > { %13320 = vmatpush1.bf16.msra.mxu0 %v16092_v12 }
 0x9ae   : > { %13321 = vmatprep.subr.bf16.mxu0 %v16097_v38 }
 0x9b1   : > { %13322 = vmatpush1.bf16.msra.mxu0 %v16095_v3 }
 0x9b2   : > { %13323 = vmatprep.subr.bf16.mxu0 %v16100_v9 }
 0x9b5   : > { %13324 = vmatpush1.bf16.msra.mxu0 %v16098_v59 }
 0x9b6   : > { %13325 = vmatprep.subr.bf16.mxu0 %v16103_v8 }
 0x9b9   : > { %13326 = vmatpush1.bf16.msra.mxu0 %v16101_v6 }
 0x9ba   : > { %13327 = vmatprep.subr.bf16.mxu0 %v16106_v44 }
 0x9bd   : > { %13328 = vmatpush1.bf16.msra.mxu0 %v16104_v36 }
 0x9be   : > { %13329 = vmatprep.subr.bf16.mxu0 %v16109_v41 }
 0x9c1   : > { %13330 = vmatpush1.bf16.msra.mxu0 %v16107_v52 }
 0x9c2   : > { %13331 = vmatprep.subr.bf16.mxu0 %v16112_v55 }
 0x9c5   : > { %13332 = vmatpush1.bf16.msra.mxu0 %v16110_v28 }
 0x9c6   : > { %13333 = vmatprep.subr.bf16.mxu0 %v16115_v53 }
 0x9c9   : > { %13334 = vmatpush1.bf16.msra.mxu0 %v16113_v4 }
 0x9ca   : > { %13335 = vmatprep.subr.bf16.mxu0 %v16118_v42 }
 0x9cd   : > { %13336 = vmatpush1.bf16.msra.mxu0 %v16116_v48 }
 0x9ce   : > { %13337 = vmatprep.subr.bf16.mxu0 %v16121_v18 }
 0x9d1   : > { %13338 = vmatpush1.bf16.msra.mxu0 %v16119_v32 }
 0x9d2   : > { %13339 = vmatprep.subr.bf16.mxu0 %v16124_v24 }
 0x9d5   : > { %13340 = vmatpush1.bf16.msra.mxu0 %v16122_v57 }
 0x9d6   : > { %13341 = vmatprep.subr.bf16.mxu0 %v16127_v56 }
 0x9d9   : > { %13342 = vmatpush1.bf16.msra.mxu0 %v16125_v29 }
 0x9da   : > { %13343 = vmatprep.subr.bf16.mxu0 %v16130_v2 }
 0x9dd   : > { %13344 = vmatpush1.bf16.msra.mxu0 %v16128_v33 }
 0x9de   : > { %13345 = vmatprep.subr.bf16.mxu0 %v16133_v13 }
 0x9e1   : > { %13346 = vmatpush1.bf16.msra.mxu0 %v16131_v22 }
 0x9e4   : > { %13348 = vmatmul.mubr.bf16.vlgmr.msra.gmra.mrb[20].mxu0 %v11464_v34 }
 0xab7   : > { %v13349_v49 = vpop.f32.mrb[20].mxu0 }
 0xab8   : > { %v15412_v10 = vadd.f32 %v13349_v49, %v11727_v47  ;;  %v13351_v30 = vpop.f32.mrb[21].mxu0 }
 0xab9   : > { %v15413_v15 = vadd.f32 %v13351_v30, %v11731_v46  ;;  %v13353_v5 = vpop.f32.mrb[22].mxu0 }
 0xaba   : > { %v13355_v11 = vpop.f32.mrb[23].mxu0  ;;  %v15414_v51 = vadd.f32 %v13353_v5, %v11727_v47 }
 0xabb   : > { %v15415_v62 = vadd.f32 %v13355_v11, %v11731_v46  ;;  %v13358_v37 = vmax.f32 %v15412_v10, %v15413_v15 }
 0xabd   : > { %13359 = vmax.xlane.f32.xlu0 %v13358_v37  ;;  %v13361_v7 = vmax.f32 %v15414_v51, %v15415_v62 }
 0xac1   : > { %13362 = vmax.xlane.f32.xlu0 %v13361_v7 }
 0xb4a   : > { %v13360_v63 = vpop.xlane.xlu0 %13359 }
 0xb4b   : > { %v13364_v16 = vsub.f32 %v15412_v10, %v13360_v63  ;;  %v13365_v14 = vsub.f32 %v15413_v15, %v13360_v63 }
 0xb4d   : > { %v13368_v34 = vmul.f32 1.442695, %v13364_v16  ;;  %v13370_v0 = vmul.f32 1.442695, %v13365_v14 }
 0xb4e   : > { %v13363_v19 = vpop.xlane.xlu0 %13362 }
 0xb4f   : > { %16278 = vpow2.f32 %v13368_v34  ;;  %v13366_v21 = vsub.f32 %v15414_v51, %v13363_v19  ;;  %v13367_v60 = vsub.f32 %v15415_v62, %v13363_v19 }
 0xb50   : > { %16280 = vpow2.f32 %v13370_v0 }
 0xb51   : > { %v13372_v35 = vmul.f32 1.442695, %v13366_v21  ;;  %v13374_v39 = vmul.f32 1.442695, %v13367_v60 }
 0xb53   : > { %16282 = vpow2.f32 %v13372_v35 }
 0xb54   : > { %16284 = vpow2.f32 %v13374_v39 }
 0xb59   : > { %v16279_v1 = vpop.eup %16278 }
 0xb5a   : > { %v16281_v61 = vpop.eup %16280 }
 0xb5b   : > { %v13376_v31 = vadd.f32 %v16281_v61, %v16279_v1 }
 0xb5d   : > { %v16283_v43 = vpop.eup %16282  ;;  %13377 = vadd.xlane.f32.xlu1 %v13376_v31 }
 0xb5e   : > { %v16285_v58 = vpop.eup %16284 }
 0xb5f   : > { %v13379_v27 = vadd.f32 %v16285_v58, %v16283_v43 }
 0xb61   : > { %13380 = vadd.xlane.f32.xlu1 %v13379_v27 }
 0xbea   : > { %v13378_v54 = vpop.xlane.xlu1 %13377 }
 0xbeb   : > { %16286 = vrcp.f32 %v13378_v54 }
 0xbee   : > { %v13381_v45 = vpop.xlane.xlu1 %13380 }
 0xbef   : > { %16288 = vrcp.f32 %v13381_v45 }
 0xbf5   : > { %v16287_v26 = vpop.eup %16286 }
 0xbf6   : > { %v13383_v23 = vmul.f32 %v16287_v26, %v16279_v1  ;;  %v13384_v50 = vmul.f32 %v16287_v26, %v16281_v61  ;;  %13396 = sbr.rel (%p15345_p12) target bundleno = 3070 (0xbfe), region = 100 }
 0xbf8   : > { %13388 = vst [vmem:[%s17125_s19] sm:$0xff] %v13383_v23  ;;  %13389 = vst [vmem:[%s17125_s19 + $0x8] sm:$0xff] %v13384_v50 }
 0xbf9   : > { %v16289_v20 = vpop.eup %16288  ;;  %13397 = vst [vmem:[#allocation2] sm:$0xff] (!%p15345_p12), %v13383_v23  ;;  %13398 = vst [vmem:[#allocation2 + $0x8] sm:$0xff] (!%p15345_p12), %v13384_v50 }
 0xbfa   : > { %v13386_v17 = vmul.f32 %v16289_v20, %v16283_v43  ;;  %v13387_v25 = vmul.f32 %v16289_v20, %v16285_v58 }
 0xbfc   : > { %13390 = vst [vmem:[%s17125_s19 + $0x10] sm:$0xff] %v13386_v17  ;;  %13391 = vst [vmem:[%s17125_s19 + $0x18] sm:$0xff] %v13387_v25 }
 0xbfd   : > { %13399 = vst [vmem:[#allocation2 + $0x10] sm:$0xff] %v13386_v17  ;;  %13400 = vst [vmem:[#allocation2 + $0x18] sm:$0xff] %v13387_v25 }
 0xbfe PF: > { %s15359_s14 = sshll.u32 %s16910_s28, 9  ;;  %s13415_s25 = sshll.u32 %s17125_s19, 4  ;;  %s19775_s25 = int_to_ptr.vmem [resolvable:$true] %s13415_s25 }
 0xbff   : > { %s19772_s13 = scalar_lea.hbm %s19828_s9, %s15359_s14  ;;  %s13402_s15 = scalar_lea.sflag [#allocation5], %s17083_s20 }
 0xc00   : > { %s16561_s0 = scalar_lea.vmem %s19775_s25, 512  ;;  %p19894_p8 = scmp.ne.s32.totalorder %s19868_s23, 0 }
 0xc01   : > { %p16562_p1 = scmp.ne.s32.totalorder %s19775_s25, %s16561_s0  ;;  %s16662_s29 = smov [#allocation18]  }
 0xc02   : > { %s16565_s16 = sshll.u32 %s16662_s29, 4  ;;  %s16566_s16 = int_to_ptr.vmem [resolvable:$false] %s16565_s16 }
 0xc03   : > { %p16563_p0 = pnand %p16562_p1, %p19894_p8  ;;  %s16567_s28 = scalar_lea.vmem %s16566_s16, 1024 }
 0xc04   : > { %p16568_p10 = scmp.lt.s32.totalorder %s19775_s25, %s16566_s16  ;;  %p16569_p11 = scmp.lt.s32.totalorder %s16567_s28, %s16561_s0 }
 0xc05   : > { %p16564_p5 = pneg %p16563_p0 }
 0xc06   : > { %p16570_p4 = por %p16569_p11, %p16568_p10 }
 0xc08   : > { %p16571_p6 = pnand %p16570_p4, %p16564_p5 }
 0xc0a   : > { %16574 = shalt.err (!%p16571_p6)
}
 0xc0b   : > { %s16575_s27 = scalar_lea.hbm %s19772_s13, 512  ;;  %s16579_s11 = scalar_lea.hbm %s19828_s9, 1024 }
 0xc0c   : > { %p16576_p13 = scmp.ne.s32.totalorder %s19772_s13, %s16575_s27  ;;  %p16580_p9 = scmp.lt.u32.totalorder %s19772_s13, %s19828_s9 }
 0xc0d   : > { %p16581_p3 = scmp.lt.u32.totalorder %s16579_s11, %s16575_s27  ;;  %p16583_p1 = scmp.lt.u32.totalorder %s16575_s27, %s19772_s13 }
 0xc0e   : > { %p16577_p2 = pnand %p16576_p13, %p19894_p8 }
 0xc0f   : > { %p16582_p12 = por %p16581_p3, %p16580_p9 }
 0xc10   : > { %p16578_p7 = pneg %p16577_p2 }
 0xc11   : > { %p16584_p0 = por %p16583_p1, %p16582_p12 }
 0xc13   : > { %p16585_p5 = pnand %p16584_p0, %p16578_p7 }
 0xc15   : > { %16588 = shalt.err (!%p16585_p5)
}
 0xc16   : > { %s16663_s7 = smov 256   ;;  %s16664_s26 = smov 16  }
 0xc17   : > { %15572 = dma.vmem_to_hbm [thread:$0]  (%p19894_p8), %s19775_s25, 512, %s19772_s13, %s13402_s15, %s16663_s7, %s16663_s7, %s16664_s26  }
 0xc18 PF: > { %s19895_s21 = sld [smem:[#allocation28_spill]]  ;;  %s13430_s19 = sand.u32 1, %s16631_s30  }
 0xc19   : > { %p19897_p11 = scmp.ge.s32.totalorder %s16643_s12, 2  ;;  %s13431_s1 = scalar_lea.sflag [#allocation5], %s13430_s19 }
 0xc1e   : > { %p19896_p10 = scmp.ne.s32.totalorder %s19895_s21, 0 }
 0xc20   : > { %p15604_p4 = pnand %p19897_p11, %p19896_p10 }
 0xc22   : > { %16626 = dma.done.wait (!%p15604_p4), %s13431_s1, 512  }
 0xc23   : > { %16628 = vsyncadd (!%p15604_p4), %s13431_s1, 4294966784  ;;  %s19898_s12 = sld [smem:[#allocation26_spill]]  ;;  %s19899_s14 = sld [smem:[#allocation25_spill]] }
 0xc24   : > { %s19900_s11 = sld [smem:[#allocation27_spill]]  ;;  %s19901_s30 = smov %s16635_s10 }
 0xc29   : > { %p32_p6 = scmp.ge.s32.totalorder %s19898_s12, 4   ;;  %s19902_s10 = smov %s19899_s14 }
 0xc2b   :  { %34 = sbr.rel (!%p32_p6) target bundleno = 18 (0x12), region = 197 }
 0xc32   :  { %13436 = vsyncpa [#allocation4], 1 }
 0xc33   :  { %13438 = vsyncpa [#allocation4 + $0x1], 1 }
 0xc34   :  { %13439 = vsyncpa [#allocation7], 1 }
 0xc35   :  { %13441 = vsyncpa [#allocation7 + $0x1], 1 }
 0xc36   :  { %13442 = vsyncpa [#allocation10], 1 }
 0xc37   :  { %13444 = vsyncpa [#allocation10 + $0x1], 1 }
 0xc38   :  { %13445 = vsyncpa [#allocation13], 1 }
 0xc39   :  { %13447 = vsyncpa [#allocation13 + $0x1], 1 }
 0xc3a   :  { %13448 = vsyncpa [#allocation16], 1 }
 0xc3b   :  { %13450 = vsyncpa [#allocation16 + $0x1], 1 }
 0xc3c   :  { %13451 = vsyncpa [#allocation5], 1 }
 0xc3d   :  { %13453 = vsyncpa [#allocation5 + $0x1], 1 }

</bundles_post_ra>
